<compile_context>
chip_gen: v7x
topology: tpu7x:2x2x1
jax: 0.10.0
libtpu: 0.0.40
codegen_flags: <defaults>
</compile_context>

<pallas_src>
import functools

import jax
import jax.numpy as jnp
from jax.experimental import pallas as pl
from jax.experimental.pallas import tpu as pltpu


# --------------------------------------------------------------------------
# Fused Pallas kernel (one batch sample per grid step)
# --------------------------------------------------------------------------
def _resnet_block_kernel(xpad_ref, w1_ref, w2_ref, xres_ref, out_ref, hbuf_ref,
                         *, H, W, dilation):
    d = dilation
    Cin = xpad_ref.shape[-1]
    Cmid = hbuf_ref.shape[-1]
    Cout = out_ref.shape[0]

    # ---- conv1: dim -> 256, dilation d, 3x3 taps folded into contraction ----
    xpad = xpad_ref[...]                                  # (H+2d, W+2d, Cin) f32
    taps = []
    for ky in range(3):
        for kx in range(3):
            taps.append(xpad[ky * d:ky * d + H, kx * d:kx * d + W, :])
    im2col = jnp.concatenate(taps, axis=-1).reshape(H * W, 9 * Cin)
    h = jnp.dot(im2col, w1_ref[...], preferred_element_type=jnp.float32)
    h = jnp.maximum(h, 0.0).astype(hbuf_ref.dtype)        # ReLU, (H*W, 256) bf16

    # ---- keep h in VMEM; build ReflectionPad2d(1) halo in place -------------
    hbuf_ref[1:H + 1, 1:W + 1, :] = h.reshape(H, W, Cmid)
    hbuf_ref[0:1, 1:W + 1, :] = hbuf_ref[2:3, 1:W + 1, :]              # top
    hbuf_ref[H + 1:H + 2, 1:W + 1, :] = hbuf_ref[H - 1:H, 1:W + 1, :]  # bottom
    hbuf_ref[:, 0:1, :] = hbuf_ref[:, 2:3, :]                          # left + corners
    hbuf_ref[:, W + 1:W + 2, :] = hbuf_ref[:, W - 1:W, :]              # right + corners

    # ---- conv2: 256 -> dim, nine K=256 bf16 MXU dots, small f32 accumulator --
    acc = jnp.zeros((H * W, Cout), jnp.float32)
    for ky in range(3):
        for kx in range(3):
            patch = hbuf_ref[ky:ky + H, kx:kx + W, :]                  # (H, W, 256)
            acc = acc + jnp.dot(patch.reshape(H * W, Cmid),
                                w2_ref[ky * 3 + kx],
                                preferred_element_type=jnp.float32)

    # ---- residual add, lane-dense (C, H*W) store (absorbs NCHW transpose) ---
    out_ref[...] = (xres_ref[...] + acc.T).astype(out_ref.dtype)


# --------------------------------------------------------------------------
# Parameter glue: spectral normalization (weight / sigma_max)
# --------------------------------------------------------------------------
def _spectral_normalize(w, n_iters=50, eps=1e-12):
    # w: (out, in, kh, kw) PyTorch layout; sigma over the (out, in*kh*kw) matrix.
    # TODO(synk): PyTorch's spectral_norm keeps a persistent randomly-initialized
    # u vector updated by ONE power iteration per forward; here the power
    # iteration is run to convergence, so sigma is the true spectral norm.
    out_ch = w.shape[0]
    mat = w.reshape(out_ch, -1)
    u = jnp.ones((out_ch,), w.dtype) / jnp.sqrt(jnp.float32(out_ch))
    v = None
    for _ in range(n_iters):
        v = mat.T @ u
        v = v / (jnp.linalg.norm(v) + eps)
        u = mat @ v
        u = u / (jnp.linalg.norm(u) + eps)
    sigma = u @ (mat @ v)
    return w / sigma


# --------------------------------------------------------------------------
# Wrapper: ResnetBlock forward
# --------------------------------------------------------------------------
@functools.partial(jax.jit, static_argnames="dilation")
def resnet_block_forward(x_nchw, w1_oihw, w2_oihw, dilation=1):
    """x: (N, dim, H, W); w1: (256, dim, 3, 3); w2: (dim, 256, 3, 3)."""
    N, C, H, W = x_nchw.shape
    Cmid = w1_oihw.shape[0]
    d = dilation
    Hp, Wp = H + 2 * d, W + 2 * d

    w1n = _spectral_normalize(w1_oihw)                 # (256, C, 3, 3) f32
    w2n = _spectral_normalize(w2_oihw)                 # (C, 256, 3, 3) f32

    # Fold conv1 taps into the contraction dim, rows ordered (ky, kx, cin).
    # Conv1 operands stay f32: K = 9*dim is tiny, so f32 MXU cost is negligible
    # and it keeps the accuracy of the small-K path.
    w1f = jnp.transpose(w1n, (2, 3, 1, 0)).reshape(9 * C, Cmid)
    # Conv2 per-tap weights in bf16 for the MXU: (tap, cin=256, cout=dim).
    w2f = jnp.transpose(w2n, (2, 3, 1, 0)).reshape(9, Cmid, C).astype(jnp.bfloat16)

    # Reflection pad of the (small, dim-channel) input in plain JAX; the
    # 256-channel intermediate's reflection pad is done inside the kernel.
    x_nhwc = jnp.transpose(x_nchw, (0, 2, 3, 1))
    xpad = jnp.pad(x_nhwc, ((0, 0), (d, d), (d, d), (0, 0)), mode="reflect")
    xres = x_nchw.reshape(N, C, H * W)                 # residual, lane-dense layout

    kernel = functools.partial(_resnet_block_kernel, H=H, W=W, dilation=d)

    out_flat = pl.pallas_call(
        kernel,
        out_shape=jax.ShapeDtypeStruct((N, C, H * W), x_nchw.dtype),
        grid_spec=pltpu.PrefetchScalarGridSpec(
            num_scalar_prefetch=0,
            grid=(N,),
            in_specs=[
                pl.BlockSpec((None, Hp, Wp, C), lambda n: (n, 0, 0, 0)),
                pl.BlockSpec((9 * C, Cmid), lambda n: (0, 0)),      # VMEM-resident
                pl.BlockSpec((9, Cmid, C), lambda n: (0, 0, 0)),    # VMEM-resident
                pl.BlockSpec((None, C, H * W), lambda n: (n, 0, 0)),
            ],
            out_specs=pl.BlockSpec((None, C, H * W), lambda n: (n, 0, 0)),
            scratch_shapes=[pltpu.VMEM((H + 2, W + 2, Cmid), jnp.bfloat16)],
        ),
        compiler_params=pltpu.CompilerParams(
            dimension_semantics=("parallel",),
            vmem_limit_bytes=32 * 1024 * 1024,
        ),
    )(xpad, w1f, w2f, xres)

    return out_flat.reshape(N, C, H, W)


# --------------------------------------------------------------------------
# Pure-JAX reference for correctness
# --------------------------------------------------------------------------
def _reference_forward(x, w1, w2, dilation):
    w1n = _spectral_normalize(w1)
    w2n = _spectral_normalize(w2)
    d = dilation
    xp = jnp.pad(x, ((0, 0), (0, 0), (d, d), (d, d)), mode="reflect")
    h = jax.lax.conv_general_dilated(
        xp, w1n, (1, 1), "VALID", rhs_dilation=(d, d),
        dimension_numbers=("NCHW", "OIHW", "NCHW"))
    h = jnp.maximum(h, 0.0)
    hp = jnp.pad(h, ((0, 0), (0, 0), (1, 1), (1, 1)), mode="reflect")
    y = jax.lax.conv_general_dilated(
        hp, w2n, (1, 1), "VALID",
        dimension_numbers=("NCHW", "OIHW", "NCHW"))
    return x + y


if __name__ == "__main__":
    key = jax.random.PRNGKey(0)
    k1, k2, k3 = jax.random.split(key, 3)

    N, C, H, W = 2, 4, 16, 16            # dim = 4
    dilation = 1

    x = jax.random.normal(k1, (N, C, H, W), jnp.float32)
    w1 = jax.random.normal(k2, (256, C, 3, 3), jnp.float32) * 0.1
    w2 = jax.random.normal(k3, (C, 256, 3, 3), jnp.float32) * 0.1

    out = jax.block_until_ready(resnet_block_forward(x, w1, w2, dilation=dilation))
    ref = _reference_forward(x, w1, w2, dilation)

    assert out.shape == (N, C, H, W), out.shape
    err = float(jnp.max(jnp.abs(out - ref)))
    # Conv2 uses bf16 MXU operands (f32 accumulation), so tolerance is bf16-level.
    assert err < 2e-2, err

    print("KERNEL_OK")
</pallas_src>

<mosaic_0001>
module attributes {stable_mosaic.version = 11 : i64} {
  func.func @_resnet_block_kernel(%arg0: i32, %arg1: memref<1x18x18x4xf32, #tpu.memory_space<vmem>>, %arg2: memref<36x256xf32, #tpu.memory_space<vmem>>, %arg3: memref<9x256x4xbf16, #tpu.memory_space<vmem>>, %arg4: memref<1x4x256xf32, #tpu.memory_space<vmem>>, %arg5: memref<1x4x256xf32, #tpu.memory_space<vmem>>, %arg6: memref<18x18x256xbf16, #tpu.memory_space<vmem>>) attributes {dimension_semantics = [#tpu.dimension_semantics<parallel>], iteration_bounds = array<i64: 2>, scalar_prefetch = 0 : i64, scratch_operands = 1 : i64, tpu.core_type = #tpu.core_type<tc>, window_params = [{transform_indices = @transform_0, window_bounds = array<i64: 1, 18, 18, 4>}, {pipeline_mode = #tpu.pipeline_mode<synchronous>, transform_indices = @transform_1, window_bounds = array<i64: 36, 256>}, {pipeline_mode = #tpu.pipeline_mode<synchronous>, transform_indices = @transform_2, window_bounds = array<i64: 9, 256, 4>}, {transform_indices = @transform_3, window_bounds = array<i64: 1, 4, 256>}, {transform_indices = @transform_4, window_bounds = array<i64: 1, 4, 256>}]} {
    %c0 = arith.constant 0 : index
    %c0_0 = arith.constant 0 : index
    %c0_1 = arith.constant 0 : index
    %c0_2 = arith.constant 0 : index
    %0 = vector.load %arg1[%c0, %c0_0, %c0_1, %c0_2] : memref<1x18x18x4xf32, #tpu.memory_space<vmem>>, vector<1x18x18x4xf32>
    %1 = vector.shape_cast %0 : vector<1x18x18x4xf32> to vector<18x18x4xf32>
    %2 = vector.extract_strided_slice %1 {offsets = [0, 0, 0], sizes = [16, 16, 4], strides = [1, 1, 1]} : vector<18x18x4xf32> to vector<16x16x4xf32>
    %3 = vector.extract_strided_slice %1 {offsets = [0, 1, 0], sizes = [16, 16, 4], strides = [1, 1, 1]} : vector<18x18x4xf32> to vector<16x16x4xf32>
    %4 = vector.extract_strided_slice %1 {offsets = [0, 2, 0], sizes = [16, 16, 4], strides = [1, 1, 1]} : vector<18x18x4xf32> to vector<16x16x4xf32>
    %5 = vector.extract_strided_slice %1 {offsets = [1, 0, 0], sizes = [16, 16, 4], strides = [1, 1, 1]} : vector<18x18x4xf32> to vector<16x16x4xf32>
    %6 = vector.extract_strided_slice %1 {offsets = [1, 1, 0], sizes = [16, 16, 4], strides = [1, 1, 1]} : vector<18x18x4xf32> to vector<16x16x4xf32>
    %7 = vector.extract_strided_slice %1 {offsets = [1, 2, 0], sizes = [16, 16, 4], strides = [1, 1, 1]} : vector<18x18x4xf32> to vector<16x16x4xf32>
    %8 = vector.extract_strided_slice %1 {offsets = [2, 0, 0], sizes = [16, 16, 4], strides = [1, 1, 1]} : vector<18x18x4xf32> to vector<16x16x4xf32>
    %9 = vector.extract_strided_slice %1 {offsets = [2, 1, 0], sizes = [16, 16, 4], strides = [1, 1, 1]} : vector<18x18x4xf32> to vector<16x16x4xf32>
    %10 = vector.extract_strided_slice %1 {offsets = [2, 2, 0], sizes = [16, 16, 4], strides = [1, 1, 1]} : vector<18x18x4xf32> to vector<16x16x4xf32>
    %11 = tpu.concatenate %2, %3, %4, %5, %6, %7, %8, %9, %10 in 2 : vector<16x16x4xf32>, vector<16x16x4xf32>, vector<16x16x4xf32>, vector<16x16x4xf32>, vector<16x16x4xf32>, vector<16x16x4xf32>, vector<16x16x4xf32>, vector<16x16x4xf32>, vector<16x16x4xf32> -> vector<16x16x36xf32>
    %12 = vector.shape_cast %11 : vector<16x16x36xf32> to vector<256x36xf32>
    %c0_3 = arith.constant 0 : index
    %c0_4 = arith.constant 0 : index
    %13 = vector.load %arg2[%c0_3, %c0_4] : memref<36x256xf32, #tpu.memory_space<vmem>>, vector<36x256xf32>
    %cst = arith.constant dense<0.000000e+00> : vector<256x256xf32>
    %14 = tpu.matmul %12, %13, %cst {dimension_numbers = #tpu.dot_dimension_numbers<[1], [0], [0], [1], [0, 0, 1, 1], [], []>} : vector<256x36xf32>, vector<36x256xf32>, vector<256x256xf32> -> vector<256x256xf32>
    %cst_5 = arith.constant 0.000000e+00 : f32
    %15 = vector.broadcast %cst_5 : f32 to vector<256x256xf32>
    %16 = arith.maximumf %14, %15 : vector<256x256xf32>
    %17 = arith.truncf %16 : vector<256x256xf32> to vector<256x256xbf16>
    %18 = vector.shape_cast %17 : vector<256x256xbf16> to vector<16x16x256xbf16>
    %c1 = arith.constant 1 : index
    %c1_6 = arith.constant 1 : index
    %c0_7 = arith.constant 0 : index
    %19 = vector.load %arg6[%c1, %c1_6, %c0_7] : memref<18x18x256xbf16, #tpu.memory_space<vmem>>, vector<16x16x256xbf16>
    tpu.vector_store %arg6[%c1, %c1_6, %c0_7], %18 {strides = array<i32>} : memref<18x18x256xbf16, #tpu.memory_space<vmem>>, vector<16x16x256xbf16>,
    %c2 = arith.constant 2 : index
    %c1_8 = arith.constant 1 : index
    %c0_9 = arith.constant 0 : index
    %20 = vector.load %arg6[%c2, %c1_8, %c0_9] : memref<18x18x256xbf16, #tpu.memory_space<vmem>>, vector<1x16x256xbf16>
    %c0_10 = arith.constant 0 : index
    %c1_11 = arith.constant 1 : index
    %c0_12 = arith.constant 0 : index
    %21 = vector.load %arg6[%c0_10, %c1_11, %c0_12] : memref<18x18x256xbf16, #tpu.memory_space<vmem>>, vector<1x16x256xbf16>
    tpu.vector_store %arg6[%c0_10, %c1_11, %c0_12], %20 {strides = array<i32>} : memref<18x18x256xbf16, #tpu.memory_space<vmem>>, vector<1x16x256xbf16>,
    %c15 = arith.constant 15 : index
    %c1_13 = arith.constant 1 : index
    %c0_14 = arith.constant 0 : index
    %22 = vector.load %arg6[%c15, %c1_13, %c0_14] : memref<18x18x256xbf16, #tpu.memory_space<vmem>>, vector<1x16x256xbf16>
    %c17 = arith.constant 17 : index
    %c1_15 = arith.constant 1 : index
    %c0_16 = arith.constant 0 : index
    %23 = vector.load %arg6[%c17, %c1_15, %c0_16] : memref<18x18x256xbf16, #tpu.memory_space<vmem>>, vector<1x16x256xbf16>
    tpu.vector_store %arg6[%c17, %c1_15, %c0_16], %22 {strides = array<i32>} : memref<18x18x256xbf16, #tpu.memory_space<vmem>>, vector<1x16x256xbf16>,
    %c0_17 = arith.constant 0 : index
    %c2_18 = arith.constant 2 : index
    %c0_19 = arith.constant 0 : index
    %24 = vector.load %arg6[%c0_17, %c2_18, %c0_19] : memref<18x18x256xbf16, #tpu.memory_space<vmem>>, vector<18x1x256xbf16>
    %c0_20 = arith.constant 0 : index
    %c0_21 = arith.constant 0 : index
    %c0_22 = arith.constant 0 : index
    %25 = vector.load %arg6[%c0_20, %c0_21, %c0_22] : memref<18x18x256xbf16, #tpu.memory_space<vmem>>, vector<18x1x256xbf16>
    tpu.vector_store %arg6[%c0_20, %c0_21, %c0_22], %24 {strides = array<i32>} : memref<18x18x256xbf16, #tpu.memory_space<vmem>>, vector<18x1x256xbf16>,
    %c0_23 = arith.constant 0 : index
    %c15_24 = arith.constant 15 : index
    %c0_25 = arith.constant 0 : index
    %26 = vector.load %arg6[%c0_23, %c15_24, %c0_25] : memref<18x18x256xbf16, #tpu.memory_space<vmem>>, vector<18x1x256xbf16>
    %c0_26 = arith.constant 0 : index
    %c17_27 = arith.constant 17 : index
    %c0_28 = arith.constant 0 : index
    %27 = vector.load %arg6[%c0_26, %c17_27, %c0_28] : memref<18x18x256xbf16, #tpu.memory_space<vmem>>, vector<18x1x256xbf16>
    tpu.vector_store %arg6[%c0_26, %c17_27, %c0_28], %26 {strides = array<i32>} : memref<18x18x256xbf16, #tpu.memory_space<vmem>>, vector<18x1x256xbf16>,
    %cst_29 = arith.constant 0.000000e+00 : f32
    %28 = vector.broadcast %cst_29 : f32 to vector<256x4xf32>
    %c0_30 = arith.constant 0 : index
    %c0_31 = arith.constant 0 : index
    %c0_32 = arith.constant 0 : index
    %29 = vector.load %arg6[%c0_30, %c0_31, %c0_32] : memref<18x18x256xbf16, #tpu.memory_space<vmem>>, vector<16x16x256xbf16>
    %30 = vector.shape_cast %29 : vector<16x16x256xbf16> to vector<256x256xbf16>
    %c0_33 = arith.constant 0 : index
    %c0_34 = arith.constant 0 : index
    %c0_35 = arith.constant 0 : index
    %31 = vector.load %arg3[%c0_33, %c0_34, %c0_35] : memref<9x256x4xbf16, #tpu.memory_space<vmem>>, vector<1x256x4xbf16>
    %32 = vector.shape_cast %31 : vector<1x256x4xbf16> to vector<256x4xbf16>
    %cst_36 = arith.constant dense<0.000000e+00> : vector<256x4xf32>
    %33 = tpu.matmul %30, %32, %cst_36 {dimension_numbers = #tpu.dot_dimension_numbers<[1], [0], [0], [1], [0, 0, 1, 1], [], []>} : vector<256x256xbf16>, vector<256x4xbf16>, vector<256x4xf32> -> vector<256x4xf32>
    %34 = arith.addf %28, %33 : vector<256x4xf32>
    %c0_37 = arith.constant 0 : index
    %c1_38 = arith.constant 1 : index
    %c0_39 = arith.constant 0 : index
    %35 = vector.load %arg6[%c0_37, %c1_38, %c0_39] : memref<18x18x256xbf16, #tpu.memory_space<vmem>>, vector<16x16x256xbf16>
    %36 = vector.shape_cast %35 : vector<16x16x256xbf16> to vector<256x256xbf16>
    %c1_40 = arith.constant 1 : index
    %c0_41 = arith.constant 0 : index
    %c0_42 = arith.constant 0 : index
    %37 = vector.load %arg3[%c1_40, %c0_41, %c0_42] : memref<9x256x4xbf16, #tpu.memory_space<vmem>>, vector<1x256x4xbf16>
    %38 = vector.shape_cast %37 : vector<1x256x4xbf16> to vector<256x4xbf16>
    %cst_43 = arith.constant dense<0.000000e+00> : vector<256x4xf32>
    %39 = tpu.matmul %36, %38, %cst_43 {dimension_numbers = #tpu.dot_dimension_numbers<[1], [0], [0], [1], [0, 0, 1, 1], [], []>} : vector<256x256xbf16>, vector<256x4xbf16>, vector<256x4xf32> -> vector<256x4xf32>
    %40 = arith.addf %34, %39 : vector<256x4xf32>
    %c0_44 = arith.constant 0 : index
    %c2_45 = arith.constant 2 : index
    %c0_46 = arith.constant 0 : index
    %41 = vector.load %arg6[%c0_44, %c2_45, %c0_46] : memref<18x18x256xbf16, #tpu.memory_space<vmem>>, vector<16x16x256xbf16>
    %42 = vector.shape_cast %41 : vector<16x16x256xbf16> to vector<256x256xbf16>
    %c2_47 = arith.constant 2 : index
    %c0_48 = arith.constant 0 : index
    %c0_49 = arith.constant 0 : index
    %43 = vector.load %arg3[%c2_47, %c0_48, %c0_49] : memref<9x256x4xbf16, #tpu.memory_space<vmem>>, vector<1x256x4xbf16>
    %44 = vector.shape_cast %43 : vector<1x256x4xbf16> to vector<256x4xbf16>
    %cst_50 = arith.constant dense<0.000000e+00> : vector<256x4xf32>
    %45 = tpu.matmul %42, %44, %cst_50 {dimension_numbers = #tpu.dot_dimension_numbers<[1], [0], [0], [1], [0, 0, 1, 1], [], []>} : vector<256x256xbf16>, vector<256x4xbf16>, vector<256x4xf32> -> vector<256x4xf32>
    %46 = arith.addf %40, %45 : vector<256x4xf32>
    %c1_51 = arith.constant 1 : index
    %c0_52 = arith.constant 0 : index
    %c0_53 = arith.constant 0 : index
    %47 = vector.load %arg6[%c1_51, %c0_52, %c0_53] : memref<18x18x256xbf16, #tpu.memory_space<vmem>>, vector<16x16x256xbf16>
    %48 = vector.shape_cast %47 : vector<16x16x256xbf16> to vector<256x256xbf16>
    %c3 = arith.constant 3 : index
    %c0_54 = arith.constant 0 : index
    %c0_55 = arith.constant 0 : index
    %49 = vector.load %arg3[%c3, %c0_54, %c0_55] : memref<9x256x4xbf16, #tpu.memory_space<vmem>>, vector<1x256x4xbf16>
    %50 = vector.shape_cast %49 : vector<1x256x4xbf16> to vector<256x4xbf16>
    %cst_56 = arith.constant dense<0.000000e+00> : vector<256x4xf32>
    %51 = tpu.matmul %48, %50, %cst_56 {dimension_numbers = #tpu.dot_dimension_numbers<[1], [0], [0], [1], [0, 0, 1, 1], [], []>} : vector<256x256xbf16>, vector<256x4xbf16>, vector<256x4xf32> -> vector<256x4xf32>
    %52 = arith.addf %46, %51 : vector<256x4xf32>
    %c1_57 = arith.constant 1 : index
    %c1_58 = arith.constant 1 : index
    %c0_59 = arith.constant 0 : index
    %53 = vector.load %arg6[%c1_57, %c1_58, %c0_59] : memref<18x18x256xbf16, #tpu.memory_space<vmem>>, vector<16x16x256xbf16>
    %54 = vector.shape_cast %53 : vector<16x16x256xbf16> to vector<256x256xbf16>
    %c4 = arith.constant 4 : index
    %c0_60 = arith.constant 0 : index
    %c0_61 = arith.constant 0 : index
    %55 = vector.load %arg3[%c4, %c0_60, %c0_61] : memref<9x256x4xbf16, #tpu.memory_space<vmem>>, vector<1x256x4xbf16>
    %56 = vector.shape_cast %55 : vector<1x256x4xbf16> to vector<256x4xbf16>
    %cst_62 = arith.constant dense<0.000000e+00> : vector<256x4xf32>
    %57 = tpu.matmul %54, %56, %cst_62 {dimension_numbers = #tpu.dot_dimension_numbers<[1], [0], [0], [1], [0, 0, 1, 1], [], []>} : vector<256x256xbf16>, vector<256x4xbf16>, vector<256x4xf32> -> vector<256x4xf32>
    %58 = arith.addf %52, %57 : vector<256x4xf32>
    %c1_63 = arith.constant 1 : index
    %c2_64 = arith.constant 2 : index
    %c0_65 = arith.constant 0 : index
    %59 = vector.load %arg6[%c1_63, %c2_64, %c0_65] : memref<18x18x256xbf16, #tpu.memory_space<vmem>>, vector<16x16x256xbf16>
    %60 = vector.shape_cast %59 : vector<16x16x256xbf16> to vector<256x256xbf16>
    %c5 = arith.constant 5 : index
    %c0_66 = arith.constant 0 : index
    %c0_67 = arith.constant 0 : index
    %61 = vector.load %arg3[%c5, %c0_66, %c0_67] : memref<9x256x4xbf16, #tpu.memory_space<vmem>>, vector<1x256x4xbf16>
    %62 = vector.shape_cast %61 : vector<1x256x4xbf16> to vector<256x4xbf16>
    %cst_68 = arith.constant dense<0.000000e+00> : vector<256x4xf32>
    %63 = tpu.matmul %60, %62, %cst_68 {dimension_numbers = #tpu.dot_dimension_numbers<[1], [0], [0], [1], [0, 0, 1, 1], [], []>} : vector<256x256xbf16>, vector<256x4xbf16>, vector<256x4xf32> -> vector<256x4xf32>
    %64 = arith.addf %58, %63 : vector<256x4xf32>
    %c2_69 = arith.constant 2 : index
    %c0_70 = arith.constant 0 : index
    %c0_71 = arith.constant 0 : index
    %65 = vector.load %arg6[%c2_69, %c0_70, %c0_71] : memref<18x18x256xbf16, #tpu.memory_space<vmem>>, vector<16x16x256xbf16>
    %66 = vector.shape_cast %65 : vector<16x16x256xbf16> to vector<256x256xbf16>
    %c6 = arith.constant 6 : index
    %c0_72 = arith.constant 0 : index
    %c0_73 = arith.constant 0 : index
    %67 = vector.load %arg3[%c6, %c0_72, %c0_73] : memref<9x256x4xbf16, #tpu.memory_space<vmem>>, vector<1x256x4xbf16>
    %68 = vector.shape_cast %67 : vector<1x256x4xbf16> to vector<256x4xbf16>
    %cst_74 = arith.constant dense<0.000000e+00> : vector<256x4xf32>
    %69 = tpu.matmul %66, %68, %cst_74 {dimension_numbers = #tpu.dot_dimension_numbers<[1], [0], [0], [1], [0, 0, 1, 1], [], []>} : vector<256x256xbf16>, vector<256x4xbf16>, vector<256x4xf32> -> vector<256x4xf32>
    %70 = arith.addf %64, %69 : vector<256x4xf32>
    %c2_75 = arith.constant 2 : index
    %c1_76 = arith.constant 1 : index
    %c0_77 = arith.constant 0 : index
    %71 = vector.load %arg6[%c2_75, %c1_76, %c0_77] : memref<18x18x256xbf16, #tpu.memory_space<vmem>>, vector<16x16x256xbf16>
    %72 = vector.shape_cast %71 : vector<16x16x256xbf16> to vector<256x256xbf16>
    %c7 = arith.constant 7 : index
    %c0_78 = arith.constant 0 : index
    %c0_79 = arith.constant 0 : index
    %73 = vector.load %arg3[%c7, %c0_78, %c0_79] : memref<9x256x4xbf16, #tpu.memory_space<vmem>>, vector<1x256x4xbf16>
    %74 = vector.shape_cast %73 : vector<1x256x4xbf16> to vector<256x4xbf16>
    %cst_80 = arith.constant dense<0.000000e+00> : vector<256x4xf32>
    %75 = tpu.matmul %72, %74, %cst_80 {dimension_numbers = #tpu.dot_dimension_numbers<[1], [0], [0], [1], [0, 0, 1, 1], [], []>} : vector<256x256xbf16>, vector<256x4xbf16>, vector<256x4xf32> -> vector<256x4xf32>
    %76 = arith.addf %70, %75 : vector<256x4xf32>
    %c2_81 = arith.constant 2 : index
    %c2_82 = arith.constant 2 : index
    %c0_83 = arith.constant 0 : index
    %77 = vector.load %arg6[%c2_81, %c2_82, %c0_83] : memref<18x18x256xbf16, #tpu.memory_space<vmem>>, vector<16x16x256xbf16>
    %78 = vector.shape_cast %77 : vector<16x16x256xbf16> to vector<256x256xbf16>
    %c8 = arith.constant 8 : index
    %c0_84 = arith.constant 0 : index
    %c0_85 = arith.constant 0 : index
    %79 = vector.load %arg3[%c8, %c0_84, %c0_85] : memref<9x256x4xbf16, #tpu.memory_space<vmem>>, vector<1x256x4xbf16>
    %80 = vector.shape_cast %79 : vector<1x256x4xbf16> to vector<256x4xbf16>
    %cst_86 = arith.constant dense<0.000000e+00> : vector<256x4xf32>
    %81 = tpu.matmul %78, %80, %cst_86 {dimension_numbers = #tpu.dot_dimension_numbers<[1], [0], [0], [1], [0, 0, 1, 1], [], []>} : vector<256x256xbf16>, vector<256x4xbf16>, vector<256x4xf32> -> vector<256x4xf32>
    %82 = arith.addf %76, %81 : vector<256x4xf32>
    %c0_87 = arith.constant 0 : index
    %c0_88 = arith.constant 0 : index
    %c0_89 = arith.constant 0 : index
    %83 = vector.load %arg4[%c0_87, %c0_88, %c0_89] : memref<1x4x256xf32, #tpu.memory_space<vmem>>, vector<1x4x256xf32>
    %84 = vector.shape_cast %83 : vector<1x4x256xf32> to vector<4x256xf32>
    %85 = tpu.transpose %82, [1, 0] : vector<256x4xf32> -> vector<4x256xf32>
    %86 = arith.addf %84, %85 : vector<4x256xf32>
    %c0_90 = arith.constant 0 : index
    %c0_91 = arith.constant 0 : index
    %c0_92 = arith.constant 0 : index
    %87 = vector.load %arg5[%c0_90, %c0_91, %c0_92] : memref<1x4x256xf32, #tpu.memory_space<vmem>>, vector<1x4x256xf32>
    %88 = vector.shape_cast %87 : vector<1x4x256xf32> to vector<4x256xf32>
    %89 = vector.shape_cast %86 : vector<4x256xf32> to vector<1x4x256xf32>
    tpu.vector_store %arg5[%c0_90, %c0_91, %c0_92], %89 {strides = array<i32>} : memref<1x4x256xf32, #tpu.memory_space<vmem>>, vector<1x4x256xf32>,
    return
  }
  func.func @transform_0(%arg0: i32) -> (i32, i32, i32, i32) {
    %c0_i32 = arith.constant 0 : i32
    %c0_i32_0 = arith.constant 0 : i32
    %c0_i32_1 = arith.constant 0 : i32
    %c0_i32_2 = arith.constant 0 : i32
    return %arg0, %c0_i32, %c0_i32_0, %c0_i32_1 : i32, i32, i32, i32
  }
  func.func @transform_1(%arg0: i32) -> (i32, i32) {
    %c0_i32 = arith.constant 0 : i32
    %c0_i32_0 = arith.constant 0 : i32
    %c0_i32_1 = arith.constant 0 : i32
    return %c0_i32, %c0_i32_0 : i32, i32
  }
  func.func @transform_2(%arg0: i32) -> (i32, i32, i32) {
    %c0_i32 = arith.constant 0 : i32
    %c0_i32_0 = arith.constant 0 : i32
    %c0_i32_1 = arith.constant 0 : i32
    %c0_i32_2 = arith.constant 0 : i32
    return %c0_i32, %c0_i32_0, %c0_i32_1 : i32, i32, i32
  }
  func.func @transform_3(%arg0: i32) -> (i32, i32, i32) {
    %c0_i32 = arith.constant 0 : i32
    %c0_i32_0 = arith.constant 0 : i32
    %c0_i32_1 = arith.constant 0 : i32
    return %arg0, %c0_i32, %c0_i32_0 : i32, i32, i32
  }
  func.func @transform_4(%arg0: i32) -> (i32, i32, i32) {
    %c0_i32 = arith.constant 0 : i32
    %c0_i32_0 = arith.constant 0 : i32
    %c0_i32_1 = arith.constant 0 : i32
    return %arg0, %c0_i32, %c0_i32_0 : i32, i32, i32
  }
}

</mosaic_0001>

<bundles_post_ra>
// kernel: resnet_block_forward.1
= control target key start
LH: loop header
LB: loop body
LE: loop exit
PB: predicated region body
PF: predicated region fallthrough
CT: control target
= control target key end

     0   :  { %s11248_s15 = smov 0   ;;  %s15740_s0 = inlined_call_operand.vmem [shape: f32[2,18,18,4], index: 0, kind: input, shape index: {}]   ;;  %s15741_s1 = inlined_call_operand.vmem [shape: f32[36,256], index: 1, kind: input, shape index: {}]   ;;  %s15742_s2 = inlined_call_operand.vmem [shape: bf16[9,256,4], index: 2, kind: input, shape index: {}]   ;;  %s15743_s3 = inlined_call_operand.vmem [shape: f32[2,4,256], index: 3, kind: input, shape index: {}]   ;;  %s15744_s4 = inlined_call_operand.vmem [shape: f32[2,4,256], index: 4, kind: output, shape index: {}]  }
   0x1 LB: > { %s8996_s16 = sadd.s32 4294967295, %s11212_s15   ;;  %p9000_p0 = scmp.ge.s32.totalorder %s11212_s15, 1  ;;  %s11212_s15 = sphi %s11248_s15, %s14_s15  }
   0x2   : > { %p172_p1 = scmp.lt.s32.totalorder %s11212_s15, 3 }
   0x4   : > { %p173_p2 = pnand %p9000_p0, %p172_p1 }
   0x6   : > { %176 = sbr.rel (%p173_p2) target bundleno = 1666 (0x682), region = 36 }
   0xd   : > { %p203_p3 = scmp.lt.s32.totalorder %s8996_s16, 1  ;;  %v1542_v0 = vld [vmem:[%s15741_s1 + $0x8] sm:$0xff]  ;;  %v1544_v1 = vld [vmem:[%s15741_s1 + $0x18] sm:$0xff]  ;;  %v1541_v3 = vld [vmem:[%s15741_s1] sm:$0xff]  ;;  %vm15745_vm0 = vcmask 1046528   ;;  %vm498_vm1 = vcmask 1045504  }
   0xe   : > { %v10888_v2 = vpack.c.bf16 %v1544_v1, %v1542_v0  ;;  %v1543_v4 = vld [vmem:[%s15741_s1 + $0x10] sm:$0xff]  ;;  %s11214_s29 = smov 12   ;;  %s11215_s30 = smov 4   ;;  %v1546_v30 = vld [vmem:[%s15741_s1 + $0x28] sm:$0xff]  ;;  %v1548_v31 = vld [vmem:[%s15741_s1 + $0x38] sm:$0xff]  ;;  %vm1648_vm2 = vcmask 1043456  }
   0xf   : > { %s16194_s16 = smov (!%p203_p3, %s8996_s16), 1  ;;  %v10890_v5 = vpack.c.bf16 %v1543_v4, %v1541_v3  ;;  %s11216_s5 = smov 16   ;;  %v1545_v32 = vld [vmem:[%s15741_s1 + $0x20] sm:$0xff]  ;;  %v1547_v33 = vld [vmem:[%s15741_s1 + $0x30] sm:$0xff]  ;;  %v10892_v39 = vpack.c.bf16 %v1548_v31, %v1546_v30  ;;  %v1550_v41 = vld [vmem:[%s15741_s1 + $0x48] sm:$0xf] }
  0x10   : > { %s10912_s21 = smul.u32 432, %s16194_s16  ;;  %10889 = vmatprep.subr.bf16.mxu0 %v10888_v2  ;;  %s11217_s6 = smov 8   ;;  %v10894_v40 = vpack.c.bf16 %v1547_v33, %v1545_v32  ;;  %v1549_v45 = vld [vmem:[%s15741_s1 + $0x40] sm:$0xf]  ;;  %v15752_v46 = vmov 0.0   ;;  %vm1277_vm3 = vcmask 31744  }
  0x11   : > { %10891 = vmatpush1.bf16.msra.mxu0 %v10890_v5  ;;  %s11218_s7 = smov 20   ;;  %s11219_s18 = smov 24   ;;  %1719 = vmatprep.mubr.f32.mxu0 %v15752_v46  ;;  %vm1310_vm4 = vcmask 64512   ;;  %vm1343_vm5 = vcmask 97280   ;;  %vm1376_vm6 = vcmask 130048   ;;  %vm1409_vm7 = vcmask 162816  }
  0x12   : > { %s11274_s28 = scalar_lea.vmem %s15740_s0, %s10912_s21  ;;  %10893 = vmatprep.subr.bf16.mxu0 %v10892_v39  ;;  %s11220_s21 = smov 28   ;;  %vm15751_vm8 = vcmask 195584   ;;  %vm15750_vm9 = vcmask 228352   ;;  %vm15748_vm10 = vcmask 261120   ;;  %vm15749_vm11 = vcmask 293888  }
  0x13   : > { %v222_v6 = vld [vmem:[%s11274_s28 + $0x18] sm:$0xff]  ;;  %v11278_v7 = vld [vmem:[%s11274_s28] sm:$0xff]  ;;  %v11281_v8 = vld [vmem:[%s11274_s28 + $0x8] sm:$0xff]  ;;  %s11222_s24 = smov 32   ;;  %vm15747_vm12 = vsmask.f32 7938 }
  0x14   : > { %677 = vrot.lane.b32.xlu1 %v222_v6, %s11214_s29  ;;  %v322_v9 = vrot.slane %v11278_v7, 1  ;;  %v323_v10 = vrot.slane %v11281_v8, 1  ;;  %v223_v11 = vld [vmem:[%s11274_s28 + $0x20] sm:$0xff]  ;;  %v327_v12 = vrot.slane %v222_v6, 1  ;;  %v499_v13 = vrot.slane %v11278_v7, 2  ;;  %v225_v24 = vld [vmem:[%s11274_s28 + $0x30] sm:$0xff]  ;;  %vm2462_vm15 = vmand %vm1648_vm2, %vm15747_vm12 }
  0x15   : > { %v328_v14 = vrot.slane %v223_v11, 1  ;;  %v500_v15 = vrot.slane %v11281_v8, 2  ;;  %v504_v16 = vrot.slane %v222_v6, 2  ;;  %v505_v17 = vrot.slane %v223_v11, 2  ;;  %v221_v18 = vld [vmem:[%s11274_s28 + $0x10] sm:$0x3]  ;;  %10895 = vmatpush1.bf16.msra.mxu0 %v10894_v40 }
  0x16   : > { %v324_v19 = vsel %vm15745_vm0, %v322_v9, %v323_v10  ;;  %v325_v22 = vrot.slane %v221_v18, 1  ;;  %v11298_v25 = vld [vmem:[%s11274_s28 + $0x38] sm:$0xff]  ;;  %v502_v27 = vrot.slane %v221_v18, 2  ;;  %v332_v28 = vrot.slane %v225_v24, 1  ;;  %v224_v35 = vld [vmem:[%s11274_s28 + $0x28] sm:$0x3]  ;;  %9006 = vmatprep.subr.msk.mxu0 %vm1648_vm2, %v1550_v41 }
  0x17   : > { %402 = vrot.lane.b32.xlu0 %v324_v19, %s11215_s30  ;;  %v329_v20 = vsel %vm15745_vm0, %v327_v12, %v328_v14  ;;  %v501_v21 = vsel %vm498_vm1, %v499_v13, %v500_v15  ;;  %v506_v23 = vsel %vm498_vm1, %v504_v16, %v505_v17  ;;  %v333_v29 = vrot.slane %v11298_v25, 1  ;;  %v227_v49 = vld [vmem:[%s11274_s28 + $0x40] sm:$0x3]  ;;  %v228_v54 = vld [vmem:[%s11274_s28 + $0x48] sm:$0xff]  ;;  %v229_v55 = vld [vmem:[%s11274_s28 + $0x50] sm:$0xff]  ;;  %s9846_s8 = sshll.u32 %s16194_s16, 3 }
  0x18   : > { %779 = vrot.lane.b32.xlu1 %v329_v20, %s11216_s5  ;;  %v326_v26 = vsel %vm15745_vm0, %v323_v10, %v325_v22  ;;  %v503_v34 = vsel %vm498_vm1, %v500_v15, %v502_v27  ;;  %v509_v37 = vrot.slane %v225_v24, 2  ;;  %v510_v38 = vrot.slane %v11298_v25, 2  ;;  %v230_v58 = vld [vmem:[%s11274_s28 + $0x58] sm:$0x3]  ;;  %v11375_v3 = vld [vmem:[%s11274_s28 + $0x60] sm:$0xff]  ;;  %v232_v4 = vld [vmem:[%s11274_s28 + $0x68] sm:$0xff]  ;;  %s212_s11 = scalar_lea.vmem %s15743_s3, %s9846_s8 }
  0x19   : > { %v11321_v36 = vsel %vm15745_vm0, %v332_v28, %v333_v29  ;;  %v330_v42 = vrot.slane %v224_v35, 1  ;;  %v507_v44 = vrot.slane %v224_v35, 2  ;;  %9007 = vmatpush1.msk.msra.mxu0 %vm1648_vm2, %v1549_v45  ;;  %v335_v50 = vrot.slane %v227_v49, 1  ;;  %v233_v9 = vld [vmem:[%s11274_s28 + $0x70] sm:$0x3]  ;;  %v11402_v15 = vld [vmem:[%s11274_s28 + $0x78] sm:$0xff] }
  0x1a   : > { %v511_v43 = vsel %vm498_vm1, %v509_v37, %v510_v38  ;;  %v512_v52 = vrot.slane %v227_v49, 2  ;;  %v337_v56 = vrot.slane %v228_v54, 1  ;;  %v338_v57 = vrot.slane %v229_v55, 1  ;;  %v11408_v18 = vld [vmem:[%s11274_s28 + $0x80] sm:$0xff]  ;;  %v236_v27 = vld [vmem:[%s11274_s28 + $0x88] sm:$0x3] }
  0x1b   : > { %579 = vrot.lane.b32.xlu0 %v501_v21, %s11217_s6  ;;  %v331_v47 = vsel %vm15745_vm0, %v328_v14, %v330_v42  ;;  %v508_v48 = vsel %vm498_vm1, %v505_v17, %v507_v44  ;;  %v336_v51 = vsel %vm15745_vm0, %v333_v29, %v335_v50  ;;  %v514_v59 = vrot.slane %v228_v54, 2  ;;  %v11471_v49 = vld [vmem:[%s11274_s28 + $0x90] sm:$0xff]  ;;  %v11474_v50 = vld [vmem:[%s11274_s28 + $0x98] sm:$0xff] }
  0x1c   : > { %880 = vrot.lane.b32.xlu1 %v506_v23, %s11218_s7  ;;  %v513_v53 = vsel %vm498_vm1, %v510_v38, %v512_v52  ;;  %v515_v60 = vrot.slane %v229_v55, 2  ;;  %v339_v61 = vsel %vm15745_vm0, %v337_v56, %v338_v57  ;;  %v517_v62 = vrot.slane %v230_v58, 2 }
  0x1d   : > { %v340_v63 = vrot.slane %v230_v58, 1  ;;  %v342_v5 = vrot.slane %v11375_v3, 1  ;;  %v343_v6 = vrot.slane %v232_v4, 1  ;;  %v520_v12 = vrot.slane %v232_v4, 2 }
  0x1e   : > { %v516_v0 = vsel %vm498_vm1, %v514_v59, %v515_v60  ;;  %v518_v1 = vsel %vm498_vm1, %v515_v60, %v517_v62  ;;  %v345_v14 = vrot.slane %v233_v9, 1  ;;  %v522_v17 = vrot.slane %v233_v9, 2 }
  0x1f   : > { %404 = vrot.lane.b32.xlu0 %v326_v26, %s11215_s30  ;;  %v341_v2 = vsel %vm15745_vm0, %v338_v57, %v340_v63  ;;  %v344_v10 = vsel %vm15745_vm0, %v342_v5, %v343_v6  ;;  %v348_v21 = vrot.slane %v11408_v18, 1  ;;  %v350_v32 = vrot.slane %v236_v27, 1 }
  0x20   : > { %978 = vrot.lane.b32.xlu1 %v225_v24, %s11219_s18  ;;  %v11405_v16 = vsel %vm15745_vm0, %v343_v6, %v345_v14  ;;  %v11414_v19 = vsel %vm498_vm1, %v520_v12, %v522_v17  ;;  %v527_v38 = vrot.slane %v236_v27, 2  ;;  %v529_v58 = vrot.slane %v11471_v49, 2 }
  0x21   : > { %v11454_v37 = vsel %vm15745_vm0, %v348_v21, %v350_v32  ;;  %v530_v59 = vrot.slane %v11474_v50, 2  ;;  %v11545_v32 = vld [vmem:[%s11274_s28 + $0xa8] sm:$0xff]  ;;  %vm2463_vm13 = vcmask 1047556   ;;  %vm15746_vm14 = vsmask.f32 7954 }
  0x23   : > { %581 = vrot.lane.b32.xlu0 %v503_v34, %s11217_s6 }
  0x24   : > { %1080 = vrot.lane.b32.xlu1 %v11321_v36, %s11220_s21 }
  0x27   : > { %679 = vrot.lane.b32.xlu0 %v223_v11, %s11214_s29  ;;  %v519_v11 = vrot.slane %v11375_v3, 2 }
  0x28   : > { %1181 = vrot.lane.b32.xlu1 %v511_v43, %s11222_s24 }
  0x29   : > { %v521_v13 = vsel %vm498_vm1, %v519_v11, %v520_v12  ;;  %v239_v11 = vld [vmem:[%s11274_s28 + $0xa0] sm:$0x3] }
  0x2a   : > { %v355_v14 = vrot.slane %v239_v11, 1 }
  0x2b   : > { %781 = vrot.lane.b32.xlu0 %v331_v47, %s11216_s5 }
  0x2c   : > { %882 = vrot.lane.b32.xlu1 %v508_v48, %s11218_s7 }
  0x2f   : > { %406 = vrot.lane.b32.xlu0 %v329_v20, %s11215_s30  ;;  %v347_v20 = vrot.slane %v11402_v15, 1 }
  0x30   : > { %980 = vrot.lane.b32.xlu1 %v11298_v25, %s11219_s18 }
  0x31   : > { %v11428_v22 = vsel %vm15745_vm0, %v347_v20, %v348_v21  ;;  %v532_v20 = vrot.slane %v239_v11, 2 }
  0x33   : > { %583 = vrot.lane.b32.xlu0 %v506_v23, %s11217_s6  ;;  %v524_v23 = vrot.slane %v11402_v15, 2 }
  0x34   : > { %1082 = vrot.lane.b32.xlu1 %v336_v51, %s11220_s21 }
  0x37   : > { %681 = vrot.lane.b32.xlu0 %v225_v24, %s11214_s29  ;;  %v525_v24 = vrot.slane %v11408_v18, 2 }
  0x38   : > { %1183 = vrot.lane.b32.xlu1 %v513_v53, %s11222_s24 }
  0x39   : > { %v11461_v41 = vsel %vm498_vm1, %v525_v24, %v527_v38 }
  0x3b   : > { %783 = vrot.lane.b32.xlu0 %v11321_v36, %s11216_s5 }
  0x3c   : > { %408 = vrot.lane.b32.xlu1 %v331_v47, %s11215_s30 }
  0x3f   : > { %884 = vrot.lane.b32.xlu0 %v511_v43, %s11218_s7 }
  0x40   : > { %585 = vrot.lane.b32.xlu1 %v508_v48, %s11217_s6 }
  0x43   : > { %982 = vrot.lane.b32.xlu0 %v228_v54, %s11219_s18 }
  0x44   : > { %683 = vrot.lane.b32.xlu1 %v11298_v25, %s11214_s29  ;;  %v11436_v25 = vsel %vm498_vm1, %v524_v23, %v525_v24 }
  0x47   : > { %1084 = vrot.lane.b32.xlu0 %v339_v61, %s11220_s21 }
  0x48   : > { %785 = vrot.lane.b32.xlu1 %v336_v51, %s11216_s5 }
  0x4b   : > { %1185 = vrot.lane.b32.xlu0 %v516_v0, %s11222_s24 }
  0x4c   : > { %984 = vrot.lane.b32.xlu1 %v229_v55, %s11219_s18 }
  0x4f   : > { %886 = vrot.lane.b32.xlu0 %v513_v53, %s11218_s7 }
  0x50   : > { %1187 = vrot.lane.b32.xlu1 %v518_v1, %s11222_s24 }
  0x53   : > { %1086 = vrot.lane.b32.xlu0 %v341_v2, %s11220_s21 }
  0x54   : > { %587 = vrot.lane.b32.xlu1 %v511_v43, %s11217_s6 }
  0x57   : > { %410 = vrot.lane.b32.xlu0 %v11321_v36, %s11215_s30 }
  0x58   : > { %787 = vrot.lane.b32.xlu1 %v339_v61, %s11216_s5 }
  0x5b   : > { %685 = vrot.lane.b32.xlu0 %v228_v54, %s11214_s29  ;;  %v353_v54 = vrot.slane %v11474_v50, 1 }
  0x5c   : > { %888 = vrot.lane.b32.xlu1 %v516_v0, %s11218_s7 }
  0x5f   : > { %412 = vrot.lane.b32.xlu0 %v336_v51, %s11215_s30 }
  0x60   : > { %986 = vrot.lane.b32.xlu1 %v11375_v3, %s11219_s18 }
  0x63   : > { %589 = vrot.lane.b32.xlu0 %v513_v53, %s11217_s6  ;;  %v352_v53 = vrot.slane %v11471_v49, 1 }
  0x64   : > { %1088 = vrot.lane.b32.xlu1 %v344_v10, %s11220_s21 }
  0x65   : > { %v11490_v57 = vsel %vm15745_vm0, %v352_v53, %v353_v54  ;;  %v534_v53 = vrot.slane %v11545_v32, 2 }
  0x67   : > { %687 = vrot.lane.b32.xlu0 %v229_v55, %s11214_s29 }
  0x68   : > { %1189 = vrot.lane.b32.xlu1 %v521_v13, %s11222_s24 }
  0x6b   : > { %789 = vrot.lane.b32.xlu0 %v341_v2, %s11216_s5 }
  0x6c   : > { %890 = vrot.lane.b32.xlu1 %v518_v1, %s11218_s7 }
  0x6f   : > { %414 = vrot.lane.b32.xlu0 %v339_v61, %s11215_s30 }
  0x70   : > { %988 = vrot.lane.b32.xlu1 %v232_v4, %s11219_s18 }
  0x73   : > { %591 = vrot.lane.b32.xlu0 %v516_v0, %s11217_s6 }
  0x74   : > { %1090 = vrot.lane.b32.xlu1 %v11405_v16, %s11220_s21 }
  0x77   : > { %689 = vrot.lane.b32.xlu0 %v11375_v3, %s11214_s29 }
  0x78   : > { %1191 = vrot.lane.b32.xlu1 %v11414_v19, %s11222_s24 }
  0x7b   : > { %791 = vrot.lane.b32.xlu0 %v344_v10, %s11216_s5 }
  0x7c   : > { %892 = vrot.lane.b32.xlu1 %v521_v13, %s11218_s7 }
  0x7f   : > { %416 = vrot.lane.b32.xlu0 %v341_v2, %s11215_s30  ;;  %v11504_v2 = vsel %vm498_vm1, %v529_v58, %v530_v59 }
  0x80   : > { %990 = vrot.lane.b32.xlu1 %v11402_v15, %s11219_s18 }
  0x83   : > { %593 = vrot.lane.b32.xlu0 %v518_v1, %s11217_s6 }
  0x84   : > { %1092 = vrot.lane.b32.xlu1 %v11428_v22, %s11220_s21 }
  0x86   : > { %v678_v26 = vpop.permute.xlu1 %677 }
  0x87   : > { %691 = vrot.lane.b32.xlu0 %v232_v4, %s11214_s29 }
  0x88   : > { %1193 = vrot.lane.b32.xlu1 %v11436_v25, %s11222_s24 }
  0x89   : > { %v403_v28 = vpop.permute.xlu0 %402 }
  0x8a   : > { %v780_v29 = vpop.permute.xlu1 %779  ;;  %v1278_v30 = vsel %vm1277_vm3, %v11278_v7, %v403_v28 }
  0x8b   : > { %793 = vrot.lane.b32.xlu0 %v11405_v16, %s11216_s5 }
  0x8c   : > { %894 = vrot.lane.b32.xlu1 %v11414_v19, %s11218_s7 }
  0x8d   : > { %v580_v31 = vpop.permute.xlu0 %579 }
  0x8e   : > { %v1311_v33 = vsel %vm1310_vm4, %v1278_v30, %v580_v31  ;;  %v881_v34 = vpop.permute.xlu1 %880 }
  0x8f   : > { %418 = vrot.lane.b32.xlu0 %v344_v10, %s11215_s30  ;;  %v1344_v35 = vsel %vm1343_vm5, %v1311_v33, %v678_v26  ;;  %v11150_v26 = vld [vmem:[%s11274_s28 + $0x18] sm:$0xff]  ;;  %v11548_v33 = vld [vmem:[%s11274_s28 + $0xb0] sm:$0xff] }
  0x90   : > { %992 = vrot.lane.b32.xlu1 %v11408_v18, %s11219_s18  ;;  %v1377_v39 = vsel %vm1376_vm6, %v1344_v35, %v780_v29  ;;  %v11151_v35 = vld [vmem:[%s11274_s28 + $0x20] sm:$0xff] }
  0x91   : > { %v405_v36 = vpop.permute.xlu0 %404  ;;  %v1410_v42 = vsel %vm1409_vm7, %v1377_v39, %v881_v34 }
  0x92   : > { %v979_v7 = vpop.permute.xlu1 %978  ;;  %v1279_v60 = vsel %vm1277_vm3, %v11281_v8, %v405_v36 }
  0x93   : > { %595 = vrot.lane.b32.xlu0 %v521_v13, %s11217_s6  ;;  %v1443_v44 = vsel %vm15751_vm8, %v1410_v42, %v979_v7  ;;  %v358_v42 = vrot.slane %v11548_v33, 1 }
  0x94   : > { %1094 = vrot.lane.b32.xlu1 %v11454_v37, %s11220_s21 }
  0x95   : > { %v582_v40 = vpop.permute.xlu0 %581 }
  0x96   : > { %v1081_v43 = vpop.permute.xlu1 %1080  ;;  %v1312_v62 = vsel %vm1310_vm4, %v1279_v60, %v582_v40  ;;  %v357_v40 = vrot.slane %v11545_v32, 1 }
  0x97   : > { %693 = vrot.lane.b32.xlu0 %v11402_v15, %s11214_s29  ;;  %v1476_v47 = vsel %vm15750_vm9, %v1443_v44, %v1081_v43 }
  0x98   : > { %1195 = vrot.lane.b32.xlu1 %v11461_v41, %s11222_s24 }
  0x99   : > { %v680_v45 = vpop.permute.xlu0 %679 }
  0x9a   : > { %v1182_v48 = vpop.permute.xlu1 %1181  ;;  %v1345_v63 = vsel %vm1343_vm5, %v1312_v62, %v680_v45 }
  0x9b   : > { %v1509_v51 = vsel %vm15748_vm10, %v1476_v47, %v1182_v48  ;;  %795 = vrot.lane.b32.xlu0 %v11428_v22, %s11216_s5 }
  0x9c   : > { %896 = vrot.lane.b32.xlu1 %v11436_v25, %s11218_s7  ;;  %9008 = vmatmul.mubr.msk.f32.vlgmr.msra.gmra.mrb[0].mxu0 %vm15749_vm11, %v1509_v51 }
  0x9d   : > { %v782_v52 = vpop.permute.xlu0 %781  ;;  %1725 = vmatprep.mubr.f32.mxu0 %v15752_v46 }
  0x9e   : > { %v883_v55 = vpop.permute.xlu1 %882  ;;  %v1378_v0 = vsel %vm1376_vm6, %v1345_v63, %v782_v52  ;;  %v11572_v52 = vsel %vm15745_vm0, %v357_v40, %v358_v42 }
  0x9f   : > { %420 = vrot.lane.b32.xlu0 %v11405_v16, %s11215_s30  ;;  %v1411_v8 = vsel %vm1409_vm7, %v1378_v0, %v883_v55  ;;  %v242_v0 = vld [vmem:[%s11274_s28 + $0xb8] sm:$0x3] }
  0xa0   : > { %994 = vrot.lane.b32.xlu1 %v11471_v49, %s11219_s18 }
  0xa1   : > { %v407_v56 = vpop.permute.xlu0 %406 }
  0xa2   : > { %v981_v61 = vpop.permute.xlu1 %980  ;;  %v1280_v27 = vsel %vm1277_vm3, %v11150_v26, %v407_v56 }
  0xa3   : > { %597 = vrot.lane.b32.xlu0 %v11414_v19, %s11217_s6  ;;  %v1444_v5 = vsel %vm15751_vm8, %v1411_v8, %v981_v61  ;;  %v11526_v19 = vsel %vm15745_vm0, %v353_v54, %v355_v14  ;;  %v535_v54 = vrot.slane %v11548_v33, 2  ;;  %v11152_v8 = vld [vmem:[%s11274_s28 + $0x30] sm:$0xff] }
  0xa4   : > { %1096 = vrot.lane.b32.xlu1 %v11490_v57, %s11220_s21 }
  0xa5   : > { %v584_v1 = vpop.permute.xlu0 %583 }
  0xa6   : > { %v1083_v4 = vpop.permute.xlu1 %1082  ;;  %v1313_v28 = vsel %vm1310_vm4, %v1280_v27, %v584_v1  ;;  %v11625_v27 = vld [vmem:[%s11274_s28 + $0xc0] sm:$0xff] }
  0xa7   : > { %695 = vrot.lane.b32.xlu0 %v11408_v18, %s11214_s29  ;;  %v1477_v9 = vsel %vm15750_vm9, %v1444_v5, %v1083_v4  ;;  %v360_v4 = vrot.slane %v242_v0, 1 }
  0xa8   : > { %1197 = vrot.lane.b32.xlu1 %v11504_v2, %s11222_s24 }
  0xa9   : > { %v682_v6 = vpop.permute.xlu0 %681  ;;  %v11606_v11 = vsel %vm15745_vm0, %v358_v42, %v360_v4 }
  0xaa   : > { %v1184_v10 = vpop.permute.xlu1 %1183 }
  0xab   : > { %v1510_v12 = vsel %vm15748_vm10, %v1477_v9, %v1184_v10  ;;  %797 = vrot.lane.b32.xlu0 %v11454_v37, %s11216_s5 }
  0xac   : > { %898 = vrot.lane.b32.xlu1 %v11461_v41, %s11218_s7  ;;  %9009 = vmatmul.mubr.msk.f32.gmra.mrb[2].mxu0 %vm15749_vm11, %v1510_v12  ;;  %v537_v12 = vrot.slane %v242_v0, 2  ;;  %v11154_v0 = vld [vmem:[%s11274_s28 + $0x48] sm:$0xff] }
  0xad   : > { %v784_v13 = vpop.permute.xlu0 %783  ;;  %1731 = vmatprep.mubr.f32.mxu0 %v15752_v46 }
  0xae   : > { %v409_v16 = vpop.permute.xlu1 %408 }
  0xaf   : > { %422 = vrot.lane.b32.xlu0 %v11428_v22, %s11215_s30  ;;  %v11533_v22 = vsel %vm498_vm1, %v530_v59, %v532_v20  ;;  %v1281_v36 = vsel %vm1277_vm3, %v11151_v35, %v409_v16  ;;  %v11583_v59 = vsel %vm498_vm1, %v534_v53, %v535_v54 }
  0xb0   : > { %996 = vrot.lane.b32.xlu1 %v11474_v50, %s11219_s18 }
  0xb1   : > { %v885_v17 = vpop.permute.xlu0 %884 }
  0xb2   : > { %v586_v21 = vpop.permute.xlu1 %585 }
  0xb3   : > { %599 = vrot.lane.b32.xlu0 %v11436_v25, %s11217_s6  ;;  %v1346_v25 = vsel %vm1343_vm5, %v1313_v28, %v682_v6  ;;  %v1314_v45 = vsel %vm1310_vm4, %v1281_v36, %v586_v21  ;;  %v11628_v28 = vld [vmem:[%s11274_s28 + $0xc8] sm:$0xff] }
  0xb4   : > { %1098 = vrot.lane.b32.xlu1 %v11526_v19, %s11220_s21  ;;  %v1379_v30 = vsel %vm1376_vm6, %v1346_v25, %v784_v13 }
  0xb5   : > { %v983_v23 = vpop.permute.xlu0 %982  ;;  %v1412_v34 = vsel %vm1409_vm7, %v1379_v30, %v885_v17  ;;  %v11615_v17 = vsel %vm498_vm1, %v535_v54, %v537_v12  ;;  %v362_v30 = vrot.slane %v11625_v27, 1 }
  0xb6   : > { %v684_v24 = vpop.permute.xlu1 %683  ;;  %v1445_v38 = vsel %vm15751_vm8, %v1412_v34, %v983_v23 }
  0xb7   : > { %697 = vrot.lane.b32.xlu0 %v11471_v49, %s11214_s29  ;;  %v1347_v47 = vsel %vm1343_vm5, %v1314_v45, %v684_v24 }
  0xb8   : > { %1199 = vrot.lane.b32.xlu1 %v11533_v22, %s11222_s24 }
  0xb9   : > { %v1085_v29 = vpop.permute.xlu0 %1084 }
  0xba   : > { %v786_v31 = vpop.permute.xlu1 %785  ;;  %v1478_v7 = vsel %vm15750_vm9, %v1445_v38, %v1085_v29  ;;  %v539_v38 = vrot.slane %v11625_v27, 2 }
  0xbb   : > { %799 = vrot.lane.b32.xlu0 %v11490_v57, %s11216_s5  ;;  %v1380_v48 = vsel %vm1376_vm6, %v1347_v47, %v786_v31  ;;  %v363_v31 = vrot.slane %v11628_v28, 1 }
  0xbc   : > { %900 = vrot.lane.b32.xlu1 %v11504_v2, %s11218_s7 }
  0xbd   : > { %v1186_v39 = vpop.permute.xlu0 %1185  ;;  %v11644_v36 = vsel %vm15745_vm0, %v362_v30, %v363_v31 }
  0xbe   : > { %v1511_v43 = vsel %vm15748_vm10, %v1478_v7, %v1186_v39  ;;  %v985_v44 = vpop.permute.xlu1 %984  ;;  %v540_v7 = vrot.slane %v11628_v28, 2  ;;  %v11153_v39 = vld [vmem:[%s11274_s28 + $0x38] sm:$0xff] }
  0xbf   : > { %424 = vrot.lane.b32.xlu0 %v11454_v37, %s11215_s30  ;;  %9010 = vmatmul.mubr.msk.f32.gmra.mrb[4].mxu0 %vm15749_vm11, %v1511_v43 }
  0xc0   : > { %998 = vrot.lane.b32.xlu1 %v11545_v32, %s11219_s18  ;;  %1737 = vmatprep.mubr.f32.mxu0 %v15752_v46  ;;  %v11658_v47 = vsel %vm498_vm1, %v539_v38, %v540_v7 }
  0xc1   : > { %v887_v51 = vpop.permute.xlu0 %886 }
  0xc2   : > { %v1413_v37 = vsel %vm1409_vm7, %v1380_v48, %v887_v51  ;;  %v1188_v55 = vpop.permute.xlu1 %1187 }
  0xc3   : > { %601 = vrot.lane.b32.xlu0 %v11461_v41, %s11217_s6  ;;  %v1446_v56 = vsel %vm15751_vm8, %v1413_v37, %v985_v44 }
  0xc4   : > { %1100 = vrot.lane.b32.xlu1 %v11572_v52, %s11220_s21 }
  0xc5   : > { %v1087_v58 = vpop.permute.xlu0 %1086 }
  0xc6   : > { %v1479_v60 = vsel %vm15750_vm9, %v1446_v56, %v1087_v58  ;;  %v588_v61 = vpop.permute.xlu1 %587 }
  0xc7   : > { %699 = vrot.lane.b32.xlu0 %v11474_v50, %s11214_s29  ;;  %v1512_v62 = vsel %vm15748_vm10, %v1479_v60, %v1188_v55  ;;  %v245_v55 = vld [vmem:[%s11274_s28 + $0xd0] sm:$0x3] }
  0xc8   : > { %1201 = vrot.lane.b32.xlu1 %v11583_v59, %s11222_s24  ;;  %9011 = vmatmul.mubr.msk.f32.gmra.mrb[6].mxu0 %vm15749_vm11, %v1512_v62  ;;  %v365_v60 = vrot.slane %v245_v55, 1 }
  0xc9   : > { %v411_v41 = vpop.permute.xlu0 %410  ;;  %1743 = vmatprep.mubr.f32.mxu0 %v15752_v46 }
  0xca   : > { %v788_v63 = vpop.permute.xlu1 %787  ;;  %v1282_v5 = vsel %vm1277_vm3, %v11152_v8, %v411_v41  ;;  %v11680_v41 = vsel %vm15745_vm0, %v363_v31, %v365_v60 }
  0xcb   : > { %801 = vrot.lane.b32.xlu0 %v11526_v19, %s11216_s5  ;;  %v1315_v9 = vsel %vm1310_vm4, %v1282_v5, %v588_v61 }
  0xcc   : > { %902 = vrot.lane.b32.xlu1 %v11533_v22, %s11218_s7 }
  0xcd   : > { %v686_v1 = vpop.permute.xlu0 %685 }
  0xce   : > { %v889_v6 = vpop.permute.xlu1 %888  ;;  %v1348_v13 = vsel %vm1343_vm5, %v1315_v9, %v686_v1 }
  0xcf   : > { %426 = vrot.lane.b32.xlu0 %v11490_v57, %s11215_s30  ;;  %v1381_v57 = vsel %vm1376_vm6, %v1348_v13, %v788_v63  ;;  %v542_v63 = vrot.slane %v245_v55, 2 }
  0xd0   : > { %1000 = vrot.lane.b32.xlu1 %v11548_v33, %s11219_s18  ;;  %v1414_v21 = vsel %vm1409_vm7, %v1381_v57, %v889_v6 }
  0xd1   : > { %v413_v10 = vpop.permute.xlu0 %412  ;;  %v11692_v9 = vsel %vm498_vm1, %v540_v7, %v542_v63 }
  0xd2   : > { %v987_v14 = vpop.permute.xlu1 %986  ;;  %v1283_v40 = vsel %vm1277_vm3, %v11153_v39, %v413_v10 }
  0xd3   : > { %603 = vrot.lane.b32.xlu0 %v11504_v2, %s11217_s6  ;;  %v1447_v2 = vsel %vm15751_vm8, %v1414_v21, %v987_v14 }
  0xd4   : > { %1102 = vrot.lane.b32.xlu1 %v11606_v11, %s11220_s21 }
  0xd5   : > { %v590_v16 = vpop.permute.xlu0 %589 }
  0xd6   : > { %v1089_v20 = vpop.permute.xlu1 %1088  ;;  %v1316_v43 = vsel %vm1310_vm4, %v1283_v40, %v590_v16  ;;  %v246_v16 = vld [vmem:[%s11274_s28 + $0xd8] sm:$0xff] }
  0xd7   : > { %701 = vrot.lane.b32.xlu0 %v11545_v32, %s11214_s29  ;;  %v1480_v24 = vsel %vm15750_vm9, %v1447_v2, %v1089_v20  ;;  %v11703_v20 = vld [vmem:[%s11274_s28 + $0xe0] sm:$0xff]  ;;  %v544_v30 = vrot.slane %v246_v16, 2 }
  0xd8   : > { %1203 = vrot.lane.b32.xlu1 %v11615_v17, %s11222_s24  ;;  %v545_v31 = vrot.slane %v11703_v20, 2 }
  0xd9   : > { %v688_v23 = vpop.permute.xlu0 %687 }
  0xda   : > { %v1190_v26 = vpop.permute.xlu1 %1189 }
  0xdb   : > { %v1513_v25 = vsel %vm15748_vm10, %v1480_v24, %v1190_v26  ;;  %803 = vrot.lane.b32.xlu0 %v11572_v52, %s11216_s5  ;;  %v368_v24 = vrot.slane %v11703_v20, 1 }
  0xdc   : > { %904 = vrot.lane.b32.xlu1 %v11583_v59, %s11218_s7  ;;  %9012 = vmatmul.mubr.msk.f32.gmra.mrb[8].mxu0 %vm15749_vm11, %v1513_v25 }
  0xdd   : > { %v790_v29 = vpop.permute.xlu0 %789  ;;  %1749 = vmatprep.mubr.f32.mxu0 %v15752_v46 }
  0xde   : > { %v891_v34 = vpop.permute.xlu1 %890 }
  0xdf   : > { %428 = vrot.lane.b32.xlu0 %v11526_v19, %s11215_s30  ;;  %v1349_v19 = vsel %vm1343_vm5, %v1316_v43, %v688_v23  ;;  %v367_v23 = vrot.slane %v246_v16, 1 }
  0xe0   : > { %1002 = vrot.lane.b32.xlu1 %v11625_v27, %s11219_s18  ;;  %v1382_v44 = vsel %vm1376_vm6, %v1349_v19, %v790_v29 }
  0xe1   : > { %v415_v35 = vpop.permute.xlu0 %414  ;;  %v1415_v51 = vsel %vm1409_vm7, %v1382_v44, %v891_v34  ;;  %v11717_v29 = vsel %vm15745_vm0, %v367_v23, %v368_v24  ;;  %v11155_v34 = vld [vmem:[%s11274_s28 + $0x50] sm:$0xff]  ;;  %v11156_v23 = vld [vmem:[%s11274_s28 + $0x68] sm:$0xff] }
  0xe2   : > { %v989_v42 = vpop.permute.xlu1 %988  ;;  %v1284_v1 = vsel %vm1277_vm3, %v11154_v0, %v415_v35 }
  0xe3   : > { %605 = vrot.lane.b32.xlu0 %v11533_v22, %s11217_s6  ;;  %v1448_v22 = vsel %vm15751_vm8, %v1415_v51, %v989_v42  ;;  %v11730_v42 = vsel %vm498_vm1, %v544_v30, %v545_v31  ;;  %v248_v51 = vld [vmem:[%s11274_s28 + $0xe8] sm:$0x3] }
  0xe4   : > { %1104 = vrot.lane.b32.xlu1 %v11644_v36, %s11220_s21 }
  0xe5   : > { %v592_v45 = vpop.permute.xlu0 %591 }
  0xe6   : > { %v1091_v48 = vpop.permute.xlu1 %1090  ;;  %v1317_v8 = vsel %vm1310_vm4, %v1284_v1, %v592_v45 }
  0xe7   : > { %703 = vrot.lane.b32.xlu0 %v11548_v33, %s11214_s29  ;;  %v1481_v54 = vsel %vm15750_vm9, %v1448_v22, %v1091_v48 }
  0xe8   : > { %1205 = vrot.lane.b32.xlu1 %v11658_v47, %s11222_s24 }
  0xe9   : > { %v690_v53 = vpop.permute.xlu0 %689 }
  0xea   : > { %v1192_v37 = vpop.permute.xlu1 %1191 }
  0xeb   : > { %v1514_v56 = vsel %vm15748_vm10, %v1481_v54, %v1192_v37  ;;  %805 = vrot.lane.b32.xlu0 %v11606_v11, %s11216_s5 }
  0xec   : > { %906 = vrot.lane.b32.xlu1 %v11615_v17, %s11218_s7  ;;  %9013 = vmatmul.mubr.msk.f32.gmra.mrb[10].mxu0 %vm15749_vm11, %v1514_v56  ;;  %v547_v56 = vrot.slane %v248_v51, 2 }
  0xed   : > { %v792_v58 = vpop.permute.xlu0 %791  ;;  %1755 = vmatprep.mubr.f32.mxu0 %v15752_v46 }
  0xee   : > { %v893_v61 = vpop.permute.xlu1 %892  ;;  %v11764_v0 = vsel %vm498_vm1, %v545_v31, %v547_v56 }
  0xef   : > { %430 = vrot.lane.b32.xlu0 %v11572_v52, %s11215_s30  ;;  %v1350_v52 = vsel %vm1343_vm5, %v1317_v8, %v690_v53  ;;  %v370_v53 = vrot.slane %v248_v51, 1  ;;  %v10933_v51 = vld [vmem:[%s15742_s2 + $0x88] sm:$0xff]  }
  0xf0   : > { %1004 = vrot.lane.b32.xlu1 %v11628_v28, %s11219_s18  ;;  %v1383_v5 = vsel %vm1376_vm6, %v1350_v52, %v792_v58 }
  0xf1   : > { %v417_v62 = vpop.permute.xlu0 %416  ;;  %v1416_v12 = vsel %vm1409_vm7, %v1383_v5, %v893_v61  ;;  %v11752_v55 = vsel %vm15745_vm0, %v368_v24, %v370_v53  ;;  %v11773_v5 = vld [vmem:[%s11274_s28 + $0xf0] sm:$0xff] }
  0xf2   : > { %v991_v4 = vpop.permute.xlu1 %990  ;;  %v1285_v35 = vsel %vm1277_vm3, %v11155_v34, %v417_v62 }
  0xf3   : > { %607 = vrot.lane.b32.xlu0 %v11583_v59, %s11217_s6  ;;  %v1449_v59 = vsel %vm15751_vm8, %v1416_v12, %v991_v4 }
  0xf4   : > { %1106 = vrot.lane.b32.xlu1 %v11680_v41, %s11220_s21 }
  0xf5   : > { %v594_v6 = vpop.permute.xlu0 %593 }
  0xf6   : > { %v1093_v10 = vpop.permute.xlu1 %1092  ;;  %v1318_v7 = vsel %vm1310_vm4, %v1285_v35, %v594_v6  ;;  %v11776_v6 = vld [vmem:[%s11274_s28 + $0xf8] sm:$0xff] }
  0xf7   : > { %705 = vrot.lane.b32.xlu0 %v11625_v27, %s11214_s29  ;;  %v1482_v14 = vsel %vm15750_vm9, %v1449_v59, %v1093_v10  ;;  %v372_v59 = vrot.slane %v11773_v5, 1 }
  0xf8   : > { %1207 = vrot.lane.b32.xlu1 %v11692_v9, %s11222_s24 }
  0xf9   : > { %v692_v13 = vpop.permute.xlu0 %691 }
  0xfa   : > { %v1194_v57 = vpop.permute.xlu1 %1193 }
  0xfb   : > { %v1515_v21 = vsel %vm15748_vm10, %v1482_v14, %v1194_v57  ;;  %807 = vrot.lane.b32.xlu0 %v11644_v36, %s11216_s5 }
  0xfc   : > { %908 = vrot.lane.b32.xlu1 %v11658_v47, %s11218_s7  ;;  %9014 = vmatmul.mubr.msk.f32.gmra.mrb[12].mxu0 %vm15749_vm11, %v1515_v21  ;;  %v549_v21 = vrot.slane %v11773_v5, 2 }
  0xfd   : > { %v794_v2 = vpop.permute.xlu0 %793  ;;  %1761 = vmatprep.mubr.f32.mxu0 %v15752_v46 }
  0xfe   : > { %v895_v26 = vpop.permute.xlu1 %894 }
  0xff   : > { %432 = vrot.lane.b32.xlu0 %v11606_v11, %s11215_s30  ;;  %v1351_v11 = vsel %vm1343_vm5, %v1318_v7, %v692_v13  ;;  %v373_v13 = vrot.slane %v11776_v6, 1 }
 0x100   : > { %1006 = vrot.lane.b32.xlu1 %v246_v16, %s11219_s18  ;;  %v1384_v39 = vsel %vm1376_vm6, %v1351_v11, %v794_v2  ;;  %v550_v2 = vrot.slane %v11776_v6, 2  ;;  %v10930_v11 = vld [vmem:[%s15742_s2 + $0xc0] sm:$0xff]  }
 0x101   : > { %v419_v25 = vpop.permute.xlu0 %418  ;;  %v1417_v19 = vsel %vm1409_vm7, %v1384_v39, %v895_v26  ;;  %9880 = vmatprep.subr.bf16.mxu1 %v10930_v11 }
 0x102   : > { %v993_v38 = vpop.permute.xlu1 %992  ;;  %v1286_v58 = vsel %vm1277_vm3, %v11375_v3, %v419_v25  ;;  %v11806_v34 = vsel %vm498_vm1, %v549_v21, %v550_v2  ;;  %v10940_v21 = vld [vmem:[%s15742_s2 + $0xe8] sm:$0xff]  }
 0x103   : > { %609 = vrot.lane.b32.xlu0 %v11615_v17, %s11217_s6  ;;  %v1450_v17 = vsel %vm15751_vm8, %v1417_v19, %v993_v38 }
 0x104   : > { %1108 = vrot.lane.b32.xlu1 %v11717_v29, %s11220_s21 }
 0x105   : > { %v596_v40 = vpop.permute.xlu0 %595 }
 0x106   : > { %v1095_v43 = vpop.permute.xlu1 %1094  ;;  %v1319_v61 = vsel %vm1310_vm4, %v1286_v58, %v596_v40 }
 0x107   : > { %707 = vrot.lane.b32.xlu0 %v11628_v28, %s11214_s29  ;;  %v1483_v45 = vsel %vm15750_vm9, %v1450_v17, %v1095_v43  ;;  %v251_v43 = vld [vmem:[%s11274_s28 + $0x100] sm:$0x3] }
 0x108   : > { %1209 = vrot.lane.b32.xlu1 %v11730_v42, %s11222_s24  ;;  %v552_v53 = vrot.slane %v251_v43, 2 }
 0x109   : > { %v694_v44 = vpop.permute.xlu0 %693 }
 0x10a   : > { %v1196_v48 = vpop.permute.xlu1 %1195 }
 0x10b   : > { %v1516_v22 = vsel %vm15748_vm10, %v1483_v45, %v1196_v48  ;;  %809 = vrot.lane.b32.xlu0 %v11680_v41, %s11216_s5  ;;  %v10932_v45 = vld [vmem:[%s15742_s2 + $0xc8] sm:$0xff]  }
 0x10c   : > { %910 = vrot.lane.b32.xlu1 %v11692_v9, %s11218_s7  ;;  %9015 = vmatmul.mubr.msk.f32.gmra.mrb[14].mxu0 %vm15749_vm11, %v1516_v22 }
 0x10d   : > { %v796_v28 = vpop.permute.xlu0 %795  ;;  %1767 = vmatprep.mubr.f32.mxu0 %v15752_v46 }
 0x10e   : > { %v897_v54 = vpop.permute.xlu1 %896 }
 0x10f   : > { %434 = vrot.lane.b32.xlu0 %v11644_v36, %s11215_s30  ;;  %v1352_v36 = vsel %vm1343_vm5, %v1319_v61, %v694_v44  ;;  %v375_v44 = vrot.slane %v251_v43, 1 }
 0x110   : > { %1008 = vrot.lane.b32.xlu1 %v11703_v20, %s11219_s18  ;;  %v1385_v62 = vsel %vm1376_vm6, %v1352_v36, %v796_v28 }
 0x111   : > { %v421_v37 = vpop.permute.xlu0 %420  ;;  %v1418_v1 = vsel %vm1409_vm7, %v1385_v62, %v897_v54  ;;  %v11840_v28 = vsel %vm15745_vm0, %v373_v13, %v375_v44  ;;  %v10934_v54 = vld [vmem:[%s15742_s2 + $0xd0] sm:$0xff]   ;;  %v10936_v62 = vld [vmem:[%s15742_s2 + $0xd8] sm:$0xff]  }
 0x112   : > { %v995_v60 = vpop.permute.xlu1 %994  ;;  %v1287_v24 = vsel %vm1277_vm3, %v11156_v23, %v421_v37  ;;  %v10941_v23 = vld [vmem:[%s15742_s2 + $0xa8] sm:$0xff]  }
 0x113   : > { %611 = vrot.lane.b32.xlu0 %v11658_v47, %s11217_s6  ;;  %v1451_v47 = vsel %vm15751_vm8, %v1418_v1, %v995_v60 }
 0x114   : > { %1110 = vrot.lane.b32.xlu1 %v11752_v55, %s11220_s21 }
 0x115   : > { %v598_v63 = vpop.permute.xlu0 %597 }
 0x116   : > { %v1097_v3 = vpop.permute.xlu1 %1096  ;;  %v1320_v25 = vsel %vm1310_vm4, %v1287_v24, %v598_v63  ;;  %v10937_v63 = vld [vmem:[%s15742_s2 + $0x98] sm:$0xff]  }
 0x117   : > { %709 = vrot.lane.b32.xlu0 %v246_v16, %s11214_s29  ;;  %v1484_v8 = vsel %vm15750_vm9, %v1451_v47, %v1097_v3  ;;  %v11792_v16 = vsel %vm15745_vm0, %v372_v59, %v373_v13 }
 0x118   : > { %1211 = vrot.lane.b32.xlu1 %v11764_v0, %s11222_s24 }
 0x119   : > { %v696_v4 = vpop.permute.xlu0 %695 }
 0x11a   : > { %v1198_v52 = vpop.permute.xlu1 %1197 }
 0x11b   : > { %v1517_v10 = vsel %vm15748_vm10, %v1484_v8, %v1198_v52  ;;  %811 = vrot.lane.b32.xlu0 %v11717_v29, %s11216_s5 }
 0x11c   : > { %912 = vrot.lane.b32.xlu1 %v11730_v42, %s11218_s7  ;;  %9016 = vmatmul.mubr.msk.f32.gmra.mrb[16].mxu0 %vm15749_vm11, %v1517_v10  ;;  %v11877_v10 = vld [vmem:[%s11274_s28 + $0x108] sm:$0xff] }
 0x11d   : > { %v798_v12 = vpop.permute.xlu0 %797  ;;  %1773 = vmatprep.mubr.f32.mxu0 %v15752_v46 }
 0x11e   : > { %v899_v14 = vpop.permute.xlu1 %898 }
 0x11f   : > { %436 = vrot.lane.b32.xlu0 %v11680_v41, %s11215_s30  ;;  %v1353_v41 = vsel %vm1343_vm5, %v1320_v25, %v696_v4  ;;  %v10938_v4 = vld [vmem:[%s15742_s2 + $0xe0] sm:$0xff]   ;;  %v554_v25 = vrot.slane %v11877_v10, 2 }
 0x120   : > { %1010 = vrot.lane.b32.xlu1 %v11773_v5, %s11219_s18  ;;  %v1386_v30 = vsel %vm1376_vm6, %v1353_v41, %v798_v12  ;;  %v10939_v12 = vld [vmem:[%s15742_s2 + $0xa0] sm:$0xff]  }
 0x121   : > { %v423_v57 = vpop.permute.xlu0 %422  ;;  %v1419_v38 = vsel %vm1409_vm7, %v1386_v30, %v899_v14  ;;  %v377_v14 = vrot.slane %v11877_v10, 1  ;;  %v10942_v30 = vld [vmem:[%s15742_s2 + $0xf0] sm:$0xff]  }
 0x122   : > { %v997_v26 = vpop.permute.xlu1 %996  ;;  %v1288_v37 = vsel %vm1277_vm3, %v11402_v15, %v423_v57  ;;  %v11858_v15 = vsel %vm498_vm1, %v550_v2, %v552_v53 }
 0x123   : > { %613 = vrot.lane.b32.xlu0 %v11692_v9, %s11217_s6  ;;  %v1452_v9 = vsel %vm15751_vm8, %v1419_v38, %v997_v26 }
 0x124   : > { %1112 = vrot.lane.b32.xlu1 %v11792_v16, %s11220_s21 }
 0x125   : > { %v600_v31 = vpop.permute.xlu0 %599 }
 0x126   : > { %v1099_v35 = vpop.permute.xlu1 %1098  ;;  %v1321_v58 = vsel %vm1310_vm4, %v1288_v37, %v600_v31 }
 0x127   : > { %711 = vrot.lane.b32.xlu0 %v11703_v20, %s11214_s29  ;;  %v1485_v39 = vsel %vm15750_vm9, %v1452_v9, %v1099_v35  ;;  %v10931_v20 = vld [vmem:[%s15742_s2 + $0x80] sm:$0xff]   ;;  %v10943_v35 = vld [vmem:[%s15742_s2 + $0xb0] sm:$0xff]  }
 0x128   : > { %1213 = vrot.lane.b32.xlu1 %v11806_v34, %s11222_s24  ;;  %9881 = vmatpush3.bf16.msra.mxu1 %v10931_v20 }
 0x129   : > { %v698_v7 = vpop.permute.xlu0 %697  ;;  %9882 = vmatprep.subr.bf16.mxu1 %v10932_v45  ;;  %v254_v45 = vld [vmem:[%s11274_s28 + $0x118] sm:$0x3] }
 0x12a   : > { %v1200_v40 = vpop.permute.xlu1 %1199  ;;  %v1354_v60 = vsel %vm1343_vm5, %v1321_v58, %v698_v7  ;;  %v557_v37 = vrot.slane %v254_v45, 2 }
 0x12b   : > { %v1518_v19 = vsel %vm15748_vm10, %v1485_v39, %v1200_v40  ;;  %813 = vrot.lane.b32.xlu0 %v11752_v55, %s11216_s5  ;;  %v10944_v39 = vld [vmem:[%s15742_s2 + $0xf8] sm:$0xff]  }
 0x12c   : > { %914 = vrot.lane.b32.xlu1 %v11764_v0, %s11218_s7  ;;  %9017 = vmatmul.mubr.msk.f32.gmra.mrb[18].mxu0 %vm15749_vm11, %v1518_v19 }
 0x12d   : > { %v800_v17 = vpop.permute.xlu0 %799  ;;  %1779 = vmatprep.mubr.f32.mxu0 %v15752_v46  ;;  %9883 = vmatpush3.bf16.msra.mxu1 %v10933_v51  ;;  %v380_v51 = vrot.slane %v254_v45, 1 }
 0x12e   : > { %v901_v48 = vpop.permute.xlu1 %900  ;;  %9884 = vmatprep.subr.bf16.mxu1 %v10934_v54  ;;  %v1387_v61 = vsel %vm1376_vm6, %v1354_v60, %v800_v17 }
 0x12f   : > { %438 = vrot.lane.b32.xlu0 %v11717_v29, %s11215_s30  ;;  %v10935_v29 = vld [vmem:[%s15742_s2 + $0x90] sm:$0xff]   ;;  %v1420_v3 = vsel %vm1409_vm7, %v1387_v61, %v901_v48 }
 0x130   : > { %1012 = vrot.lane.b32.xlu1 %v11776_v6, %s11219_s18 }
 0x131   : > { %v425_v22 = vpop.permute.xlu0 %424  ;;  %9885 = vmatpush3.bf16.msra.mxu1 %v10935_v29 }
 0x132   : > { %v999_v56 = vpop.permute.xlu1 %998  ;;  %9886 = vmatprep.subr.bf16.mxu1 %v10936_v62 }
 0x133   : > { %615 = vrot.lane.b32.xlu0 %v11730_v42, %s11217_s6  ;;  %v1453_v1 = vsel %vm15751_vm8, %v1420_v3, %v999_v56 }
 0x134   : > { %1114 = vrot.lane.b32.xlu1 %v11840_v28, %s11220_s21 }
 0x135   : > { %v602_v36 = vpop.permute.xlu0 %601  ;;  %9887 = vmatpush3.bf16.msra.mxu1 %v10937_v63 }
 0x136   : > { %v1101_v42 = vpop.permute.xlu1 %1100  ;;  %9888 = vmatprep.subr.bf16.mxu1 %v10938_v4 }
 0x137   : > { %713 = vrot.lane.b32.xlu0 %v11773_v5, %s11214_s29  ;;  %v1486_v8 = vsel %vm15750_vm9, %v1453_v1, %v1101_v42  ;;  %v11880_v5 = vld [vmem:[%s11274_s28 + $0x110] sm:$0xff]  ;;  %v11975_v1 = vld [vmem:[%s11274_s28 + $0x120] sm:$0xff] }
 0x138   : > { %1215 = vrot.lane.b32.xlu1 %v11858_v15, %s11222_s24  ;;  %v378_v57 = vrot.slane %v11880_v5, 1  ;;  %v555_v41 = vrot.slane %v11880_v5, 2 }
 0x139   : > { %v700_v47 = vpop.permute.xlu0 %699  ;;  %9889 = vmatpush3.bf16.msra.mxu1 %v10939_v12 }
 0x13a   : > { %v1202_v52 = vpop.permute.xlu1 %1201  ;;  %9890 = vmatprep.subr.bf16.mxu1 %v10940_v21  ;;  %v11905_v26 = vsel %vm15745_vm0, %v377_v14, %v378_v57  ;;  %v11925_v11 = vsel %vm498_vm1, %v554_v25, %v555_v41  ;;  %v11953_v54 = vsel %vm15745_vm0, %v378_v57, %v380_v51  ;;  %v559_v14 = vrot.slane %v11975_v1, 2 }
 0x13b   : > { %v1519_v59 = vsel %vm15748_vm10, %v1486_v8, %v1202_v52  ;;  %815 = vrot.lane.b32.xlu0 %v11792_v16, %s11216_s5  ;;  %v382_v52 = vrot.slane %v11975_v1, 1 }
 0x13c   : > { %916 = vrot.lane.b32.xlu1 %v11806_v34, %s11218_s7  ;;  %9018 = vmatmul.mubr.msk.f32.gmra.mrb[20].mxu0 %vm15749_vm11, %v1519_v59 }
 0x13d   : > { %v802_v13 = vpop.permute.xlu0 %801  ;;  %1785 = vmatprep.mubr.f32.mxu0 %v15752_v46  ;;  %9891 = vmatpush3.bf16.msra.mxu1 %v10941_v23 }
 0x13e   : > { %v903_v2 = vpop.permute.xlu1 %902  ;;  %9892 = vmatprep.subr.bf16.mxu1 %v10942_v30 }
 0x13f   : > { %440 = vrot.lane.b32.xlu0 %v11752_v55, %s11215_s30  ;;  %v1289_v55 = vsel %vm1277_vm3, %v11408_v18, %v425_v22 }
 0x140   : > { %1014 = vrot.lane.b32.xlu1 %v11877_v10, %s11219_s18  ;;  %v1322_v38 = vsel %vm1310_vm4, %v1289_v55, %v602_v36  ;;  %v11965_v36 = vsel %vm498_vm1, %v555_v41, %v557_v37 }
 0x141   : > { %v427_v24 = vpop.permute.xlu0 %426  ;;  %v1355_v9 = vsel %vm1343_vm5, %v1322_v38, %v700_v47  ;;  %9893 = vmatpush3.bf16.msra.mxu1 %v10943_v35  ;;  %v11978_v47 = vld [vmem:[%s11274_s28 + $0x128] sm:$0xff]  ;;  %v257_v38 = vld [vmem:[%s11274_s28 + $0x130] sm:$0x3] }
 0x142   : > { %v1001_v31 = vpop.permute.xlu1 %1000  ;;  %v1388_v7 = vsel %vm1376_vm6, %v1355_v9, %v802_v13  ;;  %9894 = vmatprep.subr.bf16.mxu1 %v10944_v39  ;;  %v1290_v56 = vsel %vm1277_vm3, %v11471_v49, %v427_v24  ;;  %v560_v57 = vrot.slane %v11978_v47, 2 }
 0x143   : > { %617 = vrot.lane.b32.xlu0 %v11764_v0, %s11217_s6  ;;  %v10945_v0 = vld [vmem:[%s15742_s2 + $0xb8] sm:$0xff]   ;;  %v1421_v43 = vsel %vm1409_vm7, %v1388_v7, %v903_v2  ;;  %v385_v7 = vrot.slane %v257_v38, 1 }
 0x144   : > { %1116 = vrot.lane.b32.xlu1 %v11905_v26, %s11220_s21  ;;  %v1454_v20 = vsel %vm15751_vm8, %v1421_v43, %v1001_v31  ;;  %v12008_v41 = vsel %vm498_vm1, %v559_v14, %v560_v57 }
 0x145   : > { %v604_v18 = vpop.permute.xlu0 %603  ;;  %9895 = vmatpush3.bf16.msra.mxu1 %v10945_v0 }
 0x146   : > { %v1103_v40 = vpop.permute.xlu1 %1102  ;;  %v1323_v58 = vsel %vm1310_vm4, %v1290_v56, %v604_v18 }
 0x147   : > { %715 = vrot.lane.b32.xlu0 %v11776_v6, %s11214_s29  ;;  %v1487_v17 = vsel %vm15750_vm9, %v1454_v20, %v1103_v40 }
 0x148   : > { %1217 = vrot.lane.b32.xlu1 %v11925_v11, %s11222_s24 }
 0x149   : > { %v702_v19 = vpop.permute.xlu0 %701 }
 0x14a   : > { %v1204_v44 = vpop.permute.xlu1 %1203 }
 0x14b   : > { %v1520_v48 = vsel %vm15748_vm10, %v1487_v17, %v1204_v44  ;;  %817 = vrot.lane.b32.xlu0 %v11840_v28, %s11216_s5  ;;  %v562_v17 = vrot.slane %v257_v38, 2 }
 0x14c   : > { %918 = vrot.lane.b32.xlu1 %v11858_v15, %s11218_s7  ;;  %9019 = vmatmul.mubr.msk.f32.gmra.mrb[22].mxu0 %vm15749_vm11, %v1520_v48 }
 0x14d   : > { %v804_v6 = vpop.permute.xlu0 %803  ;;  %1791 = vmatprep.mubr.f32.mxu0 %v15752_v46 }
 0x14e   : > { %v905_v22 = vpop.permute.xlu1 %904 }
 0x14f   : > { %442 = vrot.lane.b32.xlu0 %v11792_v16, %s11215_s30  ;;  %v1356_v16 = vsel %vm1343_vm5, %v1323_v58, %v702_v19 }
 0x150   : > { %1016 = vrot.lane.b32.xlu1 %v11880_v5, %s11219_s18  ;;  %v1389_v60 = vsel %vm1376_vm6, %v1356_v16, %v804_v6  ;;  %v2467_v16 = vld [vmem:[#allocation2 + $0x18] sm:$0xff] }
 0x151   : > { %v429_v53 = vpop.permute.xlu0 %428  ;;  %v1422_v62 = vsel %vm1409_vm7, %v1389_v60, %v905_v22 }
 0x152   : > { %v1003_v29 = vpop.permute.xlu1 %1002  ;;  %v1291_v21 = vsel %vm1277_vm3, %v11474_v50, %v429_v53  ;;  %v12045_v53 = vsel %vm498_vm1, %v560_v57, %v562_v17 }
 0x153   : > { %619 = vrot.lane.b32.xlu0 %v11806_v34, %s11217_s6  ;;  %v1455_v34 = vsel %vm15751_vm8, %v1422_v62, %v1003_v29 }
 0x154   : > { %1118 = vrot.lane.b32.xlu1 %v11953_v54, %s11220_s21 }
 0x155   : > { %v606_v61 = vpop.permute.xlu0 %605 }
 0x156   : > { %v1105_v49 = vpop.permute.xlu1 %1104  ;;  %v1324_v23 = vsel %vm1310_vm4, %v1291_v21, %v606_v61 }
 0x157   : > { %717 = vrot.lane.b32.xlu0 %v11877_v10, %s11214_s29  ;;  %v1488_v63 = vsel %vm15750_vm9, %v1455_v34, %v1105_v49  ;;  %v383_v10 = vrot.slane %v11978_v47, 1 }
 0x158   : > { %1219 = vrot.lane.b32.xlu1 %v11965_v36, %s11222_s24 }
 0x159   : > { %v704_v42 = vpop.permute.xlu0 %703  ;;  %v11994_v13 = vsel %vm15745_vm0, %v382_v52, %v383_v10  ;;  %v12030_v19 = vsel %vm15745_vm0, %v383_v10, %v385_v7  ;;  %vm2465_vm0 = vmand %vm2463_vm13, %vm15746_vm14  ;;  %vm2471_vm13 = vcmask 1040384   ;;  %vm2474_vm14 = vsmask.f32 4352 }
 0x15a   : > { %v1206_v3 = vpop.permute.xlu1 %1205  ;;  %vm12051_vm2 = vmor %vm2465_vm0, %vm2462_vm15  ;;  %vm2136_vm0 = vsmask.f32 256  ;;  %vm2473_vm15 = vcmask 1044484  }
 0x15b   : > { %v1521_v4 = vsel %vm15748_vm10, %v1488_v63, %v1206_v3  ;;  %819 = vrot.lane.b32.xlu0 %v11905_v26, %s11216_s5  ;;  %v12065_v63 = vld [vmem:[%s11274_s28 + $0x140] sm:$0xff]  ;;  %vm2472_vm12 = vmand %vm2471_vm13, %vm2136_vm0 }
 0x15c   : > { %920 = vrot.lane.b32.xlu1 %v11925_v11, %s11218_s7  ;;  %9020 = vmatmul.mubr.msk.f32.gmra.mrb[24].mxu0 %vm15749_vm11, %v1521_v4  ;;  %v388_v52 = vrot.slane %v12065_v63, 1 }
 0x15d   : > { %v806_v8 = vpop.permute.xlu0 %805  ;;  %1797 = vmatprep.mubr.f32.mxu0 %v15752_v46 }
 0x15e   : > { %v907_v12 = vpop.permute.xlu1 %906 }
 0x15f   : > { %444 = vrot.lane.b32.xlu0 %v11840_v28, %s11215_s30  ;;  %v1357_v28 = vsel %vm1343_vm5, %v1324_v23, %v704_v42  ;;  %v12062_v42 = vld [vmem:[%s11274_s28 + $0x138] sm:$0xff] }
 0x160   : > { %1018 = vrot.lane.b32.xlu1 %v11975_v1, %s11219_s18  ;;  %v1390_v24 = vsel %vm1376_vm6, %v1357_v28, %v806_v8  ;;  %v387_v8 = vrot.slane %v12062_v42, 1  ;;  %v564_v23 = vrot.slane %v12062_v42, 2  ;;  %v565_v28 = vrot.slane %v12065_v63, 2 }
 0x161   : > { %v431_v59 = vpop.permute.xlu0 %430  ;;  %v1423_v50 = vsel %vm1409_vm7, %v1390_v24, %v907_v12 }
 0x162   : > { %v1005_v2 = vpop.permute.xlu1 %1004  ;;  %v1292_v44 = vsel %vm1277_vm3, %v11545_v32, %v431_v59 }
 0x163   : > { %621 = vrot.lane.b32.xlu0 %v11858_v15, %s11217_s6  ;;  %v1456_v15 = vsel %vm15751_vm8, %v1423_v50, %v1005_v2 }
 0x164   : > { %1120 = vrot.lane.b32.xlu1 %v11994_v13, %s11220_s21 }
 0x165   : > { %v608_v25 = vpop.permute.xlu0 %607 }
 0x166   : > { %v1107_v30 = vpop.permute.xlu1 %1106 }
 0x167   : > { %719 = vrot.lane.b32.xlu0 %v11880_v5, %s11214_s29  ;;  %v1489_v31 = vsel %vm15750_vm9, %v1456_v15, %v1107_v30 }
 0x168   : > { %1221 = vrot.lane.b32.xlu1 %v12008_v41, %s11222_s24 }
 0x169   : > { %v706_v55 = vpop.permute.xlu0 %705 }
 0x16a   : > { %v1208_v35 = vpop.permute.xlu1 %1207 }
 0x16b   : > { %v1522_v9 = vsel %vm15748_vm10, %v1489_v31, %v1208_v35  ;;  %821 = vrot.lane.b32.xlu0 %v11953_v54, %s11216_s5 }
 0x16c   : > { %922 = vrot.lane.b32.xlu1 %v11965_v36, %s11218_s7  ;;  %9021 = vmatmul.mubr.msk.f32.gmra.mrb[26].mxu0 %vm15749_vm11, %v1522_v9 }
 0x16d   : > { %v808_v5 = vpop.permute.xlu0 %807  ;;  %1803 = vmatprep.mubr.f32.mxu0 %v15752_v46 }
 0x16e   : > { %v909_v18 = vpop.permute.xlu1 %908 }
 0x16f   : > { %v1721_v39 = vpop.f32.mrb[0].mxu0  ;;  %446 = vrot.lane.b32.xlu0 %v11905_v26, %s11215_s30  ;;  %v1325_v26 = vsel %vm1310_vm4, %v1292_v44, %v608_v25  ;;  %v11010_v25 = vld [vmem:[%s15742_s2 + $0x248] sm:$0xff]  }
 0x170   : > { %v1912_v40 = vmax.f32 %v1721_v39, 0.0  ;;  %1020 = vrot.lane.b32.xlu1 %v11978_v47, %s11219_s18  ;;  %v1723_v0 = vpop.f32.mrb[1].mxu0  ;;  %v1358_v6 = vsel %vm1343_vm5, %v1325_v26, %v706_v55 }
 0x171   : > { %v1913_v43 = vmax.f32 %v1723_v0, 0.0  ;;  %v433_v20 = vpop.permute.xlu0 %432  ;;  %v1391_v51 = vsel %vm1376_vm6, %v1358_v6, %v808_v5  ;;  %v12108_v5 = vsel %vm498_vm1, %v564_v23, %v565_v28  ;;  %v260_v6 = vld [vmem:[%s11274_s28 + $0x148] sm:$0x3] }
 0x172   : > { %v1007_v45 = vpop.permute.xlu1 %1006  ;;  %v1424_v58 = vsel %vm1409_vm7, %v1391_v51, %v909_v18 }
 0x173   : > { %v9848_v48 = vpack.c.bf16 %v1913_v43, %v1912_v40  ;;  %623 = vrot.lane.b32.xlu0 %v11925_v11, %s11217_s6  ;;  %v1457_v61 = vsel %vm15751_vm8, %v1424_v58, %v1007_v45  ;;  %v2477_v43 = vld [vmem:[#allocation2 + $0x28] sm:$0x11] }
 0x174   : > { %1122 = vrot.lane.b32.xlu1 %v12030_v19, %s11220_s21 }
 0x175   : > { %v2140_v32 = vshrl.u32 %v9848_v48, 16  ;;  %v610_v22 = vpop.permute.xlu0 %609  ;;  %v2143_v56 = vshll.u32 %v9848_v48, 16 }
 0x176   : > { %v1109_v11 = vpop.permute.xlu1 %1108 }
 0x177   : > { %v12047_v37 = vrot.slane %v2140_v32, 7  ;;  %721 = vrot.lane.b32.xlu0 %v11975_v1, %s11214_s29  ;;  %v1490_v62 = vsel %vm15750_vm9, %v1457_v61, %v1109_v11 }
 0x178   : > { %1223 = vrot.lane.b32.xlu1 %v12045_v53, %s11222_s24 }
 0x179   : > { %v2145_v60 = vor.u32 %v2143_v56, %v12047_v37  ;;  %v708_v49 = vpop.permute.xlu0 %707 }
 0x17a   : > { %v1210_v34 = vpop.permute.xlu1 %1209 }
 0x17b   : > { %v2468_v3 = vsel %vm12051_vm2, %v2145_v60, %v2467_v16  ;;  %v1523_v1 = vsel %vm15748_vm10, %v1490_v62, %v1210_v34  ;;  %823 = vrot.lane.b32.xlu0 %v11994_v13, %s11216_s5  ;;  %vm2475_vm10 = vmand %vm2473_vm15, %vm2474_vm14 }
 0x17c   : > { %2469 = vst [vmem:[#allocation2 + $0x18] sm:$0xff] %v2468_v3  ;;  %924 = vrot.lane.b32.xlu1 %v12008_v41, %s11218_s7  ;;  %9022 = vmatmul.mubr.msk.f32.gmra.mrb[28].mxu0 %vm15749_vm11, %v1523_v1  ;;  %vm15854_vm11 = vcmask 1046528   ;;  %vm12094_vm14 = vmor %vm2475_vm10, %vm2472_vm12  ;;  %vm15859_vm12 = vcmask 261120  }
 0x17d   : > { %v810_v4 = vpop.permute.xlu0 %809  ;;  %1809 = vmatprep.mubr.f32.mxu0 %v15752_v46  ;;  %v12088_v2 = vsel %vm15854_vm11, %v387_v8, %v388_v52  ;;  %vm2137_vm11 = vsmask.f32 4368 }
 0x17e   : > { %v911_v10 = vpop.permute.xlu1 %910  ;;  %vm12115_vm10 = vmor %vm2136_vm0, %vm2137_vm11  ;;  %vm15860_vm0 = vcmask 293888   ;;  %vm15861_vm11 = vsmask.f32 7938 }
 0x17f   : > { %v1727_v12 = vpop.f32.mrb[2].mxu0  ;;  %448 = vrot.lane.b32.xlu0 %v11953_v54, %s11215_s30  ;;  %v1293_v54 = vsel %vm1277_vm3, %v11548_v33, %v433_v20  ;;  %v2146_v20 = vrot.slane %v12047_v37, 4  ;;  %v390_v37 = vrot.slane %v260_v6, 1 }
 0x180   : > { %v1914_v59 = vmax.f32 %v1727_v12, 0.0  ;;  %1022 = vrot.lane.b32.xlu1 %v12062_v42, %s11219_s18  ;;  %v1729_v14 = vpop.f32.mrb[3].mxu0  ;;  %v1326_v50 = vsel %vm1310_vm4, %v1293_v54, %v610_v22 }
 0x181   : > { %v1915_v57 = vmax.f32 %v1729_v14, 0.0  ;;  %v435_v21 = vpop.permute.xlu0 %434  ;;  %v1359_v31 = vsel %vm1343_vm5, %v1326_v50, %v708_v49 }
 0x182   : > { %v1009_v24 = vpop.permute.xlu1 %1008  ;;  %v1392_v35 = vsel %vm1376_vm6, %v1359_v31, %v810_v4  ;;  %v1294_v62 = vsel %vm1277_vm3, %v11625_v27, %v435_v21 }
 0x183   : > { %v2609_v30 = vld [vmem:[#allocation2 + $0x18] sm:$0x22]  ;;  %v9849_v15 = vpack.c.bf16 %v1915_v57, %v1914_v59  ;;  %625 = vrot.lane.b32.xlu0 %v11965_v36, %s11217_s6  ;;  %v2701_v33 = vld [vmem:[#allocation2 + $0x18] sm:$0x11]  ;;  %v1425_v0 = vsel %vm1409_vm7, %v1392_v35, %v911_v10 }
 0x184   : > { %v9073_v55 = vrot.slane %v2609_v30, 9  ;;  %1124 = vrot.lane.b32.xlu1 %v12088_v2, %s11220_s21  ;;  %v1458_v45 = vsel %vm15751_vm8, %v1425_v0, %v1009_v24 }
 0x185   : > { %v2148_v38 = vshrl.u32 %v9849_v15, 16  ;;  %v612_v9 = vpop.permute.xlu0 %611  ;;  %v2151_v39 = vshll.u32 %v9849_v15, 16 }
 0x186   : > { %v2702_v36 = vsel %vm12094_vm14, %v9073_v55, %v2701_v33  ;;  %v1111_v7 = vpop.permute.xlu1 %1110  ;;  %v1327_v8 = vsel %vm1310_vm4, %v1294_v62, %v612_v9  ;;  %v12194_v9 = vld [vmem:[%s11274_s28 + $0x158] sm:$0xff] }
 0x187   : > { %2703 = vst [vmem:[#allocation2 + $0x18] sm:$0x11] %v2702_v36  ;;  %v2150_v18 = vrot.slane %v2148_v38, 7  ;;  %723 = vrot.lane.b32.xlu0 %v11978_v47, %s11214_s29  ;;  %v1491_v47 = vsel %vm15750_vm9, %v1458_v45, %v1111_v7  ;;  %vm15862_vm9 = vsmask.f32 7954  ;;  %v12191_v38 = vld [vmem:[%s11274_s28 + $0x150] sm:$0xff] }
 0x188   : > { %1225 = vrot.lane.b32.xlu1 %v12108_v5, %s11222_s24  ;;  %vm2843_vm8 = vmand %vm2473_vm15, %vm15862_vm9  ;;  %vm15867_vm15 = vcmask 228352   ;;  %v392_v45 = vrot.slane %v12191_v38, 1 }
 0x189   : > { %v2153_v17 = vor.u32 %v2151_v39, %v2150_v18  ;;  %v2155_v44 = vrot.slane %v2150_v18, 4  ;;  %v710_v26 = vpop.permute.xlu0 %709 }
 0x18a   : > { %v1212_v48 = vpop.permute.xlu1 %1211  ;;  %v1360_v59 = vsel %vm1343_vm5, %v1327_v8, %v710_v26  ;;  %v393_v26 = vrot.slane %v12194_v9, 1 }
 0x18b   : > { %v12128_v51 = vsel %vm12115_vm10, %v2146_v20, %v2153_v17  ;;  %v2478_v32 = vsel %vm12094_vm14, %v2155_v44, %v2477_v43  ;;  %v1524_v22 = vsel %vm15859_vm12, %v1491_v47, %v1212_v48  ;;  %825 = vrot.lane.b32.xlu0 %v12030_v19, %s11216_s5  ;;  %vm2842_vm12 = vmand %vm2471_vm13, %vm15861_vm11  ;;  %vm15863_vm13 = vcmask 1046528   ;;  %v2589_v43 = vld [vmem:[#allocation2] sm:$0xff]  ;;  %v4202_v47 = vld [vmem:[#allocation2 + $0x18] sm:$0xee] }
 0x18c   : > { %2470 = vst [vmem:[#allocation2 + $0x20] sm:$0xff] %v12128_v51  ;;  %2479 = vst [vmem:[#allocation2 + $0x28] sm:$0x11] %v2478_v32  ;;  %926 = vrot.lane.b32.xlu1 %v12045_v53, %s11218_s7  ;;  %9023 = vmatmul.mubr.msk.f32.gmra.mrb[30].mxu0 %vm15860_vm0, %v1524_v22  ;;  %v12159_v49 = vsel %vm15863_vm13, %v388_v52, %v390_v37  ;;  %vm15868_vm0 = vcmask 261120   ;;  %vm4249_vm11 = vcmask 1042432   ;;  %vm4250_vm13 = vcmask 1046532  }
 0x18d   : > { %v812_v11 = vpop.permute.xlu0 %811  ;;  %1815 = vmatprep.mubr.f32.mxu0 %v15752_v46  ;;  %vm12163_vm9 = vmor %vm2843_vm8, %vm2842_vm12  ;;  %vm15866_vm8 = vcmask 195584   ;;  %vm15869_vm12 = vcmask 293888   ;;  %v4261_v20 = vrot.slane %v12128_v51, 5  ;;  %v9237_v62 = vrot.slane %v4202_v47, 9  ;;  %v263_v47 = vld [vmem:[%s11274_s28 + $0x160] sm:$0x3] }
 0x18e   : > { %v913_v56 = vpop.permute.xlu1 %912  ;;  %v12140_v58 = vld [vmem:[#allocation2 + $0x18] sm:$0xff]  ;;  %v1393_v57 = vsel %vm1376_vm6, %v1360_v59, %v812_v11  ;;  %v569_v11 = vrot.slane %v12191_v38, 2 }
 0x18f   : > { %450 = vrot.lane.b32.xlu0 %v11994_v13, %s11215_s30  ;;  %v567_v13 = vrot.slane %v260_v6, 2  ;;  %v1426_v30 = vsel %vm1409_vm7, %v1393_v57, %v913_v56 }
 0x190   : > { %1024 = vrot.lane.b32.xlu1 %v12065_v63, %s11219_s18 }
 0x191   : > { %v12154_v61 = vpop.permute.xlu0 %436  ;;  %v12177_v23 = vsel %vm498_vm1, %v565_v28, %v567_v13  ;;  %v570_v13 = vrot.slane %v12194_v9, 2 }
 0x192   : > { %v1011_v34 = vpop.permute.xlu1 %1010  ;;  %v1733_v3 = vpop.f32.mrb[4].mxu0 }
 0x193   : > { %v2753_v4 = vld [vmem:[#allocation2 + $0x20] sm:$0x88]  ;;  %v1916_v10 = vmax.f32 %v1733_v3, 0.0  ;;  %v1735_v12 = vpop.f32.mrb[5].mxu0  ;;  %627 = vrot.lane.b32.xlu0 %v12008_v41, %s11217_s6  ;;  %v2848_v27 = vld [vmem:[#allocation2 + $0x28] sm:$0x11]  ;;  %v1459_v15 = vsel %vm15866_vm8, %v1426_v30, %v1011_v34  ;;  %vm12218_vm8 = vmor %vm4249_vm11, %vm4250_vm13  ;;  %v12255_v30 = vsel %vm498_vm1, %v569_v11, %v570_v13 }
 0x194   : > { %v9091_v52 = vrot.slane %v2753_v4, 11  ;;  %v1917_v14 = vmax.f32 %v1735_v12, 0.0  ;;  %1126 = vrot.lane.b32.xlu1 %v12159_v49, %s11220_s21  ;;  %v4263_v34 = vrot.slane %v4261_v20, 4  ;;  %v12238_v59 = vsel %vm12218_vm8, %v9237_v62, %v4261_v20 }
 0x195   : > { %v614_v21 = vpop.permute.xlu0 %613  ;;  %vm15874_vm11 = vcmask 228352   ;;  %vm15876_vm13 = vcmask 293888   ;;  %v3020_v11 = vshrl.u32 %v12128_v51, 16 }
 0x196   : > { %v2849_v41 = vsel %vm12163_vm9, %v9091_v52, %v2848_v27  ;;  %v9850_v54 = vpack.c.bf16 %v1917_v14, %v1916_v10  ;;  %v1113_v24 = vpop.permute.xlu1 %1112  ;;  %v11157_v10 = vld [vmem:[%s11274_s28 + $0xc8] sm:$0xff] }
 0x197   : > { %2850 = vst [vmem:[#allocation2 + $0x28] sm:$0x11] %v2849_v41  ;;  %725 = vrot.lane.b32.xlu0 %v12062_v42, %s11214_s29  ;;  %v1492_v33 = vsel %vm15867_vm15, %v1459_v15, %v1113_v24  ;;  %v2480_v42 = vld [vmem:[#allocation2 + $0x30] sm:$0xff]  ;;  %vm15872_vm15 = vcmask 1046528   ;;  %v1295_v12 = vsel %vm1277_vm3, %v11157_v10, %v12154_v61  ;;  %v2484_v24 = vld [vmem:[#allocation2 + $0x40] sm:$0x11] }
 0x198   : > { %v2157_v50 = vshrl.u32 %v9850_v54, 16  ;;  %1227 = vrot.lane.b32.xlu1 %v12177_v23, %s11222_s24  ;;  %v2160_v31 = vshll.u32 %v9850_v54, 16  ;;  %v12231_v8 = vsel %vm15872_vm15, %v392_v45, %v393_v26  ;;  %v1328_v27 = vsel %vm1310_vm4, %v1295_v12, %v614_v21 }
 0x199   : > { %v712_v28 = vpop.permute.xlu0 %711 }
 0x19a   : > { %v12187_v55 = vrot.slane %v2157_v50, 7  ;;  %v1214_v35 = vpop.permute.xlu1 %1213  ;;  %v1361_v61 = vsel %vm1343_vm5, %v1328_v27, %v712_v28 }
 0x19b   : > { %v1525_v36 = vsel %vm15868_vm0, %v1492_v33, %v1214_v35  ;;  %v1739_v7 = vpop.f32.mrb[6].mxu0  ;;  %827 = vrot.lane.b32.xlu0 %v12088_v2, %s11216_s5  ;;  %vm15873_vm0 = vcmask 195584  }
 0x19c   : > { %v2162_v18 = vor.u32 %v2160_v31, %v12187_v55  ;;  %v1918_v39 = vmax.f32 %v1739_v7, 0.0  ;;  %928 = vrot.lane.b32.xlu1 %v12108_v5, %s11218_s7  ;;  %v1741_v0 = vpop.f32.mrb[7].mxu0  ;;  %9024 = vmatmul.mubr.msk.f32.gmra.mrb[32].mxu0 %vm15869_vm12, %v1525_v36  ;;  %v2163_v50 = vrot.slane %v12187_v55, 4  ;;  %vm15875_vm12 = vcmask 261120  }
 0x19d   : > { %v1919_v17 = vmax.f32 %v1741_v0, 0.0  ;;  %v814_v44 = vpop.permute.xlu0 %813  ;;  %1821 = vmatprep.mubr.f32.mxu0 %v15752_v46 }
 0x19e   : > { %v2481_v48 = vsel %vm12051_vm2, %v2162_v18, %v2480_v42  ;;  %v915_v6 = vpop.permute.xlu1 %914  ;;  %v12209_v32 = vld [vmem:[#allocation2 + $0x28] sm:$0x11]  ;;  %v1394_v31 = vsel %vm1376_vm6, %v1361_v61, %v814_v44  ;;  %v12302_v61 = vld [vmem:[%s11274_s28 + $0x170] sm:$0xff] }
 0x19f   : > { %2482 = vst [vmem:[#allocation2 + $0x30] sm:$0xff] %v2481_v48  ;;  %v9851_v22 = vpack.c.bf16 %v1919_v17, %v1918_v39  ;;  %452 = vrot.lane.b32.xlu0 %v12030_v19, %s11215_s30  ;;  %v2590_v37 = vsel %vm12051_vm2, %v2481_v48, %v2589_v43  ;;  %v4264_v19 = vrot.slane %v12209_v32, 5  ;;  %v1427_v39 = vsel %vm1409_vm7, %v1394_v31, %v915_v6 }
 0x1a0   : > { %1026 = vrot.lane.b32.xlu1 %v12191_v38, %s11219_s18  ;;  %2591 = vst [vmem:[#allocation2] sm:$0xff] %v2590_v37  ;;  %v2593_v37 = vld [vmem:[#allocation2 + $0x10] sm:$0x11] }
 0x1a1   : > { %v2165_v3 = vshrl.u32 %v9851_v22, 16  ;;  %v12226_v4 = vpop.permute.xlu0 %438  ;;  %v12242_v14 = vsel %vm12218_vm8, %v4263_v34, %v4264_v19  ;;  %v2168_v41 = vshll.u32 %v9851_v22, 16  ;;  %v3016_v22 = vshll.u32 %v12128_v51, 16 }
 0x1a2   : > { %v1013_v52 = vpop.permute.xlu1 %1012  ;;  %v395_v34 = vrot.slane %v263_v47, 1  ;;  %v16003_v1 = vcombine.low %v12238_v59, %v12242_v14 }
 0x1a3   : > { %v2167_v57 = vrot.slane %v2165_v3, 7  ;;  %629 = vrot.lane.b32.xlu0 %v12045_v53, %s11217_s6  ;;  %v1460_v20 = vsel %vm15873_vm0, %v1427_v39, %v1013_v52  ;;  %v572_v3 = vrot.slane %v263_v47, 2  ;;  %v12295_v52 = vld [vmem:[%s11274_s28 + $0x168] sm:$0xff]  ;;  %vm2979_vm0 = vsmask.f32 3328 }
 0x1a4   : > { %1128 = vrot.lane.b32.xlu1 %v12231_v8, %s11220_s21 }
 0x1a5   : > { %v2170_v53 = vor.u32 %v2168_v41, %v2167_v57  ;;  %v2172_v15 = vrot.slane %v2167_v57, 4  ;;  %v12261_v33 = vpop.permute.xlu0 %615 }
 0x1a6   : > { %v2610_v28 = vld [vmem:[#allocation2 + $0x30] sm:$0x22]  ;;  %v1115_v35 = vpop.permute.xlu1 %1114  ;;  %v2704_v18 = vld [vmem:[#allocation2 + $0x30] sm:$0x11] }
 0x1a7   : > { %v9074_v42 = vrot.slane %v2610_v28, 9  ;;  %v12265_v36 = vsel %vm12115_vm10, %v2163_v50, %v2170_v53  ;;  %v2485_v7 = vsel %vm12094_vm14, %v2172_v15, %v2484_v24  ;;  %727 = vrot.lane.b32.xlu0 %v12065_v63, %s11214_s29  ;;  %v2608_v55 = vld [vmem:[#allocation2] sm:$0x22]  ;;  %v2698_v17 = vld [vmem:[#allocation2] sm:$0x11]  ;;  %v1493_v44 = vsel %vm15874_vm11, %v1460_v20, %v1115_v35 }
 0x1a8   : > { %2483 = vst [vmem:[#allocation2 + $0x38] sm:$0xff] %v12265_v36  ;;  %2486 = vst [vmem:[#allocation2 + $0x40] sm:$0x11] %v2485_v7  ;;  %1229 = vrot.lane.b32.xlu1 %v12255_v30, %s11222_s24  ;;  %v9072_v0 = vrot.slane %v2608_v55, 9  ;;  %v12304_v24 = vrot.slane %v3016_v22, 5  ;;  %v12306_v50 = vrot.slane %v3020_v11, 4  ;;  %v12313_v28 = vsel %vm15872_vm15, %v393_v26, %v395_v34 }
 0x1a9   : > { %2592 = vst [vmem:[#allocation2 + $0x8] sm:$0xff] %v12265_v36  ;;  %v2705_v43 = vsel %vm12094_vm14, %v9074_v42, %v2704_v18  ;;  %v714_v63 = vpop.permute.xlu0 %713  ;;  %v3007_v35 = vshrl.u32 %v12140_v58, 16  ;;  %v11158_v7 = vld [vmem:[%s11274_s28 + $0xd8] sm:$0xff]  ;;  %vm15877_vm11 = vcmask 195584   ;;  %v4201_v21 = vld [vmem:[#allocation2] sm:$0xee] }
 0x1aa   : > { %2706 = vst [vmem:[#allocation2 + $0x30] sm:$0x11] %v2705_v43  ;;  %v1216_v45 = vpop.permute.xlu1 %1215  ;;  %v2699_v48 = vsel %vm12094_vm14, %v9072_v0, %v2698_v17  ;;  %v1296_v55 = vsel %vm1277_vm3, %v11158_v7, %v12226_v4  ;;  %v12324_v0 = vsel %vm498_vm1, %v570_v13, %v572_v3  ;;  %v397_v4 = vrot.slane %v12295_v52, 1  ;;  %v2487_v7 = vld [vmem:[#allocation2 + $0x48] sm:$0xff] }
 0x1ab   : > { %v1526_v6 = vsel %vm15875_vm12, %v1493_v44, %v1216_v45  ;;  %829 = vrot.lane.b32.xlu0 %v12159_v49, %s11216_s5  ;;  %2700 = vst [vmem:[#allocation2] sm:$0x11] %v2699_v48  ;;  %v1329_v20 = vsel %vm1310_vm4, %v1296_v55, %v12261_v33  ;;  %v398_v17 = vrot.slane %v12302_v61, 1  ;;  %v3010_v44 = vshll.u32 %v12140_v58, 16 }
 0x1ac   : > { %930 = vrot.lane.b32.xlu1 %v12177_v23, %s11218_s7  ;;  %9025 = vmatmul.mubr.msk.f32.gmra.mrb[34].mxu0 %vm15876_vm13, %v1526_v6  ;;  %v1362_v13 = vsel %vm1343_vm5, %v1329_v20, %v714_v63  ;;  %v12347_v22 = vrot.slane %v3007_v35, 4  ;;  %v3023_v63 = vor.u32 %v12306_v50, %v12304_v24  ;;  %v3026_v20 = vshll.u32 %v12209_v32, 16 }
 0x1ad   : > { %v816_v62 = vpop.permute.xlu0 %815  ;;  %1827 = vmatprep.mubr.f32.mxu0 %v15752_v46  ;;  %v3012_v50 = vrot.slane %v3010_v44, 5  ;;  %vm15878_vm12 = vcmask 228352   ;;  %vm15879_vm13 = vcmask 261120   ;;  %vm15880_vm15 = vcmask 293888  }
 0x1ae   : > { %v917_v19 = vpop.permute.xlu1 %916 }
 0x1af   : > { %v2588_v10 = vld [vmem:[#allocation2 + $0x40] sm:$0x11]  ;;  %v2754_v12 = vld [vmem:[#allocation2 + $0x38] sm:$0x88]  ;;  %454 = vrot.lane.b32.xlu0 %v12088_v2, %s11215_s30  ;;  %v1745_v41 = vpop.f32.mrb[8].mxu0 }
 0x1b0   : > { %v2594_v27 = vsel %vm12094_vm14, %v2588_v10, %v2593_v37  ;;  %v9092_v57 = vrot.slane %v2754_v12, 11  ;;  %1028 = vrot.lane.b32.xlu1 %v12194_v9, %s11219_s18  ;;  %v2851_v53 = vld [vmem:[#allocation2 + $0x40] sm:$0x11]  ;;  %v1920_v2 = vmax.f32 %v1745_v41, 0.0  ;;  %v1747_v15 = vpop.f32.mrb[9].mxu0  ;;  %v2996_v41 = vshrl.u32 %v12265_v36, 16 }
 0x1b1   : > { %2595 = vst [vmem:[#allocation2 + $0x10] sm:$0x11] %v2594_v27  ;;  %v12308_v31 = vpop.permute.xlu0 %440  ;;  %v1921_v18 = vmax.f32 %v1747_v15, 0.0  ;;  %v12328_v26 = vld [vmem:[#allocation2 + $0x30] sm:$0xff]  ;;  %v2752_v45 = vld [vmem:[#allocation2 + $0x8] sm:$0x88] }
 0x1b2   : > { %v2852_v42 = vsel %vm12163_vm9, %v9092_v57, %v2851_v53  ;;  %v1015_v39 = vpop.permute.xlu1 %1014  ;;  %v12326_v43 = vld [vmem:[#allocation2] sm:$0xff]  ;;  %v4203_v12 = vld [vmem:[#allocation2 + $0x30] sm:$0xee]  ;;  %v9090_v27 = vrot.slane %v2752_v45, 11  ;;  %v2992_v57 = vshll.u32 %v12265_v36, 16 }
 0x1b3   : > { %2853 = vst [vmem:[#allocation2 + $0x40] sm:$0x11] %v2852_v42  ;;  %631 = vrot.lane.b32.xlu0 %v12108_v5, %s11217_s6  ;;  %v9852_v47 = vpack.c.bf16 %v1921_v18, %v1920_v2  ;;  %v1395_v5 = vsel %vm1376_vm6, %v1362_v13, %v816_v62  ;;  %v2983_v3 = vshrl.u32 %v12326_v43, 16  ;;  %v2986_v10 = vshll.u32 %v12326_v43, 16 }
 0x1b4   : > { %1130 = vrot.lane.b32.xlu1 %v12313_v28, %s11220_s21  ;;  %v1428_v2 = vsel %vm1409_vm7, %v1395_v5, %v917_v19  ;;  %v12367_v42 = vrot.slane %v12265_v36, 5  ;;  %v9238_v19 = vrot.slane %v4203_v12, 9  ;;  %v12383_v32 = vrot.slane %v2992_v57, 5 }
 0x1b5   : > { %v12345_v6 = vpop.permute.xlu0 %617  ;;  %v2174_v37 = vshrl.u32 %v9852_v47, 16  ;;  %v2177_v35 = vshll.u32 %v9852_v47, 16  ;;  %v1461_v55 = vsel %vm15877_vm11, %v1428_v2, %v1015_v39  ;;  %v2985_v47 = vrot.slane %v2983_v3, 4 }
 0x1b6   : > { %v1117_v34 = vpop.permute.xlu1 %1116  ;;  %v2988_v5 = vrot.slane %v2986_v10, 5  ;;  %v574_v39 = vrot.slane %v12295_v52, 2  ;;  %v2998_v12 = vrot.slane %v2996_v41, 4  ;;  %v4256_v3 = vrot.slane %v12367_v42, 4 }
 0x1b7   : > { %729 = vrot.lane.b32.xlu0 %v12191_v38, %s11214_s29  ;;  %v12362_v15 = vrot.slane %v2174_v37, 7  ;;  %v1494_v45 = vsel %vm15878_vm12, %v1461_v55, %v1117_v34  ;;  %v575_v34 = vrot.slane %v12302_v61, 2  ;;  %vm2980_vm11 = vsmask.f32 7440 }
 0x1b8   : > { %v2845_v53 = vld [vmem:[#allocation2 + $0x10] sm:$0x11]  ;;  %1231 = vrot.lane.b32.xlu1 %v12324_v0, %s11222_s24  ;;  %v3013_v57 = vor.u32 %v3012_v50, %v12347_v22  ;;  %v3028_v41 = vrot.slane %v3026_v20, 5  ;;  %v3024_v55 = vrot.slane %v3023_v63, 4  ;;  %v2999_v22 = vor.u32 %v2998_v12, %v12383_v32  ;;  %v11159_v50 = vld [vmem:[%s11274_s28 + $0xe0] sm:$0xff] }
 0x1b9   : > { %v2846_v38 = vsel %vm12163_vm9, %v9090_v27, %v2845_v53  ;;  %v12372_v18 = vpop.permute.xlu0 %715  ;;  %v2179_v44 = vor.u32 %v2177_v35, %v12362_v15  ;;  %v9236_v35 = vrot.slane %v4201_v21, 9  ;;  %v3031_v21 = vshrl.u32 %v12328_v26, 16 }
 0x1ba   : > { %2847 = vst [vmem:[#allocation2 + $0x10] sm:$0x11] %v2846_v38  ;;  %v1218_v13 = vpop.permute.xlu1 %1217  ;;  %v12377_v37 = vld [vmem:[#allocation2 + $0x40] sm:$0x11]  ;;  %vm15881_vm12 = vcmask 1046528   ;;  %v1297_v63 = vsel %vm1277_vm3, %v11159_v50, %v12308_v31 }
 0x1bb   : > { %v1527_v27 = vsel %vm15879_vm13, %v1494_v45, %v1218_v13  ;;  %831 = vrot.lane.b32.xlu0 %v12231_v8, %s11216_s5  ;;  %v2488_v53 = vsel %vm12051_vm2, %v2179_v44, %v2487_v7  ;;  %v4271_v10 = vrot.slane %v12377_v37, 5  ;;  %v2989_v7 = vor.u32 %v2988_v5, %v2985_v47  ;;  %vm12428_vm13 = vmor %vm2979_vm0, %vm2980_vm11 }
 0x1bc   : > { %932 = vrot.lane.b32.xlu1 %v12255_v30, %s11218_s7  ;;  %9026 = vmatmul.mubr.msk.f32.gmra.mrb[36].mxu0 %vm15880_vm15, %v1527_v27  ;;  %2489 = vst [vmem:[#allocation2 + $0x48] sm:$0xff] %v2488_v53  ;;  %v12398_v44 = vsel %vm12218_vm8, %v9238_v19, %v12367_v42  ;;  %v12424_v47 = vsel %vm498_vm1, %v574_v39, %v575_v34  ;;  %v3034_v27 = vshll.u32 %v12328_v26, 16  ;;  %vm15884_vm0 = vcmask 195584  }
 0x1bd   : > { %v818_v2 = vpop.permute.xlu0 %817  ;;  %1833 = vmatprep.mubr.f32.mxu0 %v15752_v46  ;;  %v12402_v45 = vsel %vm12218_vm8, %v4256_v3, %v4271_v10  ;;  %v12442_v39 = vsel %vm12218_vm8, %v9236_v35, %v12367_v42  ;;  %v2990_v62 = vrot.slane %v2989_v7, 4  ;;  %vm15885_vm15 = vcmask 228352  }
 0x1be   : > { %v919_v38 = vpop.permute.xlu1 %918  ;;  %v3036_v35 = vrot.slane %v3034_v27, 5  ;;  %vm15886_vm11 = vcmask 261120  }
 0x1bf   : > { %v1751_v13 = vpop.f32.mrb[10].mxu0  ;;  %456 = vrot.lane.b32.xlu0 %v12159_v49, %s11215_s30  ;;  %v12419_v49 = vsel %vm15881_vm12, %v397_v4, %v398_v17  ;;  %v12437_v4 = vsel %vm12428_vm13, %v3024_v55, %v3028_v41  ;;  %v3000_v41 = vrot.slane %v2999_v22, 4  ;;  %v3033_v55 = vrot.slane %v3031_v21, 4 }
 0x1c0   : > { %v1922_v20 = vmax.f32 %v1751_v13, 0.0  ;;  %1030 = vrot.lane.b32.xlu1 %v12295_v52, %s11219_s18  ;;  %v1753_v19 = vpop.f32.mrb[11].mxu0  ;;  %v3014_v13 = vrot.slane %v3013_v57, 4  ;;  %v1330_v57 = vsel %vm1310_vm4, %v1297_v63, %v12345_v6  ;;  %vm15887_vm12 = vcmask 293888  }
 0x1c1   : > { %v1923_v12 = vmax.f32 %v1753_v19, 0.0  ;;  %v12433_v53 = vpop.permute.xlu0 %442  ;;  %v2963_v10 = vld [vmem:[#allocation2 + $0x10] sm:$0x11]  ;;  %v1363_v42 = vsel %vm1343_vm5, %v1330_v57, %v12372_v18 }
 0x1c2   : > { %v1017_v54 = vpop.permute.xlu1 %1016  ;;  %v3002_v19 = vshll.u32 %v2963_v10, 16  ;;  %v4257_v11 = vrot.slane %v2963_v10, 5  ;;  %v1396_v63 = vsel %vm1376_vm6, %v1363_v42, %v818_v2  ;;  %v3019_v57 = vsel %vm12428_vm13, %v3014_v13, %v12304_v24 }
 0x1c3   : > { %v9853_v60 = vpack.c.bf16 %v1923_v12, %v1922_v20  ;;  %633 = vrot.lane.b32.xlu0 %v12177_v23, %s11217_s6  ;;  %v2611_v16 = vld [vmem:[#allocation2 + $0x48] sm:$0x22]  ;;  %v2707_v21 = vld [vmem:[#allocation2 + $0x48] sm:$0x11]  ;;  %v2995_v20 = vsel %vm12428_vm13, %v2990_v62, %v12383_v32  ;;  %v1429_v62 = vsel %vm1409_vm7, %v1396_v63, %v919_v38  ;;  %v3037_v42 = vor.u32 %v3036_v35, %v3033_v55 }
 0x1c4   : > { %1132 = vrot.lane.b32.xlu1 %v12419_v49, %s11220_s21  ;;  %v3004_v31 = vrot.slane %v3002_v19, 5  ;;  %v12457_v7 = vsel %vm12218_vm8, %v4256_v3, %v4257_v11  ;;  %v9075_v6 = vrot.slane %v2611_v16, 9  ;;  %v3050_v11 = vshll.u32 %v12377_v37, 16  ;;  %v2491_v19 = vld [vmem:[#allocation2 + $0x58] sm:$0x11] }
 0x1c5   : > { %v2182_v50 = vshrl.u32 %v9853_v60, 16  ;;  %v12460_v23 = vpop.permute.xlu0 %619  ;;  %v2185_v12 = vshll.u32 %v9853_v60, 16  ;;  %v3038_v35 = vrot.slane %v3037_v42, 4 }
 0x1c6   : > { %v1119_v18 = vpop.permute.xlu1 %1118  ;;  %v3005_v27 = vsel %vm12428_vm13, %v3000_v41, %v3004_v31  ;;  %v2708_v3 = vsel %vm12094_vm14, %v9075_v6, %v2707_v21  ;;  %v2180_v31 = vrot.slane %v12362_v15, 4  ;;  %v266_v21 = vld [vmem:[%s11274_s28 + $0x178] sm:$0x3] }
 0x1c7   : > { %v2184_v2 = vrot.slane %v2182_v50, 7  ;;  %731 = vrot.lane.b32.xlu0 %v12194_v9, %s11214_s29  ;;  %v9140_v10 = vcombine.low %v2995_v20, %v3005_v27  ;;  %2709 = vst [vmem:[#allocation2 + $0x48] sm:$0x11] %v2708_v3  ;;  %v9141_v37 = vcombine.high %v2995_v20, %v3005_v27  ;;  %v1462_v9 = vsel %vm15884_vm0, %v1429_v62, %v1017_v54 }
 0x1c8   : > { %1233 = vrot.lane.b32.xlu1 %v12424_v47, %s11222_s24  ;;  %v1495_v38 = vsel %vm15885_vm15, %v1462_v9, %v1119_v18  ;;  %v9143_v3 = vcombine.high %v3019_v57, %v12437_v4  ;;  %v3052_v54 = vrot.slane %v3050_v11, 5  ;;  %v400_v13 = vrot.slane %v266_v21, 1 }
 0x1c9   : > { %v2187_v60 = vor.u32 %v2185_v12, %v2184_v2  ;;  %v2189_v6 = vrot.slane %v2184_v2, 4  ;;  %v718_v50 = vpop.permute.xlu0 %717  ;;  %3655 = vmatprep.mubr.bf16.mxu1 %v9141_v37  ;;  %v9142_v62 = vcombine.low %v3019_v57, %v12437_v4  ;;  %vm15888_vm0 = vcmask 1046528   ;;  %v11160_v4 = vld [vmem:[%s11274_s28 + $0xf0] sm:$0xff] }
 0x1ca   : > { %v1220_v63 = vpop.permute.xlu1 %1219  ;;  %3656 = vmatmul.mubr.bf16.vlgmr.msra.gmra.mrb[0].mxu1 %v9140_v10  ;;  %v3053_v11 = vsel %vm12428_vm13, %v3000_v41, %v3052_v54  ;;  %v577_v37 = vrot.slane %v266_v21, 2  ;;  %v3043_v41 = vsel %vm12428_vm13, %v3038_v35, %v12383_v32  ;;  %v1298_v57 = vsel %vm1277_vm3, %v11160_v4, %v12433_v53  ;;  %v2494_v4 = vld [vmem:[#allocation2 + $0x60] sm:$0xff] }
 0x1cb   : > { %v12489_v20 = vsel %vm12115_vm10, %v2180_v31, %v2187_v60  ;;  %v2492_v24 = vsel %vm12094_vm14, %v2189_v6, %v2491_v19  ;;  %v1528_v15 = vsel %vm15886_vm11, %v1495_v38, %v1220_v63  ;;  %833 = vrot.lane.b32.xlu0 %v12313_v28, %s11216_s5  ;;  %3663 = vmatprep.mubr.bf16.mxu1 %v9143_v3  ;;  %vm15889_vm15 = vcmask 195584  }
 0x1cc   : > { %2490 = vst [vmem:[#allocation2 + $0x50] sm:$0xff] %v12489_v20  ;;  %2493 = vst [vmem:[#allocation2 + $0x58] sm:$0x11] %v2492_v24  ;;  %934 = vrot.lane.b32.xlu1 %v12324_v0, %s11218_s7  ;;  %9027 = vmatmul.mubr.msk.f32.gmra.mrb[38].mxu0 %vm15887_vm12, %v1528_v15  ;;  %v12513_v19 = vsel %vm15888_vm0, %v398_v17, %v400_v13  ;;  %v9145_v6 = vcombine.high %v3043_v41, %v3053_v11  ;;  %v3064_v13 = vshll.u32 %v12489_v20, 16  ;;  %vm15890_vm11 = vcmask 228352  }
 0x1cd   : > { %v820_v55 = vpop.permute.xlu0 %819  ;;  %1839 = vmatprep.mubr.f32.mxu0 %v15752_v46  ;;  %v1331_v21 = vsel %vm1310_vm4, %v1298_v57, %v12460_v23  ;;  %v12539_v53 = vsel %vm498_vm1, %v575_v34, %v577_v37  ;;  %v12553_v34 = vld [vmem:[%s11274_s28 + $0x180] sm:$0xff]  ;;  %v9144_v57 = vcombine.low %v3043_v41, %v3053_v11  ;;  %vm15891_vm12 = vcmask 261120   ;;  %v4204_v41 = vld [vmem:[#allocation2 + $0x48] sm:$0xee] }
 0x1ce   : > { %v921_v18 = vpop.permute.xlu1 %920  ;;  %v12505_v2 = vld [vmem:[#allocation2 + $0x48] sm:$0xff]  ;;  %v1364_v24 = vsel %vm1343_vm5, %v1331_v21, %v718_v50  ;;  %v3068_v50 = vshrl.u32 %v12489_v20, 16  ;;  %vm15892_vm0 = vcmask 293888  }
 0x1cf   : > { %v1757_v27 = vpop.f32.mrb[12].mxu0  ;;  %458 = vrot.lane.b32.xlu0 %v12231_v8, %s11215_s30  ;;  %v3055_v32 = vshrl.u32 %v12505_v2, 16  ;;  %v3058_v63 = vshll.u32 %v12505_v2, 16 }
 0x1d0   : > { %v1924_v12 = vmax.f32 %v1757_v27, 0.0  ;;  %1032 = vrot.lane.b32.xlu1 %v12302_v61, %s11219_s18  ;;  %v1759_v10 = vpop.f32.mrb[13].mxu0 }
 0x1d1   : > { %v1925_v42 = vmax.f32 %v1759_v10, 0.0  ;;  %v12515_v8 = vpop.permute.xlu0 %444  ;;  %v3060_v37 = vrot.slane %v3058_v63, 5 }
 0x1d2   : > { %v1019_v17 = vpop.permute.xlu1 %1018  ;;  %3664 = vmatmul.mubr.bf16.gmra.mrb[4].mxu1 %v9142_v62  ;;  %v3057_v62 = vrot.slane %v3055_v32, 4  ;;  %v774_v32 = vrot.slane %v12553_v34, 1 }
 0x1d3   : > { %v2755_v9 = vld [vmem:[#allocation2 + $0x50] sm:$0x88]  ;;  %v9854_v38 = vpack.c.bf16 %v1925_v42, %v1924_v12  ;;  %635 = vrot.lane.b32.xlu0 %v12255_v30, %s11217_s6  ;;  %3671 = vmatprep.mubr.bf16.mxu1 %v9145_v6  ;;  %v2854_v23 = vld [vmem:[#allocation2 + $0x58] sm:$0x11]  ;;  %v1397_v30 = vsel %vm1376_vm6, %v1364_v24, %v820_v55  ;;  %v12556_v55 = vld [vmem:[%s11274_s28 + $0x188] sm:$0xff] }
 0x1d4   : > { %v9093_v3 = vrot.slane %v2755_v9, 11  ;;  %1134 = vrot.lane.b32.xlu1 %v12513_v19, %s11220_s21  ;;  %v1430_v42 = vsel %vm1409_vm7, %v1397_v30, %v921_v18  ;;  %v775_v63 = vrot.slane %v12556_v55, 1  ;;  %v3061_v11 = vor.u32 %v3060_v37, %v3057_v62 }
 0x1d5   : > { %v2191_v15 = vshrl.u32 %v9854_v38, 16  ;;  %v12542_v54 = vpop.permute.xlu0 %621  ;;  %v2194_v10 = vshll.u32 %v9854_v38, 16  ;;  %v1463_v9 = vsel %vm15889_vm15, %v1430_v42, %v1019_v17  ;;  %v3066_v38 = vrot.slane %v3064_v13, 5 }
 0x1d6   : > { %v2855_v35 = vsel %vm12163_vm9, %v9093_v3, %v2854_v23  ;;  %v1121_v27 = vpop.permute.xlu1 %1120  ;;  %v4275_v17 = vrot.slane %v12489_v20, 5  ;;  %vm15893_vm15 = vcmask 1046528   ;;  %v3062_v62 = vrot.slane %v3061_v11, 4  ;;  %v11161_v11 = vld [vmem:[%s11274_s28 + $0xf8] sm:$0xff] }
 0x1d7   : > { %2856 = vst [vmem:[#allocation2 + $0x58] sm:$0x11] %v2855_v35  ;;  %v12548_v12 = vrot.slane %v2191_v15, 7  ;;  %733 = vrot.lane.b32.xlu0 %v12295_v52, %s11214_s29  ;;  %v3070_v52 = vrot.slane %v3068_v50, 4  ;;  %v1496_v3 = vsel %vm15890_vm11, %v1463_v9, %v1121_v27  ;;  %v12579_v50 = vsel %vm15893_vm15, %v774_v32, %v775_v63 }
 0x1d8   : > { %1235 = vrot.lane.b32.xlu1 %v12539_v53, %s11222_s24  ;;  %v9239_v27 = vrot.slane %v4204_v41, 9  ;;  %v4277_v42 = vrot.slane %v4275_v17, 4  ;;  %v1299_v41 = vsel %vm1277_vm3, %v11161_v11, %v12515_v8  ;;  %vm15894_vm11 = vcmask 195584  }
 0x1d9   : > { %v2196_v6 = vor.u32 %v2194_v10, %v12548_v12  ;;  %v720_v21 = vpop.permute.xlu0 %719  ;;  %v3071_v15 = vor.u32 %v3070_v52, %v3066_v38  ;;  %v876_v52 = vrot.slane %v12556_v55, 2  ;;  %vm15897_vm15 = vcmask 293888  }
 0x1da   : > { %v1222_v24 = vpop.permute.xlu1 %1221  ;;  %3672 = vmatmul.mubr.bf16.gmra.mrb[8].mxu1 %v9144_v57 }
 0x1db   : > { %v2495_v18 = vsel %vm12051_vm2, %v2196_v6, %v2494_v4  ;;  %v1529_v23 = vsel %vm15891_vm12, %v1496_v3, %v1222_v24  ;;  %835 = vrot.lane.b32.xlu0 %v12419_v49, %s11216_s5  ;;  %v875_v6 = vrot.slane %v12553_v34, 2  ;;  %v12589_v3 = vsel %vm12218_vm8, %v9239_v27, %v4275_v17 }
 0x1dc   : > { %2496 = vst [vmem:[#allocation2 + $0x60] sm:$0xff] %v2495_v18  ;;  %936 = vrot.lane.b32.xlu1 %v12424_v47, %s11218_s7  ;;  %9028 = vmatmul.mubr.msk.f32.gmra.mrb[40].mxu0 %vm15892_vm0, %v1529_v23  ;;  %v3072_v32 = vrot.slane %v3071_v15, 4  ;;  %v1332_v15 = vsel %vm1310_vm4, %v1299_v41, %v12542_v54  ;;  %v2498_v41 = vld [vmem:[#allocation2 + $0x70] sm:$0x11]  ;;  %vm15895_vm12 = vcmask 228352   ;;  %vm15896_vm0 = vcmask 261120  }
 0x1dd   : > { %v822_v30 = vpop.permute.xlu0 %821  ;;  %1845 = vmatprep.mubr.f32.mxu0 %v15752_v46 }
 0x1de   : > { %v923_v13 = vpop.permute.xlu1 %922  ;;  %v2966_v35 = vld [vmem:[#allocation2 + $0x58] sm:$0x11] }
 0x1df   : > { %v1763_v10 = vpop.f32.mrb[14].mxu0  ;;  %460 = vrot.lane.b32.xlu0 %v12313_v28, %s11215_s30  ;;  %v3074_v37 = vshll.u32 %v2966_v35, 16  ;;  %v4278_v4 = vrot.slane %v2966_v35, 5 }
 0x1e0   : > { %v1926_v57 = vmax.f32 %v1763_v10, 0.0  ;;  %1034 = vrot.lane.b32.xlu1 %v12553_v34, %s11219_s18  ;;  %v1765_v9 = vpop.f32.mrb[15].mxu0 }
 0x1e1   : > { %v1927_v24 = vmax.f32 %v1765_v9, 0.0  ;;  %v12591_v28 = vpop.permute.xlu0 %446  ;;  %v3076_v18 = vrot.slane %v3074_v37, 5  ;;  %v12595_v23 = vsel %vm12218_vm8, %v4277_v42, %v4278_v4  ;;  %v3067_v42 = vsel %vm12428_vm13, %v3062_v62, %v3066_v38  ;;  %v269_v38 = vld [vmem:[%s11274_s28 + $0x190] sm:$0x3] }
 0x1e2   : > { %v1021_v35 = vpop.permute.xlu1 %1020  ;;  %v1365_v9 = vsel %vm1343_vm5, %v1332_v15, %v720_v21 }
 0x1e3   : > { %v2612_v27 = vld [vmem:[#allocation2 + $0x60] sm:$0x22]  ;;  %v9855_v37 = vpack.c.bf16 %v1927_v24, %v1926_v57  ;;  %637 = vrot.lane.b32.xlu0 %v12324_v0, %s11217_s6  ;;  %v3077_v8 = vsel %vm12428_vm13, %v3072_v32, %v3076_v18  ;;  %v2710_v10 = vld [vmem:[#allocation2 + $0x60] sm:$0x11]  ;;  %v1398_v54 = vsel %vm1376_vm6, %v1365_v9, %v822_v30  ;;  %v12619_v0 = vsel %vm498_vm1, %v875_v6, %v876_v52 }
 0x1e4   : > { %v9076_v4 = vrot.slane %v2612_v27, 9  ;;  %1136 = vrot.lane.b32.xlu1 %v12579_v50, %s11220_s21  ;;  %v9147_v11 = vcombine.high %v3067_v42, %v3077_v8  ;;  %v9146_v17 = vcombine.low %v3067_v42, %v3077_v8  ;;  %v1431_v30 = vsel %vm1409_vm7, %v1398_v54, %v923_v13  ;;  %v10946_v9 = vld [vmem:[%s15742_s2 + $0x40] sm:$0xff]  }
 0x1e5   : > { %v2199_v57 = vshrl.u32 %v9855_v37, 16  ;;  %v12616_v24 = vpop.permute.xlu0 %623  ;;  %v2202_v18 = vshll.u32 %v9855_v37, 16  ;;  %v878_v6 = vrot.slane %v269_v38, 2  ;;  %v2197_v27 = vrot.slane %v12548_v12, 4  ;;  %v12641_v12 = vld [vmem:[#allocation2 + $0x38] sm:$0xff]  ;;  %9992 = vmatprep.subr.bf16.mxu0 %v10946_v9 }
 0x1e6   : > { %v2711_v62 = vsel %vm12094_vm14, %v9076_v4, %v2710_v10  ;;  %v1123_v32 = vpop.permute.xlu1 %1122  ;;  %3679 = vmatprep.mubr.bf16.mxu1 %v9147_v11  ;;  %v1464_v42 = vsel %vm15894_vm11, %v1431_v30, %v1021_v35  ;;  %v777_v35 = vrot.slane %v269_v38, 1  ;;  %v8298_v38 = vrot.slane %v12641_v12, 5 }
 0x1e7   : > { %2712 = vst [vmem:[#allocation2 + $0x60] sm:$0x11] %v2711_v62  ;;  %v2201_v21 = vrot.slane %v2199_v57, 7  ;;  %3680 = vmatmul.mubr.bf16.gmra.mrb[12].mxu1 %v9146_v17  ;;  %735 = vrot.lane.b32.xlu0 %v12302_v61, %s11214_s29  ;;  %v1497_v37 = vsel %vm15895_vm12, %v1464_v42, %v1123_v32  ;;  %v12651_v54 = vsel %vm498_vm1, %v876_v52, %v878_v6  ;;  %v10947_v57 = vld [vmem:[%s15742_s2] sm:$0xff]   ;;  %vm15898_vm11 = vcmask 1046528  }
 0x1e8   : > { %1237 = vrot.lane.b32.xlu1 %v12619_v0, %s11222_s24  ;;  %v7352_v62 = vld [vmem:[#allocation2 + $0x40] sm:$0x11]  ;;  %9993 = vmatpush3.bf16.msra.mxu0 %v10947_v57  ;;  %v12667_v6 = vsel %vm15898_vm11, %v775_v63, %v777_v35  ;;  %v11162_v63 = vld [vmem:[%s11274_s28 + $0x108] sm:$0xff]  ;;  %v8300_v35 = vrot.slane %v8298_v38, 4  ;;  %v8232_v52 = vld [vmem:[#allocation2 + $0x30] sm:$0xee] }
 0x1e9   : > { %v2204_v15 = vor.u32 %v2202_v18, %v2201_v21  ;;  %v2206_v10 = vrot.slane %v2201_v21, 4  ;;  %v722_v8 = vpop.permute.xlu0 %721  ;;  %vm15900_vm12 = vcmask 195584   ;;  %vm15903_vm11 = vcmask 293888  }
 0x1ea   : > { %v1224_v17 = vpop.permute.xlu1 %1223 }
 0x1eb   : > { %v12634_v61 = vsel %vm12115_vm10, %v2197_v27, %v2204_v15  ;;  %v2499_v13 = vsel %vm12094_vm14, %v2206_v10, %v2498_v41  ;;  %v1530_v4 = vsel %vm15896_vm0, %v1497_v37, %v1224_v17  ;;  %837 = vrot.lane.b32.xlu0 %v12513_v19, %s11216_s5  ;;  %v10948_v27 = vld [vmem:[%s15742_s2 + $0x48] sm:$0xff]   ;;  %v8301_v10 = vrot.slane %v7352_v62, 5 }
 0x1ec   : > { %2497 = vst [vmem:[#allocation2 + $0x68] sm:$0xff] %v12634_v61  ;;  %2500 = vst [vmem:[#allocation2 + $0x70] sm:$0x11] %v2499_v13  ;;  %9029 = vmatmul.mubr.msk.f32.gmra.mrb[42].mxu0 %vm15897_vm15, %v1530_v4  ;;  %1036 = vrot.lane.b32.xlu1 %v12556_v55, %s11219_s18  ;;  %v10949_v17 = vld [vmem:[%s15742_s2 + $0x8] sm:$0xff]   ;;  %v1300_v13 = vsel %vm1277_vm3, %v11162_v63, %v12591_v28  ;;  %vm15901_vm0 = vcmask 228352   ;;  %vm15902_vm15 = vcmask 261120  }
 0x1ed   : > { %v824_v11 = vpop.permute.xlu0 %823  ;;  %1851 = vmatprep.mubr.f32.mxu0 %v15752_v46  ;;  %9994 = vmatprep.subr.bf16.mxu0 %v10948_v27  ;;  %v1333_v57 = vsel %vm1310_vm4, %v1300_v13, %v12616_v24  ;;  %v10950_v24 = vld [vmem:[%s15742_s2 + $0x50] sm:$0xff]  }
 0x1ee   : > { %v925_v32 = vpop.permute.xlu1 %924  ;;  %v12657_v21 = vld [vmem:[#allocation2 + $0x60] sm:$0xff]  ;;  %9995 = vmatpush3.bf16.msra.mxu0 %v10949_v17  ;;  %v1366_v27 = vsel %vm1343_vm5, %v1333_v57, %v722_v8  ;;  %v3092_v8 = vshrl.u32 %v12634_v61, 16 }
 0x1ef   : > { %v1769_v18 = vpop.f32.mrb[16].mxu0  ;;  %938 = vrot.lane.b32.xlu0 %v12539_v53, %s11218_s7  ;;  %v1399_v63 = vsel %vm1376_vm6, %v1366_v27, %v824_v11  ;;  %9996 = vmatprep.subr.bf16.mxu0 %v10950_v24  ;;  %v10952_v24 = vld [vmem:[%s15742_s2 + $0x58] sm:$0xff]  }
 0x1f0   : > { %v1928_v30 = vmax.f32 %v1769_v18, 0.0  ;;  %v1771_v41 = vpop.f32.mrb[17].mxu0  ;;  %1239 = vrot.lane.b32.xlu1 %v12651_v54, %s11222_s24  ;;  %v3079_v18 = vshrl.u32 %v12657_v21, 16  ;;  %v1432_v60 = vsel %vm1409_vm7, %v1399_v63, %v925_v32  ;;  %v10953_v32 = vld [vmem:[%s15742_s2 + $0x18] sm:$0xff]  }
 0x1f1   : > { %v1929_v42 = vmax.f32 %v1771_v41, 0.0  ;;  %v12676_v37 = vpop.permute.xlu0 %448  ;;  %v3082_v41 = vshll.u32 %v12657_v21, 16 }
 0x1f2   : > { %v1023_v4 = vpop.permute.xlu1 %1022  ;;  %v3081_v16 = vrot.slane %v3079_v18, 4  ;;  %v3094_v18 = vrot.slane %v3092_v8, 4  ;;  %v4205_v8 = vld [vmem:[#allocation2 + $0x60] sm:$0xee] }
 0x1f3   : > { %v2756_v9 = vld [vmem:[#allocation2 + $0x68] sm:$0x88]  ;;  %v9856_v62 = vpack.c.bf16 %v1929_v42, %v1928_v30  ;;  %1138 = vrot.lane.b32.xlu0 %v12667_v6, %s11220_s21  ;;  %v12700_v30 = vsel %vm12218_vm8, %v8300_v35, %v8301_v10  ;;  %v2857_v42 = vld [vmem:[#allocation2 + $0x70] sm:$0x11]  ;;  %v12713_v10 = vld [vmem:[%s11274_s28 + $0x198] sm:$0xff]  ;;  %v3084_v15 = vrot.slane %v3082_v41, 5 }
 0x1f4   : > { %v9094_v28 = vrot.slane %v2756_v9, 11  ;;  %639 = vrot.lane.b32.xlu1 %v12424_v47, %s11217_s6  ;;  %15899 = vst [vmem:[#allocation3_spill] sm:$0xff] %v12700_v30  ;;  %v3088_v9 = vshll.u32 %v12634_v61, 16  ;;  %v10951_v47 = vld [vmem:[%s15742_s2 + $0x10] sm:$0xff]   ;;  %v12716_v35 = vld [vmem:[%s11274_s28 + $0x1a0] sm:$0xff]  ;;  %v1075_v63 = vrot.slane %v12713_v10, 1 }
 0x1f5   : > { %v2208_v13 = vshrl.u32 %v9856_v62, 16  ;;  %v12703_v17 = vpop.permute.xlu0 %625  ;;  %v2211_v27 = vshll.u32 %v9856_v62, 16  ;;  %9997 = vmatpush3.bf16.msra.mxu0 %v10951_v47  ;;  %v1465_v62 = vsel %vm15900_vm12, %v1432_v60, %v1023_v4  ;;  %v1076_v47 = vrot.slane %v12716_v35, 1 }
 0x1f6   : > { %v2858_v57 = vsel %vm12163_vm9, %v9094_v28, %v2857_v42  ;;  %v1125_v22 = vpop.permute.xlu1 %1124  ;;  %v2501_v28 = vld [vmem:[#allocation2 + $0x78] sm:$0xff]  ;;  %9998 = vmatprep.subr.bf16.mxu0 %v10952_v24  ;;  %vm15905_vm12 = vcmask 1046528  }
 0x1f7   : > { %2859 = vst [vmem:[#allocation2 + $0x70] sm:$0x11] %v2858_v57  ;;  %v12718_v11 = vrot.slane %v2208_v13, 7  ;;  %462 = vrot.lane.b32.xlu0 %v12419_v49, %s11215_s30  ;;  %v12732_v49 = vrot.slane %v3088_v9, 5  ;;  %v1498_v41 = vsel %vm15901_vm0, %v1465_v62, %v1125_v22  ;;  %v9748_v57 = vrot.slane %v8232_v52, 9  ;;  %v10954_v52 = vld [vmem:[%s15742_s2 + $0x60] sm:$0xff]  }
 0x1f8   : > { %839 = vrot.lane.b32.xlu1 %v12579_v50, %s11216_s5  ;;  %v3085_v9 = vor.u32 %v3084_v15, %v3081_v16  ;;  %v4282_v22 = vrot.slane %v12634_v61, 5  ;;  %v9240_v62 = vrot.slane %v4205_v8, 9  ;;  %v12788_v8 = vld [vmem:[#allocation2 + $0x50] sm:$0xff]  ;;  %vm15906_vm0 = vcmask 195584  }
 0x1f9   : > { %v2213_v42 = vor.u32 %v2211_v27, %v12718_v11  ;;  %v12730_v13 = vpop.permute.xlu0 %723  ;;  %9999 = vmatpush3.bf16.msra.mxu0 %v10953_v32  ;;  %v3095_v15 = vor.u32 %v3094_v18, %v12732_v49  ;;  %v10955_v27 = vld [vmem:[%s15742_s2 + $0x20] sm:$0xff]  }
 0x1fa   : > { %v1226_v50 = vpop.permute.xlu1 %1225  ;;  %10000 = vmatprep.subr.bf16.mxu0 %v10954_v52  ;;  %v3086_v32 = vrot.slane %v3085_v9, 4  ;;  %v12786_v9 = vsel %vm12218_vm8, %v9240_v62, %v4282_v22 }
 0x1fb   : > { %v2502_v60 = vsel %vm12051_vm2, %v2213_v42, %v2501_v28  ;;  %v1531_v4 = vsel %vm15902_vm15, %v1498_v41, %v1226_v50  ;;  %737 = vrot.lane.b32.xlu0 %v12553_v34, %s11214_s29  ;;  %v12756_v34 = vsel %vm12218_vm8, %v9748_v57, %v8298_v38  ;;  %v1176_v38 = vrot.slane %v12713_v10, 2 }
 0x1fc   : > { %2503 = vst [vmem:[#allocation2 + $0x78] sm:$0xff] %v2502_v60  ;;  %9030 = vmatmul.mubr.msk.f32.gmra.mrb[44].mxu0 %vm15903_vm11, %v1531_v4  ;;  %940 = vrot.lane.b32.xlu1 %v12619_v0, %s11218_s7  ;;  %15904 = vst [vmem:[#allocation4_spill] sm:$0xff] %v12756_v34  ;;  %v1077_v42 = vsel %vm15905_vm12, %v1075_v63, %v1076_v47  ;;  %v4284_v50 = vrot.slane %v4282_v22, 4  ;;  %v11163_v60 = vld [vmem:[%s11274_s28 + $0x110] sm:$0xff]  ;;  %v1177_v63 = vrot.slane %v12716_v35, 2  ;;  %vm15907_vm15 = vcmask 228352  }
 0x1fd   : > { %v826_v16 = vpop.permute.xlu0 %825  ;;  %1857 = vmatprep.mubr.f32.mxu0 %v15752_v46  ;;  %10001 = vmatpush3.bf16.msra.mxu0 %v10955_v27  ;;  %v1301_v4 = vsel %vm1277_vm3, %v11163_v60, %v12676_v37  ;;  %v3096_v37 = vrot.slane %v3095_v15, 4  ;;  %vm15910_vm11 = vcmask 261120   ;;  %vm15911_vm12 = vcmask 293888  }
 0x1fe   : > { %v12767_v28 = vpop.permute.xlu1 %926  ;;  %v2967_v24 = vld [vmem:[#allocation2 + $0x70] sm:$0x11]  ;;  %v1334_v60 = vsel %vm1310_vm4, %v1301_v4, %v12703_v17 }
 0x1ff   : > { %v1775_v18 = vpop.f32.mrb[18].mxu0  ;;  %464 = vrot.lane.b32.xlu0 %v12513_v19, %s11215_s30  ;;  %v3098_v41 = vshll.u32 %v2967_v24, 16  ;;  %v4285_v57 = vrot.slane %v2967_v24, 5  ;;  %v10956_v19 = vld [vmem:[%s15742_s2 + $0x68] sm:$0xff]   ;;  %s217_s30 = scalar_lea.vmem %s15744_s4, %s9846_s8 }
 0x200   : > { %v1930_v0 = vmax.f32 %v1775_v18, 0.0  ;;  %v1777_v12 = vpop.f32.mrb[19].mxu0  ;;  %1038 = vrot.lane.b32.xlu1 %v12713_v10, %s11219_s18  ;;  %v10957_v10 = vld [vmem:[%s15742_s2 + $0x28] sm:$0xff]   ;;  %10002 = vmatprep.subr.bf16.mxu0 %v10956_v19  ;;  %v1367_v19 = vsel %vm1343_vm5, %v1334_v60, %v12730_v13  ;;  %v1178_v13 = vsel %vm498_vm1, %v1176_v38, %v1177_v63 }
 0x201   : > { %v1931_v52 = vmax.f32 %v1777_v12, 0.0  ;;  %v12790_v27 = vpop.permute.xlu0 %450  ;;  %v3100_v24 = vrot.slane %v3098_v41, 5  ;;  %v12797_v18 = vsel %vm12218_vm8, %v4284_v50, %v4285_v57  ;;  %v3091_v50 = vsel %vm12428_vm13, %v3086_v32, %v12732_v49  ;;  %10003 = vmatpush3.bf16.msra.mxu0 %v10957_v10  ;;  %v8233_v49 = vld [vmem:[#allocation2 + $0x48] sm:$0xee] }
 0x202   : > { %v1025_v22 = vpop.permute.xlu1 %1024  ;;  %v8305_v57 = vrot.slane %v12788_v8, 5 }
 0x203   : > { %v2613_v62 = vld [vmem:[#allocation2 + $0x78] sm:$0x22]  ;;  %v9857_v41 = vpack.c.bf16 %v1931_v52, %v1930_v0  ;;  %641 = vrot.lane.b32.xlu0 %v12539_v53, %s11217_s6  ;;  %v3101_v17 = vsel %vm12428_vm13, %v3096_v37, %v3100_v24  ;;  %v12817_v0 = vld [vmem:[%s11274_s28 + $0x1a8] sm:$0x3]  ;;  %v10958_v53 = vld [vmem:[%s15742_s2 + $0x70] sm:$0xff]   ;;  %v1400_v52 = vsel %vm1376_vm6, %v1367_v19, %v826_v16 }
 0x204   : > { %v9077_v4 = vrot.slane %v2613_v62, 9  ;;  %v9149_v15 = vcombine.high %v3091_v50, %v3101_v17  ;;  %v9148_v12 = vcombine.low %v3091_v50, %v3101_v17  ;;  %1140 = vrot.lane.b32.xlu1 %v1077_v42, %s11220_s21  ;;  %v2713_v32 = vld [vmem:[#allocation2 + $0x78] sm:$0x11]  ;;  %v10959_v42 = vld [vmem:[%s15742_s2 + $0x30] sm:$0xff]   ;;  %10004 = vmatprep.subr.bf16.mxu0 %v10958_v53  ;;  %v1179_v38 = vrot.slane %v12817_v0, 2 }
 0x205   : > { %v2216_v37 = vshrl.u32 %v9857_v41, 16  ;;  %v12823_v8 = vpop.permute.xlu0 %627  ;;  %v7355_v24 = vld [vmem:[#allocation2 + $0x58] sm:$0x11]  ;;  %v2219_v62 = vshll.u32 %v9857_v41, 16  ;;  %v1433_v50 = vsel %vm1409_vm7, %v1400_v52, %v12767_v28  ;;  %v2505_v17 = vld [vmem:[#allocation2 + $0x88] sm:$0x11]  ;;  %10005 = vmatpush3.bf16.msra.mxu0 %v10959_v42 }
 0x206   : > { %v2714_v10 = vsel %vm12094_vm14, %v9077_v4, %v2713_v32  ;;  %v1127_v60 = vpop.permute.xlu1 %1126  ;;  %3687 = vmatprep.mubr.bf16.mxu1 %v9149_v15  ;;  %v10960_v15 = vld [vmem:[%s15742_s2 + $0x78] sm:$0xff]   ;;  %v9749_v4 = vrot.slane %v8233_v49, 9  ;;  %v8307_v19 = vrot.slane %v8305_v57, 4  ;;  %v8308_v41 = vrot.slane %v7355_v24, 5 }
 0x207   : > { %2715 = vst [vmem:[#allocation2 + $0x78] sm:$0x11] %v2714_v10  ;;  %v2218_v16 = vrot.slane %v2216_v37, 7  ;;  %3688 = vmatmul.mubr.bf16.gmra.mrb[16].mxu1 %v9148_v12  ;;  %739 = vrot.lane.b32.xlu0 %v12556_v55, %s11214_s29  ;;  %v2214_v12 = vrot.slane %v12718_v11, 4  ;;  %v1466_v32 = vsel %vm15906_vm0, %v1433_v50, %v1025_v22  ;;  %v10961_v28 = vld [vmem:[%s15742_s2 + $0x38] sm:$0xff]   ;;  %v1078_v10 = vrot.slane %v12817_v0, 1 }
 0x208   : > { %1241 = vrot.lane.b32.xlu1 %v1178_v13, %s11222_s24  ;;  %v1499_v52 = vsel %vm15907_vm15, %v1466_v32, %v1127_v60  ;;  %10006 = vmatprep.subr.bf16.mxu0 %v10960_v15  ;;  %v12850_v49 = vsel %vm12218_vm8, %v9749_v4, %v8305_v57  ;;  %v12854_v11 = vsel %vm12218_vm8, %v8307_v19, %v8308_v41 }
 0x209   : > { %v2221_v53 = vor.u32 %v2219_v62, %v2218_v16  ;;  %v2223_v55 = vrot.slane %v2218_v16, 4  ;;  %v726_v37 = vpop.permute.xlu0 %725  ;;  %15908 = vst [vmem:[#allocation5_spill] sm:$0xff] %v12850_v49  ;;  %15909 = vst [vmem:[#allocation6_spill] sm:$0xff] %v12854_v11  ;;  %v1180_v16 = vsel %vm498_vm1, %v1177_v63, %v1179_v38  ;;  %10007 = vmatpush3.bf16.msra.mxu0 %v10961_v28  ;;  %vm15912_vm1 = vcmask 1046528  }
 0x20a   : > { %v1228_v13 = vpop.permute.xlu1 %1227  ;;  %v1079_v63 = vsel %vm15912_vm1, %v1076_v47, %v1078_v10  ;;  %vm15915_vm1 = vmmov %vm15906_vm0 }
 0x20b   : > { %v12858_v22 = vsel %vm12115_vm10, %v2214_v12, %v2221_v53  ;;  %v2506_v42 = vsel %vm12094_vm14, %v2223_v55, %v2505_v17  ;;  %v1532_v24 = vsel %vm15910_vm11, %v1499_v52, %v1228_v13  ;;  %841 = vrot.lane.b32.xlu0 %v12667_v6, %s11216_s5  ;;  %v11164_v12 = vld [vmem:[%s11274_s28 + $0x120] sm:$0xff] }
 0x20c   : > { %2504 = vst [vmem:[#allocation2 + $0x80] sm:$0xff] %v12858_v22  ;;  %2507 = vst [vmem:[#allocation2 + $0x88] sm:$0x11] %v2506_v42  ;;  %9031 = vmatmul.mubr.msk.f32.gmra.mrb[46].mxu0 %vm15911_vm12, %v1532_v24  ;;  %1040 = vrot.lane.b32.xlu1 %v12716_v35, %s11219_s18 }
 0x20d   : > { %v828_v60 = vpop.permute.xlu0 %827  ;;  %1863 = vmatprep.mubr.f32.mxu0 %v15752_v46 }
 0x20e   : > { %v929_v62 = vpop.permute.xlu1 %928  ;;  %v12878_v50 = vld [vmem:[#allocation2 + $0x78] sm:$0xff] }
 0x20f   : > { %v1781_v17 = vpop.f32.mrb[20].mxu0  ;;  %942 = vrot.lane.b32.xlu0 %v12651_v54, %s11218_s7  ;;  %v1302_v54 = vsel %vm1277_vm3, %v11164_v12, %v12790_v27  ;;  %v3103_v35 = vshrl.u32 %v12878_v50, 16  ;;  %v3106_v47 = vshll.u32 %v12878_v50, 16 }
 0x210   : > { %v1932_v15 = vmax.f32 %v1781_v17, 0.0  ;;  %v1783_v4 = vpop.f32.mrb[21].mxu0  ;;  %1243 = vrot.lane.b32.xlu1 %v1180_v16, %s11222_s24  ;;  %v1335_v32 = vsel %vm1310_vm4, %v1302_v54, %v12823_v8  ;;  %v3112_v16 = vshll.u32 %v12858_v22, 16  ;;  %v3116_v17 = vshrl.u32 %v12858_v22, 16  ;;  %v2508_v54 = vld [vmem:[#allocation2 + $0x90] sm:$0xff] }
 0x211   : > { %v1933_v19 = vmax.f32 %v1783_v4, 0.0  ;;  %v453_v41 = vpop.permute.xlu0 %452  ;;  %v1368_v13 = vsel %vm1343_vm5, %v1335_v32, %v726_v37  ;;  %v3108_v12 = vrot.slane %v3106_v47, 5  ;;  %v4206_v47 = vld [vmem:[#allocation2 + $0x78] sm:$0xee] }
 0x212   : > { %v1027_v53 = vpop.permute.xlu1 %1026  ;;  %v1401_v24 = vsel %vm1376_vm6, %v1368_v13, %v828_v60  ;;  %v3114_v13 = vrot.slane %v3112_v16, 5  ;;  %v3118_v57 = vrot.slane %v3116_v17, 4  ;;  %v9241_v17 = vrot.slane %v4206_v47, 9 }
 0x213   : > { %v2757_v55 = vld [vmem:[#allocation2 + $0x80] sm:$0x88]  ;;  %v9858_v28 = vpack.c.bf16 %v1933_v19, %v1932_v15  ;;  %1142 = vrot.lane.b32.xlu0 %v1079_v63, %s11220_s21  ;;  %v2860_v42 = vld [vmem:[#allocation2 + $0x88] sm:$0x11]  ;;  %v3105_v19 = vrot.slane %v3103_v35, 4  ;;  %v1434_v37 = vsel %vm1409_vm7, %v1401_v24, %v929_v62  ;;  %v4289_v62 = vrot.slane %v12858_v22, 5 }
 0x214   : > { %v9095_v52 = vrot.slane %v2757_v55, 11  ;;  %v1467_v55 = vsel %vm15906_vm0, %v1434_v37, %v1027_v53  ;;  %v3119_v24 = vor.u32 %v3118_v57, %v3114_v13  ;;  %vm15916_vm0 = vmmov %vm15907_vm15 }
 0x215   : > { %v2225_v10 = vshrl.u32 %v9858_v28, 16  ;;  %v630_v27 = vpop.permute.xlu0 %629  ;;  %v2228_v63 = vshll.u32 %v9858_v28, 16  ;;  %v3109_v35 = vor.u32 %v3108_v12, %v3105_v19  ;;  %v4291_v37 = vrot.slane %v4289_v62, 4  ;;  %v7357_v19 = vld [vmem:[#allocation2 + $0x68] sm:$0xff] }
 0x216   : > { %v2861_v8 = vsel %vm12163_vm9, %v9095_v52, %v2860_v42  ;;  %v1129_v15 = vpop.permute.xlu1 %1128  ;;  %v11165_v12 = vld [vmem:[%s11274_s28 + $0x128] sm:$0xff] }
 0x217   : > { %2862 = vst [vmem:[#allocation2 + $0x88] sm:$0x11] %v2861_v8  ;;  %v12904_v4 = vrot.slane %v2225_v10, 7  ;;  %v1500_v6 = vsel %vm15907_vm15, %v1467_v55, %v1129_v15  ;;  %v3110_v15 = vrot.slane %v3109_v35, 4  ;;  %vm15917_vm15 = vmmov %vm15910_vm11 }
 0x219   : > { %v2230_v60 = vor.u32 %v2228_v63, %v12904_v4  ;;  %v728_v32 = vpop.permute.xlu0 %727 }
 0x21a   : > { %v1230_v52 = vpop.permute.xlu1 %1229 }
 0x21b   : > { %v2509_v42 = vsel %vm12051_vm2, %v2230_v60, %v2508_v54  ;;  %v1533_v28 = vsel %vm15910_vm11, %v1500_v6, %v1230_v52  ;;  %v1303_v54 = vsel %vm1277_vm3, %v11165_v12, %v453_v41  ;;  %v12920_v52 = vsel %vm12218_vm8, %v9241_v17, %v4289_v62  ;;  %vm15918_vm11 = vmmov %vm15911_vm12 }
 0x21c   : > { %2510 = vst [vmem:[#allocation2 + $0x90] sm:$0xff] %v2509_v42  ;;  %9032 = vmatmul.mubr.msk.f32.gmra.mrb[48].mxu0 %vm15911_vm12, %v1533_v28  ;;  %v3120_v28 = vrot.slane %v3119_v24, 4  ;;  %v1336_v38 = vsel %vm1310_vm4, %v1303_v54, %v630_v27  ;;  %v8312_v17 = vrot.slane %v7357_v19, 5  ;;  %vm15920_vm12 = vmmov %vm15915_vm1 }
 0x21d   : > { %v830_v53 = vpop.permute.xlu0 %829  ;;  %1869 = vmatprep.mubr.f32.mxu0 %v15752_v46  ;;  %v1369_v12 = vsel %vm1343_vm5, %v1336_v38, %v728_v32 }
 0x21e   : > { %v931_v10 = vpop.permute.xlu1 %930  ;;  %v2968_v16 = vld [vmem:[#allocation2 + $0x88] sm:$0x11]  ;;  %v1402_v33 = vsel %vm1376_vm6, %v1369_v12, %v830_v53 }
 0x21f   : > { %v1787_v8 = vpop.f32.mrb[22].mxu0  ;;  %v3122_v63 = vshll.u32 %v2968_v16, 16  ;;  %v4292_v6 = vrot.slane %v2968_v16, 5  ;;  %v7358_v16 = vld [vmem:[#allocation2 + $0x70] sm:$0x11] }
 0x220   : > { %v1934_v60 = vmax.f32 %v1787_v8, 0.0  ;;  %v1789_v55 = vpop.f32.mrb[23].mxu0  ;;  %v8315_v31 = vrot.slane %v7358_v16, 5  ;;  %v2512_v16 = vld [vmem:[#allocation2 + $0xa0] sm:$0x11] }
 0x221   : > { %v1935_v57 = vmax.f32 %v1789_v55, 0.0  ;;  %v12922_v42 = vpop.permute.xlu0 %454  ;;  %v3124_v47 = vrot.slane %v3122_v63, 5  ;;  %v12926_v35 = vsel %vm12218_vm8, %v4291_v37, %v4292_v6  ;;  %v3115_v63 = vsel %vm12428_vm13, %v3110_v15, %v3114_v13  ;;  %v8234_v6 = vld [vmem:[#allocation2 + $0x60] sm:$0xee] }
 0x222   : > { %v1029_v0 = vpop.permute.xlu1 %1028  ;;  %v8314_v13 = vrot.slane %v8312_v17, 4 }
 0x223   : > { %v2614_v8 = vld [vmem:[#allocation2 + $0x90] sm:$0x22]  ;;  %v9859_v24 = vpack.c.bf16 %v1935_v57, %v1934_v60  ;;  %v3125_v37 = vsel %vm12428_vm13, %v3120_v28, %v3124_v47  ;;  %v2716_v41 = vld [vmem:[#allocation2 + $0x90] sm:$0x11]  ;;  %v9750_v60 = vrot.slane %v8234_v6, 9  ;;  %v2231_v28 = vrot.slane %v12904_v4, 4 }
 0x224   : > { %v9078_v27 = vrot.slane %v2614_v8, 9  ;;  %v9151_v54 = vcombine.high %v3115_v63, %v3125_v37  ;;  %v9150_v55 = vcombine.low %v3115_v63, %v3125_v37  ;;  %v1435_v47 = vsel %vm1409_vm7, %v1402_v33, %v931_v10 }
 0x225   : > { %v2233_v62 = vshrl.u32 %v9859_v24, 16  ;;  %v632_v19 = vpop.permute.xlu0 %631  ;;  %v2236_v57 = vshll.u32 %v9859_v24, 16  ;;  %v12945_v53 = vsel %vm12218_vm8, %v9750_v60, %v8312_v17  ;;  %v1468_v63 = vsel %vm15915_vm1, %v1435_v47, %v1029_v0  ;;  %v12964_v0 = vld [vmem:[#allocation2 + $0x80] sm:$0xff]  ;;  %vm15921_vm1 = vmmov %vm15916_vm0 }
 0x226   : > { %v2717_v38 = vsel %vm12094_vm14, %v9078_v27, %v2716_v41  ;;  %v1131_v32 = vpop.permute.xlu1 %1130  ;;  %3695 = vmatprep.mubr.bf16.mxu1 %v9151_v54  ;;  %15913 = vst [vmem:[#allocation7_spill] sm:$0xff] %v12945_v53  ;;  %v12949_v41 = vsel %vm12218_vm8, %v8314_v13, %v8315_v31  ;;  %v7361_v27 = vld [vmem:[#allocation2 + $0x88] sm:$0x11] }
 0x227   : > { %2718 = vst [vmem:[#allocation2 + $0x90] sm:$0x11] %v2717_v38  ;;  %v2235_v15 = vrot.slane %v2233_v62, 7  ;;  %3696 = vmatmul.mubr.bf16.gmra.mrb[20].mxu1 %v9150_v55  ;;  %15914 = vst [vmem:[#allocation8_spill] sm:$0xff] %v12949_v41  ;;  %v1501_v4 = vsel %vm15916_vm0, %v1468_v63, %v1131_v32  ;;  %v8319_v38 = vrot.slane %v12964_v0, 5 }
 0x228   : > { %vm15922_vm0 = vmmov %vm15917_vm15 }
 0x229   : > { %v2238_v8 = vor.u32 %v2236_v57, %v2235_v15  ;;  %v2240_v12 = vrot.slane %v2235_v15, 4  ;;  %v730_v62 = vpop.permute.xlu0 %729 }
 0x22a   : > { %v1232_v33 = vpop.permute.xlu1 %1231 }
 0x22b   : > { %v12959_v17 = vsel %vm12115_vm10, %v2231_v28, %v2238_v8  ;;  %v2513_v31 = vsel %vm12094_vm14, %v2240_v12, %v2512_v16  ;;  %v1534_v37 = vsel %vm15917_vm15, %v1501_v4, %v1232_v33  ;;  %v8322_v28 = vrot.slane %v7361_v27, 5  ;;  %v11166_v8 = vld [vmem:[%s11274_s28 + $0x138] sm:$0xff]  ;;  %vm15923_vm15 = vmmov %vm15918_vm11 }
 0x22c   : > { %2511 = vst [vmem:[#allocation2 + $0x98] sm:$0xff] %v12959_v17  ;;  %2514 = vst [vmem:[#allocation2 + $0xa0] sm:$0x11] %v2513_v31  ;;  %9033 = vmatmul.mubr.msk.f32.gmra.mrb[50].mxu0 %vm15918_vm11, %v1534_v37  ;;  %v1304_v12 = vsel %vm1277_vm3, %v11166_v8, %v12922_v42  ;;  %v8321_v4 = vrot.slane %v8319_v38, 4  ;;  %v3136_v60 = vshll.u32 %v12959_v17, 16 }
 0x22d   : > { %v832_v6 = vpop.permute.xlu0 %831  ;;  %1875 = vmatprep.mubr.f32.mxu0 %v15752_v46  ;;  %v1337_v31 = vsel %vm1310_vm4, %v1304_v12, %v632_v19  ;;  %v3140_v19 = vshrl.u32 %v12959_v17, 16  ;;  %vm15926_vm11 = vmmov %vm15920_vm12 }
 0x22e   : > { %v933_v54 = vpop.permute.xlu1 %932  ;;  %v12969_v55 = vld [vmem:[#allocation2 + $0x90] sm:$0xff]  ;;  %v1370_v27 = vsel %vm1343_vm5, %v1337_v31, %v730_v62  ;;  %v3138_v41 = vrot.slane %v3136_v60, 5 }
 0x22f   : > { %v1793_v32 = vpop.f32.mrb[24].mxu0  ;;  %v3127_v0 = vshrl.u32 %v12969_v55, 16  ;;  %v1403_v42 = vsel %vm1376_vm6, %v1370_v27, %v832_v6  ;;  %v2515_v6 = vld [vmem:[#allocation2 + $0xa8] sm:$0xff]  ;;  %v3142_v53 = vrot.slane %v3140_v19, 4 }
 0x230   : > { %v1936_v13 = vmax.f32 %v1793_v32, 0.0  ;;  %v1795_v15 = vpop.f32.mrb[25].mxu0  ;;  %v3130_v32 = vshll.u32 %v12969_v55, 16  ;;  %v1436_v31 = vsel %vm1409_vm7, %v1403_v42, %v933_v54  ;;  %v4296_v54 = vrot.slane %v12959_v17, 5 }
 0x231   : > { %v1937_v47 = vmax.f32 %v1795_v15, 0.0  ;;  %v12976_v16 = vpop.permute.xlu0 %456  ;;  %v12987_v15 = vsel %vm12218_vm8, %v8321_v4, %v8322_v28  ;;  %v8235_v4 = vld [vmem:[#allocation2 + $0x78] sm:$0xee]  ;;  %v15925_v42 = vmov 0.0  }
 0x232   : > { %v1031_v63 = vpop.permute.xlu1 %1030  ;;  %15919 = vst [vmem:[#allocation9_spill] sm:$0xff] %v12987_v15  ;;  %v3132_v28 = vrot.slane %v3130_v32, 5 }
 0x233   : > { %v2758_v33 = vld [vmem:[#allocation2 + $0x98] sm:$0x88]  ;;  %v9860_v37 = vpack.c.bf16 %v1937_v47, %v1936_v13  ;;  %v2863_v10 = vld [vmem:[#allocation2 + $0xa0] sm:$0x11]  ;;  %v1469_v48 = vsel %vm15920_vm12, %v1436_v31, %v1031_v63  ;;  %vm15927_vm12 = vmmov %vm15921_vm1 }
 0x234   : > { %v9096_v24 = vrot.slane %v2758_v33, 11  ;;  %v3129_v33 = vrot.slane %v3127_v0, 4 }
 0x235   : > { %v2242_v8 = vshrl.u32 %v9860_v37, 16  ;;  %v634_v57 = vpop.permute.xlu0 %633  ;;  %v2245_v62 = vshll.u32 %v9860_v37, 16 }
 0x236   : > { %v2864_v13 = vsel %vm12163_vm9, %v9096_v24, %v2863_v10  ;;  %v1133_v47 = vpop.permute.xlu1 %1132  ;;  %v3133_v32 = vor.u32 %v3132_v28, %v3129_v33  ;;  %v11167_v28 = vld [vmem:[%s11274_s28 + $0x140] sm:$0xff] }
 0x237   : > { %2865 = vst [vmem:[#allocation2 + $0xa0] sm:$0x11] %v2864_v13  ;;  %v12994_v12 = vrot.slane %v2242_v8, 7  ;;  %v1502_v24 = vsel %vm15921_vm1, %v1469_v48, %v1133_v47  ;;  %v9751_v13 = vrot.slane %v8235_v4, 9  ;;  %v4207_v8 = vld [vmem:[#allocation2 + $0x90] sm:$0xee]  ;;  %v3143_v48 = vor.u32 %v3142_v53, %v3138_v41  ;;  %vm15928_vm1 = vmmov %vm15922_vm0 }
 0x238   : > { %v9242_v33 = vrot.slane %v4207_v8, 9  ;;  %v3134_v31 = vrot.slane %v3133_v32, 4  ;;  %v1305_v32 = vsel %vm1277_vm3, %v11167_v28, %v12976_v16 }
 0x239   : > { %v2247_v27 = vor.u32 %v2245_v62, %v12994_v12  ;;  %v732_v46 = vpop.permute.xlu0 %731  ;;  %v13007_v60 = vsel %vm12218_vm8, %v9751_v13, %v8319_v38 }
 0x23a   : > { %v1234_v10 = vpop.permute.xlu1 %1233  ;;  %15924 = vst [vmem:[#allocation10_spill] sm:$0xff] %v13007_v60  ;;  %v13016_v53 = vsel %vm12218_vm8, %v9242_v33, %v4296_v54  ;;  %v7363_v60 = vld [vmem:[#allocation2 + $0x98] sm:$0xff] }
 0x23b   : > { %v2516_v37 = vsel %vm12051_vm2, %v2247_v27, %v2515_v6  ;;  %v1535_v0 = vsel %vm15922_vm0, %v1502_v24, %v1234_v10  ;;  %v4298_v27 = vrot.slane %v4296_v54, 4  ;;  %vm15929_vm0 = vmmov %vm15923_vm15 }
 0x23c   : > { %2517 = vst [vmem:[#allocation2 + $0xa8] sm:$0xff] %v2516_v37  ;;  %9034 = vmatmul.mubr.msk.f32.gmra.mrb[52].mxu0 %vm15923_vm15, %v1535_v0  ;;  %v3144_v0 = vrot.slane %v3143_v48, 4  ;;  %vm15932_vm15 = vmmov %vm15926_vm11 }
 0x23d   : > { %v834_v63 = vpop.permute.xlu0 %833  ;;  %1881 = vmatprep.mubr.f32.mxu0 %v15925_v42 }
 0x23e   : > { %v935_v47 = vpop.permute.xlu1 %934  ;;  %v2969_v62 = vld [vmem:[#allocation2 + $0xa0] sm:$0x11] }
 0x23f   : > { %v1799_v4 = vpop.f32.mrb[26].mxu0  ;;  %v3146_v6 = vshll.u32 %v2969_v62, 16  ;;  %v4299_v38 = vrot.slane %v2969_v62, 5 }
 0x240   : > { %v1938_v24 = vmax.f32 %v1799_v4, 0.0  ;;  %v1801_v10 = vpop.f32.mrb[27].mxu0  ;;  %v1338_v4 = vsel %vm1310_vm4, %v1305_v32, %v634_v57  ;;  %v2519_v32 = vld [vmem:[#allocation2 + $0xb8] sm:$0x11] }
 0x241   : > { %v1939_v13 = vmax.f32 %v1801_v10, 0.0  ;;  %v459_v37 = vpop.permute.xlu0 %458  ;;  %v3148_v19 = vrot.slane %v3146_v6, 5  ;;  %v13020_v8 = vsel %vm12218_vm8, %v4298_v27, %v4299_v38  ;;  %v3139_v6 = vsel %vm12428_vm13, %v3134_v31, %v3138_v41  ;;  %v7364_v41 = vld [vmem:[#allocation2 + $0xa0] sm:$0x11] }
 0x242   : > { %v1033_v15 = vpop.permute.xlu1 %1032  ;;  %v1371_v16 = vsel %vm1343_vm5, %v1338_v4, %v732_v46  ;;  %v2248_v46 = vrot.slane %v12994_v12, 4 }
 0x243   : > { %v2615_v33 = vld [vmem:[#allocation2 + $0xa8] sm:$0x22]  ;;  %v9861_v48 = vpack.c.bf16 %v1939_v13, %v1938_v24  ;;  %v3149_v27 = vsel %vm12428_vm13, %v3144_v0, %v3148_v19  ;;  %v2719_v62 = vld [vmem:[#allocation2 + $0xa8] sm:$0x11]  ;;  %v1404_v11 = vsel %vm1376_vm6, %v1371_v16, %v834_v63  ;;  %v8326_v13 = vrot.slane %v7363_v60, 5 }
 0x244   : > { %v9079_v38 = vrot.slane %v2615_v33, 9  ;;  %v9153_v28 = vcombine.high %v3139_v6, %v3149_v27  ;;  %v9152_v10 = vcombine.low %v3139_v6, %v3149_v27  ;;  %v1437_v0 = vsel %vm1409_vm7, %v1404_v11, %v935_v47  ;;  %v8236_v47 = vld [vmem:[#allocation2 + $0x90] sm:$0xee] }
 0x245   : > { %v2250_v54 = vshrl.u32 %v9861_v48, 16  ;;  %v636_v49 = vpop.permute.xlu0 %635  ;;  %v2253_v19 = vshll.u32 %v9861_v48, 16  ;;  %v1470_v4 = vsel %vm15926_vm11, %v1437_v0, %v1033_v15  ;;  %v8329_v27 = vrot.slane %v7364_v41, 5  ;;  %vm15933_vm11 = vmmov %vm15927_vm12 }
 0x246   : > { %v2720_v57 = vsel %vm12094_vm14, %v9079_v38, %v2719_v62  ;;  %v1135_v24 = vpop.permute.xlu1 %1134  ;;  %3703 = vmatprep.mubr.bf16.mxu1 %v9153_v28  ;;  %v8328_v60 = vrot.slane %v8326_v13, 4  ;;  %v9752_v0 = vrot.slane %v8236_v47, 9 }
 0x247   : > { %2721 = vst [vmem:[#allocation2 + $0xa8] sm:$0x11] %v2720_v57  ;;  %v2252_v31 = vrot.slane %v2250_v54, 7  ;;  %3704 = vmatmul.mubr.bf16.gmra.mrb[24].mxu1 %v9152_v10  ;;  %v1503_v62 = vsel %vm15927_vm12, %v1470_v4, %v1135_v24  ;;  %v11168_v24 = vld [vmem:[%s11274_s28 + $0x150] sm:$0xff]  ;;  %v2522_v57 = vld [vmem:[#allocation2 + $0xc0] sm:$0xff]  ;;  %vm15934_vm12 = vmmov %vm15928_vm1 }
 0x248   : > { %v13054_v48 = vsel %vm12218_vm8, %v8328_v60, %v8329_v27  ;;  %v1306_v41 = vsel %vm1277_vm3, %v11168_v24, %v459_v37 }
 0x249   : > { %v2255_v33 = vor.u32 %v2253_v19, %v2252_v31  ;;  %v2257_v63 = vrot.slane %v2252_v31, 4  ;;  %v734_v6 = vpop.permute.xlu0 %733  ;;  %15930 = vst [vmem:[#allocation11_spill] sm:$0xff] %v13054_v48 }
 0x24a   : > { %v1236_v38 = vpop.permute.xlu1 %1235 }
 0x24b   : > { %v13044_v54 = vsel %vm12115_vm10, %v2248_v46, %v2255_v33  ;;  %v2520_v12 = vsel %vm12094_vm14, %v2257_v63, %v2519_v32  ;;  %v1536_v11 = vsel %vm15928_vm1, %v1503_v62, %v1236_v38  ;;  %v1339_v32 = vsel %vm1310_vm4, %v1306_v41, %v636_v49  ;;  %vm15935_vm1 = vmmov %vm15929_vm0 }
 0x24c   : > { %2518 = vst [vmem:[#allocation2 + $0xb0] sm:$0xff] %v13044_v54  ;;  %2521 = vst [vmem:[#allocation2 + $0xb8] sm:$0x11] %v2520_v12  ;;  %9035 = vmatmul.mubr.msk.f32.gmra.mrb[54].mxu0 %vm15929_vm0, %v1536_v11  ;;  %v1372_v4 = vsel %vm1343_vm5, %v1339_v32, %v734_v6  ;;  %v13068_v62 = vsel %vm12218_vm8, %v9752_v0, %v8326_v13  ;;  %v3160_v60 = vshll.u32 %v13044_v54, 16  ;;  %v3164_v49 = vshrl.u32 %v13044_v54, 16 }
 0x24d   : > { %v836_v15 = vpop.permute.xlu0 %835  ;;  %1887 = vmatprep.mubr.f32.mxu0 %v15925_v42  ;;  %15931 = vst [vmem:[#allocation12_spill] sm:$0xff] %v13068_v62  ;;  %vm15938_vm0 = vmmov %vm15932_vm15 }
 0x24e   : > { %v937_v16 = vpop.permute.xlu1 %936  ;;  %v13056_v28 = vld [vmem:[#allocation2 + $0xa8] sm:$0xff]  ;;  %v1405_v13 = vsel %vm1376_vm6, %v1372_v4, %v836_v15  ;;  %v3162_v30 = vrot.slane %v3160_v60, 5  ;;  %v3166_v6 = vrot.slane %v3164_v49, 4 }
 0x24f   : > { %v1805_v10 = vpop.f32.mrb[28].mxu0  ;;  %v3151_v37 = vshrl.u32 %v13056_v28, 16  ;;  %v3154_v11 = vshll.u32 %v13056_v28, 16 }
 0x250   : > { %v1940_v31 = vmax.f32 %v1805_v10, 0.0  ;;  %v1807_v19 = vpop.f32.mrb[29].mxu0  ;;  %v1438_v10 = vsel %vm1409_vm7, %v1405_v13, %v937_v16  ;;  %v3167_v60 = vor.u32 %v3166_v6, %v3162_v30 }
 0x251   : > { %v1941_v33 = vmax.f32 %v1807_v19, 0.0  ;;  %v461_v63 = vpop.permute.xlu0 %460  ;;  %v3156_v46 = vrot.slane %v3154_v11, 5  ;;  %v4208_v11 = vld [vmem:[#allocation2 + $0xa8] sm:$0xee] }
 0x252   : > { %v1035_v27 = vpop.permute.xlu1 %1034 }
 0x253   : > { %v2759_v38 = vld [vmem:[#allocation2 + $0xb0] sm:$0x88]  ;;  %v9862_v12 = vpack.c.bf16 %v1941_v33, %v1940_v31  ;;  %v2866_v24 = vld [vmem:[#allocation2 + $0xb8] sm:$0x11]  ;;  %v1471_v4 = vsel %vm15932_vm15, %v1438_v10, %v1035_v27  ;;  %vm15939_vm15 = vmmov %vm15933_vm11 }
 0x254   : > { %v9097_v47 = vrot.slane %v2759_v38, 11  ;;  %v3153_v38 = vrot.slane %v3151_v37, 4  ;;  %v11169_v27 = vld [vmem:[%s11274_s28 + $0x158] sm:$0xff] }
 0x255   : > { %v2259_v41 = vshrl.u32 %v9862_v12, 16  ;;  %v638_v31 = vpop.permute.xlu0 %637  ;;  %v2262_v33 = vshll.u32 %v9862_v12, 16  ;;  %v1307_v10 = vsel %vm1277_vm3, %v11169_v27, %v461_v63 }
 0x256   : > { %v2867_v19 = vsel %vm12163_vm9, %v9097_v47, %v2866_v24  ;;  %v1137_v0 = vpop.permute.xlu1 %1136  ;;  %v3157_v16 = vor.u32 %v3156_v46, %v3153_v38 }
 0x257   : > { %2868 = vst [vmem:[#allocation2 + $0xb8] sm:$0x11] %v2867_v19  ;;  %v13081_v32 = vrot.slane %v2259_v41, 7  ;;  %v1504_v47 = vsel %vm15933_vm11, %v1471_v4, %v1137_v0  ;;  %v4303_v41 = vrot.slane %v13044_v54, 5  ;;  %v9243_v0 = vrot.slane %v4208_v11, 9  ;;  %vm15940_vm11 = vmmov %vm15934_vm12 }
 0x258   : > { %v3158_v4 = vrot.slane %v3157_v16, 4  ;;  %v7366_v16 = vld [vmem:[#allocation2 + $0xb0] sm:$0xff] }
 0x259   : > { %v2264_v15 = vor.u32 %v2262_v33, %v13081_v32  ;;  %v736_v48 = vpop.permute.xlu0 %735  ;;  %v4305_v33 = vrot.slane %v4303_v41, 4 }
 0x25a   : > { %v1238_v24 = vpop.permute.xlu1 %1237 }
 0x25b   : > { %v2523_v12 = vsel %vm12051_vm2, %v2264_v15, %v2522_v57  ;;  %v1537_v37 = vsel %vm15934_vm12, %v1504_v47, %v1238_v24  ;;  %v1340_v57 = vsel %vm1310_vm4, %v1307_v10, %v638_v31  ;;  %vm15941_vm12 = vmmov %vm15935_vm1 }
 0x25c   : > { %2524 = vst [vmem:[#allocation2 + $0xc0] sm:$0xff] %v2523_v12  ;;  %9036 = vmatmul.mubr.msk.f32.gmra.mrb[56].mxu0 %vm15935_vm1, %v1537_v37  ;;  %v1373_v47 = vsel %vm1343_vm5, %v1340_v57, %v736_v48  ;;  %v3168_v12 = vrot.slane %v3167_v60, 4  ;;  %v13099_v37 = vsel %vm12218_vm8, %v9243_v0, %v4303_v41  ;;  %vm15944_vm1 = vmmov %vm15938_vm0 }
 0x25d   : > { %v838_v49 = vpop.permute.xlu0 %837  ;;  %1893 = vmatprep.mubr.f32.mxu0 %v15925_v42  ;;  %15936 = vst [vmem:[#allocation13_spill] sm:$0xff] %v13099_v37 }
 0x25e   : > { %v1037_v13 = vpop.permute.xlu1 %1036  ;;  %v2970_v19 = vld [vmem:[#allocation2 + $0xb8] sm:$0x11]  ;;  %v1406_v63 = vsel %vm1376_vm6, %v1373_v47, %v838_v49  ;;  %v3163_v49 = vsel %vm12428_vm13, %v3158_v4, %v3162_v30 }
 0x25f   : > { %v1811_v15 = vpop.f32.mrb[30].mxu0  ;;  %v3170_v46 = vshll.u32 %v2970_v19, 16  ;;  %v4306_v38 = vrot.slane %v2970_v19, 5  ;;  %v7367_v60 = vld [vmem:[#allocation2 + $0xb8] sm:$0x11] }
 0x260   : > { %v1942_v24 = vmax.f32 %v1811_v15, 0.0  ;;  %v1813_v6 = vpop.f32.mrb[31].mxu0 }
 0x261   : > { %v1943_v27 = vmax.f32 %v1813_v6, 0.0  ;;  %v939_v11 = vpop.permute.xlu0 %938  ;;  %v3172_v62 = vrot.slane %v3170_v46, 5  ;;  %v13104_v31 = vsel %vm12218_vm8, %v4305_v33, %v4306_v38  ;;  %v8333_v38 = vrot.slane %v7366_v16, 5  ;;  %v2526_v16 = vld [vmem:[#allocation2 + $0xd0] sm:$0x11] }
 0x262   : > { %15937 = vst [vmem:[#allocation14_spill] sm:$0xff] %v13104_v31  ;;  %v1439_v10 = vsel %vm1409_vm7, %v1406_v63, %v939_v11  ;;  %v1240_v48 = vpop.permute.xlu1 %1239 }
 0x263   : > { %v2616_v19 = vld [vmem:[#allocation2 + $0xc0] sm:$0x22]  ;;  %v9863_v0 = vpack.c.bf16 %v1943_v27, %v1942_v24  ;;  %v3173_v57 = vsel %vm12428_vm13, %v3168_v12, %v3172_v62  ;;  %v2722_v47 = vld [vmem:[#allocation2 + $0xc0] sm:$0x11]  ;;  %v1472_v63 = vsel %vm15938_vm0, %v1439_v10, %v1037_v13  ;;  %v8237_v27 = vld [vmem:[#allocation2 + $0xa8] sm:$0xee] }
 0x264   : > { %v9080_v33 = vrot.slane %v2616_v19, 9  ;;  %v9155_v15 = vcombine.high %v3163_v49, %v3173_v57  ;;  %v9154_v46 = vcombine.low %v3163_v49, %v3173_v57  ;;  %v8335_v13 = vrot.slane %v8333_v38, 4  ;;  %vm15945_vm0 = vmmov %vm15939_vm15  ;;  %v4209_v31 = vld [vmem:[#allocation2 + $0xc0] sm:$0xee] }
 0x265   : > { %v2267_v6 = vshrl.u32 %v9863_v0, 16  ;;  %v1139_v11 = vpop.permute.xlu0 %1138  ;;  %v2270_v4 = vshll.u32 %v9863_v0, 16  ;;  %v8336_v10 = vrot.slane %v7367_v60, 5  ;;  %v2265_v19 = vrot.slane %v13081_v32, 4 }
 0x266   : > { %v2723_v41 = vsel %vm12094_vm14, %v9080_v33, %v2722_v47  ;;  %v1505_v24 = vsel %vm15939_vm15, %v1472_v63, %v1139_v11  ;;  %3711 = vmatprep.mubr.bf16.mxu1 %v9155_v15  ;;  %v640_v30 = vpop.permute.xlu1 %639  ;;  %v11170_v15 = vld [vmem:[%s11274_s28 + $0x168] sm:$0xff]  ;;  %v9753_v47 = vrot.slane %v8237_v27, 9  ;;  %vm15947_vm15 = vmmov %vm15941_vm12 }
 0x267   : > { %2724 = vst [vmem:[#allocation2 + $0xc0] sm:$0x11] %v2723_v41  ;;  %v2269_v62 = vrot.slane %v2267_v6, 7  ;;  %v1538_v12 = vsel %vm15940_vm11, %v1505_v24, %v1240_v48  ;;  %3712 = vmatmul.mubr.bf16.gmra.mrb[28].mxu1 %v9154_v46  ;;  %v13127_v48 = vsel %vm12218_vm8, %v8335_v13, %v8336_v10 }
 0x268   : > { %9037 = vmatmul.mubr.msk.f32.gmra.mrb[58].mxu0 %vm15941_vm12, %v1538_v12  ;;  %15942 = vst [vmem:[#allocation15_spill] sm:$0xff] %v13127_v48  ;;  %v13139_v6 = vsel %vm12218_vm8, %v9753_v47, %v8333_v38  ;;  %v2529_v48 = vld [vmem:[#allocation2 + $0xd8] sm:$0xff] }
 0x269   : > { %v2272_v49 = vor.u32 %v2270_v4, %v2269_v62  ;;  %v2274_v57 = vrot.slane %v2269_v62, 4  ;;  %v463_v33 = vpop.permute.xlu0 %462  ;;  %1899 = vmatprep.mubr.f32.mxu0 %v15925_v42  ;;  %15943 = vst [vmem:[#allocation16_spill] sm:$0xff] %v13139_v6 }
 0x26a   : > { %v1308_v41 = vsel %vm1277_vm3, %v11170_v15, %v463_v33  ;;  %v840_v0 = vpop.permute.xlu1 %839 }
 0x26b   : > { %v13131_v46 = vsel %vm12115_vm10, %v2265_v19, %v2272_v49  ;;  %v2527_v32 = vsel %vm12094_vm14, %v2274_v57, %v2526_v16  ;;  %v1341_v60 = vsel %vm1310_vm4, %v1308_v41, %v640_v30 }
 0x26c   : > { %2525 = vst [vmem:[#allocation2 + $0xc8] sm:$0xff] %v13131_v46  ;;  %2528 = vst [vmem:[#allocation2 + $0xd0] sm:$0x11] %v2527_v32  ;;  %v3184_v11 = vshll.u32 %v13131_v46, 16 }
 0x26d   : > { %v738_v63 = vpop.permute.xlu0 %737 }
 0x26e   : > { %v1374_v62 = vsel %vm1343_vm5, %v1341_v60, %v738_v63  ;;  %v941_v4 = vpop.permute.xlu1 %940  ;;  %v13146_v12 = vld [vmem:[#allocation2 + $0xc0] sm:$0xff] }
 0x26f   : > { %v1407_v30 = vsel %vm1376_vm6, %v1374_v62, %v840_v0  ;;  %v1817_v27 = vpop.f32.mrb[32].mxu0  ;;  %v3175_v47 = vshrl.u32 %v13146_v12, 16  ;;  %v3178_v0 = vshll.u32 %v13146_v12, 16 }
 0x270   : > { %v1944_v38 = vmax.f32 %v1817_v27, 0.0  ;;  %v1819_v13 = vpop.f32.mrb[33].mxu0  ;;  %v1440_v57 = vsel %vm1409_vm7, %v1407_v30, %v941_v4  ;;  %v11171_v30 = vld [vmem:[%s11274_s28 + $0x170] sm:$0xff] }
 0x271   : > { %v1945_v19 = vmax.f32 %v1819_v13, 0.0  ;;  %v465_v49 = vpop.permute.xlu0 %464  ;;  %v3188_v13 = vshrl.u32 %v13131_v46, 16  ;;  %v3177_v10 = vrot.slane %v3175_v47, 4  ;;  %v3180_v16 = vrot.slane %v3178_v0, 5 }
 0x272   : > { %v1039_v33 = vpop.permute.xlu1 %1038  ;;  %v4310_v0 = vrot.slane %v13131_v46, 5 }
 0x273   : > { %v2760_v15 = vld [vmem:[#allocation2 + $0xc8] sm:$0x88]  ;;  %v9864_v41 = vpack.c.bf16 %v1945_v19, %v1944_v38  ;;  %v2869_v60 = vld [vmem:[#allocation2 + $0xd0] sm:$0x11]  ;;  %v1473_v27 = vsel %vm15944_vm1, %v1440_v57, %v1039_v33  ;;  %v1309_v38 = vsel %vm1277_vm3, %v11171_v30, %v465_v49  ;;  %v10962_v57 = vld [vmem:[%s15742_s2 + $0x140] sm:$0xff]   ;;  %v3181_v34 = vor.u32 %v3180_v16, %v3177_v10 }
 0x274   : > { %v9098_v32 = vrot.slane %v2760_v15, 11  ;;  %v10963_v33 = vld [vmem:[%s15742_s2 + $0x100] sm:$0xff]   ;;  %10104 = vmatprep.subr.bf16.mxu1 %v10962_v57  ;;  %vm15946_vm3 = vmmov %vm15940_vm11  ;;  %v9244_v10 = vrot.slane %v4209_v31, 9 }
 0x275   : > { %v2276_v63 = vshrl.u32 %v9864_v41, 16  ;;  %v642_v62 = vpop.permute.xlu0 %641  ;;  %v2279_v15 = vshll.u32 %v9864_v41, 16  ;;  %v3190_v41 = vrot.slane %v3188_v13, 4  ;;  %10105 = vmatpush3.bf16.msra.mxu1 %v10963_v33  ;;  %v3182_v57 = vrot.slane %v3181_v34, 4 }
 0x276   : > { %v2870_v4 = vsel %vm12163_vm9, %v9098_v32, %v2869_v60  ;;  %v1141_v19 = vpop.permute.xlu1 %1140  ;;  %v1342_v60 = vsel %vm1310_vm4, %v1309_v38, %v642_v62  ;;  %v10965_v62 = vld [vmem:[%s15742_s2 + $0x108] sm:$0xff]   ;;  %vm15948_vm4 = vmmov %vm15944_vm1 }
 0x277   : > { %2871 = vst [vmem:[#allocation2 + $0xd0] sm:$0x11] %v2870_v4  ;;  %v13163_v24 = vrot.slane %v2276_v63, 7  ;;  %v1506_v32 = vsel %vm15945_vm0, %v1473_v27, %v1141_v19  ;;  %v3186_v4 = vrot.slane %v3184_v11, 5  ;;  %v10964_v11 = vld [vmem:[%s15742_s2 + $0x148] sm:$0xff]   ;;  %v4312_v19 = vrot.slane %v4310_v0, 4 }
 0x278   : > { %10106 = vmatprep.subr.bf16.mxu1 %v10964_v11 }
 0x279   : > { %v2281_v49 = vor.u32 %v2279_v15, %v13163_v24  ;;  %v740_v63 = vpop.permute.xlu0 %739  ;;  %v3191_v38 = vor.u32 %v3190_v41, %v3186_v4  ;;  %10107 = vmatpush3.bf16.msra.mxu1 %v10965_v62 }
 0x27a   : > { %v1242_v47 = vpop.permute.xlu1 %1241  ;;  %v1375_v27 = vsel %vm1343_vm5, %v1342_v60, %v740_v63  ;;  %v13190_v63 = vsel %vm12218_vm8, %v9244_v10, %v4310_v0  ;;  %vm15949_vm5 = vmmov %vm15945_vm0 }
 0x27b   : > { %v2530_v30 = vsel %vm12051_vm2, %v2281_v49, %v2529_v48  ;;  %v1539_v6 = vsel %vm15946_vm3, %v1506_v32, %v1242_v47  ;;  %v3192_v47 = vrot.slane %v3191_v38, 4  ;;  %v3187_v38 = vsel %vm12428_vm13, %v3182_v57, %v3186_v4 }
 0x27c   : > { %2531 = vst [vmem:[#allocation2 + $0xd8] sm:$0xff] %v2530_v30  ;;  %9038 = vmatmul.mubr.msk.f32.gmra.mrb[60].mxu0 %vm15947_vm15, %v1539_v6 }
 0x27d   : > { %v842_v13 = vpop.permute.xlu0 %841  ;;  %1905 = vmatprep.mubr.f32.mxu0 %v15925_v42 }
 0x27e   : > { %v1041_v48 = vpop.permute.xlu1 %1040  ;;  %v2971_v16 = vld [vmem:[#allocation2 + $0xd0] sm:$0x11]  ;;  %v1408_v15 = vsel %vm1376_vm6, %v1375_v27, %v842_v13  ;;  %v7369_v27 = vld [vmem:[#allocation2 + $0xc8] sm:$0xff]  ;;  %vm15950_vm6 = vmmov %vm15946_vm3 }
 0x27f   : > { %v1823_v6 = vpop.f32.mrb[34].mxu0  ;;  %v3194_v33 = vshll.u32 %v2971_v16, 16  ;;  %v4313_v32 = vrot.slane %v2971_v16, 5  ;;  %v7370_v62 = vld [vmem:[#allocation2 + $0xd0] sm:$0x11] }
 0x280   : > { %v1946_v49 = vmax.f32 %v1823_v6, 0.0  ;;  %v1825_v60 = vpop.f32.mrb[35].mxu0 }
 0x281   : > { %v1947_v41 = vmax.f32 %v1825_v60, 0.0  ;;  %v943_v42 = vpop.permute.xlu0 %942  ;;  %v3196_v30 = vrot.slane %v3194_v33, 5  ;;  %v13194_v31 = vsel %vm12218_vm8, %v4312_v19, %v4313_v32  ;;  %v8238_v32 = vld [vmem:[#allocation2 + $0xc0] sm:$0xee]  ;;  %v8340_v60 = vrot.slane %v7369_v27, 5 }
 0x282   : > { %v1441_v34 = vsel %vm1409_vm7, %v1408_v15, %v943_v42  ;;  %v1244_v6 = vpop.permute.xlu1 %1243  ;;  %vm15951_vm7 = vmmov %vm15941_vm12 }
 0x283   : > { %v2617_v13 = vld [vmem:[#allocation2 + $0xd8] sm:$0x22]  ;;  %v9865_v0 = vpack.c.bf16 %v1947_v41, %v1946_v49  ;;  %v1474_v16 = vsel %vm15948_vm4, %v1441_v34, %v1041_v48  ;;  %v3197_v10 = vsel %vm12428_vm13, %v3192_v47, %v3196_v30  ;;  %v2725_v42 = vld [vmem:[#allocation2 + $0xd8] sm:$0x11]  ;;  %v2533_v47 = vld [vmem:[#allocation2 + $0xe8] sm:$0x11] }
 0x284   : > { %v9081_v19 = vrot.slane %v2617_v13, 9  ;;  %v9157_v33 = vcombine.high %v3187_v38, %v3197_v10  ;;  %v9156_v15 = vcombine.low %v3187_v38, %v3197_v10  ;;  %v9754_v30 = vrot.slane %v8238_v32, 9 }
 0x285   : > { %v2284_v11 = vshrl.u32 %v9865_v0, 16  ;;  %v1143_v37 = vpop.permute.xlu0 %1142  ;;  %v2287_v57 = vshll.u32 %v9865_v0, 16  ;;  %v8342_v27 = vrot.slane %v8340_v60, 4  ;;  %v8343_v34 = vrot.slane %v7370_v62, 5 }
 0x286   : > { %v2726_v49 = vsel %vm12094_vm14, %v9081_v19, %v2725_v42  ;;  %v1507_v48 = vsel %vm15949_vm5, %v1474_v16, %v1143_v37  ;;  %3719 = vmatprep.mubr.bf16.mxu1 %v9157_v33  ;;  %v2282_v13 = vrot.slane %v13163_v24, 4  ;;  %v15952_v37 = vcombine.high %v12326_v43, %v12265_v36 }
 0x287   : > { %2727 = vst [vmem:[#allocation2 + $0xd8] sm:$0x11] %v2726_v49  ;;  %v2286_v4 = vrot.slane %v2284_v11, 7  ;;  %v1540_v41 = vsel %vm15950_vm6, %v1507_v48, %v1244_v6  ;;  %3720 = vmatmul.mubr.bf16.gmra.mrb[32].mxu1 %v9156_v15  ;;  %v13217_v11 = vsel %vm12218_vm8, %v9754_v30, %v8340_v60  ;;  %v13221_v0 = vsel %vm12218_vm8, %v8342_v27, %v8343_v34 }
 0x288   : > { %9039 = vmatmul.mubr.msk.f32.gmra.mrb[62].mxu0 %vm15951_vm7, %v1540_v41  ;;  %15953 = vst [vmem:[#allocation17_spill] sm:$0xff] %v13217_v11  ;;  %15954 = vst [vmem:[#allocation18_spill] sm:$0xff] %v13221_v0  ;;  %v15955_v19 = vcombine.low %v12326_v43, %v12265_v36  ;;  %v15956_v6 = vcombine.high %v12140_v58, %v12128_v51  ;;  %v15958_v34 = vcombine.high %v12328_v26, %v12265_v36 }
 0x289   : > { %v2289_v38 = vor.u32 %v2287_v57, %v2286_v4  ;;  %v2291_v10 = vrot.slane %v2286_v4, 4  ;;  %4072 = vmatprep.mubr.bf16.mxu0 %v15952_v37 }
 0x28b   : > { %v13225_v16 = vsel %vm12115_vm10, %v2282_v13, %v2289_v38  ;;  %v2534_v24 = vsel %vm12094_vm14, %v2291_v10, %v2533_v47  ;;  %v15957_v47 = vcombine.low %v12140_v58, %v12128_v51  ;;  %v10966_v58 = vld [vmem:[%s15742_s2 + $0x150] sm:$0xff]  }
 0x28c   : > { %2532 = vst [vmem:[#allocation2 + $0xe0] sm:$0xff] %v13225_v16  ;;  %2535 = vst [vmem:[#allocation2 + $0xe8] sm:$0x11] %v2534_v24  ;;  %4073 = vmatmul.mubr.bf16.vlgmr.msra.gmra.mrb[64].mxu0 %v15955_v19  ;;  %v3208_v13 = vshll.u32 %v13225_v16, 16  ;;  %v3212_v38 = vshrl.u32 %v13225_v16, 16  ;;  %10108 = vmatprep.subr.bf16.mxu1 %v10966_v58 }
 0x28d   : > { %4080 = vmatprep.mubr.bf16.mxu0 %v15956_v6  ;;  %v10967_v6 = vld [vmem:[%s15742_s2 + $0x110] sm:$0xff]  }
 0x28e   : > { %v13240_v42 = vld [vmem:[#allocation2 + $0xd8] sm:$0xff]  ;;  %10109 = vmatpush3.bf16.msra.mxu1 %v10967_v6 }
 0x28f   : > { %v1829_v15 = vpop.f32.mrb[36].mxu0  ;;  %v3199_v57 = vshrl.u32 %v13240_v42, 16  ;;  %v3202_v43 = vshll.u32 %v13240_v42, 16 }
 0x290   : > { %v1948_v32 = vmax.f32 %v1829_v15, 0.0  ;;  %v1831_v60 = vpop.f32.mrb[37].mxu0  ;;  %v2536_v15 = vld [vmem:[#allocation2 + $0xf0] sm:$0xff] }
 0x291   : > { %v1949_v49 = vmax.f32 %v1831_v60, 0.0  ;;  %v3201_v19 = vrot.slane %v3199_v57, 4  ;;  %v3204_v51 = vrot.slane %v3202_v43, 5  ;;  %v3210_v60 = vrot.slane %v3208_v13, 5  ;;  %v4210_v57 = vld [vmem:[#allocation2 + $0xd8] sm:$0xee] }
 0x292   : > { %v4317_v43 = vrot.slane %v13225_v16, 5 }
 0x293   : > { %v2761_v48 = vld [vmem:[#allocation2 + $0xe0] sm:$0x88]  ;;  %v9866_v4 = vpack.c.bf16 %v1949_v49, %v1948_v32  ;;  %v2872_v30 = vld [vmem:[#allocation2 + $0xe8] sm:$0x11]  ;;  %v3214_v49 = vrot.slane %v3212_v38, 4 }
 0x294   : > { %v9099_v41 = vrot.slane %v2761_v48, 11  ;;  %4081 = vmatmul.mubr.bf16.gmra.mrb[68].mxu0 %v15957_v47  ;;  %v10968_v47 = vld [vmem:[%s15742_s2 + $0x158] sm:$0xff]  }
 0x295   : > { %v2293_v27 = vshrl.u32 %v9866_v4, 16  ;;  %4088 = vmatprep.mubr.bf16.mxu0 %v15958_v34  ;;  %v2296_v24 = vshll.u32 %v9866_v4, 16  ;;  %v3205_v4 = vor.u32 %v3204_v51, %v3201_v19  ;;  %v3215_v34 = vor.u32 %v3214_v49, %v3210_v60  ;;  %10110 = vmatprep.subr.bf16.mxu1 %v10968_v47  ;;  %v7372_v49 = vld [vmem:[#allocation2 + $0xe0] sm:$0xff] }
 0x296   : > { %v2873_v10 = vsel %vm12163_vm9, %v9099_v41, %v2872_v30  ;;  %v15959_v41 = vcombine.low %v12328_v26, %v12265_v36  ;;  %v10969_v30 = vld [vmem:[%s15742_s2 + $0x118] sm:$0xff]   ;;  %v4319_v51 = vrot.slane %v4317_v43, 4 }
 0x297   : > { %2874 = vst [vmem:[#allocation2 + $0xe8] sm:$0x11] %v2873_v10  ;;  %v13254_v37 = vrot.slane %v2293_v27, 7  ;;  %v15960_v27 = vcombine.high %v12505_v2, %v12489_v20  ;;  %v9245_v10 = vrot.slane %v4210_v57, 9  ;;  %v3206_v26 = vrot.slane %v3205_v4, 4  ;;  %10111 = vmatpush3.bf16.msra.mxu1 %v10969_v30 }
 0x298   : > { %v3216_v57 = vrot.slane %v3215_v34, 4 }
 0x299   : > { %v2298_v32 = vor.u32 %v2296_v24, %v13254_v37 }
 0x29b   : > { %v2537_v48 = vsel %vm12051_vm2, %v2298_v32, %v2536_v15 }
 0x29c   : > { %2538 = vst [vmem:[#allocation2 + $0xf0] sm:$0xff] %v2537_v48  ;;  %4089 = vmatmul.mubr.bf16.gmra.mrb[72].mxu0 %v15959_v41  ;;  %v13282_v41 = vsel %vm12218_vm8, %v9245_v10, %v4317_v43  ;;  %v3211_v10 = vsel %vm12428_vm13, %v3206_v26, %v3210_v60 }
 0x29d   : > { %4096 = vmatprep.mubr.bf16.mxu0 %v15960_v27  ;;  %v9896_v13 = vpop.f32.mrb[0].mxu1  ;;  %15961 = vst [vmem:[#allocation19_spill] sm:$0xff] %v13282_v41 }
 0x29e   : > { %v2972_v38 = vld [vmem:[#allocation2 + $0xe8] sm:$0x11]  ;;  %v9897_v36 = vpop.f32.mrb[1].mxu1 }
 0x29f   : > { %v1835_v24 = vpop.f32.mrb[38].mxu0  ;;  %v3218_v19 = vshll.u32 %v2972_v38, 16  ;;  %v4320_v58 = vrot.slane %v2972_v38, 5  ;;  %v13278_v15 = vadd.f32 %v9897_v36, %v9896_v13  ;;  %v9899_v48 = vpop.f32.mrb[2].mxu1  ;;  %v7373_v36 = vld [vmem:[#allocation2 + $0xe8] sm:$0x11] }
 0x2a0   : > { %v1950_v6 = vmax.f32 %v1835_v24, 0.0  ;;  %v1837_v32 = vpop.f32.mrb[39].mxu0  ;;  %v9900_v47 = vpop.f32.mrb[3].mxu1  ;;  %v8350_v26 = vrot.slane %v7373_v36, 5 }
 0x2a1   : > { %v1951_v27 = vmax.f32 %v1837_v32, 0.0  ;;  %v3220_v62 = vrot.slane %v3218_v19, 5  ;;  %v13286_v4 = vsel %vm12218_vm8, %v4319_v51, %v4320_v58  ;;  %v13288_v30 = vadd.f32 %v9900_v47, %v9899_v48  ;;  %v8239_v47 = vld [vmem:[#allocation2 + $0xd8] sm:$0xee] }
 0x2a2   : > { %15962 = vst [vmem:[#allocation20_spill] sm:$0xff] %v13286_v4  ;;  %v8347_v19 = vrot.slane %v7372_v49, 5  ;;  %v15963_v58 = vcombine.low %v12505_v2, %v12489_v20  ;;  %v9755_v2 = vrot.slane %v8239_v47, 9 }
 0x2a3   : > { %v2618_v24 = vld [vmem:[#allocation2 + $0xf0] sm:$0x22]  ;;  %v9867_v43 = vpack.c.bf16 %v1951_v27, %v1950_v6  ;;  %v3221_v34 = vsel %vm12428_vm13, %v3216_v57, %v3220_v62  ;;  %v2728_v33 = vld [vmem:[#allocation2 + $0xf0] sm:$0x11]  ;;  %v15964_v6 = vcombine.high %v12657_v21, %v12634_v61 }
 0x2a4   : > { %v9082_v51 = vrot.slane %v2618_v24, 9  ;;  %4097 = vmatmul.mubr.bf16.gmra.mrb[76].mxu0 %v15963_v58  ;;  %v9159_v32 = vcombine.high %v3211_v10, %v3221_v34  ;;  %v9158_v48 = vcombine.low %v3211_v10, %v3221_v34  ;;  %v8349_v57 = vrot.slane %v8347_v19, 4  ;;  %v2540_v10 = vld [vmem:[#allocation2 + $0x100] sm:$0x11] }
 0x2a5   : > { %v2301_v38 = vshrl.u32 %v9867_v43, 16  ;;  %4104 = vmatprep.mubr.bf16.mxu0 %v15964_v6  ;;  %v9902_v62 = vpop.f32.mrb[4].mxu1  ;;  %v2304_v27 = vshll.u32 %v9867_v43, 16  ;;  %v2299_v24 = vrot.slane %v13254_v37, 4 }
 0x2a6   : > { %v2729_v60 = vsel %vm12094_vm14, %v9082_v51, %v2728_v33  ;;  %3727 = vmatprep.mubr.bf16.mxu1 %v9159_v32  ;;  %v9903_v20 = vpop.f32.mrb[5].mxu1  ;;  %v13311_v33 = vsel %vm12218_vm8, %v9755_v2, %v8347_v19  ;;  %v15968_v32 = vcombine.high %v12878_v50, %v12858_v22 }
 0x2a7   : > { %2730 = vst [vmem:[#allocation2 + $0xf0] sm:$0x11] %v2729_v60  ;;  %v2303_v49 = vrot.slane %v2301_v38, 7  ;;  %3728 = vmatmul.mubr.bf16.gmra.mrb[36].mxu1 %v9158_v48  ;;  %v13307_v34 = vadd.f32 %v9903_v20, %v9902_v62  ;;  %v9905_v58 = vpop.f32.mrb[6].mxu1  ;;  %15965 = vst [vmem:[#allocation21_spill] sm:$0xff] %v13311_v33  ;;  %v13315_v38 = vsel %vm12218_vm8, %v8349_v57, %v8350_v26 }
 0x2a8   : > { %v9906_v0 = vpop.f32.mrb[7].mxu1  ;;  %15966 = vst [vmem:[#allocation22_spill] sm:$0xff] %v13315_v38 }
 0x2a9   : > { %v2306_v6 = vor.u32 %v2304_v27, %v2303_v49  ;;  %v2308_v13 = vrot.slane %v2303_v49, 4  ;;  %v13317_v43 = vadd.f32 %v9906_v0, %v9905_v58  ;;  %v15967_v0 = vcombine.low %v12657_v21, %v12634_v61 }
 0x2ab   : > { %v13325_v51 = vsel %vm12115_vm10, %v2299_v24, %v2306_v6  ;;  %v2541_v19 = vsel %vm12094_vm14, %v2308_v13, %v2540_v10  ;;  %v15969_v6 = vcombine.low %v12878_v50, %v12858_v22  ;;  %v10970_v50 = vld [vmem:[%s15742_s2 + $0x1c0] sm:$0xff]  }
 0x2ac   : > { %2539 = vst [vmem:[#allocation2 + $0xf8] sm:$0xff] %v13325_v51  ;;  %2542 = vst [vmem:[#allocation2 + $0x100] sm:$0x11] %v2541_v19  ;;  %4105 = vmatmul.mubr.bf16.gmra.mrb[80].mxu0 %v15967_v0  ;;  %10216 = vmatprep.subr.bf16.mxu0 %v10970_v50  ;;  %v4324_v37 = vrot.slane %v13325_v51, 5 }
 0x2ad   : > { %4112 = vmatprep.mubr.bf16.mxu0 %v15968_v32  ;;  %v9908_v48 = vpop.f32.mrb[8].mxu1  ;;  %v15970_v32 = vcombine.high %v12969_v55, %v12959_v17 }
 0x2ae   : > { %v9909_v60 = vpop.f32.mrb[9].mxu1  ;;  %v13336_v62 = vld [vmem:[#allocation2 + $0xf0] sm:$0xff] }
 0x2af   : > { %v1841_v47 = vpop.f32.mrb[40].mxu0  ;;  %v13338_v49 = vadd.f32 %v9909_v60, %v9908_v48  ;;  %v9911_v27 = vpop.f32.mrb[10].mxu1  ;;  %v3223_v61 = vshrl.u32 %v13336_v62, 16  ;;  %v3226_v10 = vshll.u32 %v13336_v62, 16  ;;  %v3232_v48 = vshll.u32 %v13325_v51, 16 }
 0x2b0   : > { %v1952_v26 = vmax.f32 %v1841_v47, 0.0  ;;  %v1843_v13 = vpop.f32.mrb[41].mxu0  ;;  %v9912_v2 = vpop.f32.mrb[11].mxu1  ;;  %v3236_v47 = vshrl.u32 %v13325_v51, 16 }
 0x2b1   : > { %v1953_v20 = vmax.f32 %v1843_v13, 0.0  ;;  %v13340_v57 = vadd.f32 %v9912_v2, %v9911_v27  ;;  %v3228_v22 = vrot.slane %v3226_v10, 5  ;;  %v10972_v2 = vld [vmem:[%s15742_s2 + $0x160] sm:$0xff]   ;;  %v3234_v10 = vrot.slane %v3232_v48, 5 }
 0x2b2   : > { %10112 = vmatprep.subr.bf16.mxu1 %v10972_v2  ;;  %v15971_v48 = vcombine.low %v12969_v55, %v12959_v17  ;;  %v10974_v17 = vld [vmem:[%s15742_s2 + $0x1c8] sm:$0xff]  }
 0x2b3   : > { %v2762_v21 = vld [vmem:[#allocation2 + $0xf8] sm:$0x88]  ;;  %v9868_v24 = vpack.c.bf16 %v1953_v20, %v1952_v26  ;;  %v2875_v19 = vld [vmem:[#allocation2 + $0x100] sm:$0x11]  ;;  %v3225_v26 = vrot.slane %v3223_v61, 4 }
 0x2b4   : > { %v9100_v58 = vrot.slane %v2762_v21, 11  ;;  %4113 = vmatmul.mubr.bf16.gmra.mrb[84].mxu0 %v15969_v6  ;;  %v10971_v20 = vld [vmem:[%s15742_s2 + $0x180] sm:$0xff]   ;;  %v2543_v21 = vld [vmem:[#allocation2 + $0x108] sm:$0xff] }
 0x2b5   : > { %v2310_v0 = vshrl.u32 %v9868_v24, 16  ;;  %4120 = vmatprep.mubr.bf16.mxu0 %v15970_v32  ;;  %v2313_v27 = vshll.u32 %v9868_v24, 16  ;;  %v10973_v61 = vld [vmem:[%s15742_s2 + $0x120] sm:$0xff]   ;;  %10217 = vmatpush3.bf16.msra.mxu0 %v10971_v20  ;;  %v3229_v32 = vor.u32 %v3228_v22, %v3225_v26 }
 0x2b6   : > { %v2876_v60 = vsel %vm12163_vm9, %v9100_v58, %v2875_v19  ;;  %v3238_v58 = vrot.slane %v3236_v47, 4  ;;  %10113 = vmatpush3.bf16.msra.mxu1 %v10973_v61  ;;  %10218 = vmatprep.subr.bf16.mxu0 %v10974_v17 }
 0x2b7   : > { %2877 = vst [vmem:[#allocation2 + $0x100] sm:$0x11] %v2876_v60  ;;  %v13354_v13 = vrot.slane %v2310_v0, 7  ;;  %v4211_v60 = vld [vmem:[#allocation2 + $0xf0] sm:$0xee] }
 0x2b8   : > { %v3239_v50 = vor.u32 %v3238_v58, %v3234_v10  ;;  %v9246_v22 = vrot.slane %v4211_v60, 9 }
 0x2b9   : > { %v2315_v24 = vor.u32 %v2313_v27, %v13354_v13  ;;  %v15972_v27 = vcombine.high %v13056_v28, %v13044_v54 }
 0x2ba   : > { %v9914_v6 = vpop.f32.mrb[12].mxu1  ;;  %v13387_v55 = vsel %vm12218_vm8, %v9246_v22, %v4324_v37 }
 0x2bb   : > { %v2544_v19 = vsel %vm12051_vm2, %v2315_v24, %v2543_v21  ;;  %v9915_v0 = vpop.f32.mrb[13].mxu1  ;;  %v3230_v21 = vrot.slane %v3229_v32, 4  ;;  %v4326_v24 = vrot.slane %v4324_v37, 4  ;;  %15973 = vst [vmem:[#allocation23_spill] sm:$0xff] %v13387_v55  ;;  %v10975_v32 = vld [vmem:[%s15742_s2 + $0x188] sm:$0xff]  }
 0x2bc   : > { %2545 = vst [vmem:[#allocation2 + $0x108] sm:$0xff] %v2544_v19  ;;  %v13372_v36 = vadd.f32 %v9915_v0, %v9914_v6  ;;  %v9917_v38 = vpop.f32.mrb[14].mxu1  ;;  %4121 = vmatmul.mubr.bf16.gmra.mrb[88].mxu0 %v15971_v48 }
 0x2bd   : > { %v9918_v47 = vpop.f32.mrb[15].mxu1  ;;  %4128 = vmatprep.mubr.bf16.mxu0 %v15972_v27  ;;  %10219 = vmatpush3.bf16.msra.mxu0 %v10975_v32  ;;  %v8240_v32 = vld [vmem:[#allocation2 + $0xf0] sm:$0xee] }
 0x2be   : > { %v13380_v20 = vadd.f32 %v9918_v47, %v9917_v38  ;;  %v2973_v26 = vld [vmem:[#allocation2 + $0x100] sm:$0x11]  ;;  %v3240_v38 = vrot.slane %v3239_v50, 4  ;;  %v7375_v47 = vld [vmem:[#allocation2 + $0xf8] sm:$0xff]  ;;  %v3235_v50 = vsel %vm12428_vm13, %v3230_v21, %v3234_v10  ;;  %v10977_v10 = vld [vmem:[%s15742_s2 + $0x128] sm:$0xff]   ;;  %v9756_v37 = vrot.slane %v8240_v32, 9 }
 0x2bf   : > { %v1847_v2 = vpop.f32.mrb[42].mxu0  ;;  %v3242_v61 = vshll.u32 %v2973_v26, 16  ;;  %v4327_v6 = vrot.slane %v2973_v26, 5  ;;  %v10978_v21 = vld [vmem:[%s15742_s2 + $0x1d0] sm:$0xff]  }
 0x2c0   : > { %v1954_v19 = vmax.f32 %v1847_v2, 0.0  ;;  %v1849_v0 = vpop.f32.mrb[43].mxu0  ;;  %10220 = vmatprep.subr.bf16.mxu0 %v10978_v21 }
 0x2c1   : > { %v1955_v58 = vmax.f32 %v1849_v0, 0.0  ;;  %v3244_v48 = vrot.slane %v3242_v61, 5  ;;  %v13394_v60 = vsel %vm12218_vm8, %v4326_v24, %v4327_v6  ;;  %v7376_v61 = vld [vmem:[#allocation2 + $0x100] sm:$0x11]  ;;  %v15975_v24 = vcombine.low %v13056_v28, %v13044_v54 }
 0x2c2   : > { %15974 = vst [vmem:[#allocation24_spill] sm:$0xff] %v13394_v60  ;;  %v15976_v54 = vcombine.high %v13146_v12, %v13131_v46 }
 0x2c3   : > { %v9869_v26 = vpack.c.bf16 %v1955_v58, %v1954_v19  ;;  %v3245_v22 = vsel %vm12428_vm13, %v3240_v38, %v3244_v48  ;;  %v2619_v2 = vld [vmem:[#allocation2 + $0x108] sm:$0x22]  ;;  %v8354_v58 = vrot.slane %v7375_v47, 5  ;;  %v2731_v28 = vld [vmem:[#allocation2 + $0x108] sm:$0x11]  ;;  %v10979_v48 = vld [vmem:[%s15742_s2 + $0x190] sm:$0xff]  }
 0x2c4   : > { %4129 = vmatmul.mubr.bf16.gmra.mrb[92].mxu0 %v15975_v24  ;;  %v9161_v6 = vcombine.high %v3235_v50, %v3245_v22  ;;  %v9160_v0 = vcombine.low %v3235_v50, %v3245_v22  ;;  %v9083_v17 = vrot.slane %v2619_v2, 9  ;;  %v10976_v19 = vld [vmem:[%s15742_s2 + $0x168] sm:$0xff]   ;;  %v8357_v47 = vrot.slane %v7376_v61, 5  ;;  %v2547_v24 = vld [vmem:[#allocation2 + $0x118] sm:$0x11] }
 0x2c5   : > { %v2318_v38 = vshrl.u32 %v9869_v26, 16  ;;  %4136 = vmatprep.mubr.bf16.mxu0 %v15976_v54  ;;  %10114 = vmatprep.subr.bf16.mxu1 %v10976_v19  ;;  %v2321_v2 = vshll.u32 %v9869_v26, 16  ;;  %v10980_v54 = vld [vmem:[%s15742_s2 + $0x1d8] sm:$0xff]   ;;  %v8356_v27 = vrot.slane %v8354_v58, 4  ;;  %v9207_v61 = vcombine.high %v13240_v42, %v13225_v16 }
 0x2c6   : > { %3735 = vmatprep.mubr.bf16.mxu1 %v9161_v6  ;;  %v2732_v50 = vsel %vm12094_vm14, %v9083_v17, %v2731_v28  ;;  %10115 = vmatpush3.bf16.msra.mxu1 %v10977_v10  ;;  %v2316_v6 = vrot.slane %v13354_v13, 4  ;;  %v10981_v26 = vld [vmem:[%s15742_s2 + $0x198] sm:$0xff]  }
 0x2c7   : > { %v2320_v22 = vrot.slane %v2318_v38, 7  ;;  %3736 = vmatmul.mubr.bf16.gmra.mrb[40].mxu1 %v9160_v0  ;;  %2733 = vst [vmem:[#allocation2 + $0x108] sm:$0x11] %v2732_v50  ;;  %10221 = vmatpush3.bf16.msra.mxu0 %v10979_v48  ;;  %v13435_v0 = vsel %vm12218_vm8, %v9756_v37, %v8354_v58  ;;  %v13439_v19 = vsel %vm12218_vm8, %v8356_v27, %v8357_v47  ;;  %v10985_v37 = vld [vmem:[%s15742_s2 + $0x1a0] sm:$0xff]   ;;  %v10987_v50 = vld [vmem:[%s15742_s2 + $0x1a8] sm:$0xff]  }
 0x2c8   : > { %10222 = vmatprep.subr.bf16.mxu0 %v10980_v54  ;;  %15977 = vst [vmem:[#allocation25_spill] sm:$0xff] %v13435_v0  ;;  %15978 = vst [vmem:[#allocation26_spill] sm:$0xff] %v13439_v19  ;;  %v15979_v27 = vcombine.low %v13146_v12, %v13131_v46  ;;  %v10986_v46 = vld [vmem:[%s15742_s2 + $0x1e8] sm:$0xff]  }
 0x2c9   : > { %v2323_v33 = vor.u32 %v2321_v2, %v2320_v22  ;;  %v2325_v17 = vrot.slane %v2320_v22, 4  ;;  %v9206_v22 = vcombine.low %v13240_v42, %v13225_v16 }
 0x2cb   : > { %v13443_v13 = vsel %vm12115_vm10, %v2316_v6, %v2323_v33  ;;  %v2548_v10 = vsel %vm12094_vm14, %v2325_v17, %v2547_v24  ;;  %v10984_v33 = vld [vmem:[%s15742_s2 + $0x1e0] sm:$0xff]   ;;  %10223 = vmatpush3.bf16.msra.mxu0 %v10981_v26  ;;  %v9209_v24 = vcombine.high %v13336_v62, %v13325_v51  ;;  %v10988_v26 = vld [vmem:[%s15742_s2 + $0x1f0] sm:$0xff]  }
 0x2cc   : > { %2546 = vst [vmem:[#allocation2 + $0x110] sm:$0xff] %v13443_v13  ;;  %2549 = vst [vmem:[#allocation2 + $0x118] sm:$0x11] %v2548_v10  ;;  %4137 = vmatmul.mubr.bf16.gmra.mrb[96].mxu0 %v15979_v27  ;;  %10224 = vmatprep.subr.bf16.mxu0 %v10984_v33  ;;  %v3256_v16 = vshll.u32 %v13443_v13, 16  ;;  %v3260_v42 = vshrl.u32 %v13443_v13, 16  ;;  %v10989_v27 = vld [vmem:[%s15742_s2 + $0x1b0] sm:$0xff]  }
 0x2cd   : > { %4144 = vmatprep.mubr.bf16.mxu0 %v9207_v61 }
 0x2ce   : > { %v13461_v32 = vld [vmem:[#allocation2 + $0x108] sm:$0xff] }
 0x2cf   : > { %v1853_v58 = vpop.f32.mrb[44].mxu0  ;;  %10225 = vmatpush3.bf16.msra.mxu0 %v10985_v37  ;;  %v3247_v54 = vshrl.u32 %v13461_v32, 16  ;;  %v3250_v6 = vshll.u32 %v13461_v32, 16 }
 0x2d0   : > { %v1956_v28 = vmax.f32 %v1853_v58, 0.0  ;;  %v1855_v48 = vpop.f32.mrb[45].mxu0  ;;  %10226 = vmatprep.subr.bf16.mxu0 %v10986_v46  ;;  %v2550_v46 = vld [vmem:[#allocation2 + $0x120] sm:$0xff] }
 0x2d1   : > { %v1957_v12 = vmax.f32 %v1855_v48, 0.0  ;;  %v3252_v48 = vrot.slane %v3250_v6, 5  ;;  %v10983_v6 = vld [vmem:[%s15742_s2 + $0x130] sm:$0xff]  }
 0x2d3   : > { %v2763_v2 = vld [vmem:[#allocation2 + $0x110] sm:$0x88]  ;;  %v9870_v47 = vpack.c.bf16 %v1957_v12, %v1956_v28  ;;  %v2878_v61 = vld [vmem:[#allocation2 + $0x118] sm:$0x11]  ;;  %10227 = vmatpush3.bf16.msra.mxu0 %v10987_v50  ;;  %v3249_v28 = vrot.slane %v3247_v54, 4 }
 0x2d4   : > { %v9101_v17 = vrot.slane %v2763_v2, 11  ;;  %4145 = vmatmul.mubr.bf16.gmra.mrb[100].mxu0 %v9206_v22  ;;  %10228 = vmatprep.subr.bf16.mxu0 %v10988_v26  ;;  %v10993_v12 = vld [vmem:[%s15742_s2 + $0x1f8] sm:$0xff]   ;;  %v3258_v22 = vrot.slane %v3256_v16, 5  ;;  %v3262_v2 = vrot.slane %v3260_v42, 4  ;;  %v10982_v54 = vld [vmem:[%s15742_s2 + $0x170] sm:$0xff]   ;;  %v4331_v42 = vrot.slane %v13443_v13, 5 }
 0x2d5   : > { %v2327_v10 = vshrl.u32 %v9870_v47, 16  ;;  %4152 = vmatprep.mubr.bf16.mxu0 %v9209_v24  ;;  %v2330_v58 = vshll.u32 %v9870_v47, 16  ;;  %v10994_v24 = vld [vmem:[%s15742_s2 + $0x1b8] sm:$0xff]   ;;  %v9208_v47 = vcombine.low %v13336_v62, %v13325_v51  ;;  %v9211_v51 = vcombine.high %v13461_v32, %v13443_v13  ;;  %v4212_v16 = vld [vmem:[#allocation2 + $0x108] sm:$0xee]  ;;  %10116 = vmatprep.subr.bf16.mxu1 %v10982_v54  ;;  %v7378_v54 = vld [vmem:[#allocation2 + $0x110] sm:$0xff] }
 0x2d6   : > { %v2879_v33 = vsel %vm12163_vm9, %v9101_v17, %v2878_v61  ;;  %v10995_v26 = vld [vmem:[%s15742_s2 + $0x178] sm:$0xff]   ;;  %v3253_v62 = vor.u32 %v3252_v48, %v3249_v28  ;;  %10117 = vmatpush3.bf16.msra.mxu1 %v10983_v6  ;;  %v9247_v48 = vrot.slane %v4212_v16, 9  ;;  %v4333_v21 = vrot.slane %v4331_v42, 4 }
 0x2d7   : > { %2880 = vst [vmem:[#allocation2 + $0x118] sm:$0x11] %v2879_v33  ;;  %v13485_v37 = vrot.slane %v2327_v10, 7  ;;  %10229 = vmatpush3.bf16.msra.mxu0 %v10989_v27  ;;  %10118 = vmatprep.subr.bf16.mxu1 %v10995_v26  ;;  %v9210_v26 = vcombine.low %v13461_v32, %v13443_v13  ;;  %v8241_v32 = vld [vmem:[#allocation2 + $0x108] sm:$0xee] }
 0x2d8   : > { %10230 = vmatprep.subr.bf16.mxu0 %v10993_v12  ;;  %v3263_v12 = vor.u32 %v3262_v2, %v3258_v22  ;;  %v13519_v2 = vsel %vm12218_vm8, %v9247_v48, %v4331_v42 }
 0x2d9   : > { %v2332_v50 = vor.u32 %v2330_v58, %v13485_v37  ;;  %15980 = vst [vmem:[#allocation27_spill] sm:$0xff] %v13519_v2 }
 0x2da   : > { %v9920_v17 = vpop.f32.mrb[16].mxu1  ;;  %v3264_v19 = vrot.slane %v3263_v12, 4 }
 0x2db   : > { %v2551_v61 = vsel %vm12051_vm2, %v2332_v50, %v2550_v46  ;;  %v9921_v10 = vpop.f32.mrb[17].mxu1  ;;  %v10996_v46 = vld [vmem:[%s15742_s2 + $0x138] sm:$0xff]   ;;  %10231 = vmatpush3.bf16.msra.mxu0 %v10994_v24 }
 0x2dc   : > { %2552 = vst [vmem:[#allocation2 + $0x120] sm:$0xff] %v2551_v61  ;;  %v13510_v27 = vadd.f32 %v9921_v10, %v9920_v17  ;;  %v9923_v33 = vpop.f32.mrb[18].mxu1  ;;  %4153 = vmatmul.mubr.bf16.gmra.mrb[104].mxu0 %v9208_v47  ;;  %v3254_v17 = vrot.slane %v3253_v62, 4  ;;  %10119 = vmatpush3.bf16.msra.mxu1 %v10996_v46 }
 0x2dd   : > { %v9924_v58 = vpop.f32.mrb[19].mxu1  ;;  %4160 = vmatprep.mubr.bf16.mxu0 %v9211_v51 }
 0x2de   : > { %v13515_v50 = vadd.f32 %v9924_v58, %v9923_v33  ;;  %v2974_v28 = vld [vmem:[#allocation2 + $0x118] sm:$0x11]  ;;  %v8361_v58 = vrot.slane %v7378_v54, 5  ;;  %v3259_v12 = vsel %vm12428_vm13, %v3254_v17, %v3258_v22  ;;  %v2554_v17 = vld [vmem:[#allocation2 + $0x130] sm:$0x11] }
 0x2df   : > { %v1859_v61 = vpop.f32.mrb[46].mxu0  ;;  %v3266_v10 = vshll.u32 %v2974_v28, 16  ;;  %v4334_v47 = vrot.slane %v2974_v28, 5 }
 0x2e0   : > { %v1958_v38 = vmax.f32 %v1859_v61, 0.0  ;;  %v1861_v51 = vpop.f32.mrb[47].mxu0 }
 0x2e1   : > { %v1959_v6 = vmax.f32 %v1861_v51, 0.0  ;;  %v3268_v33 = vrot.slane %v3266_v10, 5  ;;  %v13523_v24 = vsel %vm12218_vm8, %v4333_v21, %v4334_v47  ;;  %v7379_v21 = vld [vmem:[#allocation2 + $0x118] sm:$0x11] }
 0x2e2   : > { %15981 = vst [vmem:[#allocation28_spill] sm:$0xff] %v13523_v24  ;;  %v8364_v51 = vrot.slane %v7379_v21, 5 }
 0x2e3   : > { %v9871_v42 = vpack.c.bf16 %v1959_v6, %v1958_v38  ;;  %v3269_v46 = vsel %vm12428_vm13, %v3264_v19, %v3268_v33  ;;  %v2620_v28 = vld [vmem:[#allocation2 + $0x120] sm:$0x22]  ;;  %v2734_v47 = vld [vmem:[#allocation2 + $0x120] sm:$0x11]  ;;  %v8363_v38 = vrot.slane %v8361_v58, 4  ;;  %v9757_v19 = vrot.slane %v8241_v32, 9 }
 0x2e4   : > { %4161 = vmatmul.mubr.bf16.gmra.mrb[108].mxu0 %v9210_v26  ;;  %v9163_v48 = vcombine.high %v3259_v12, %v3269_v46  ;;  %v9162_v61 = vcombine.low %v3259_v12, %v3269_v46  ;;  %v9084_v13 = vrot.slane %v2620_v28, 9  ;;  %v2333_v26 = vrot.slane %v13485_v37, 4  ;;  %v4213_v16 = vld [vmem:[#allocation2 + $0x120] sm:$0xee] }
 0x2e5   : > { %v2335_v10 = vshrl.u32 %v9871_v42, 16  ;;  %v2338_v22 = vshll.u32 %v9871_v42, 16  ;;  %v13539_v33 = vsel %vm12218_vm8, %v8363_v38, %v8364_v51  ;;  %v13544_v28 = vsel %vm12218_vm8, %v9757_v19, %v8361_v58  ;;  %v11002_v19 = vld [vmem:[%s15742_s2 + $0x240] sm:$0xff]  }
 0x2e6   : > { %3743 = vmatprep.mubr.bf16.mxu1 %v9163_v48  ;;  %v2735_v54 = vsel %vm12094_vm14, %v9084_v13, %v2734_v47  ;;  %15982 = vst [vmem:[#allocation29_spill] sm:$0xff] %v13539_v33  ;;  %15983 = vst [vmem:[#allocation30_spill] sm:$0xff] %v13544_v28  ;;  %10328 = vmatprep.subr.bf16.mxu1 %v11002_v19  ;;  %v8242_v0 = vld [vmem:[#allocation2 + $0x120] sm:$0xee] }
 0x2e7   : > { %v2337_v6 = vrot.slane %v2335_v10, 7  ;;  %3744 = vmatmul.mubr.bf16.gmra.mrb[44].mxu1 %v9162_v61  ;;  %2736 = vst [vmem:[#allocation2 + $0x120] sm:$0x11] %v2735_v54 }
 0x2e9   : > { %v2340_v12 = vor.u32 %v2338_v22, %v2337_v6  ;;  %v2342_v46 = vrot.slane %v2337_v6, 4 }
 0x2eb   : > { %v2341_v48 = vsel %vm12115_vm10, %v2333_v26, %v2340_v12  ;;  %v2555_v61 = vsel %vm12094_vm14, %v2342_v46, %v2554_v17 }
 0x2ec   : > { %2553 = vst [vmem:[#allocation2 + $0x128] sm:$0xff] %v2341_v48  ;;  %2556 = vst [vmem:[#allocation2 + $0x130] sm:$0x11] %v2555_v61  ;;  %v3280_v26 = vshll.u32 %v2341_v48, 16  ;;  %v3284_v12 = vshrl.u32 %v2341_v48, 16 }
 0x2ee   : > { %v2923_v37 = vld [vmem:[#allocation2 + $0x120] sm:$0xff]  ;;  %v3286_v21 = vrot.slane %v3284_v12, 4 }
 0x2ef   : > { %v1865_v13 = vpop.f32.mrb[48].mxu0  ;;  %v9213_v32 = vcombine.high %v2923_v37, %v2341_v48  ;;  %v9212_v10 = vcombine.low %v2923_v37, %v2341_v48  ;;  %v3271_v6 = vshrl.u32 %v2923_v37, 16  ;;  %v3274_v22 = vshll.u32 %v2923_v37, 16  ;;  %v2557_v37 = vld [vmem:[#allocation2 + $0x138] sm:$0xff] }
 0x2f0   : > { %v1960_v58 = vmax.f32 %v1865_v13, 0.0  ;;  %v1867_v47 = vpop.f32.mrb[49].mxu0 }
 0x2f1   : > { %v1961_v54 = vmax.f32 %v1867_v47, 0.0  ;;  %4168 = vmatprep.mubr.bf16.mxu0 %v9213_v32  ;;  %v3276_v47 = vrot.slane %v3274_v22, 5 }
 0x2f2   : > { %4169 = vmatmul.mubr.bf16.gmra.mrb[112].mxu0 %v9212_v10 }
 0x2f3   : > { %v2764_v38 = vld [vmem:[#allocation2 + $0x128] sm:$0x88]  ;;  %v9872_v51 = vpack.c.bf16 %v1961_v54, %v1960_v58  ;;  %v2881_v46 = vld [vmem:[#allocation2 + $0x130] sm:$0x11]  ;;  %v3273_v58 = vrot.slane %v3271_v6, 4  ;;  %v3282_v54 = vrot.slane %v3280_v26, 5 }
 0x2f4   : > { %v9102_v17 = vrot.slane %v2764_v38, 11  ;;  %v7381_v62 = vld [vmem:[#allocation2 + $0x128] sm:$0xff] }
 0x2f5   : > { %v2344_v61 = vshrl.u32 %v9872_v51, 16  ;;  %v2347_v10 = vshll.u32 %v9872_v51, 16  ;;  %v3277_v28 = vor.u32 %v3276_v47, %v3273_v58  ;;  %v3287_v6 = vor.u32 %v3286_v21, %v3282_v54 }
 0x2f6   : > { %v2882_v13 = vsel %vm12163_vm9, %v9102_v17, %v2881_v46  ;;  %v4338_v17 = vrot.slane %v2341_v48, 5  ;;  %v8368_v26 = vrot.slane %v7381_v62, 5 }
 0x2f7   : > { %2883 = vst [vmem:[#allocation2 + $0x130] sm:$0x11] %v2882_v13  ;;  %v13559_v32 = vrot.slane %v2344_v61, 7  ;;  %v9248_v61 = vrot.slane %v4213_v16, 9  ;;  %v3278_v24 = vrot.slane %v3277_v28, 4  ;;  %v3288_v47 = vrot.slane %v3287_v6, 4 }
 0x2f9   : > { %v2349_v42 = vor.u32 %v2347_v10, %v13559_v32 }
 0x2fa   : > { %v9926_v38 = vpop.f32.mrb[20].mxu1 }
 0x2fb   : > { %v2558_v19 = vsel %vm12051_vm2, %v2349_v42, %v2557_v37  ;;  %v9927_v33 = vpop.f32.mrb[21].mxu1  ;;  %v4340_v42 = vrot.slane %v4338_v17, 4 }
 0x2fc   : > { %2559 = vst [vmem:[#allocation2 + $0x138] sm:$0xff] %v2558_v19  ;;  %v13564_v46 = vadd.f32 %v9927_v33, %v9926_v38  ;;  %v9929_v51 = vpop.f32.mrb[22].mxu1  ;;  %v13570_v33 = vsel %vm12218_vm8, %v9248_v61, %v4338_v17  ;;  %v8370_v19 = vrot.slane %v8368_v26, 4  ;;  %v3283_v17 = vsel %vm12428_vm13, %v3278_v24, %v3282_v54 }
 0x2fd   : > { %v9930_v22 = vpop.f32.mrb[23].mxu1  ;;  %15984 = vst [vmem:[#allocation31_spill] sm:$0xff] %v13570_v33 }
 0x2fe   : > { %v13566_v12 = vadd.f32 %v9930_v22, %v9929_v51  ;;  %v2975_v13 = vld [vmem:[#allocation2 + $0x130] sm:$0x11]  ;;  %v9758_v51 = vrot.slane %v8242_v0, 9 }
 0x2ff   : > { %v7382_v10 = vld [vmem:[#allocation2 + $0x130] sm:$0x11]  ;;  %v1871_v11 = vpop.f32.mrb[50].mxu0  ;;  %v3290_v2 = vshll.u32 %v2975_v13, 16  ;;  %v4341_v37 = vrot.slane %v2975_v13, 5 }
 0x300   : > { %v1962_v58 = vmax.f32 %v1871_v11, 0.0  ;;  %v1873_v48 = vpop.f32.mrb[51].mxu0  ;;  %v8371_v21 = vrot.slane %v7382_v10, 5  ;;  %v13590_v0 = vsel %vm12218_vm8, %v9758_v51, %v8368_v26 }
 0x301   : > { %v1963_v16 = vmax.f32 %v1873_v48, 0.0  ;;  %v3292_v62 = vrot.slane %v3290_v2, 5  ;;  %v13574_v38 = vsel %vm12218_vm8, %v4340_v42, %v4341_v37  ;;  %15987 = vst [vmem:[#allocation34_spill] sm:$0xff] %v13590_v0 }
 0x302   : > { %15985 = vst [vmem:[#allocation32_spill] sm:$0xff] %v13574_v38  ;;  %v13586_v61 = vsel %vm12218_vm8, %v8370_v19, %v8371_v21 }
 0x303   : > { %v9873_v6 = vpack.c.bf16 %v1963_v16, %v1962_v58  ;;  %v3293_v22 = vsel %vm12428_vm13, %v3288_v47, %v3292_v62  ;;  %v2621_v2 = vld [vmem:[#allocation2 + $0x138] sm:$0x22]  ;;  %15986 = vst [vmem:[#allocation33_spill] sm:$0xff] %v13586_v61  ;;  %v2737_v48 = vld [vmem:[#allocation2 + $0x138] sm:$0x11]  ;;  %v2350_v62 = vrot.slane %v13559_v32, 4 }
 0x304   : > { %v9165_v13 = vcombine.high %v3283_v17, %v3293_v22  ;;  %v9164_v10 = vcombine.low %v3283_v17, %v3293_v22  ;;  %v9085_v42 = vrot.slane %v2621_v2, 9  ;;  %v2561_v16 = vld [vmem:[#allocation2 + $0x148] sm:$0x11]  ;;  %v8243_v38 = vld [vmem:[#allocation2 + $0x138] sm:$0xee] }
 0x305   : > { %v2352_v37 = vshrl.u32 %v9873_v6, 16  ;;  %v2355_v21 = vshll.u32 %v9873_v6, 16 }
 0x306   : > { %3751 = vmatprep.mubr.bf16.mxu1 %v9165_v13  ;;  %v2738_v24 = vsel %vm12094_vm14, %v9085_v42, %v2737_v48 }
 0x307   : > { %v2354_v47 = vrot.slane %v2352_v37, 7  ;;  %3752 = vmatmul.mubr.bf16.gmra.mrb[48].mxu1 %v9164_v10  ;;  %2739 = vst [vmem:[#allocation2 + $0x138] sm:$0x11] %v2738_v24 }
 0x309   : > { %v2357_v19 = vor.u32 %v2355_v21, %v2354_v47  ;;  %v2359_v26 = vrot.slane %v2354_v47, 4 }
 0x30b   : > { %v2358_v51 = vsel %vm12115_vm10, %v2350_v62, %v2357_v19  ;;  %v2562_v17 = vsel %vm12094_vm14, %v2359_v26, %v2561_v16 }
 0x30c   : > { %2560 = vst [vmem:[#allocation2 + $0x140] sm:$0xff] %v2358_v51  ;;  %2563 = vst [vmem:[#allocation2 + $0x148] sm:$0x11] %v2562_v17  ;;  %v3304_v62 = vshll.u32 %v2358_v51, 16  ;;  %v3308_v19 = vshrl.u32 %v2358_v51, 16 }
 0x30e   : > { %v2925_v22 = vld [vmem:[#allocation2 + $0x138] sm:$0xff]  ;;  %v3310_v11 = vrot.slane %v3308_v19, 4 }
 0x30f   : > { %v1877_v2 = vpop.f32.mrb[52].mxu0  ;;  %v9215_v13 = vcombine.high %v2925_v22, %v2358_v51  ;;  %v9214_v42 = vcombine.low %v2925_v22, %v2358_v51  ;;  %v3295_v24 = vshrl.u32 %v2925_v22, 16  ;;  %v3298_v47 = vshll.u32 %v2925_v22, 16 }
 0x310   : > { %v1964_v6 = vmax.f32 %v1877_v2, 0.0  ;;  %v1879_v10 = vpop.f32.mrb[53].mxu0 }
 0x311   : > { %v1965_v37 = vmax.f32 %v1879_v10, 0.0  ;;  %4176 = vmatprep.mubr.bf16.mxu0 %v9215_v13  ;;  %v3297_v58 = vrot.slane %v3295_v24, 4  ;;  %v3300_v10 = vrot.slane %v3298_v47, 5  ;;  %v2564_v13 = vld [vmem:[#allocation2 + $0x150] sm:$0xff] }
 0x312   : > { %4177 = vmatmul.mubr.bf16.gmra.mrb[116].mxu0 %v9214_v42  ;;  %v3306_v42 = vrot.slane %v3304_v62, 5 }
 0x313   : > { %v2765_v32 = vld [vmem:[#allocation2 + $0x140] sm:$0x88]  ;;  %v9874_v48 = vpack.c.bf16 %v1965_v37, %v1964_v6  ;;  %v2884_v54 = vld [vmem:[#allocation2 + $0x148] sm:$0x11]  ;;  %v4214_v37 = vld [vmem:[#allocation2 + $0x138] sm:$0xee]  ;;  %v3301_v0 = vor.u32 %v3300_v10, %v3297_v58 }
 0x314   : > { %v9103_v21 = vrot.slane %v2765_v32, 11  ;;  %v7384_v32 = vld [vmem:[#allocation2 + $0x140] sm:$0xff]  ;;  %v3311_v24 = vor.u32 %v3310_v11, %v3306_v42 }
 0x315   : > { %v2361_v16 = vshrl.u32 %v9874_v48, 16  ;;  %v2364_v2 = vshll.u32 %v9874_v48, 16  ;;  %v8375_v62 = vrot.slane %v7384_v32, 5  ;;  %v3302_v60 = vrot.slane %v3301_v0, 4 }
 0x316   : > { %v2885_v26 = vsel %vm12163_vm9, %v9103_v21, %v2884_v54  ;;  %v4345_v54 = vrot.slane %v2358_v51, 5 }
 0x317   : > { %2886 = vst [vmem:[#allocation2 + $0x148] sm:$0x11] %v2885_v26  ;;  %v13605_v17 = vrot.slane %v2361_v16, 7  ;;  %v9249_v16 = vrot.slane %v4214_v37, 9  ;;  %v8377_v32 = vrot.slane %v8375_v62, 4 }
 0x319   : > { %v2366_v6 = vor.u32 %v2364_v2, %v13605_v17 }
 0x31a   : > { %v9932_v22 = vpop.f32.mrb[24].mxu1 }
 0x31b   : > { %v2565_v28 = vsel %vm12051_vm2, %v2366_v6, %v2564_v13  ;;  %v9933_v61 = vpop.f32.mrb[25].mxu1  ;;  %v4347_v13 = vrot.slane %v4345_v54, 4 }
 0x31c   : > { %2566 = vst [vmem:[#allocation2 + $0x150] sm:$0xff] %v2565_v28  ;;  %v13610_v21 = vadd.f32 %v9933_v61, %v9932_v22  ;;  %v9935_v48 = vpop.f32.mrb[26].mxu1  ;;  %v3312_v28 = vrot.slane %v3311_v24, 4  ;;  %v13616_v61 = vsel %vm12218_vm8, %v9249_v16, %v4345_v54  ;;  %v3307_v54 = vsel %vm12428_vm13, %v3302_v60, %v3306_v42 }
 0x31d   : > { %v9936_v47 = vpop.f32.mrb[27].mxu1  ;;  %15988 = vst [vmem:[#allocation35_spill] sm:$0xff] %v13616_v61 }
 0x31e   : > { %v13612_v19 = vadd.f32 %v9936_v47, %v9935_v48  ;;  %v2976_v26 = vld [vmem:[#allocation2 + $0x148] sm:$0x11]  ;;  %v9759_v48 = vrot.slane %v8243_v38, 9  ;;  %v11031_v38 = vld [vmem:[%s15742_s2 + $0x2c0] sm:$0xff]  }
 0x31f   : > { %v7385_v2 = vld [vmem:[#allocation2 + $0x148] sm:$0x11]  ;;  %v1883_v33 = vpop.f32.mrb[54].mxu0  ;;  %v3314_v55 = vshll.u32 %v2976_v26, 16  ;;  %v4348_v6 = vrot.slane %v2976_v26, 5  ;;  %10440 = vmatprep.subr.bf16.mxu0 %v11031_v38 }
 0x320   : > { %v1966_v58 = vmax.f32 %v1883_v33, 0.0  ;;  %v1885_v51 = vpop.f32.mrb[55].mxu0  ;;  %v8378_v11 = vrot.slane %v7385_v2, 5  ;;  %v13639_v60 = vsel %vm12218_vm8, %v9759_v48, %v8375_v62 }
 0x321   : > { %v1967_v10 = vmax.f32 %v1885_v51, 0.0  ;;  %v3316_v22 = vrot.slane %v3314_v55, 5  ;;  %v13620_v37 = vsel %vm12218_vm8, %v4347_v13, %v4348_v6  ;;  %15991 = vst [vmem:[#allocation38_spill] sm:$0xff] %v13639_v60 }
 0x322   : > { %15989 = vst [vmem:[#allocation36_spill] sm:$0xff] %v13620_v37  ;;  %v13632_v16 = vsel %vm12218_vm8, %v8377_v32, %v8378_v11  ;;  %v2367_v32 = vrot.slane %v13605_v17, 4 }
 0x323   : > { %v9875_v24 = vpack.c.bf16 %v1967_v10, %v1966_v58  ;;  %v3317_v47 = vsel %vm12428_vm13, %v3312_v28, %v3316_v22  ;;  %v2622_v55 = vld [vmem:[#allocation2 + $0x150] sm:$0x22]  ;;  %15990 = vst [vmem:[#allocation37_spill] sm:$0xff] %v13632_v16  ;;  %v2740_v51 = vld [vmem:[#allocation2 + $0x150] sm:$0x11] }
 0x324   : > { %v9167_v26 = vcombine.high %v3307_v54, %v3317_v47  ;;  %v9166_v2 = vcombine.low %v3307_v54, %v3317_v47  ;;  %v9086_v13 = vrot.slane %v2622_v55, 9  ;;  %v2568_v22 = vld [vmem:[#allocation2 + $0x160] sm:$0x11] }
 0x325   : > { %v2369_v6 = vshrl.u32 %v9875_v24, 16  ;;  %v2372_v10 = vshll.u32 %v9875_v24, 16 }
 0x326   : > { %3759 = vmatprep.mubr.bf16.mxu1 %v9167_v26  ;;  %v2741_v42 = vsel %vm12094_vm14, %v9086_v13, %v2740_v51 }
 0x327   : > { %v2371_v11 = vrot.slane %v2369_v6, 7  ;;  %3760 = vmatmul.mubr.bf16.gmra.mrb[52].mxu1 %v9166_v2  ;;  %2742 = vst [vmem:[#allocation2 + $0x150] sm:$0x11] %v2741_v42 }
 0x329   : > { %v2374_v62 = vor.u32 %v2372_v10, %v2371_v11  ;;  %v2376_v48 = vrot.slane %v2371_v11, 4 }
 0x32b   : > { %v2375_v54 = vsel %vm12115_vm10, %v2367_v32, %v2374_v62  ;;  %v2569_v47 = vsel %vm12094_vm14, %v2376_v48, %v2568_v22 }
 0x32c   : > { %2567 = vst [vmem:[#allocation2 + $0x158] sm:$0xff] %v2375_v54  ;;  %2570 = vst [vmem:[#allocation2 + $0x160] sm:$0x11] %v2569_v47  ;;  %v3328_v58 = vshll.u32 %v2375_v54, 16  ;;  %v3332_v22 = vshrl.u32 %v2375_v54, 16  ;;  %v4352_v33 = vrot.slane %v2375_v54, 5 }
 0x32e   : > { %v2927_v55 = vld [vmem:[#allocation2 + $0x150] sm:$0xff]  ;;  %v4354_v37 = vrot.slane %v4352_v33, 4 }
 0x32f   : > { %v1889_v26 = vpop.f32.mrb[56].mxu0  ;;  %v9217_v13 = vcombine.high %v2927_v55, %v2375_v54  ;;  %v9216_v24 = vcombine.low %v2927_v55, %v2375_v54  ;;  %v3319_v42 = vshrl.u32 %v2927_v55, 16  ;;  %v3322_v11 = vshll.u32 %v2927_v55, 16  ;;  %v2601_v55 = vld [vmem:[#allocation2 + $0x198] sm:$0xff] }
 0x330   : > { %v1968_v2 = vmax.f32 %v1889_v26, 0.0  ;;  %v1891_v6 = vpop.f32.mrb[57].mxu0 }
 0x331   : > { %v1969_v51 = vmax.f32 %v1891_v6, 0.0  ;;  %4184 = vmatprep.mubr.bf16.mxu0 %v9217_v13  ;;  %v3321_v28 = vrot.slane %v3319_v42, 4  ;;  %v3324_v6 = vrot.slane %v3322_v11, 5  ;;  %v2571_v13 = vld [vmem:[#allocation2 + $0x168] sm:$0xff] }
 0x332   : > { %4185 = vmatmul.mubr.bf16.gmra.mrb[120].mxu0 %v9216_v24 }
 0x333   : > { %v2766_v17 = vld [vmem:[#allocation2 + $0x158] sm:$0x88]  ;;  %v9876_v38 = vpack.c.bf16 %v1969_v51, %v1968_v2  ;;  %v2887_v32 = vld [vmem:[#allocation2 + $0x160] sm:$0x11]  ;;  %v3330_v2 = vrot.slane %v3328_v58, 5  ;;  %v3334_v51 = vrot.slane %v3332_v22, 4 }
 0x334   : > { %v9104_v10 = vrot.slane %v2766_v17, 11 }
 0x335   : > { %v2378_v62 = vshrl.u32 %v9876_v38, 16  ;;  %v2381_v26 = vshll.u32 %v9876_v38, 16 }
 0x336   : > { %v2888_v48 = vsel %vm12163_vm9, %v9104_v10, %v2887_v32  ;;  %v3325_v10 = vor.u32 %v3324_v6, %v3321_v28  ;;  %v4215_v32 = vld [vmem:[#allocation2 + $0x150] sm:$0xee] }
 0x337   : > { %2889 = vst [vmem:[#allocation2 + $0x160] sm:$0x11] %v2888_v48  ;;  %v13654_v47 = vrot.slane %v2378_v62, 7 }
 0x338   : > { %v3326_v6 = vrot.slane %v3325_v10, 4 }
 0x339   : > { %v2383_v24 = vor.u32 %v2381_v26, %v13654_v47  ;;  %v3335_v26 = vor.u32 %v3334_v51, %v3330_v2 }
 0x33a   : > { %v9938_v17 = vpop.f32.mrb[28].mxu1 }
 0x33b   : > { %v2572_v0 = vsel %vm12051_vm2, %v2383_v24, %v2571_v13  ;;  %v1895_v16 = vpop.f32.mrb[58].mxu0  ;;  %v9939_v60 = vpop.f32.mrb[29].mxu1  ;;  %v9250_v24 = vrot.slane %v4215_v32, 9 }
 0x33c   : > { %2573 = vst [vmem:[#allocation2 + $0x168] sm:$0xff] %v2572_v0  ;;  %v1970_v62 = vmax.f32 %v1895_v16, 0.0  ;;  %v13659_v38 = vadd.f32 %v9939_v60, %v9938_v17  ;;  %v1897_v42 = vpop.f32.mrb[59].mxu0  ;;  %v9941_v11 = vpop.f32.mrb[30].mxu1  ;;  %v2602_v58 = vsel %vm12051_vm2, %v2572_v0, %v2601_v55  ;;  %v7387_v60 = vld [vmem:[#allocation2 + $0x158] sm:$0xff]  ;;  %v3336_v0 = vrot.slane %v3335_v26, 4 }
 0x33d   : > { %v1971_v22 = vmax.f32 %v1897_v42, 0.0  ;;  %v9942_v48 = vpop.f32.mrb[31].mxu1  ;;  %2603 = vst [vmem:[#allocation2 + $0x198] sm:$0xff] %v2602_v58  ;;  %v13667_v17 = vsel %vm12218_vm8, %v9250_v24, %v4352_v33  ;;  %v3331_v33 = vsel %vm12428_vm13, %v3326_v6, %v3330_v2  ;;  %v2384_v24 = vrot.slane %v13654_v47, 4 }
 0x33e   : > { %v13663_v54 = vadd.f32 %v9942_v48, %v9941_v11  ;;  %v2977_v13 = vld [vmem:[#allocation2 + $0x160] sm:$0x11]  ;;  %15992 = vst [vmem:[#allocation39_spill] sm:$0xff] %v13667_v17  ;;  %v2575_v48 = vld [vmem:[#allocation2 + $0x178] sm:$0x11] }
 0x33f   : > { %v9877_v28 = vpack.c.bf16 %v1971_v22, %v1970_v62  ;;  %v3338_v61 = vshll.u32 %v2977_v13, 16  ;;  %v4355_v16 = vrot.slane %v2977_v13, 5  ;;  %v8382_v62 = vrot.slane %v7387_v60, 5  ;;  %v7388_v13 = vld [vmem:[#allocation2 + $0x160] sm:$0x11] }
 0x340   : > { %v8244_v60 = vld [vmem:[#allocation2 + $0x150] sm:$0xee]  ;;  %v11033_v17 = vld [vmem:[%s15742_s2 + $0x280] sm:$0xff]  }
 0x341   : > { %v2386_v4 = vshrl.u32 %v9877_v28, 16  ;;  %v3340_v55 = vrot.slane %v3338_v61, 5  ;;  %v13671_v51 = vsel %vm12218_vm8, %v4354_v37, %v4355_v16  ;;  %v2389_v58 = vshll.u32 %v9877_v28, 16 }
 0x342   : > { %15993 = vst [vmem:[#allocation40_spill] sm:$0xff] %v13671_v51  ;;  %v8384_v2 = vrot.slane %v8382_v62, 4 }
 0x343   : > { %v2623_v42 = vld [vmem:[#allocation2 + $0x168] sm:$0x22]  ;;  %v2388_v11 = vrot.slane %v2386_v4, 7  ;;  %v3341_v61 = vsel %vm12428_vm13, %v3336_v0, %v3340_v55  ;;  %v2743_v10 = vld [vmem:[#allocation2 + $0x168] sm:$0x11]  ;;  %v8385_v55 = vrot.slane %v7388_v13, 5 }
 0x344   : > { %v9087_v22 = vrot.slane %v2623_v42, 9  ;;  %v9169_v37 = vcombine.high %v3331_v33, %v3341_v61  ;;  %v9168_v26 = vcombine.low %v3331_v33, %v3341_v61  ;;  %v2625_v28 = vld [vmem:[#allocation2 + $0x198] sm:$0x22]  ;;  %v2749_v42 = vld [vmem:[#allocation2 + $0x198] sm:$0x11] }
 0x345   : > { %v2391_v16 = vor.u32 %v2389_v58, %v2388_v11  ;;  %v2393_v32 = vrot.slane %v2388_v11, 4  ;;  %v9089_v47 = vrot.slane %v2625_v28, 9  ;;  %v13696_v58 = vsel %vm12218_vm8, %v8384_v2, %v8385_v55 }
 0x346   : > { %3767 = vmatprep.mubr.bf16.mxu1 %v9169_v37  ;;  %v2744_v4 = vsel %vm12094_vm14, %v9087_v22, %v2743_v10  ;;  %v9760_v10 = vrot.slane %v8244_v60, 9  ;;  %15994 = vst [vmem:[#allocation41_spill] sm:$0xff] %v13696_v58  ;;  %v2605_v22 = vld [vmem:[#allocation2 + $0x1a8] sm:$0x11] }
 0x347   : > { %v13686_v6 = vsel %vm12115_vm10, %v2384_v24, %v2391_v16  ;;  %v2576_v0 = vsel %vm12094_vm14, %v2393_v32, %v2575_v48  ;;  %3768 = vmatmul.mubr.bf16.gmra.mrb[56].mxu1 %v9168_v26  ;;  %2745 = vst [vmem:[#allocation2 + $0x168] sm:$0x11] %v2744_v4  ;;  %v2750_v11 = vsel %vm12094_vm14, %v9089_v47, %v2749_v42  ;;  %v10992_v4 = vld [vmem:[#allocation2 + $0x1c] ss:$8 sps:$4 sm:$0xff]  }
 0x348   : > { %2574 = vst [vmem:[#allocation2 + $0x170] sm:$0xff] %v13686_v6  ;;  %2577 = vst [vmem:[#allocation2 + $0x178] sm:$0x11] %v2576_v0  ;;  %v13700_v32 = vsel %vm12218_vm8, %v9760_v10, %v8382_v62  ;;  %v3352_v2 = vshll.u32 %v13686_v6, 16  ;;  %v3356_v10 = vshrl.u32 %v13686_v6, 16 }
 0x349   : > { %2604 = vst [vmem:[#allocation2 + $0x1a0] sm:$0xff] %v13686_v6  ;;  %2751 = vst [vmem:[#allocation2 + $0x198] sm:$0x11] %v2750_v11 }
 0x34a   : > { %15995 = vst [vmem:[#allocation42_spill] sm:$0xff] %v13700_v32  ;;  %v3358_v58 = vrot.slane %v3356_v10, 4 }
 0x34e   : > { %v13706_v48 = vld [vmem:[#allocation2 + $0x168] sm:$0xff] }
 0x34f   : > { %15996 = vst [vmem:[#allocation43_spill] sm:$0xff] %v13706_v48  ;;  %v2599_v37 = vld [vmem:[#allocation2 + $0x178] sm:$0x11]  ;;  %v2767_v26 = vld [vmem:[#allocation2 + $0x170] sm:$0x88]  ;;  %v9219_v13 = vcombine.high %v13706_v48, %v13686_v6  ;;  %v9218_v24 = vcombine.low %v13706_v48, %v13686_v6  ;;  %v3343_v60 = vshrl.u32 %v13706_v48, 16 }
 0x350   : > { %v2606_v62 = vsel %vm12094_vm14, %v2599_v37, %v2605_v22  ;;  %v9105_v16 = vrot.slane %v2767_v26, 11  ;;  %v1901_v28 = vpop.f32.mrb[60].mxu0  ;;  %v2890_v0 = vld [vmem:[#allocation2 + $0x178] sm:$0x11]  ;;  %v3346_v47 = vshll.u32 %v13706_v48, 16 }
 0x351   : > { %2607 = vst [vmem:[#allocation2 + $0x1a8] sm:$0x11] %v2606_v62  ;;  %4192 = vmatprep.mubr.bf16.mxu0 %v9219_v13  ;;  %v1972_v55 = vmax.f32 %v1901_v28, 0.0  ;;  %v1903_v42 = vpop.f32.mrb[61].mxu0  ;;  %v3345_v37 = vrot.slane %v3343_v60, 4  ;;  %v3354_v62 = vrot.slane %v3352_v2, 5 }
 0x352   : > { %v2891_v11 = vsel %vm12163_vm9, %v9105_v16, %v2890_v0  ;;  %4193 = vmatmul.mubr.bf16.gmra.mrb[124].mxu0 %v9218_v24  ;;  %v1973_v22 = vmax.f32 %v1903_v42, 0.0  ;;  %v3348_v26 = vrot.slane %v3346_v47, 5  ;;  %v2769_v33 = vld [vmem:[#allocation2 + $0x1a0] sm:$0x88]  ;;  %v4216_v48 = vld [vmem:[#allocation2 + $0x168] sm:$0xee] }
 0x353   : > { %2892 = vst [vmem:[#allocation2 + $0x178] sm:$0x11] %v2891_v11  ;;  %5167 = vmatprep.mubr.bf16.mxu0 %v10992_v4  ;;  %v9107_v13 = vrot.slane %v2769_v33, 11  ;;  %v4359_v24 = vrot.slane %v13686_v6, 5  ;;  %v10990_v0 = vld [vmem:[#allocation2 + $0x18] ss:$8 sps:$4 sm:$0xff]   ;;  %v3359_v47 = vor.u32 %v3358_v58, %v3354_v62 }
 0x354   : > { %v9878_v61 = vpack.c.bf16 %v1973_v22, %v1972_v55  ;;  %v3349_v28 = vor.u32 %v3348_v26, %v3345_v37  ;;  %v11041_v60 = vld [vmem:[%s15742_s2 + $0x2c8] sm:$0xff]   ;;  %v2578_v33 = vld [vmem:[#allocation2 + $0x180] sm:$0xff]  ;;  %v10997_v2 = vld [vmem:[#allocation2 + $0x34] ss:$8 sps:$4 sm:$0xff]   ;;  %v9251_v10 = vrot.slane %v4216_v48, 9 }
 0x355   : > { %v11051_v48 = vld [vmem:[%s15742_s2 + $0x2d0] sm:$0xff]  }
 0x356   : > { %v2395_v32 = vshrl.u32 %v9878_v61, 16  ;;  %v2398_v51 = vshll.u32 %v9878_v61, 16  ;;  %v3350_v37 = vrot.slane %v3349_v28, 4  ;;  %v13744_v28 = vsel %vm12218_vm8, %v9251_v10, %v4359_v24 }
 0x358   : > { %v2896_v16 = vld [vmem:[#allocation2 + $0x1a8] sm:$0x11]  ;;  %v13724_v4 = vrot.slane %v2395_v32, 7  ;;  %v3355_v10 = vsel %vm12428_vm13, %v3350_v37, %v3354_v62  ;;  %v11055_v62 = vld [vmem:[%s15742_s2 + $0x2d8] sm:$0xff]  }
 0x359   : > { %v2897_v61 = vsel %vm12163_vm9, %v9107_v13, %v2896_v16  ;;  %v11043_v32 = vld [vmem:[%s15742_s2 + $0x288] sm:$0xff]   ;;  %v4361_v13 = vrot.slane %v4359_v24, 4 }
 0x35a   : > { %2898 = vst [vmem:[#allocation2 + $0x1a8] sm:$0x11] %v2897_v61  ;;  %v9944_v55 = vpop.f32.mrb[32].mxu1  ;;  %5168 = vmatmul.mubr.bf16.vlgmr.msra.gmra.mrb[128].mxu0 %v10990_v0  ;;  %v2400_v42 = vor.u32 %v2398_v51, %v13724_v4  ;;  %v2978_v6 = vld [vmem:[#allocation2 + $0x178] sm:$0x11]  ;;  %v2401_v37 = vrot.slane %v13724_v4, 4 }
 0x35b   : > { %v9945_v11 = vpop.f32.mrb[33].mxu1  ;;  %5175 = vmatprep.mubr.bf16.mxu0 %v10997_v2  ;;  %v1907_v22 = vpop.f32.mrb[62].mxu0  ;;  %v3362_v26 = vshll.u32 %v2978_v6, 16  ;;  %10441 = vmatpush3.bf16.msra.mxu0 %v11033_v17  ;;  %v4362_v16 = vrot.slane %v2978_v6, 5 }
 0x35c   : > { %v13735_v58 = vadd.f32 %v9945_v11, %v9944_v55  ;;  %v2579_v0 = vsel %vm12051_vm2, %v2400_v42, %v2578_v33  ;;  %v9947_v51 = vpop.f32.mrb[34].mxu1  ;;  %v1974_v61 = vmax.f32 %v1907_v22, 0.0  ;;  %v1909_v41 = vpop.f32.mrb[63].mxu0  ;;  %10442 = vmatprep.subr.bf16.mxu0 %v11041_v60  ;;  %v3360_v55 = vrot.slane %v3359_v47, 4 }
 0x35d   : > { %2580 = vst [vmem:[#allocation2 + $0x180] sm:$0xff] %v2579_v0  ;;  %v9948_v17 = vpop.f32.mrb[35].mxu1  ;;  %v1975_v2 = vmax.f32 %v1909_v41, 0.0  ;;  %v3364_v6 = vrot.slane %v3362_v26, 5  ;;  %v13748_v29 = vsel %vm12218_vm8, %v4361_v13, %v4362_v16  ;;  %v10999_v13 = vld [vmem:[#allocation2 + $0x30] ss:$8 sps:$4 sm:$0xff]  }
 0x35e   : > { %v13750_v33 = vadd.f32 %v9948_v17, %v9947_v51  ;;  %v11053_v16 = vld [vmem:[%s15742_s2 + $0x290] sm:$0xff]  }
 0x35f   : > { %v9879_v11 = vpack.c.bf16 %v1975_v2, %v1974_v61  ;;  %v10008_v24 = vpop.f32.mrb[64].mxu0  ;;  %v3365_v41 = vsel %vm12428_vm13, %v3360_v55, %v3364_v6  ;;  %10443 = vmatpush3.bf16.msra.mxu0 %v11043_v32  ;;  %v11000_v2 = vld [vmem:[#allocation2 + $0x4c] ss:$8 sps:$4 sm:$0xff]  }
 0x360   : > { %v10009_v47 = vpop.f32.mrb[65].mxu0  ;;  %v9171_v22 = vcombine.high %v3355_v10, %v3365_v41  ;;  %v9170_v26 = vcombine.low %v3355_v10, %v3365_v41  ;;  %10444 = vmatprep.subr.bf16.mxu0 %v11051_v48  ;;  %v2582_v48 = vld [vmem:[#allocation2 + $0x190] sm:$0x11]  ;;  %v15997_v41 = vcombine.high %v12442_v39, %v12457_v7 }
 0x361   : > { %v2403_v0 = vshrl.u32 %v9879_v11, 16  ;;  %v2406_v51 = vshll.u32 %v9879_v11, 16  ;;  %v10010_v61 = vadd.f32 %v10009_v47, %v10008_v24  ;;  %v10011_v17 = vpop.f32.mrb[66].mxu0  ;;  %v11056_v47 = vld [vmem:[%s15742_s2 + $0x298] sm:$0xff]  }
 0x362   : > { %3775 = vmatprep.mubr.bf16.mxu1 %v9171_v22  ;;  %v10012_v32 = vpop.f32.mrb[67].mxu0  ;;  %5176 = vmatmul.mubr.bf16.gmra.mrb[132].mxu0 %v10999_v13 }
 0x363   : > { %v2405_v55 = vrot.slane %v2403_v0, 7  ;;  %v10013_v6 = vadd.f32 %v10012_v32, %v10011_v17  ;;  %3776 = vmatmul.mubr.bf16.gmra.mrb[60].mxu1 %v9170_v26  ;;  %5183 = vmatprep.mubr.bf16.mxu0 %v11000_v2  ;;  %v13768_v10 = vadd.f32 %v10010_v61, %v13278_v15  ;;  %v11060_v15 = vld [vmem:[%s15742_s2 + $0x2e0] sm:$0xff]   ;;  %v11003_v17 = vld [vmem:[#allocation2 + $0x48] ss:$8 sps:$4 sm:$0xff]  }
 0x364   : > { %v2624_v11 = vld [vmem:[#allocation2 + $0x180] sm:$0x22]  ;;  %v2746_v24 = vld [vmem:[#allocation2 + $0x180] sm:$0x11]  ;;  %4653 = vmatprep.mubr.bf16.mxu1 %v15997_v41  ;;  %10445 = vmatpush3.bf16.msra.mxu0 %v11053_v16  ;;  %v7390_v32 = vld [vmem:[#allocation2 + $0x170] sm:$0xff] }
 0x365   : > { %v9088_v4 = vrot.slane %v2624_v11, 9  ;;  %v2408_v22 = vor.u32 %v2406_v51, %v2405_v55  ;;  %v2410_v13 = vrot.slane %v2405_v55, 4  ;;  %10446 = vmatprep.subr.bf16.mxu0 %v11055_v62  ;;  %v13780_v26 = vadd.f32 %v10013_v6, %v13288_v30  ;;  %v11004_v30 = vld [vmem:[%s15742_s2 + $0x200] sm:$0xff]   ;;  %v11062_v11 = vld [vmem:[%s15742_s2 + $0x2e8] sm:$0xff]  }
 0x366   : > { %v11005_v62 = vld [vmem:[#allocation2 + $0x64] ss:$8 sps:$4 sm:$0xff]  }
 0x367   : > { %v2747_v0 = vsel %vm12094_vm14, %v9088_v4, %v2746_v24  ;;  %v13786_v16 = vsel %vm12115_vm10, %v2401_v37, %v2408_v22  ;;  %v2583_v61 = vsel %vm12094_vm14, %v2410_v13, %v2582_v48  ;;  %v10014_v51 = vpop.f32.mrb[68].mxu0  ;;  %v11061_v55 = vld [vmem:[%s15742_s2 + $0x2a0] sm:$0xff]   ;;  %v7391_v48 = vld [vmem:[#allocation2 + $0x178] sm:$0x11]  ;;  %v15998_v4 = vcombine.low %v12442_v39, %v12457_v7  ;;  %v8245_v22 = vld [vmem:[#allocation2 + $0x168] sm:$0xee] }
 0x368   : > { %2748 = vst [vmem:[#allocation2 + $0x180] sm:$0x11] %v2747_v0  ;;  %2581 = vst [vmem:[#allocation2 + $0x188] sm:$0xff] %v13786_v16  ;;  %v10015_v2 = vpop.f32.mrb[69].mxu0  ;;  %10447 = vmatpush3.bf16.msra.mxu0 %v11056_v47  ;;  %v7396_v24 = vld [vmem:[#allocation2 + $0x1a0] sm:$0xff]  ;;  %v8389_v13 = vrot.slane %v7390_v32, 5  ;;  %v15999_v0 = vcombine.high %v12238_v59, %v12242_v14 }
 0x369   : > { %2584 = vst [vmem:[#allocation2 + $0x190] sm:$0x11] %v2583_v61  ;;  %v10016_v40 = vadd.f32 %v10015_v2, %v10014_v51  ;;  %v10017_v37 = vpop.f32.mrb[70].mxu0  ;;  %10448 = vmatprep.subr.bf16.mxu0 %v11060_v15  ;;  %v8247_v15 = vld [vmem:[#allocation2 + $0x198] sm:$0xee]  ;;  %v11012_v61 = vld [vmem:[%s15742_s2 + $0x208] sm:$0xff]  }
 0x36a   : > { %v10018_v6 = vpop.f32.mrb[71].mxu0  ;;  %5184 = vmatmul.mubr.bf16.gmra.mrb[136].mxu0 %v11003_v17  ;;  %v8392_v51 = vrot.slane %v7391_v48, 5  ;;  %v11018_v39 = vld [vmem:[%s15742_s2 + $0x250] sm:$0xff]   ;;  %v11063_v7 = vld [vmem:[%s15742_s2 + $0x2a8] sm:$0xff]   ;;  %v8391_v2 = vrot.slane %v8389_v13, 4  ;;  %v9761_v32 = vrot.slane %v8245_v22, 9 }
 0x36b   : > { %v13804_v41 = vadd.f32 %v10016_v40, %v13307_v34  ;;  %v10019_v47 = vadd.f32 %v10018_v6, %v10017_v37  ;;  %4654 = vmatmul.mubr.bf16.vlgmr.msra.gmra.mrb[64].mxu1 %v15998_v4  ;;  %5191 = vmatprep.mubr.bf16.mxu0 %v11005_v62  ;;  %v7397_v34 = vld [vmem:[#allocation2 + $0x1a8] sm:$0x11]  ;;  %v11064_v62 = vld [vmem:[%s15742_s2 + $0x2f0] sm:$0xff]   ;;  %v11008_v22 = vld [vmem:[#allocation2 + $0x7c] ss:$8 sps:$4 sm:$0xff]  }
 0x36c   : > { %10329 = vmatpush3.bf16.msra.mxu1 %v11004_v30  ;;  %4661 = vmatprep.mubr.bf16.mxu1 %v15999_v0  ;;  %v8403_v30 = vrot.slane %v7396_v24, 5  ;;  %v13829_v48 = vsel %vm12218_vm8, %v8391_v2, %v8392_v51  ;;  %v11007_v4 = vld [vmem:[#allocation2 + $0x60] ss:$8 sps:$4 sm:$0xff]  }
 0x36d   : > { %v13816_v17 = vadd.f32 %v10019_v47, %v13317_v43  ;;  %10330 = vmatprep.subr.bf16.mxu1 %v11010_v25  ;;  %10449 = vmatpush3.bf16.msra.mxu0 %v11061_v55  ;;  %v9763_v43 = vrot.slane %v8247_v15, 9  ;;  %16000 = vst [vmem:[#allocation44_spill] sm:$0xff] %v13829_v48  ;;  %v8406_v55 = vrot.slane %v7397_v34, 5  ;;  %v11026_v15 = vld [vmem:[%s15742_s2 + $0x258] sm:$0xff]   ;;  %v11065_v34 = vld [vmem:[%s15742_s2 + $0x2b0] sm:$0xff]  }
 0x36e   : > { %10450 = vmatprep.subr.bf16.mxu0 %v11062_v11  ;;  %v11020_v11 = vld [vmem:[%s15742_s2 + $0x210] sm:$0xff]   ;;  %v8405_v2 = vrot.slane %v8403_v30, 4 }
 0x36f   : > { %v2768_v40 = vld [vmem:[#allocation2 + $0x188] sm:$0x88]  ;;  %v10020_v25 = vpop.f32.mrb[72].mxu0  ;;  %v13846_v51 = vsel %vm12218_vm8, %v9763_v43, %v8403_v30  ;;  %v16005_v43 = vcombine.high %v12398_v44, %v12402_v45 }
 0x370   : > { %v2893_v37 = vld [vmem:[#allocation2 + $0x190] sm:$0x11]  ;;  %v9106_v6 = vrot.slane %v2768_v40, 11  ;;  %v10021_v47 = vpop.f32.mrb[73].mxu0  ;;  %10331 = vmatpush3.bf16.msra.mxu1 %v11012_v61  ;;  %v13842_v61 = vsel %vm12218_vm8, %v9761_v32, %v8389_v13  ;;  %16002 = vst [vmem:[#allocation46_spill] sm:$0xff] %v13846_v51 }
 0x371   : > { %v10022_v24 = vadd.f32 %v10021_v47, %v10020_v25  ;;  %v10023_v0 = vpop.f32.mrb[74].mxu0  ;;  %10332 = vmatprep.subr.bf16.mxu1 %v11018_v39  ;;  %10451 = vmatpush3.bf16.msra.mxu0 %v11063_v7  ;;  %16001 = vst [vmem:[#allocation45_spill] sm:$0xff] %v13842_v61  ;;  %v11066_v7 = vld [vmem:[%s15742_s2 + $0x2f8] sm:$0xff]  }
 0x372   : > { %v2894_v39 = vsel %vm12163_vm9, %v9106_v6, %v2893_v37  ;;  %v10024_v40 = vpop.f32.mrb[75].mxu0  ;;  %5192 = vmatmul.mubr.bf16.gmra.mrb[140].mxu0 %v11007_v4  ;;  %10452 = vmatprep.subr.bf16.mxu0 %v11064_v62  ;;  %v13865_v62 = vsel %vm12218_vm8, %v8405_v2, %v8406_v55  ;;  %v11036_v55 = vld [vmem:[%s15742_s2 + $0x260] sm:$0xff]   ;;  %v11067_v6 = vld [vmem:[%s15742_s2 + $0x2b8] sm:$0xff]  }
 0x373   : > { %2895 = vst [vmem:[#allocation2 + $0x190] sm:$0x11] %v2894_v39  ;;  %v13858_v32 = vadd.f32 %v10022_v24, %v13338_v49  ;;  %v10025_v30 = vadd.f32 %v10024_v40, %v10023_v0  ;;  %4662 = vmatmul.mubr.bf16.gmra.mrb[68].mxu1 %v16003_v1  ;;  %5199 = vmatprep.mubr.bf16.mxu0 %v11008_v22  ;;  %16004 = vst [vmem:[#allocation47_spill] sm:$0xff] %v13865_v62  ;;  %v11028_v49 = vld [vmem:[%s15742_s2 + $0x218] sm:$0xff]  }
 0x374   : > { %4669 = vmatprep.mubr.bf16.mxu1 %v16005_v43  ;;  %10333 = vmatpush3.bf16.msra.mxu1 %v11020_v11  ;;  %v11011_v11 = vld [vmem:[#allocation2 + $0x78] ss:$8 sps:$4 sm:$0xff]   ;;  %v11013_v22 = vld [vmem:[#allocation2 + $0x94] ss:$8 sps:$4 sm:$0xff]  }
 0x375   : > { %v13878_v14 = vadd.f32 %v10025_v30, %v13340_v57  ;;  %10334 = vmatprep.subr.bf16.mxu1 %v11026_v15  ;;  %10453 = vmatpush3.bf16.msra.mxu0 %v11065_v34  ;;  %v11038_v57 = vld [vmem:[%s15742_s2 + $0x220] sm:$0xff]   ;;  %v11046_v15 = vld [vmem:[%s15742_s2 + $0x268] sm:$0xff]   ;;  %v16006_v30 = vcombine.low %v12398_v44, %v12402_v45  ;;  %v11057_v44 = vld [vmem:[%s15742_s2 + $0x270] sm:$0xff]  }
 0x376   : > { %10454 = vmatprep.subr.bf16.mxu0 %v11066_v7 }
 0x377   : > { %v10026_v47 = vpop.f32.mrb[76].mxu0 }
 0x378   : > { %v10027_v4 = vpop.f32.mrb[77].mxu0  ;;  %10335 = vmatpush3.bf16.msra.mxu1 %v11028_v49  ;;  %v16007_v49 = vcombine.high %v12589_v3, %v12595_v23 }
 0x379   : > { %v10028_v24 = vadd.f32 %v10027_v4, %v10026_v47  ;;  %v10029_v0 = vpop.f32.mrb[78].mxu0  ;;  %10336 = vmatprep.subr.bf16.mxu1 %v11036_v55  ;;  %10455 = vmatpush3.bf16.msra.mxu0 %v11067_v6 }
 0x37a   : > { %v9950_v34 = vpop.f32.mrb[36].mxu1  ;;  %v10030_v2 = vpop.f32.mrb[79].mxu0  ;;  %5200 = vmatmul.mubr.bf16.gmra.mrb[144].mxu0 %v11011_v11  ;;  %v11015_v11 = vld [vmem:[#allocation2 + $0x90] ss:$8 sps:$4 sm:$0xff]  }
 0x37b   : > { %v13893_v39 = vadd.f32 %v10028_v24, %v13372_v36  ;;  %v10031_v40 = vadd.f32 %v10030_v2, %v10029_v0  ;;  %v9951_v7 = vpop.f32.mrb[37].mxu1  ;;  %4670 = vmatmul.mubr.bf16.gmra.mrb[72].mxu1 %v16006_v30  ;;  %5207 = vmatprep.mubr.bf16.mxu0 %v11013_v22  ;;  %v11048_v36 = vld [vmem:[%s15742_s2 + $0x228] sm:$0xff]   ;;  %v11068_v22 = vld [vmem:[%s15742_s2 + $0x278] sm:$0xff]  }
 0x37c   : > { %v13898_v1 = vadd.f32 %v9951_v7, %v9950_v34  ;;  %v9953_v43 = vpop.f32.mrb[38].mxu1  ;;  %4677 = vmatprep.mubr.bf16.mxu1 %v16007_v49  ;;  %10337 = vmatpush3.bf16.msra.mxu1 %v11038_v57  ;;  %v11059_v57 = vld [vmem:[%s15742_s2 + $0x230] sm:$0xff]   ;;  %v16009_v7 = vcombine.high %v12786_v9, %v12797_v18  ;;  %v11069_v30 = vld [vmem:[%s15742_s2 + $0x238] sm:$0xff]  }
 0x37d   : > { %v13907_v55 = vadd.f32 %v10031_v40, %v13380_v20  ;;  %v9954_v6 = vpop.f32.mrb[39].mxu1  ;;  %10338 = vmatprep.subr.bf16.mxu1 %v11046_v15  ;;  %v11016_v20 = vld [vmem:[#allocation2 + $0xac] ss:$8 sps:$4 sm:$0xff]   ;;  %v16008_v40 = vcombine.low %v12589_v3, %v12595_v23  ;;  %v11019_v49 = vld [vmem:[#allocation2 + $0xa8] ss:$8 sps:$4 sm:$0xff]  }
 0x37e   : > { %v13912_v45 = vadd.f32 %v9954_v6, %v9953_v43 }
 0x37f   : > { %v10032_v47 = vpop.f32.mrb[80].mxu0 }
 0x380   : > { %v10033_v4 = vpop.f32.mrb[81].mxu0  ;;  %10339 = vmatpush3.bf16.msra.mxu1 %v11048_v36 }
 0x381   : > { %v10034_v24 = vadd.f32 %v10033_v4, %v10032_v47  ;;  %v10035_v0 = vpop.f32.mrb[82].mxu0  ;;  %10340 = vmatprep.subr.bf16.mxu1 %v11057_v44  ;;  %v11021_v44 = vld [vmem:[#allocation2 + $0xc4] ss:$8 sps:$4 sm:$0xff]  }
 0x382   : > { %v10036_v15 = vpop.f32.mrb[83].mxu0  ;;  %5208 = vmatmul.mubr.bf16.gmra.mrb[148].mxu0 %v11015_v11  ;;  %v16010_v11 = vcombine.low %v12786_v9, %v12797_v18  ;;  %v16014_v18 = vcombine.low %v12920_v52, %v12926_v35 }
 0x383   : > { %v13921_v34 = vadd.f32 %v10034_v24, %v13510_v27  ;;  %v10037_v2 = vadd.f32 %v10036_v15, %v10035_v0  ;;  %4678 = vmatmul.mubr.bf16.gmra.mrb[76].mxu1 %v16008_v40  ;;  %5215 = vmatprep.mubr.bf16.mxu0 %v11016_v20  ;;  %v11070_v27 = vld [vmem:[%s15742_s2 + $0x340] sm:$0xff]  }
 0x384   : > { %4685 = vmatprep.mubr.bf16.mxu1 %v16009_v7  ;;  %10341 = vmatpush3.bf16.msra.mxu1 %v11059_v57  ;;  %v16011_v57 = vcombine.high %v12920_v52, %v12926_v35 }
 0x385   : > { %v13933_v43 = vadd.f32 %v10037_v2, %v13515_v50  ;;  %10342 = vmatprep.subr.bf16.mxu1 %v11068_v22  ;;  %v11023_v22 = vld [vmem:[#allocation2 + $0xc0] ss:$8 sps:$4 sm:$0xff]  }
 0x387   : > { %v10038_v3 = vpop.f32.mrb[84].mxu0 }
 0x388   : > { %v10039_v23 = vpop.f32.mrb[85].mxu0  ;;  %10343 = vmatpush3.bf16.msra.mxu1 %v11069_v30 }
 0x389   : > { %v10040_v36 = vadd.f32 %v10039_v23, %v10038_v3  ;;  %v10041_v6 = vpop.f32.mrb[86].mxu0  ;;  %10552 = vmatprep.subr.bf16.mxu1 %v11070_v27  ;;  %v11027_v23 = vld [vmem:[#allocation2 + $0xd8] ss:$8 sps:$4 sm:$0xff]  }
 0x38a   : > { %v10042_v47 = vpop.f32.mrb[87].mxu0  ;;  %5216 = vmatmul.mubr.bf16.gmra.mrb[152].mxu0 %v11019_v49 }
 0x38b   : > { %v13939_v4 = vadd.f32 %v10040_v36, %v13564_v46  ;;  %v10043_v50 = vadd.f32 %v10042_v47, %v10041_v6  ;;  %4686 = vmatmul.mubr.bf16.gmra.mrb[80].mxu1 %v16010_v11  ;;  %5223 = vmatprep.mubr.bf16.mxu0 %v11021_v44  ;;  %v11024_v46 = vld [vmem:[#allocation2 + $0xdc] ss:$8 sps:$4 sm:$0xff]  }
 0x38c   : > { %4693 = vmatprep.mubr.bf16.mxu1 %v16011_v57  ;;  %v16019_v57 = vld [vmem:[#allocation13_spill] sm:$0xff] }
 0x38d   : > { %v13948_v24 = vadd.f32 %v10043_v50, %v13566_v12  ;;  %v16015_v12 = vcombine.high %v13016_v53, %v13020_v8  ;;  %v16018_v50 = vcombine.low %v13016_v53, %v13020_v8  ;;  %v11032_v53 = vld [vmem:[#allocation2 + $0xf0] ss:$8 sps:$4 sm:$0xff]  }
 0x38f   : > { %16012 = vst [vmem:[#allocation48_spill] sm:$0xff] %v13948_v24  ;;  %v10044_v0 = vpop.f32.mrb[88].mxu0  ;;  %v5373_v24 = vld [vmem:[#allocation2 + $0x180] sm:$0xff] }
 0x390   : > { %v10045_v20 = vpop.f32.mrb[89].mxu0 }
 0x391   : > { %v10046_v15 = vadd.f32 %v10045_v20, %v10044_v0  ;;  %v10047_v2 = vpop.f32.mrb[90].mxu0  ;;  %v16020_v0 = vld [vmem:[#allocation14_spill] sm:$0xff] }
 0x392   : > { %v10048_v40 = vpop.f32.mrb[91].mxu0  ;;  %5224 = vmatmul.mubr.bf16.gmra.mrb[156].mxu0 %v11023_v22  ;;  %v16021_v20 = vcombine.high %v16019_v57, %v16020_v0 }
 0x393   : > { %v13951_v7 = vadd.f32 %v10046_v15, %v13610_v21  ;;  %v10049_v9 = vadd.f32 %v10048_v40, %v10047_v2  ;;  %4694 = vmatmul.mubr.bf16.gmra.mrb[84].mxu1 %v16014_v18  ;;  %5231 = vmatprep.mubr.bf16.mxu0 %v11024_v46  ;;  %v11029_v21 = vld [vmem:[#allocation2 + $0xf4] ss:$8 sps:$4 sm:$0xff]  }
 0x394   : > { %4701 = vmatprep.mubr.bf16.mxu1 %v16015_v12  ;;  %v11034_v18 = vld [vmem:[#allocation2 + $0x10c] ss:$8 sps:$4 sm:$0xff]  }
 0x395   : > { %16013 = vst [vmem:[#allocation49_spill] sm:$0xff] %v13951_v7  ;;  %v13960_v30 = vadd.f32 %v10049_v9, %v13612_v19 }
 0x397   : > { %16016 = vst [vmem:[#allocation50_spill] sm:$0xff] %v13960_v30  ;;  %v10050_v27 = vpop.f32.mrb[92].mxu0  ;;  %v14683_v30 = vld [vmem:[#allocation2 + $0x60] sm:$0xff] }
 0x398   : > { %v10051_v3 = vpop.f32.mrb[93].mxu0 }
 0x399   : > { %v10052_v49 = vadd.f32 %v10051_v3, %v10050_v27  ;;  %v10053_v36 = vpop.f32.mrb[94].mxu0  ;;  %v16024_v3 = vcombine.low %v16019_v57, %v16020_v0  ;;  %v16028_v0 = vcombine.low %v13190_v63, %v13194_v31 }
 0x39a   : > { %v9956_v6 = vpop.f32.mrb[40].mxu1  ;;  %v10054_v44 = vpop.f32.mrb[95].mxu0  ;;  %5232 = vmatmul.mubr.bf16.gmra.mrb[160].mxu0 %v11027_v23  ;;  %v16025_v23 = vcombine.high %v13190_v63, %v13194_v31  ;;  %v11042_v31 = vld [vmem:[#allocation2 + $0x120] ss:$8 sps:$4 sm:$0xff]  }
 0x39b   : > { %v13963_v52 = vadd.f32 %v10052_v49, %v13659_v38  ;;  %v10055_v35 = vadd.f32 %v10054_v44, %v10053_v36  ;;  %v9957_v47 = vpop.f32.mrb[41].mxu1  ;;  %4702 = vmatmul.mubr.bf16.gmra.mrb[88].mxu1 %v16018_v50  ;;  %5239 = vmatprep.mubr.bf16.mxu0 %v11029_v21  ;;  %v11078_v38 = vld [vmem:[%s15742_s2 + $0x3c0] sm:$0xff]   ;;  %v7393_v44 = vld [vmem:[#allocation2 + $0x188] sm:$0xff] }
 0x39c   : > { %v9958_v19 = vadd.f32 %v9957_v47, %v9956_v6  ;;  %v9959_v11 = vpop.f32.mrb[42].mxu1  ;;  %4709 = vmatprep.mubr.bf16.mxu1 %v16021_v20  ;;  %10664 = vmatprep.subr.bf16.mxu0 %v11078_v38  ;;  %v11037_v6 = vld [vmem:[#allocation2 + $0x108] ss:$8 sps:$4 sm:$0xff]   ;;  %v11039_v47 = vld [vmem:[#allocation2 + $0x124] ss:$8 sps:$4 sm:$0xff]   ;;  %v8396_v20 = vrot.slane %v7393_v44, 5 }
 0x39d   : > { %16017 = vst [vmem:[#allocation51_spill] sm:$0xff] %v13963_v52  ;;  %v13972_v22 = vadd.f32 %v10055_v35, %v13663_v54  ;;  %v9960_v15 = vpop.f32.mrb[43].mxu1  ;;  %v16030_v38 = vld [vmem:[#allocation20_spill] sm:$0xff] }
 0x39e   : > { %v9961_v2 = vadd.f32 %v9960_v15, %v9959_v11  ;;  %v16029_v15 = vld [vmem:[#allocation19_spill] sm:$0xff] }
 0x39f   : > { %16022 = vst [vmem:[#allocation13_spill] sm:$0xff] %v13972_v22  ;;  %v10056_v46 = vpop.f32.mrb[96].mxu0 }
 0x3a0   : > { %v10057_v40 = vpop.f32.mrb[97].mxu0 }
 0x3a1   : > { %v10058_v8 = vadd.f32 %v10057_v40, %v10056_v46  ;;  %v10059_v9 = vpop.f32.mrb[98].mxu0  ;;  %v16031_v46 = vcombine.high %v16029_v15, %v16030_v38  ;;  %v8246_v40 = vld [vmem:[#allocation2 + $0x180] sm:$0xee] }
 0x3a2   : > { %v10060_v12 = vpop.f32.mrb[99].mxu0  ;;  %5240 = vmatmul.mubr.bf16.gmra.mrb[164].mxu0 %v11032_v53 }
 0x3a3   : > { %v13978_v27 = vadd.f32 %v10058_v8, %v13735_v58  ;;  %v10061_v54 = vadd.f32 %v10060_v12, %v10059_v9  ;;  %4710 = vmatmul.mubr.bf16.gmra.mrb[92].mxu1 %v16024_v3  ;;  %5247 = vmatprep.mubr.bf16.mxu0 %v11034_v18  ;;  %v9762_v8 = vrot.slane %v8246_v40, 9  ;;  %v8398_v9 = vrot.slane %v8396_v20, 4 }
 0x3a4   : > { %4717 = vmatprep.mubr.bf16.mxu1 %v16025_v23 }
 0x3a5   : > { %16023 = vst [vmem:[#allocation14_spill] sm:$0xff] %v13978_v27  ;;  %v13987_v49 = vadd.f32 %v10061_v54, %v13750_v33  ;;  %v7394_v33 = vld [vmem:[#allocation2 + $0x190] sm:$0x11]  ;;  %v14003_v12 = vsel %vm12218_vm8, %v9762_v8, %v8396_v20 }
 0x3a6   : > { %16033 = vst [vmem:[#allocation20_spill] sm:$0xff] %v14003_v12 }
 0x3a7   : > { %16026 = vst [vmem:[#allocation52_spill] sm:$0xff] %v13987_v49  ;;  %v10062_v36 = vpop.f32.mrb[100].mxu0 }
 0x3a8   : > { %v10063_v21 = vpop.f32.mrb[101].mxu0 }
 0x3a9   : > { %v10064_v35 = vadd.f32 %v10063_v21, %v10062_v36  ;;  %v10065_v58 = vpop.f32.mrb[102].mxu0  ;;  %v11044_v36 = vld [vmem:[#allocation2 + $0x13c] ss:$8 sps:$4 sm:$0xff]  }
 0x3aa   : > { %v10066_v50 = vpop.f32.mrb[103].mxu0  ;;  %5248 = vmatmul.mubr.bf16.gmra.mrb[168].mxu0 %v11037_v6 }
 0x3ab   : > { %v13990_v11 = vadd.f32 %v10064_v35, %v13898_v1  ;;  %v10067_v57 = vadd.f32 %v10066_v50, %v10065_v58  ;;  %4718 = vmatmul.mubr.bf16.gmra.mrb[96].mxu1 %v16028_v0  ;;  %5255 = vmatprep.mubr.bf16.mxu0 %v11039_v47  ;;  %v8399_v1 = vrot.slane %v7394_v33, 5  ;;  %v16036_v58 = vcombine.low %v16029_v15, %v16030_v38  ;;  %v16037_v47 = vld [vmem:[#allocation23_spill] sm:$0xff]  ;;  %v16038_v50 = vld [vmem:[#allocation24_spill] sm:$0xff] }
 0x3ac   : > { %4725 = vmatprep.mubr.bf16.mxu1 %v16031_v46  ;;  %v11047_v46 = vld [vmem:[#allocation2 + $0x138] ss:$8 sps:$4 sm:$0xff]   ;;  %v16041_v15 = vcombine.low %v16037_v47, %v16038_v50 }
 0x3ad   : > { %16027 = vst [vmem:[#allocation53_spill] sm:$0xff] %v13990_v11  ;;  %v13999_v53 = vadd.f32 %v10067_v57, %v13912_v45  ;;  %v14007_v54 = vsel %vm12218_vm8, %v8398_v9, %v8399_v1  ;;  %v16039_v57 = vcombine.high %v16037_v47, %v16038_v50  ;;  %v11049_v9 = vld [vmem:[#allocation2 + $0x154] ss:$8 sps:$4 sm:$0xff]   ;;  %v5362_v11 = vld [vmem:[#allocation2 + $0x128] sm:$0xff] }
 0x3ae   : > { %16034 = vst [vmem:[#allocation54_spill] sm:$0xff] %v14007_v54  ;;  %v16049_v50 = vld [vmem:[#allocation31_spill] sm:$0xff] }
 0x3af   : > { %16032 = vst [vmem:[#allocation19_spill] sm:$0xff] %v13999_v53  ;;  %v10068_v18 = vpop.f32.mrb[104].mxu0 }
 0x3b0   : > { %v10069_v63 = vpop.f32.mrb[105].mxu0 }
 0x3b1   : > { %v10070_v3 = vadd.f32 %v10069_v63, %v10068_v18  ;;  %v10071_v23 = vpop.f32.mrb[106].mxu0 }
 0x3b2   : > { %v10072_v6 = vpop.f32.mrb[107].mxu0  ;;  %5256 = vmatmul.mubr.bf16.gmra.mrb[172].mxu0 %v11042_v31 }
 0x3b3   : > { %v14013_v44 = vadd.f32 %v10070_v3, %v9958_v19  ;;  %v10073_v35 = vadd.f32 %v10072_v6, %v10071_v23  ;;  %4726 = vmatmul.mubr.bf16.gmra.mrb[100].mxu1 %v16036_v58  ;;  %5263 = vmatprep.mubr.bf16.mxu0 %v11044_v36  ;;  %v16043_v3 = vld [vmem:[#allocation28_spill] sm:$0xff] }
 0x3b4   : > { %4733 = vmatprep.mubr.bf16.mxu1 %v16039_v57  ;;  %v11052_v57 = vld [vmem:[#allocation2 + $0x150] ss:$8 sps:$4 sm:$0xff]  }
 0x3b5   : > { %16035 = vst [vmem:[#allocation55_spill] sm:$0xff] %v14013_v44  ;;  %v14021_v0 = vadd.f32 %v10073_v35, %v9961_v2  ;;  %v16042_v2 = vld [vmem:[#allocation27_spill] sm:$0xff] }
 0x3b6   : > { %v16044_v23 = vcombine.high %v16042_v2, %v16043_v3  ;;  %v4843_v35 = vld [vmem:[#allocation2 + $0x170] sm:$0xff]  ;;  %v16048_v47 = vcombine.low %v16042_v2, %v16043_v3 }
 0x3b7   : > { %16040 = vst [vmem:[#allocation23_spill] sm:$0xff] %v14021_v0  ;;  %v10074_v33 = vpop.f32.mrb[108].mxu0 }
 0x3b8   : > { %v10075_v20 = vpop.f32.mrb[109].mxu0 }
 0x3b9   : > { %v10076_v40 = vadd.f32 %v10075_v20, %v10074_v33  ;;  %v10077_v8 = vpop.f32.mrb[110].mxu0  ;;  %v16047_v20 = vld [vmem:[#allocation43_spill] sm:$0xff] }
 0x3ba   : > { %v9962_v19 = vpop.f32.mrb[44].mxu1  ;;  %v10078_v1 = vpop.f32.mrb[111].mxu0  ;;  %5264 = vmatmul.mubr.bf16.gmra.mrb[176].mxu0 %v11047_v46  ;;  %v9393_v46 = vcombine.high %v16047_v20, %v4843_v35 }
 0x3bb   : > { %v10079_v18 = vadd.f32 %v10078_v1, %v10077_v8  ;;  %v9963_v63 = vpop.f32.mrb[45].mxu1  ;;  %4734 = vmatmul.mubr.bf16.gmra.mrb[104].mxu1 %v16041_v15  ;;  %5271 = vmatprep.mubr.bf16.mxu0 %v11049_v9  ;;  %v16050_v8 = vld [vmem:[#allocation32_spill] sm:$0xff] }
 0x3bc   : > { %v9964_v38 = vadd.f32 %v9963_v63, %v9962_v19  ;;  %v9965_v31 = vpop.f32.mrb[46].mxu1  ;;  %4741 = vmatprep.mubr.bf16.mxu1 %v16044_v23  ;;  %v16051_v9 = vcombine.high %v16049_v50, %v16050_v8  ;;  %v4844_v19 = vld [vmem:[#allocation2 + $0x180] sm:$0xff]  ;;  %v9392_v23 = vcombine.low %v16047_v20, %v4843_v35  ;;  %v5332_v20 = vld [vmem:[#allocation2 + $0x38] sm:$0xff] }
 0x3bd   : > { %v9966_v36 = vpop.f32.mrb[47].mxu1  ;;  %v5329_v63 = vld [vmem:[#allocation2 + $0x20] sm:$0xff]  ;;  %v5414_v60 = vshrl.u32 %v5332_v20, 16 }
 0x3be   : > { %v9967_v6 = vadd.f32 %v9966_v36, %v9965_v31  ;;  %v14029_v58 = vadd.f32 %v10076_v40, %v9964_v38  ;;  %v9395_v38 = vcombine.high %v4844_v19, %v13786_v16  ;;  %v5330_v31 = vld [vmem:[#allocation2 + $0x28] sm:$0x11]  ;;  %v6276_v2 = vrot.slane %v5329_v63, 5 }
 0x3bf   : > { %v5386_v59 = vshll.u32 %v5329_v63, 16  ;;  %v5390_v35 = vshrl.u32 %v5329_v63, 16  ;;  %v5396_v42 = vshll.u32 %v5330_v31, 16  ;;  %v5416_v54 = vrot.slane %v5414_v60, 4  ;;  %v14105_v60 = vld [vmem:[#allocation2 + $0x68] sm:$0xff] }
 0x3c0   : > { %16045 = vst [vmem:[#allocation24_spill] sm:$0xff] %v14029_v58  ;;  %v14031_v33 = vadd.f32 %v10079_v18, %v9967_v6  ;;  %v6279_v6 = vrot.slane %v5330_v31, 5  ;;  %v6278_v37 = vrot.slane %v6276_v2, 4  ;;  %v11085_v58 = vld [vmem:[%s15742_s2 + $0x328] sm:$0xff]  }
 0x3c2   : > { %16046 = vst [vmem:[#allocation27_spill] sm:$0xff] %v14031_v33  ;;  %5272 = vmatmul.mubr.bf16.gmra.mrb[180].mxu0 %v11052_v57  ;;  %v5328_v57 = vld [vmem:[#allocation2 + $0x18] sm:$0xff]  ;;  %v6280_v21 = vsel %vm12218_vm8, %v6278_v37, %v6279_v6  ;;  %v6211_v37 = vld [vmem:[#allocation2 + $0x30] sm:$0xee] }
 0x3c3   : > { %4742 = vmatmul.mubr.bf16.gmra.mrb[108].mxu1 %v16048_v47  ;;  %5279 = vmatprep.mubr.bf16.mxu0 %v9393_v46  ;;  %v16052_v46 = vcombine.low %v16049_v50, %v16050_v8  ;;  %v6210_v47 = vld [vmem:[#allocation2 + $0x18] sm:$0xee]  ;;  %v5377_v45 = vshrl.u32 %v5328_v57, 16  ;;  %v14055_v50 = vld [vmem:[#allocation2 + $0x40] sm:$0x11] }
 0x3c4   : > { %4749 = vmatprep.mubr.bf16.mxu1 %v16051_v9  ;;  %v16053_v9 = vld [vmem:[#allocation35_spill] sm:$0xff]  ;;  %v16058_v6 = vld [vmem:[#allocation40_spill] sm:$0xff]  ;;  %v5420_v61 = vshll.u32 %v14055_v50, 16 }
 0x3c5   : > { %v10080_v1 = vpop.f32.mrb[112].mxu0  ;;  %v5379_v13 = vrot.slane %v5377_v45, 4  ;;  %v14066_v45 = vld [vmem:[#allocation2 + $0x50] sm:$0xff] }
 0x3c6   : > { %v10081_v40 = vpop.f32.mrb[113].mxu0 }
 0x3c7   : > { %v14040_v15 = vadd.f32 %v10081_v40, %v10080_v1  ;;  %v10083_v18 = vpop.f32.mrb[114].mxu0  ;;  %v16054_v1 = vld [vmem:[#allocation36_spill] sm:$0xff] }
 0x3c8   : > { %v10084_v36 = vpop.f32.mrb[115].mxu0  ;;  %v16055_v40 = vcombine.high %v16053_v9, %v16054_v1 }
 0x3c9   : > { %v14044_v3 = vadd.f32 %v10084_v36, %v10083_v18  ;;  %v5380_v18 = vshll.u32 %v5328_v57, 16  ;;  %v9492_v36 = vrot.slane %v6210_v47, 9  ;;  %v6286_v57 = vrot.slane %v14055_v50, 5  ;;  %v11086_v50 = vld [vmem:[%s15742_s2 + $0x3d0] sm:$0xff]  }
 0x3ca   : > { %5280 = vmatmul.mubr.bf16.gmra.mrb[184].mxu0 %v9392_v23  ;;  %v9394_v23 = vcombine.low %v4844_v19, %v13786_v16  ;;  %v16056_v16 = vcombine.low %v16053_v9, %v16054_v1  ;;  %v16057_v19 = vld [vmem:[#allocation39_spill] sm:$0xff]  ;;  %v14072_v9 = vld [vmem:[#allocation2 + $0x58] sm:$0x11] }
 0x3cb   : > { %4750 = vmatmul.mubr.bf16.gmra.mrb[112].mxu1 %v16052_v46  ;;  %5287 = vmatprep.mubr.bf16.mxu0 %v9395_v38  ;;  %v6277_v8 = vsel %vm12218_vm8, %v9492_v36, %v6276_v2  ;;  %v6283_v38 = vrot.slane %v5332_v20, 5  ;;  %v5388_v46 = vrot.slane %v5386_v59, 5  ;;  %v5382_v63 = vrot.slane %v5380_v18, 5 }
 0x3cc   : > { %4757 = vmatprep.mubr.bf16.mxu1 %v16055_v40  ;;  %v5392_v40 = vrot.slane %v5390_v35, 4  ;;  %v9541_v25 = vcombine.high %v6277_v8, %v6280_v21  ;;  %v16059_v47 = vcombine.high %v16057_v19, %v16058_v6  ;;  %v5331_v35 = vld [vmem:[#allocation2 + $0x30] sm:$0xff]  ;;  %v9493_v18 = vrot.slane %v6211_v37, 9  ;;  %v6212_v37 = vld [vmem:[#allocation2 + $0x48] sm:$0xee] }
 0x3cd   : > { %v6285_v2 = vrot.slane %v6283_v38, 4  ;;  %v5383_v36 = vor.u32 %v5382_v63, %v5379_v13  ;;  %v5404_v1 = vshll.u32 %v5331_v35, 16  ;;  %v9540_v62 = vcombine.low %v6277_v8, %v6280_v21  ;;  %v11079_v63 = vld [vmem:[%s15742_s2 + $0x380] sm:$0xff]  }
 0x3ce   : > { %v5393_v59 = vor.u32 %v5392_v40, %v5388_v46  ;;  %v6284_v40 = vsel %vm12218_vm8, %v9493_v18, %v6283_v38  ;;  %v6290_v13 = vrot.slane %v14066_v45, 5  ;;  %v6293_v8 = vrot.slane %v14072_v9, 5  ;;  %v5334_v38 = vld [vmem:[#allocation2 + $0x48] sm:$0xff] }
 0x3cf   : > { %v14070_v31 = vsel %vm12218_vm8, %v6285_v2, %v6286_v57  ;;  %v11082_v2 = vld [vmem:[%s15742_s2 + $0x3c8] sm:$0xff]   ;;  %v5406_v18 = vrot.slane %v5404_v1, 5  ;;  %v5425_v1 = vshrl.u32 %v5334_v38, 16 }
 0x3d0   : > { %v9543_v57 = vcombine.high %v6284_v40, %v14070_v31  ;;  %v6292_v48 = vrot.slane %v6290_v13, 4 }
 0x3d2   : > { %5288 = vmatmul.mubr.bf16.gmra.mrb[188].mxu0 %v9394_v23  ;;  %v5398_v23 = vrot.slane %v5396_v42, 5  ;;  %v5384_v42 = vrot.slane %v5383_v36, 4 }
 0x3d3   : > { %4758 = vmatmul.mubr.bf16.gmra.mrb[116].mxu1 %v16056_v16  ;;  %6675 = vmatprep.mubr.bf16.mxu0 %v9541_v25  ;;  %v5401_v25 = vshrl.u32 %v5331_v35, 16  ;;  %v5410_v16 = vshll.u32 %v5332_v20, 16  ;;  %v16060_v35 = vcombine.low %v16057_v19, %v16058_v6  ;;  %v11083_v19 = vld [vmem:[%s15742_s2 + $0x388] sm:$0xff]  }
 0x3d4   : > { %4765 = vmatprep.mubr.bf16.mxu1 %v16059_v47  ;;  %v5394_v47 = vrot.slane %v5393_v59, 4 }
 0x3d5   : > { %v5403_v36 = vrot.slane %v5401_v25, 4  ;;  %v14092_v51 = vrot.slane %v5410_v16, 5  ;;  %v14103_v25 = vsel %vm12428_vm13, %v5384_v42, %v5388_v46  ;;  %v5428_v16 = vshll.u32 %v5334_v38, 16 }
 0x3d6   : > { %v14086_v21 = vsel %vm12428_vm13, %v5394_v47, %v5398_v23  ;;  %v16061_v23 = vcombine.high %v13744_v28, %v13748_v29  ;;  %v9494_v47 = vrot.slane %v6212_v37, 9  ;;  %v14113_v37 = vsel %vm12218_vm8, %v6292_v48, %v6293_v8 }
 0x3d7   : > { %v9445_v42 = vcombine.high %v14103_v25, %v14086_v21  ;;  %v5417_v38 = vor.u32 %v5416_v54, %v14092_v51  ;;  %v6297_v48 = vrot.slane %v14105_v60, 5  ;;  %v5407_v54 = vor.u32 %v5406_v18, %v5403_v36 }
 0x3d8   : > { %v5422_v8 = vrot.slane %v5420_v61, 5  ;;  %v6213_v61 = vld [vmem:[#allocation2 + $0x60] sm:$0xee] }
 0x3d9   : > { %v5418_v36 = vrot.slane %v5417_v38, 4  ;;  %v6299_v18 = vrot.slane %v6297_v48, 4 }
 0x3da   : > { %v9968_v20 = vpop.f32.mrb[48].mxu1  ;;  %6676 = vmatmul.mubr.bf16.vlgmr.msra.gmra.mrb[192].mxu0 %v9540_v62 }
 0x3db   : > { %v9969_v59 = vpop.f32.mrb[49].mxu1  ;;  %4766 = vmatmul.mubr.bf16.gmra.mrb[120].mxu1 %v16060_v35  ;;  %6683 = vmatprep.mubr.bf16.mxu0 %v9543_v57  ;;  %v5434_v57 = vshll.u32 %v14066_v45, 16  ;;  %v6291_v35 = vsel %vm12218_vm8, %v9494_v47, %v6290_v13  ;;  %v5430_v13 = vrot.slane %v5428_v16, 5  ;;  %v5408_v16 = vrot.slane %v5407_v54, 4 }
 0x3dc   : > { %v9970_v12 = vadd.f32 %v9969_v59, %v9968_v20  ;;  %v9971_v62 = vpop.f32.mrb[50].mxu1  ;;  %4773 = vmatprep.mubr.bf16.mxu1 %v16061_v23  ;;  %10665 = vmatpush3.bf16.msra.mxu0 %v11079_v63  ;;  %v5438_v20 = vshrl.u32 %v14066_v45, 16  ;;  %v9542_v59 = vcombine.low %v6284_v40, %v14070_v31  ;;  %v9545_v45 = vcombine.high %v6291_v35, %v14113_v37  ;;  %v11088_v31 = vld [vmem:[%s15742_s2 + $0x3d8] sm:$0xff]  }
 0x3dd   : > { %v9972_v6 = vpop.f32.mrb[51].mxu1  ;;  %10666 = vmatprep.subr.bf16.mxu0 %v11082_v2  ;;  %v14122_v2 = vld [vmem:[#allocation2 + $0x70] sm:$0x11]  ;;  %v14139_v23 = vrot.slane %v5434_v57, 5  ;;  %v14151_v57 = vsel %vm12428_vm13, %v5418_v36, %v5422_v8  ;;  %v5458_v54 = vshll.u32 %v14105_v60, 16  ;;  %v5462_v8 = vshrl.u32 %v14105_v60, 16 }
 0x3de   : > { %v9973_v63 = vadd.f32 %v9972_v6, %v9971_v62  ;;  %v14117_v46 = vadd.f32 %v14040_v15, %v9970_v12  ;;  %v11087_v12 = vld [vmem:[%s15742_s2 + $0x390] sm:$0xff]   ;;  %v5427_v62 = vrot.slane %v5425_v1, 4  ;;  %v6300_v40 = vrot.slane %v14122_v2, 5  ;;  %v11093_v36 = vld [vmem:[%s15742_s2 + $0x3a0] sm:$0xff]  }
 0x3df   : > { %v5440_v47 = vrot.slane %v5438_v20, 4  ;;  %v9444_v6 = vcombine.low %v14103_v25, %v14086_v21  ;;  %v9495_v20 = vrot.slane %v6213_v61, 9 }
 0x3e0   : > { %16062 = vst [vmem:[#allocation28_spill] sm:$0xff] %v14117_v46  ;;  %10667 = vmatpush3.bf16.msra.mxu0 %v11083_v19  ;;  %v14132_v15 = vadd.f32 %v14044_v3, %v9973_v63  ;;  %v16064_v3 = vcombine.low %v13744_v28, %v13748_v29  ;;  %v11089_v19 = vld [vmem:[%s15742_s2 + $0x398] sm:$0xff]   ;;  %v14153_v28 = vld [vmem:[#allocation2 + $0x80] sm:$0xff]  ;;  %v5431_v21 = vor.u32 %v5430_v13, %v5427_v62 }
 0x3e1   : > { %10668 = vmatprep.subr.bf16.mxu0 %v11086_v50  ;;  %v5337_v29 = vld [vmem:[#allocation2 + $0x60] sm:$0xff]  ;;  %v5441_v25 = vor.u32 %v5440_v47, %v14139_v23  ;;  %v14176_v62 = vsel %vm12218_vm8, %v9495_v20, %v6297_v48  ;;  %v6304_v47 = vrot.slane %v14153_v28, 5  ;;  %v5464_v20 = vrot.slane %v5462_v8, 4  ;;  %v11074_v8 = vld [vmem:[%s15742_s2 + $0x350] sm:$0xff]  }
 0x3e2   : > { %16063 = vst [vmem:[#allocation43_spill] sm:$0xff] %v14132_v15  ;;  %6684 = vmatmul.mubr.bf16.gmra.mrb[196].mxu0 %v9542_v59  ;;  %v11092_v50 = vld [vmem:[%s15742_s2 + $0x3e0] sm:$0xff]   ;;  %v5452_v48 = vshll.u32 %v5337_v29, 16  ;;  %v5432_v61 = vrot.slane %v5431_v21, 4  ;;  %v11073_v21 = vld [vmem:[%s15742_s2 + $0x308] sm:$0xff]   ;;  %v5486_v15 = vshrl.u32 %v14153_v28, 16 }
 0x3e3   : > { %4774 = vmatmul.mubr.bf16.gmra.mrb[124].mxu1 %v16064_v3  ;;  %6691 = vmatprep.mubr.bf16.mxu0 %v9545_v45  ;;  %v14166_v45 = vld [vmem:[#allocation2 + $0x88] sm:$0x11]  ;;  %v14182_v3 = vsel %vm12428_vm13, %v5408_v16, %v14092_v51  ;;  %v5442_v16 = vrot.slane %v5441_v25, 4  ;;  %v14207_v25 = vld [vmem:[#allocation2 + $0x98] sm:$0xff] }
 0x3e4   : > { %6049 = vmatprep.mubr.bf16.mxu1 %v9445_v42  ;;  %10669 = vmatpush3.bf16.msra.mxu0 %v11087_v12  ;;  %v14160_v42 = vsel %vm12218_vm8, %v6299_v18, %v6300_v40  ;;  %v5444_v12 = vshll.u32 %v14072_v9, 16  ;;  %v11071_v40 = vld [vmem:[%s15742_s2 + $0x300] sm:$0xff]   ;;  %v5449_v9 = vshrl.u32 %v5337_v29, 16  ;;  %v9447_v51 = vcombine.high %v14182_v3, %v14151_v57 }
 0x3e5   : > { %v10086_v1 = vpop.f32.mrb[116].mxu0  ;;  %10670 = vmatprep.subr.bf16.mxu0 %v11088_v31  ;;  %v9544_v31 = vcombine.low %v6291_v35, %v14113_v37  ;;  %v9547_v60 = vcombine.high %v14176_v62, %v14160_v42  ;;  %v11072_v35 = vld [vmem:[%s15742_s2 + $0x348] sm:$0xff]   ;;  %v6307_v18 = vrot.slane %v14166_v45, 5 }
 0x3e6   : > { %v10087_v63 = vpop.f32.mrb[117].mxu0  ;;  %v5446_v29 = vrot.slane %v5444_v12, 5 }
 0x3e7   : > { %v14163_v38 = vadd.f32 %v10087_v63, %v10086_v1  ;;  %v10089_v59 = vpop.f32.mrb[118].mxu0  ;;  %v11094_v1 = vld [vmem:[%s15742_s2 + $0x3e8] sm:$0xff]   ;;  %v14200_v63 = vrot.slane %v5458_v54, 5 }
 0x3e8   : > { %v10090_v13 = vpop.f32.mrb[119].mxu0  ;;  %10671 = vmatpush3.bf16.msra.mxu0 %v11089_v19  ;;  %v5340_v19 = vld [vmem:[#allocation2 + $0x78] sm:$0xff] }
 0x3e9   : > { %v14186_v37 = vadd.f32 %v10090_v13, %v10089_v59  ;;  %10672 = vmatprep.subr.bf16.mxu0 %v11092_v50  ;;  %v6214_v50 = vld [vmem:[#allocation2 + $0x78] sm:$0xee]  ;;  %v6306_v59 = vrot.slane %v6304_v47, 4  ;;  %v5482_v13 = vshll.u32 %v14153_v28, 16  ;;  %v5473_v12 = vshrl.u32 %v5340_v19, 16 }
 0x3ea   : > { %6692 = vmatmul.mubr.bf16.gmra.mrb[200].mxu0 %v9544_v31  ;;  %v5451_v31 = vrot.slane %v5449_v9, 4  ;;  %v5476_v54 = vshll.u32 %v5340_v19, 16  ;;  %v9446_v9 = vcombine.low %v14182_v3, %v14151_v57  ;;  %v14234_v57 = vsel %vm12428_vm13, %v5442_v16, %v5446_v29 }
 0x3eb   : > { %6050 = vmatmul.mubr.bf16.vlgmr.msra.gmra.mrb[128].mxu1 %v9444_v6  ;;  %6699 = vmatprep.mubr.bf16.mxu0 %v9547_v60  ;;  %v5454_v6 = vrot.slane %v5452_v48, 5  ;;  %v9496_v60 = vrot.slane %v6214_v50, 9  ;;  %v14219_v28 = vsel %vm12218_vm8, %v6306_v59, %v6307_v18  ;;  %v11096_v48 = vld [vmem:[%s15742_s2 + $0x3f0] sm:$0xff]   ;;  %v5465_v3 = vor.u32 %v5464_v20, %v14200_v63 }
 0x3ec   : > { %10553 = vmatpush3.bf16.msra.mxu1 %v11071_v40  ;;  %6057 = vmatprep.mubr.bf16.mxu1 %v9447_v51  ;;  %v11095_v40 = vld [vmem:[%s15742_s2 + $0x3a8] sm:$0xff]   ;;  %v14230_v51 = vsel %vm12428_vm13, %v5432_v61, %v14139_v23  ;;  %v5488_v19 = vrot.slane %v5486_v15, 4  ;;  %v11075_v23 = vld [vmem:[%s15742_s2 + $0x310] sm:$0xff]   ;;  %v5475_v16 = vrot.slane %v5473_v12, 4  ;;  %v5478_v29 = vrot.slane %v5476_v54, 5 }
 0x3ed   : > { %10554 = vmatprep.subr.bf16.mxu1 %v11072_v35  ;;  %10673 = vmatpush3.bf16.msra.mxu0 %v11093_v36  ;;  %v5468_v35 = vshll.u32 %v14122_v2, 16  ;;  %v9546_v36 = vcombine.low %v14176_v62, %v14160_v42  ;;  %v14237_v2 = vld [vmem:[#allocation2 + $0xa0] sm:$0x11]  ;;  %v14241_v18 = vsel %vm12218_vm8, %v9496_v60, %v6304_v47  ;;  %v6311_v42 = vrot.slane %v14207_v25, 5  ;;  %v11076_v47 = vld [vmem:[%s15742_s2 + $0x358] sm:$0xff]   ;;  %v11097_v15 = vld [vmem:[%s15742_s2 + $0x3b0] sm:$0xff]  }
 0x3ee   : > { %10674 = vmatprep.subr.bf16.mxu0 %v11094_v1  ;;  %v14244_v62 = vrot.slane %v5482_v13, 5  ;;  %v9549_v61 = vcombine.high %v14241_v18, %v14219_v28  ;;  %v5455_v1 = vor.u32 %v5454_v6, %v5451_v31  ;;  %v9449_v50 = vcombine.high %v14230_v51, %v14234_v57  ;;  %v11098_v31 = vld [vmem:[%s15742_s2 + $0x3f8] sm:$0xff]   ;;  %v6215_v13 = vld [vmem:[#allocation2 + $0x90] sm:$0xee] }
 0x3ef   : > { %v5470_v20 = vrot.slane %v5468_v35, 5  ;;  %v6314_v59 = vrot.slane %v14237_v2, 5  ;;  %v5466_v6 = vrot.slane %v5465_v3, 4  ;;  %v6313_v12 = vrot.slane %v6311_v42, 4  ;;  %v14268_v35 = vld [vmem:[#allocation2 + $0xb0] sm:$0xff] }
 0x3f0   : > { %10555 = vmatpush3.bf16.msra.mxu1 %v11073_v21  ;;  %v5492_v21 = vshll.u32 %v14166_v45, 16  ;;  %v5489_v54 = vor.u32 %v5488_v19, %v14244_v62  ;;  %v5456_v45 = vrot.slane %v5455_v1, 4  ;;  %v5479_v60 = vor.u32 %v5478_v29, %v5475_v16  ;;  %v14289_v1 = vld [vmem:[%s15742_s2 + $0x440] sm:$0xff]   ;;  %v14291_v16 = vld [vmem:[#allocation2 + $0xb8] sm:$0x11] }
 0x3f1   : > { %10556 = vmatprep.subr.bf16.mxu1 %v11074_v8  ;;  %10675 = vmatpush3.bf16.msra.mxu0 %v11095_v40  ;;  %v5343_v8 = vld [vmem:[#allocation2 + $0x90] sm:$0xff]  ;;  %v11077_v40 = vld [vmem:[%s15742_s2 + $0x318] sm:$0xff]   ;;  %v9497_v3 = vrot.slane %v6215_v13, 9  ;;  %v14282_v19 = vsel %vm12218_vm8, %v6313_v12, %v6314_v59  ;;  %v11081_v13 = vld [vmem:[%s15742_s2 + $0x320] sm:$0xff]   ;;  %v5516_v33 = vshll.u32 %v14237_v2, 16 }
 0x3f2   : > { %6700 = vmatmul.mubr.bf16.gmra.mrb[204].mxu0 %v9546_v36  ;;  %10676 = vmatprep.subr.bf16.mxu0 %v11096_v48  ;;  %v11099_v48 = vld [vmem:[%s15742_s2 + $0x3b8] sm:$0xff]   ;;  %v14278_v36 = vsel %vm12428_vm13, %v5466_v6, %v5470_v20  ;;  %v5497_v29 = vshrl.u32 %v5343_v8, 16  ;;  %v9548_v20 = vcombine.low %v14241_v18, %v14219_v28  ;;  %v9448_v6 = vcombine.low %v14230_v51, %v14234_v57  ;;  %v11084_v12 = vld [vmem:[%s15742_s2 + $0x368] sm:$0xff]   ;;  %v11090_v2 = vld [vmem:[%s15742_s2 + $0x370] sm:$0xff]  }
 0x3f3   : > { %6058 = vmatmul.mubr.bf16.gmra.mrb[132].mxu1 %v9446_v9  ;;  %6707 = vmatprep.mubr.bf16.mxu0 %v9549_v61  ;;  %v11080_v9 = vld [vmem:[%s15742_s2 + $0x360] sm:$0xff]   ;;  %v14284_v61 = vld [vmem:[#allocation2 + $0x30] sm:$0xff]  ;;  %v14299_v59 = vsel %vm12218_vm8, %v9497_v3, %v6311_v42  ;;  %v5480_v18 = vrot.slane %v5479_v60, 4  ;;  %v6216_v42 = vld [vmem:[#allocation2 + $0xa8] sm:$0xee]  ;;  %v6321_v57 = vrot.slane %v14291_v16, 5 }
 0x3f4   : > { %6065 = vmatprep.mubr.bf16.mxu1 %v9449_v50  ;;  %10557 = vmatpush3.bf16.msra.mxu1 %v11075_v23  ;;  %v5494_v23 = vrot.slane %v5492_v21, 5  ;;  %v5510_v50 = vshrl.u32 %v14207_v25, 16  ;;  %v5490_v21 = vrot.slane %v5489_v54, 4  ;;  %v9551_v28 = vcombine.high %v14299_v59, %v14282_v19 }
 0x3f5   : > { %10558 = vmatprep.subr.bf16.mxu1 %v11076_v47  ;;  %10677 = vmatpush3.bf16.msra.mxu0 %v11097_v15  ;;  %v5500_v47 = vshll.u32 %v5343_v8, 16  ;;  %v5506_v15 = vshll.u32 %v14207_v25, 16  ;;  %v14310_v25 = vsel %vm12428_vm13, %v5456_v45, %v14200_v63  ;;  %v5346_v8 = vld [vmem:[#allocation2 + $0xa8] sm:$0xff]  ;;  %v5499_v60 = vrot.slane %v5497_v29, 4 }
 0x3f6   : > { %10678 = vmatprep.subr.bf16.mxu0 %v11098_v31  ;;  %v6318_v31 = vrot.slane %v14268_v35, 5  ;;  %v9451_v51 = vcombine.high %v14310_v25, %v14278_v36  ;;  %v14321_v63 = vsel %vm12428_vm13, %v5490_v21, %v5494_v23  ;;  %v5512_v3 = vrot.slane %v5510_v50, 4 }
 0x3f7   : > { %v9498_v23 = vrot.slane %v6216_v42, 9  ;;  %v14335_v29 = vsel %vm12428_vm13, %v5480_v18, %v14244_v62  ;;  %v5524_v50 = vshll.u32 %v5346_v8, 16  ;;  %v5534_v42 = vshrl.u32 %v14268_v35, 16 }
 0x3f8   : > { %10559 = vmatpush3.bf16.msra.mxu1 %v11077_v40  ;;  %v7399_v40 = vshrl.u32 %v14284_v61, 16  ;;  %v6320_v21 = vrot.slane %v6318_v31, 4  ;;  %v9450_v18 = vcombine.low %v14310_v25, %v14278_v36  ;;  %v11091_v36 = vld [vmem:[%s15742_s2 + $0x330] sm:$0xff]  }
 0x3f9   : > { %10560 = vmatprep.subr.bf16.mxu1 %v11080_v9  ;;  %10679 = vmatpush3.bf16.msra.mxu0 %v11099_v48  ;;  %v5502_v9 = vrot.slane %v5500_v47, 5  ;;  %v14326_v48 = vrot.slane %v5506_v15, 5  ;;  %v14337_v47 = vld [vmem:[#allocation2 + $0xc8] sm:$0xff]  ;;  %v5521_v15 = vshrl.u32 %v5346_v8, 16 }
 0x3fa   : > { %v9974_v54 = vpop.f32.mrb[52].mxu1  ;;  %6708 = vmatmul.mubr.bf16.gmra.mrb[208].mxu0 %v9548_v20  ;;  %10776 = vmatprep.subr.bf16.mxu0 %v14289_v1 }
 0x3fb   : > { %v9975_v45 = vpop.f32.mrb[53].mxu1  ;;  %6066 = vmatmul.mubr.bf16.gmra.mrb[136].mxu1 %v9448_v6  ;;  %6715 = vmatprep.mubr.bf16.mxu0 %v9551_v28  ;;  %v5530_v6 = vshll.u32 %v14268_v35, 16  ;;  %v14345_v28 = vsel %vm12218_vm8, %v6320_v21, %v6321_v57  ;;  %v6319_v35 = vsel %vm12218_vm8, %v9498_v23, %v6318_v31  ;;  %v5503_v8 = vor.u32 %v5502_v9, %v5499_v60  ;;  %v14380_v23 = vld [vmem:[#allocation2 + $0x38] sm:$0xff] }
 0x3fc   : > { %v9976_v20 = vadd.f32 %v9975_v45, %v9974_v54  ;;  %v9977_v46 = vpop.f32.mrb[54].mxu1  ;;  %6073 = vmatprep.mubr.bf16.mxu1 %v9451_v51  ;;  %10561 = vmatpush3.bf16.msra.mxu1 %v11081_v13  ;;  %v5513_v54 = vor.u32 %v5512_v3, %v14326_v48  ;;  %v14356_v51 = vld [vmem:[#allocation2 + $0xd0] sm:$0x11]  ;;  %v9553_v57 = vcombine.high %v6319_v35, %v14345_v28  ;;  %v5523_v45 = vrot.slane %v5521_v15, 4  ;;  %v11101_v15 = vld [vmem:[%s15742_s2 + $0x338] sm:$0xff]  }
 0x3fd   : > { %v9978_v0 = vpop.f32.mrb[55].mxu1  ;;  %10562 = vmatprep.subr.bf16.mxu1 %v11084_v12  ;;  %v9453_v12 = vcombine.high %v14335_v29, %v14321_v63  ;;  %v14375_v31 = vrot.slane %v5530_v6, 5  ;;  %v5536_v3 = vrot.slane %v5534_v42, 4  ;;  %v14378_v9 = vrot.slane %v7399_v40, 4  ;;  %v5349_v40 = vld [vmem:[#allocation2 + $0xc0] sm:$0xff] }
 0x3fe   : > { %v9979_v13 = vadd.f32 %v9978_v0, %v9977_v46  ;;  %v14349_v62 = vadd.f32 %v14163_v38, %v9976_v20  ;;  %v7402_v0 = vshll.u32 %v14284_v61, 16  ;;  %v9550_v46 = vcombine.low %v14299_v59, %v14282_v19  ;;  %v11100_v19 = vld [vmem:[%s15742_s2 + $0x378] sm:$0xff]   ;;  %v6217_v20 = vld [vmem:[#allocation2 + $0xc0] sm:$0xee] }
 0x3ff   : > { %v6325_v38 = vrot.slane %v14337_v47, 5  ;;  %v5518_v61 = vrot.slane %v5516_v33, 5  ;;  %v5526_v59 = vrot.slane %v5524_v50, 5  ;;  %v5540_v33 = vshll.u32 %v14291_v16, 16  ;;  %v14392_v16 = vld [vmem:[#allocation2 + $0xe0] sm:$0xff] }
 0x400   : > { %16065 = vst [vmem:[#allocation31_spill] sm:$0xff] %v14349_v62  ;;  %10563 = vmatpush3.bf16.msra.mxu1 %v11085_v58  ;;  %v14368_v25 = vadd.f32 %v14186_v37, %v9979_v13  ;;  %v6328_v58 = vrot.slane %v14356_v51, 5  ;;  %v5514_v37 = vrot.slane %v5513_v54, 4  ;;  %v7408_v21 = vshll.u32 %v14380_v23, 16 }
 0x401   : > { %10564 = vmatprep.subr.bf16.mxu1 %v11090_v2  ;;  %v6327_v60 = vrot.slane %v6325_v38, 4  ;;  %v9452_v6 = vcombine.low %v14335_v29, %v14321_v63  ;;  %v5504_v2 = vrot.slane %v5503_v8, 4  ;;  %v14394_v42 = vrot.slane %v7402_v0, 5  ;;  %v14402_v8 = vld [vmem:[#allocation2 + $0xe8] sm:$0x11] }
 0x402   : > { %16066 = vst [vmem:[#allocation32_spill] sm:$0xff] %v14368_v25  ;;  %6716 = vmatmul.mubr.bf16.gmra.mrb[212].mxu0 %v9550_v46  ;;  %v14390_v13 = vsel %vm12428_vm13, %v5514_v37, %v5518_v61  ;;  %v5527_v46 = vor.u32 %v5526_v59, %v5523_v45  ;;  %v9552_v29 = vcombine.low %v6319_v35, %v14345_v28  ;;  %v5554_v61 = vshll.u32 %v14337_v47, 16 }
 0x403   : > { %6074 = vmatmul.mubr.bf16.gmra.mrb[140].mxu1 %v9450_v18  ;;  %6723 = vmatprep.mubr.bf16.mxu0 %v9553_v57  ;;  %v6329_v54 = vsel %vm12218_vm8, %v6327_v60, %v6328_v58  ;;  %v5558_v0 = vshrl.u32 %v14337_v47, 16  ;;  %v6332_v45 = vrot.slane %v14392_v16, 5  ;;  %v5545_v58 = vshrl.u32 %v5349_v40, 16  ;;  %v6218_v60 = vld [vmem:[#allocation2 + $0xd8] sm:$0xee] }
 0x404   : > { %6081 = vmatprep.mubr.bf16.mxu1 %v9453_v12  ;;  %10565 = vmatpush3.bf16.msra.mxu1 %v11091_v36  ;;  %v9499_v12 = vrot.slane %v6217_v20, 9  ;;  %v5537_v36 = vor.u32 %v5536_v3, %v14375_v31  ;;  %v5542_v20 = vrot.slane %v5540_v33, 5  ;;  %v5509_v28 = vsel %vm12428_vm13, %v5504_v2, %v14326_v48 }
 0x405   : > { %v10092_v50 = vpop.f32.mrb[120].mxu0  ;;  %10566 = vmatprep.subr.bf16.mxu1 %v11100_v19  ;;  %v5548_v3 = vshll.u32 %v5349_v40, 16  ;;  %v9455_v47 = vcombine.high %v5509_v28, %v14390_v13  ;;  %v6335_v33 = vrot.slane %v14402_v8, 5  ;;  %v14418_v48 = vrot.slane %v5554_v61, 5 }
 0x406   : > { %v10093_v18 = vpop.f32.mrb[121].mxu0  ;;  %v6326_v19 = vsel %vm12218_vm8, %v9499_v12, %v6325_v38  ;;  %v5538_v38 = vrot.slane %v5537_v36, 4  ;;  %v5560_v2 = vrot.slane %v5558_v0, 4  ;;  %v7405_v40 = vor.u32 %v14394_v42, %v14378_v9 }
 0x407   : > { %v14399_v63 = vadd.f32 %v10093_v18, %v10092_v50  ;;  %v10095_v57 = vpop.f32.mrb[122].mxu0  ;;  %v9555_v35 = vcombine.high %v6326_v19, %v6329_v54  ;;  %v5352_v50 = vld [vmem:[#allocation2 + $0xd8] sm:$0xff]  ;;  %v5528_v18 = vrot.slane %v5527_v46, 4  ;;  %v6334_v12 = vrot.slane %v6332_v45, 4 }
 0x408   : > { %v10096_v37 = vpop.f32.mrb[123].mxu0  ;;  %10567 = vmatpush3.bf16.msra.mxu1 %v11101_v15  ;;  %v7412_v15 = vshrl.u32 %v14380_v23, 16  ;;  %v5547_v36 = vrot.slane %v5545_v58, 4  ;;  %v14429_v46 = vld [vmem:[#allocation2 + $0xf8] sm:$0xff]  ;;  %v5569_v61 = vshrl.u32 %v5352_v50, 16  ;;  %v5572_v9 = vshll.u32 %v5352_v50, 16 }
 0x409   : > { %v14412_v59 = vadd.f32 %v10096_v37, %v10095_v57  ;;  %10896 = vmatprep.subr.bf16.mxu1 %v14289_v1  ;;  %v14424_v1 = vsel %vm12428_vm13, %v5538_v38, %v5542_v20  ;;  %v9500_v57 = vrot.slane %v6218_v60, 9  ;;  %v5550_v37 = vrot.slane %v5548_v3, 5 }
 0x40a   : > { %6724 = vmatmul.mubr.bf16.gmra.mrb[216].mxu0 %v9552_v29  ;;  %v14426_v29 = vrot.slane %v7408_v21, 5  ;;  %v6336_v0 = vsel %vm12218_vm8, %v6334_v12, %v6335_v33  ;;  %v5578_v42 = vshll.u32 %v14392_v16, 16  ;;  %v5582_v20 = vshrl.u32 %v14392_v16, 16  ;;  %v5355_v12 = vld [vmem:[#allocation2 + $0xf0] sm:$0xff] }
 0x40b   : > { %6082 = vmatmul.mubr.bf16.gmra.mrb[144].mxu1 %v9452_v6  ;;  %6731 = vmatprep.mubr.bf16.mxu0 %v9555_v35  ;;  %v5564_v6 = vshll.u32 %v14356_v51, 16  ;;  %v9454_v35 = vcombine.low %v5509_v28, %v14390_v13  ;;  %v5533_v21 = vsel %vm12428_vm13, %v5528_v18, %v14375_v31  ;;  %v5561_v58 = vor.u32 %v5560_v2, %v14418_v48  ;;  %v14440_v51 = vld [vmem:[#allocation2 + $0x100] sm:$0x11] }
 0x40c   : > { %6089 = vmatprep.mubr.bf16.mxu1 %v9455_v47  ;;  %v14442_v3 = vrot.slane %v7412_v15, 4  ;;  %v9554_v47 = vcombine.low %v6326_v19, %v6329_v54  ;;  %v9457_v38 = vcombine.high %v5533_v21, %v14424_v1  ;;  %v6333_v60 = vsel %vm12218_vm8, %v9500_v57, %v6332_v45  ;;  %v6219_v19 = vld [vmem:[#allocation2 + $0xf0] sm:$0xee] }
 0x40d   : > { %v6339_v16 = vrot.slane %v14429_v46, 5  ;;  %v9557_v33 = vcombine.high %v6333_v60, %v6336_v0  ;;  %v5551_v13 = vor.u32 %v5550_v37, %v5547_v36  ;;  %v5566_v28 = vrot.slane %v5564_v6, 5 }
 0x40e   : > { %v5571_v50 = vrot.slane %v5569_v61, 4  ;;  %v6342_v31 = vrot.slane %v14440_v51, 5  ;;  %v5574_v18 = vrot.slane %v5572_v9, 5  ;;  %v14449_v2 = vrot.slane %v5578_v42, 5  ;;  %v14456_v61 = vld [vmem:[#allocation2 + $0x110] sm:$0xff] }
 0x40f   : > { %v5584_v15 = vrot.slane %v5582_v20, 4  ;;  %v5562_v54 = vrot.slane %v5561_v58, 4  ;;  %v6341_v45 = vrot.slane %v6339_v16, 4  ;;  %v5593_v57 = vshrl.u32 %v5355_v12, 16 }
 0x410   : > { %v5596_v25 = vshll.u32 %v5355_v12, 16  ;;  %v7406_v62 = vrot.slane %v7405_v40, 4  ;;  %v9456_v36 = vcombine.low %v5533_v21, %v14424_v1  ;;  %v5552_v37 = vrot.slane %v5551_v13, 4  ;;  %v5358_v40 = vld [vmem:[#allocation2 + $0x108] sm:$0xff]  ;;  %v14464_v21 = vld [vmem:[#allocation2 + $0x118] sm:$0x11] }
 0x411   : > { %v14454_v6 = vsel %vm12428_vm13, %v5562_v54, %v5566_v28  ;;  %v9501_v42 = vrot.slane %v6219_v19, 9  ;;  %v6343_v20 = vsel %vm12218_vm8, %v6341_v45, %v6342_v31  ;;  %v5585_v58 = vor.u32 %v5584_v15, %v14449_v2 }
 0x412   : > { %6732 = vmatmul.mubr.bf16.gmra.mrb[220].mxu0 %v9554_v47  ;;  %v9556_v47 = vcombine.low %v6333_v60, %v6336_v0  ;;  %v5588_v1 = vshll.u32 %v14402_v8, 16  ;;  %v6346_v28 = vrot.slane %v14456_v61, 5  ;;  %v5595_v12 = vrot.slane %v5593_v57, 4 }
 0x413   : > { %6090 = vmatmul.mubr.bf16.gmra.mrb[148].mxu1 %v9454_v35  ;;  %6739 = vmatprep.mubr.bf16.mxu0 %v9557_v33  ;;  %v5575_v35 = vor.u32 %v5574_v18, %v5571_v50  ;;  %v5606_v33 = vshrl.u32 %v14429_v46, 16  ;;  %v6340_v13 = vsel %vm12218_vm8, %v9501_v42, %v6339_v16  ;;  %v5598_v31 = vrot.slane %v5596_v25, 5 }
 0x414   : > { %6097 = vmatprep.mubr.bf16.mxu1 %v9457_v38  ;;  %v5602_v38 = vshll.u32 %v14429_v46, 16  ;;  %v5557_v50 = vsel %vm12428_vm13, %v5552_v37, %v14418_v48  ;;  %v9559_v0 = vcombine.high %v6340_v13, %v6343_v20  ;;  %v5617_v60 = vshrl.u32 %v5358_v40, 16  ;;  %v6220_v46 = vld [vmem:[#allocation2 + $0x108] sm:$0xee] }
 0x415   : > { %v5620_v8 = vshll.u32 %v5358_v40, 16  ;;  %v9459_v15 = vcombine.high %v5557_v50, %v14454_v6  ;;  %v5576_v54 = vrot.slane %v5575_v35, 4  ;;  %v6349_v19 = vrot.slane %v14464_v21, 5 }
 0x416   : > { %v14479_v16 = vsel %vm12428_vm13, %v7406_v62, %v14426_v29  ;;  %v5586_v48 = vrot.slane %v5585_v58, 4  ;;  %v5590_v45 = vrot.slane %v5588_v1, 5  ;;  %v5604_v57 = vrot.slane %v5602_v38, 5 }
 0x417   : > { %v5608_v37 = vrot.slane %v5606_v33, 4  ;;  %v5599_v35 = vor.u32 %v5598_v31, %v5595_v12  ;;  %v5612_v9 = vshll.u32 %v14440_v51, 16  ;;  %v9502_v53 = vrot.slane %v6220_v46, 9  ;;  %v14501_v31 = vld [vmem:[#allocation2 + $0x130] sm:$0x11] }
 0x418   : > { %v5619_v49 = vrot.slane %v5617_v60, 4  ;;  %v5622_v62 = vrot.slane %v5620_v8, 5  ;;  %v5626_v27 = vshll.u32 %v14456_v61, 16  ;;  %v5630_v1 = vshrl.u32 %v14456_v61, 16  ;;  %v5361_v60 = vld [vmem:[#allocation2 + $0x120] sm:$0xff] }
 0x419   : > { %v9458_v33 = vcombine.low %v5557_v50, %v14454_v6  ;;  %v14495_v51 = vsel %vm12428_vm13, %v5576_v54, %v14449_v2  ;;  %v14499_v12 = vsel %vm12428_vm13, %v5586_v48, %v5590_v45  ;;  %v6347_v61 = vsel %vm12218_vm8, %v9502_v53, %v6346_v28  ;;  %v11173_v45 = vld [vmem:[#allocation2 + $0x40] sm:$0x11] }
 0x41a   : > { %v9980_v18 = vpop.f32.mrb[56].mxu1  ;;  %6740 = vmatmul.mubr.bf16.gmra.mrb[224].mxu0 %v9556_v47  ;;  %v6348_v47 = vrot.slane %v6346_v28, 4  ;;  %v5600_v2 = vrot.slane %v5599_v35, 4  ;;  %v5614_v8 = vrot.slane %v5612_v9, 5  ;;  %v6356_v54 = vrot.slane %v14501_v31, 5 }
 0x41b   : > { %v9981_v25 = vpop.f32.mrb[57].mxu1  ;;  %6098 = vmatmul.mubr.bf16.gmra.mrb[152].mxu1 %v9456_v36  ;;  %6747 = vmatprep.mubr.bf16.mxu0 %v9559_v0  ;;  %v9558_v0 = vcombine.low %v6340_v13, %v6343_v20  ;;  %v5628_v20 = vrot.slane %v5626_v27, 5  ;;  %v5632_v13 = vrot.slane %v5630_v1, 4  ;;  %v6221_v28 = vld [vmem:[#allocation2 + $0x120] sm:$0xee]  ;;  %v5641_v46 = vshrl.u32 %v5361_v60, 16 }
 0x41c   : > { %v9982_v42 = vadd.f32 %v9981_v25, %v9980_v18  ;;  %v9983_v40 = vpop.f32.mrb[58].mxu1  ;;  %6105 = vmatprep.mubr.bf16.mxu1 %v9459_v15  ;;  %v14485_v58 = vsel %vm12218_vm8, %v6348_v47, %v6349_v19  ;;  %v5623_v18 = vor.u32 %v5622_v62, %v5619_v49  ;;  %v9461_v15 = vcombine.high %v14495_v51, %v14499_v12 }
 0x41d   : > { %v9984_v44 = vpop.f32.mrb[59].mxu1  ;;  %v9561_v50 = vcombine.high %v6347_v61, %v14485_v58  ;;  %v16069_v19 = vor.u32 %v14442_v3, %v14426_v29  ;;  %v5650_v9 = vshll.u32 %v5362_v11, 16  ;;  %v5654_v48 = vshrl.u32 %v5362_v11, 16  ;;  %v5365_v3 = vld [vmem:[#allocation2 + $0x140] sm:$0xff] }
 0x41e   : > { %v9985_v36 = vadd.f32 %v9984_v44, %v9983_v40  ;;  %v14489_v38 = vadd.f32 %v14399_v63, %v9982_v42  ;;  %v5609_v44 = vor.u32 %v5608_v37, %v5604_v57  ;;  %v6353_v63 = vrot.slane %v5362_v11, 5 }
 0x41f   : > { %v14515_v25 = vrot.slane %v16069_v19, 4  ;;  %v7418_v37 = vshll.u32 %v11173_v45, 16  ;;  %v9460_v27 = vcombine.low %v14495_v51, %v14499_v12  ;;  %v14521_v40 = vsel %vm12428_vm13, %v5600_v2, %v5604_v57  ;;  %v14535_v12 = vld [vmem:[#allocation2 + $0x148] sm:$0x11] }
 0x420   : > { %16067 = vst [vmem:[#allocation35_spill] sm:$0xff] %v14489_v38  ;;  %v14506_v6 = vadd.f32 %v14412_v59, %v9985_v36  ;;  %v5610_v53 = vrot.slane %v5609_v44, 4  ;;  %v5644_v59 = vshll.u32 %v5361_v60, 16  ;;  %v6355_v49 = vrot.slane %v6353_v63, 4 }
 0x421   : > { %v5624_v29 = vrot.slane %v5623_v18, 4  ;;  %v9503_v62 = vrot.slane %v6221_v28, 9  ;;  %v5633_v36 = vor.u32 %v5632_v13, %v5628_v20  ;;  %v5636_v1 = vshll.u32 %v14464_v21, 16 }
 0x422   : > { %16068 = vst [vmem:[#allocation36_spill] sm:$0xff] %v14506_v6  ;;  %6748 = vmatmul.mubr.bf16.gmra.mrb[228].mxu0 %v9558_v0  ;;  %v14525_v47 = vsel %vm12428_vm13, %v5610_v53, %v5614_v8  ;;  %v14529_v11 = vsel %vm12218_vm8, %v6355_v49, %v6356_v54  ;;  %v9560_v57 = vcombine.low %v6347_v61, %v14485_v58  ;;  %v5643_v44 = vrot.slane %v5641_v46, 4  ;;  %v14541_v54 = vld [vmem:[#allocation2 + $0x48] sm:$0xff]  ;;  %v14624_v6 = vld [vmem:[#allocation2 + $0x178] sm:$0x11] }
 0x423   : > { %6106 = vmatmul.mubr.bf16.gmra.mrb[156].mxu1 %v9458_v33  ;;  %6755 = vmatprep.mubr.bf16.mxu0 %v9561_v50  ;;  %v5646_v0 = vrot.slane %v5644_v59, 5  ;;  %v6354_v50 = vsel %vm12218_vm8, %v9503_v62, %v6353_v63  ;;  %v6360_v2 = vrot.slane %v5365_v3, 5  ;;  %v14539_v8 = vrot.slane %v5650_v9, 5  ;;  %16070 = vst [vmem:[#allocation39_spill] sm:$0xff] %v14541_v54  ;;  %v6222_v59 = vld [vmem:[#allocation2 + $0x138] sm:$0xee] }
 0x424   : > { %6113 = vmatprep.mubr.bf16.mxu1 %v9461_v15  ;;  %v5656_v18 = vrot.slane %v5654_v48, 4  ;;  %v5364_v15 = vld [vmem:[#allocation2 + $0x138] sm:$0xff]  ;;  %v9563_v13 = vcombine.high %v6354_v50, %v14529_v11  ;;  %v5674_v58 = vshll.u32 %v5365_v3, 16  ;;  %v5678_v61 = vshrl.u32 %v5365_v3, 16 }
 0x425   : > { %v10098_v42 = vpop.f32.mrb[124].mxu0  ;;  %v9463_v53 = vcombine.high %v14521_v40, %v14525_v47  ;;  %v5638_v28 = vrot.slane %v5636_v1, 5  ;;  %v6363_v63 = vrot.slane %v14535_v12, 5  ;;  %v5660_v46 = vshll.u32 %v14501_v31, 16 }
 0x426   : > { %v10099_v35 = vpop.f32.mrb[125].mxu0  ;;  %v5665_v19 = vshrl.u32 %v5364_v15, 16  ;;  %v5668_v49 = vshll.u32 %v5364_v15, 16  ;;  %v7420_v9 = vrot.slane %v7418_v37, 5  ;;  %v9462_v45 = vcombine.low %v14521_v40, %v14525_v47 }
 0x427   : > { %v14532_v33 = vadd.f32 %v10099_v35, %v10098_v42  ;;  %v10101_v51 = vpop.f32.mrb[126].mxu0  ;;  %v5634_v42 = vrot.slane %v5633_v36, 4  ;;  %v6362_v3 = vrot.slane %v6360_v2, 4  ;;  %v5647_v35 = vor.u32 %v5646_v0, %v5643_v44  ;;  %v14572_v44 = vld [vmem:[#allocation2 + $0x160] sm:$0x11] }
 0x428   : > { %v10102_v60 = vpop.f32.mrb[127].mxu0  ;;  %v14555_v1 = vsel %vm12428_vm13, %v5624_v29, %v5628_v20  ;;  %v5657_v31 = vor.u32 %v5656_v18, %v14539_v8  ;;  %v5680_v37 = vrot.slane %v5678_v61, 4  ;;  %v9504_v40 = vrot.slane %v6222_v59, 9 }
 0x429   : > { %v14543_v21 = vadd.f32 %v10102_v60, %v10101_v51  ;;  %v14560_v51 = vrot.slane %v5674_v58, 5  ;;  %v14564_v60 = vsel %vm12428_vm13, %v5634_v42, %v5638_v28  ;;  %v14568_v47 = vsel %vm12218_vm8, %v6362_v3, %v6363_v63 }
 0x42a   : > { %6756 = vmatmul.mubr.bf16.gmra.mrb[232].mxu0 %v9560_v57  ;;  %v5662_v36 = vrot.slane %v5660_v46, 5  ;;  %v5667_v0 = vrot.slane %v5665_v19, 4  ;;  %v5670_v18 = vrot.slane %v5668_v49, 5  ;;  %v5684_v15 = vshll.u32 %v14535_v12, 16  ;;  %v5367_v19 = vld [vmem:[#allocation2 + $0x150] sm:$0xff] }
 0x42b   : > { %6114 = vmatmul.mubr.bf16.gmra.mrb[160].mxu1 %v9460_v27  ;;  %6763 = vmatprep.mubr.bf16.mxu0 %v9563_v13  ;;  %v14558_v27 = vld [vmem:[#allocation2 + $0x158] sm:$0xff]  ;;  %v9562_v58 = vcombine.low %v6354_v50, %v14529_v11  ;;  %v6361_v61 = vsel %vm12218_vm8, %v9504_v40, %v6360_v2  ;;  %v5658_v59 = vrot.slane %v5657_v31, 4  ;;  %v5681_v42 = vor.u32 %v5680_v37, %v14560_v51  ;;  %v14587_v2 = vld [vmem:[#allocation2 + $0x50] sm:$0xff] }
 0x42c   : > { %6121 = vmatprep.mubr.bf16.mxu1 %v9463_v53  ;;  %v5648_v53 = vrot.slane %v5647_v35, 4  ;;  %v6367_v28 = vrot.slane %v14558_v27, 5  ;;  %v9565_v46 = vcombine.high %v6361_v61, %v14568_v47  ;;  %v9465_v12 = vcombine.high %v14555_v1, %v14564_v60  ;;  %16071 = vst [vmem:[#allocation40_spill] sm:$0xff] %v14587_v2  ;;  %v6223_v35 = vld [vmem:[#allocation2 + $0x150] sm:$0xee] }
 0x42d   : > { %v10232_v62 = vpop.f32.mrb[128].mxu0  ;;  %v6370_v11 = vrot.slane %v14572_v44, 5  ;;  %v7426_v50 = vshll.u32 %v14541_v54, 16  ;;  %v7432_v49 = vshll.u32 %v14587_v2, 16  ;;  %v14592_v3 = vsel %vm12428_vm13, %v5658_v59, %v5662_v36 }
 0x42e   : > { %v10233_v57 = vpop.f32.mrb[129].mxu0  ;;  %v5686_v31 = vrot.slane %v5684_v15, 5  ;;  %v14597_v37 = vsel %vm12428_vm13, %v14515_v25, %v7420_v9  ;;  %v6369_v40 = vrot.slane %v6367_v28, 4  ;;  %v14605_v36 = vsel %vm12428_vm13, %v5648_v53, %v14539_v8 }
 0x42f   : > { %v14570_v20 = vadd.f32 %v10233_v57, %v10232_v62  ;;  %v10235_v29 = vpop.f32.mrb[130].mxu0  ;;  %v5671_v62 = vor.u32 %v5670_v18, %v5667_v0  ;;  %v9464_v57 = vcombine.low %v14555_v1, %v14564_v60  ;;  %v5682_v0 = vrot.slane %v5681_v42, 4  ;;  %v14607_v18 = vld [vmem:[#allocation2 + $0x170] sm:$0xff] }
 0x430   : > { %v10236_v13 = vpop.f32.mrb[131].mxu0  ;;  %v5692_v15 = vshll.u32 %v5367_v19, 16  ;;  %v5698_v25 = vshll.u32 %v14558_v27, 16  ;;  %v9467_v1 = vcombine.high %v14605_v36, %v14592_v3  ;;  %v9505_v60 = vrot.slane %v6223_v35, 9 }
 0x431   : > { %v14579_v63 = vadd.f32 %v10236_v13, %v10235_v29  ;;  %v5689_v29 = vshrl.u32 %v5367_v19, 16  ;;  %v5702_v59 = vshrl.u32 %v14558_v27, 16  ;;  %v9564_v19 = vcombine.low %v6361_v61, %v14568_v47 }
 0x432   : > { %6764 = vmatmul.mubr.bf16.gmra.mrb[236].mxu0 %v9562_v58  ;;  %v14622_v48 = vsel %vm12428_vm13, %v5682_v0, %v5686_v31  ;;  %v6374_v27 = vrot.slane %v14607_v18, 5  ;;  %v5694_v61 = vrot.slane %v5692_v15, 5 }
 0x433   : > { %6122 = vmatmul.mubr.bf16.gmra.mrb[164].mxu1 %v9462_v45  ;;  %6771 = vmatprep.mubr.bf16.mxu0 %v9565_v46  ;;  %v7436_v45 = vshrl.u32 %v14587_v2, 16  ;;  %v14614_v46 = vsel %vm12218_vm8, %v6369_v40, %v6370_v11  ;;  %v6368_v11 = vsel %vm12218_vm8, %v9505_v60, %v6367_v28  ;;  %v14629_v40 = vrot.slane %v5689_v29, 4  ;;  %v6224_v29 = vld [vmem:[#allocation2 + $0x168] sm:$0xee] }
 0x434   : > { %6129 = vmatprep.mubr.bf16.mxu1 %v9465_v12  ;;  %v5672_v12 = vrot.slane %v5671_v62, 4  ;;  %v9567_v47 = vcombine.high %v6368_v11, %v14614_v46  ;;  %v14634_v62 = vrot.slane %v5698_v25, 5  ;;  %v5704_v28 = vrot.slane %v5702_v59, 4  ;;  %v5370_v59 = vld [vmem:[#allocation2 + $0x168] sm:$0xff] }
 0x435   : > { %v10238_v13 = vpop.f32.mrb[132].mxu0  ;;  %v5708_v60 = vshll.u32 %v14572_v44, 16  ;;  %v16073_v25 = vshrl.u32 %v14541_v54, 16  ;;  %v6376_v44 = vrot.slane %v6374_v27, 4  ;;  %v11175_v54 = vld [vmem:[#allocation2 + $0x58] sm:$0x11] }
 0x436   : > { %v9986_v9 = vpop.f32.mrb[60].mxu1  ;;  %v10239_v58 = vpop.f32.mrb[133].mxu0  ;;  %v7442_v2 = vshll.u32 %v11175_v54, 16  ;;  %v5732_v54 = vshll.u32 %v14624_v6, 16 }
 0x437   : > { %v9987_v8 = vpop.f32.mrb[61].mxu1  ;;  %v14617_v53 = vadd.f32 %v10239_v58, %v10238_v13  ;;  %v10241_v42 = vpop.f32.mrb[134].mxu0 }
 0x438   : > { %v9988_v35 = vadd.f32 %v9987_v8, %v9986_v9  ;;  %v9989_v38 = vpop.f32.mrb[62].mxu1  ;;  %v10242_v22 = vpop.f32.mrb[135].mxu0  ;;  %v6377_v9 = vrot.slane %v14624_v6, 5  ;;  %v14647_v8 = vrot.slane %v16073_v25, 4 }
 0x439   : > { %v9990_v13 = vpop.f32.mrb[63].mxu1  ;;  %v14631_v58 = vadd.f32 %v10242_v22, %v10241_v42  ;;  %v14641_v22 = vld [vmem:[#allocation2 + $0x188] sm:$0xff]  ;;  %v14659_v42 = vrot.slane %v7432_v49, 5  ;;  %v5705_v49 = vor.u32 %v5704_v28, %v14634_v62  ;;  %v5722_v28 = vshll.u32 %v14607_v18, 16 }
 0x43a   : > { %v14637_v31 = vadd.f32 %v14532_v33, %v9988_v35  ;;  %v9991_v0 = vadd.f32 %v9990_v13, %v9989_v38  ;;  %6772 = vmatmul.mubr.bf16.gmra.mrb[240].mxu0 %v9564_v19  ;;  %v14649_v33 = vrot.slane %v7426_v50, 5  ;;  %v9466_v35 = vcombine.low %v14605_v36, %v14592_v3 }
 0x43b   : > { %6130 = vmatmul.mubr.bf16.gmra.mrb[168].mxu1 %v9464_v57  ;;  %6779 = vmatprep.mubr.bf16.mxu0 %v9567_v47  ;;  %v14657_v57 = vsel %vm12428_vm13, %v5672_v12, %v14560_v51  ;;  %v14666_v13 = vrot.slane %v7436_v45, 4  ;;  %v14670_v51 = vsel %vm12218_vm8, %v6376_v44, %v6377_v9  ;;  %v6225_v12 = vld [vmem:[#allocation2 + $0x180] sm:$0xee]  ;;  %v6381_v25 = vrot.slane %v14641_v22, 5 }
 0x43c   : > { %16072 = vst [vmem:[#allocation56_spill] sm:$0xff] %v14637_v31  ;;  %v14652_v38 = vadd.f32 %v14543_v21, %v9991_v0  ;;  %6137 = vmatprep.mubr.bf16.mxu1 %v9467_v1  ;;  %v9469_v50 = vcombine.high %v14657_v57, %v14622_v48  ;;  %v5695_v21 = vor.u32 %v5694_v61, %v14629_v40  ;;  %v9506_v0 = vrot.slane %v6224_v29, 9  ;;  %v14677_v61 = vld [vmem:[#allocation2 + $0x190] sm:$0x11] }
 0x43d   : > { %v10244_v19 = vpop.f32.mrb[136].mxu0  ;;  %v9566_v40 = vcombine.low %v6368_v11, %v14614_v46  ;;  %v5710_v45 = vrot.slane %v5708_v60, 5  ;;  %v5726_v44 = vshrl.u32 %v14607_v18, 16  ;;  %v9507_v11 = vrot.slane %v6225_v12, 9 }
 0x43e   : > { %16074 = vst [vmem:[#allocation57_spill] sm:$0xff] %v14652_v38  ;;  %v10120_v1 = vpop.f32.mrb[64].mxu1  ;;  %v10245_v47 = vpop.f32.mrb[137].mxu0  ;;  %v5713_v38 = vshrl.u32 %v5370_v59, 16  ;;  %v6375_v9 = vsel %vm12218_vm8, %v9506_v0, %v6374_v27  ;;  %v5716_v60 = vshll.u32 %v5370_v59, 16  ;;  %v6383_v7 = vrot.slane %v6381_v25, 4 }
 0x43f   : > { %v10121_v3 = vpop.f32.mrb[65].mxu1  ;;  %v14674_v36 = vadd.f32 %v10245_v47, %v10244_v19  ;;  %v10247_v15 = vpop.f32.mrb[138].mxu0  ;;  %v9569_v46 = vcombine.high %v6375_v9, %v14670_v51  ;;  %v6384_v27 = vrot.slane %v14677_v61, 5  ;;  %v5696_v0 = vrot.slane %v5695_v21, 4 }
 0x440   : > { %v10122_v29 = vadd.f32 %v10121_v3, %v10120_v1  ;;  %v10123_v31 = vpop.f32.mrb[66].mxu1  ;;  %v10248_v52 = vpop.f32.mrb[139].mxu0  ;;  %v5706_v18 = vrot.slane %v5705_v49, 4  ;;  %v14692_v59 = vrot.slane %v5722_v28, 5  ;;  %v5715_v21 = vrot.slane %v5713_v38, 4 }
 0x441   : > { %v10124_v19 = vpop.f32.mrb[67].mxu1  ;;  %v14685_v47 = vadd.f32 %v10248_v52, %v10247_v15  ;;  %v7447_v52 = vshrl.u32 %v14683_v30, 16  ;;  %v5718_v49 = vrot.slane %v5716_v60, 5  ;;  %v5746_v6 = vshll.u32 %v14641_v22, 16 }
 0x442   : > { %v4782_v1 = vadd.f32 %v10122_v29, %v13768_v10  ;;  %v10125_v3 = vadd.f32 %v10124_v19, %v10123_v31  ;;  %6780 = vmatmul.mubr.bf16.gmra.mrb[244].mxu0 %v9566_v40  ;;  %v5728_v10 = vrot.slane %v5726_v44, 4  ;;  %v5740_v19 = vshll.u32 %v5373_v24, 16 }
 0x443   : > { %6138 = vmatmul.mubr.bf16.gmra.mrb[172].mxu1 %v9466_v35  ;;  %6787 = vmatprep.mubr.bf16.mxu0 %v9569_v46  ;;  %v14699_v35 = vsel %vm12428_vm13, %v5706_v18, %v5710_v45  ;;  %v5750_v46 = vshrl.u32 %v14641_v22, 16  ;;  %v9468_v56 = vcombine.low %v14657_v57, %v14622_v48  ;;  %v5734_v57 = vrot.slane %v5732_v54, 5 }
 0x444   : > { %v4783_v15 = vadd.f32 %v10125_v3, %v13780_v26  ;;  %6145 = vmatprep.mubr.bf16.mxu1 %v9469_v50  ;;  %v14695_v31 = vadd.f32 %v14570_v20, %v4782_v1  ;;  %v14704_v26 = vsel %vm12218_vm8, %v9507_v11, %v6381_v25  ;;  %v14708_v50 = vsel %vm12218_vm8, %v6383_v7, %v6384_v27 }
 0x445   : > { %v10250_v12 = vpop.f32.mrb[140].mxu0  ;;  %v5737_v20 = vshrl.u32 %v5373_v24, 16  ;;  %v9568_v7 = vcombine.low %v6375_v9, %v14670_v51  ;;  %v5701_v24 = vsel %vm12428_vm13, %v5696_v0, %v14634_v62  ;;  %v9571_v22 = vcombine.high %v14704_v26, %v14708_v50 }
 0x446   : > { %v10126_v40 = vpop.f32.mrb[68].mxu1  ;;  %v10251_v29 = vpop.f32.mrb[141].mxu0  ;;  %v14711_v28 = vadd.f32 %v14579_v63, %v4783_v15  ;;  %v5729_v63 = vor.u32 %v5728_v10, %v14692_v59  ;;  %v5719_v27 = vor.u32 %v5718_v49, %v5715_v21  ;;  %v9471_v48 = vcombine.high %v5701_v24, %v14699_v35 }
 0x447   : > { %v10127_v45 = vpop.f32.mrb[69].mxu1  ;;  %v14713_v44 = vadd.f32 %v10251_v29, %v10250_v12  ;;  %v10253_v38 = vpop.f32.mrb[142].mxu0  ;;  %v5739_v51 = vrot.slane %v5737_v20, 4  ;;  %v5742_v9 = vrot.slane %v5740_v19, 5  ;;  %v14730_v10 = vrot.slane %v5746_v6, 5  ;;  %v14741_v20 = vld [vmem:[#allocation2 + $0x68] sm:$0xff] }
 0x448   : > { %v10128_v60 = vadd.f32 %v10127_v45, %v10126_v40  ;;  %v10129_v25 = vpop.f32.mrb[70].mxu1  ;;  %v10254_v11 = vpop.f32.mrb[143].mxu0  ;;  %v5752_v12 = vrot.slane %v5750_v46, 4  ;;  %v5730_v0 = vrot.slane %v5729_v63, 4  ;;  %v7450_v21 = vshll.u32 %v14683_v30, 16 }
 0x449   : > { %v10130_v1 = vpop.f32.mrb[71].mxu1  ;;  %v14721_v3 = vadd.f32 %v10254_v11, %v10253_v38  ;;  %v5720_v40 = vrot.slane %v5719_v27, 4  ;;  %v7429_v54 = vor.u32 %v14649_v33, %v14647_v8  ;;  %v7439_v29 = vor.u32 %v14666_v13, %v14659_v42 }
 0x44a   : > { %v4784_v18 = vadd.f32 %v10128_v60, %v13804_v41  ;;  %v10131_v15 = vadd.f32 %v10130_v1, %v10129_v25  ;;  %6788 = vmatmul.mubr.bf16.gmra.mrb[248].mxu0 %v9568_v7  ;;  %v7456_v45 = vshll.u32 %v14741_v20, 16  ;;  %v14746_v19 = vsel %vm12428_vm13, %v5730_v0, %v5734_v57 }
 0x44b   : > { %6146 = vmatmul.mubr.bf16.gmra.mrb[176].mxu1 %v9468_v56  ;;  %6795 = vmatprep.mubr.bf16.mxu0 %v9571_v22  ;;  %v7460_v6 = vshrl.u32 %v14741_v20, 16  ;;  %v5743_v60 = vor.u32 %v5742_v9, %v5739_v51  ;;  %v5753_v25 = vor.u32 %v5752_v12, %v14730_v10  ;;  %v5756_v11 = vshll.u32 %v14677_v61, 16  ;;  %v14773_v12 = vld [vmem:[#allocation2 + $0x78] sm:$0xff] }
 0x44c   : > { %v4785_v62 = vadd.f32 %v10131_v15, %v13816_v17  ;;  %6153 = vmatprep.mubr.bf16.mxu1 %v9471_v48  ;;  %v14735_v41 = vadd.f32 %v14617_v53, %v4784_v18  ;;  %v7444_v53 = vrot.slane %v7442_v2, 5  ;;  %v9570_v2 = vcombine.low %v14704_v26, %v14708_v50 }
 0x44d   : > { %v10256_v49 = vpop.f32.mrb[144].mxu0  ;;  %v7449_v1 = vrot.slane %v7447_v52, 4  ;;  %v9470_v18 = vcombine.low %v5701_v24, %v14699_v35  ;;  %v5725_v15 = vsel %vm12428_vm13, %v5720_v40, %v14692_v59  ;;  %v14766_v61 = vrot.slane %v7456_v45, 5 }
 0x44e   : > { %v10132_v17 = vpop.f32.mrb[72].mxu1  ;;  %v10257_v38 = vpop.f32.mrb[145].mxu0  ;;  %v14750_v46 = vadd.f32 %v14631_v58, %v4785_v62  ;;  %v7452_v58 = vrot.slane %v7450_v21, 5  ;;  %v9473_v26 = vcombine.high %v5725_v15, %v14746_v19  ;;  %v7462_v50 = vrot.slane %v7460_v6, 4 }
 0x44f   : > { %v10133_v8 = vpop.f32.mrb[73].mxu1  ;;  %v14752_v33 = vadd.f32 %v10257_v38, %v10256_v49  ;;  %v10259_v13 = vpop.f32.mrb[146].mxu0  ;;  %v16075_v52 = vcombine.high %v14479_v16, %v14597_v37  ;;  %v5744_v51 = vrot.slane %v5743_v60, 4  ;;  %v5754_v35 = vrot.slane %v5753_v25, 4  ;;  %v11177_v38 = vld [vmem:[#allocation2 + $0x70] sm:$0x11] }
 0x450   : > { %v10134_v56 = vadd.f32 %v10133_v8, %v10132_v17  ;;  %v10135_v7 = vpop.f32.mrb[74].mxu1  ;;  %v10260_v63 = vpop.f32.mrb[147].mxu0  ;;  %v5758_v24 = vrot.slane %v5756_v11, 5  ;;  %v7440_v9 = vrot.slane %v7439_v29, 4  ;;  %v9700_v0 = vcombine.low %v14479_v16, %v14597_v37 }
 0x451   : > { %v10136_v22 = vpop.f32.mrb[75].mxu1  ;;  %v14760_v27 = vadd.f32 %v10260_v63, %v10259_v13  ;;  %v7453_v40 = vor.u32 %v7452_v58, %v7449_v1  ;;  %v7463_v17 = vor.u32 %v7462_v50, %v14766_v61  ;;  %v14795_v37 = vsel %vm12428_vm13, %v5744_v51, %v14730_v10  ;;  %v14812_v10 = vld [vmem:[#allocation2 + $0x80] sm:$0xff]  ;;  %v14829_v51 = vld [vmem:[#allocation2 + $0x90] sm:$0xff] }
 0x452   : > { %v4786_v48 = vadd.f32 %v10134_v56, %v13858_v32  ;;  %v10137_v57 = vadd.f32 %v10136_v22, %v10135_v7  ;;  %6796 = vmatmul.mubr.bf16.gmra.mrb[252].mxu0 %v9570_v2  ;;  %v7430_v32 = vrot.slane %v7429_v54, 4  ;;  %v14783_v49 = vsel %vm12428_vm13, %v7440_v9, %v7444_v53  ;;  %v14810_v56 = vld [vmem:[%s15742_s2 + $0x400] sm:$0xff]   ;;  %v14824_v22 = vld [vmem:[%s15742_s2 + $0x448] sm:$0xff]  }
 0x453   : > { %6154 = vmatmul.mubr.bf16.gmra.mrb[180].mxu1 %v9470_v18  ;;  %8071 = vmatprep.mubr.bf16.mxu0 %v16075_v52  ;;  %v7471_v54 = vshrl.u32 %v14773_v12, 16  ;;  %v14799_v53 = vsel %vm12428_vm13, %v5754_v35, %v5758_v24  ;;  %v7474_v13 = vshll.u32 %v14773_v12, 16  ;;  %v7480_v7 = vshll.u32 %v14812_v10, 16  ;;  %v14837_v9 = vld [vmem:[%s15742_s2 + $0x408] sm:$0xff]  }
 0x454   : > { %v4787_v59 = vadd.f32 %v10137_v57, %v13878_v14  ;;  %6161 = vmatprep.mubr.bf16.mxu1 %v9473_v26  ;;  %v14777_v62 = vadd.f32 %v14674_v36, %v4786_v48  ;;  %v7466_v14 = vshll.u32 %v11177_v38, 16  ;;  %v7484_v63 = vshrl.u32 %v14812_v10, 16 }
 0x455   : > { %v10262_v21 = vpop.f32.mrb[148].mxu0  ;;  %v9472_v58 = vcombine.low %v5725_v15, %v14746_v19  ;;  %v9475_v57 = vcombine.high %v14795_v37, %v14799_v53  ;;  %v7454_v50 = vrot.slane %v7453_v40, 4  ;;  %v7464_v19 = vrot.slane %v7463_v17, 4 }
 0x456   : > { %v10138_v45 = vpop.f32.mrb[76].mxu1  ;;  %v10263_v29 = vpop.f32.mrb[149].mxu0  ;;  %v14788_v36 = vadd.f32 %v14685_v47, %v4787_v59  ;;  %v14805_v47 = vsel %vm12428_vm13, %v7430_v32, %v14659_v42  ;;  %v7468_v26 = vrot.slane %v7466_v14, 5  ;;  %v7473_v15 = vrot.slane %v7471_v54, 4 }
 0x457   : > { %v10139_v6 = vpop.f32.mrb[77].mxu1  ;;  %v14790_v8 = vadd.f32 %v10263_v29, %v10262_v21  ;;  %v10265_v16 = vpop.f32.mrb[150].mxu0  ;;  %v9703_v42 = vcombine.high %v14805_v47, %v14783_v49  ;;  %v7476_v52 = vrot.slane %v7474_v13, 5  ;;  %v14832_v24 = vrot.slane %v7480_v7, 5  ;;  %v11180_v21 = vld [vmem:[#allocation2 + $0x88] sm:$0x11] }
 0x458   : > { %v10140_v60 = vadd.f32 %v10139_v6, %v10138_v45  ;;  %v10141_v25 = vpop.f32.mrb[78].mxu1  ;;  %v10266_v11 = vpop.f32.mrb[151].mxu0  ;;  %v7490_v40 = vshll.u32 %v11180_v21, 16  ;;  %v14850_v45 = vld [vmem:[%s15742_s2 + $0x450] sm:$0xff]   ;;  %v7495_v38 = vshrl.u32 %v14829_v51, 16  ;;  %v7498_v14 = vshll.u32 %v14829_v51, 16 }
 0x459   : > { %v10142_v2 = vpop.f32.mrb[79].mxu1  ;;  %v14816_v1 = vadd.f32 %v10266_v11, %v10265_v16  ;;  %v9702_v54 = vcombine.low %v14805_v47, %v14783_v49  ;;  %v14879_v47 = vld [vmem:[%s15742_s2 + $0x410] sm:$0xff]   ;;  %v14898_v21 = vld [vmem:[#allocation2 + $0xa8] sm:$0xff] }
 0x45a   : > { %v4788_v18 = vadd.f32 %v10140_v60, %v13893_v39  ;;  %v10143_v48 = vadd.f32 %v10142_v2, %v10141_v25  ;;  %8072 = vmatmul.mubr.bf16.vlgmr.msra.gmra.mrb[0].mxu0 %v9700_v0  ;;  %v7486_v39 = vrot.slane %v7484_v63, 4  ;;  %v14843_v0 = vld [vmem:[#allocation2 + $0x30] sm:$0xff]  ;;  %v14866_v60 = vld [vmem:[#allocation2 + $0x98] sm:$0xff] }
 0x45b   : > { %6162 = vmatmul.mubr.bf16.gmra.mrb[184].mxu1 %v9472_v58  ;;  %8079 = vmatprep.mubr.bf16.mxu0 %v9703_v42  ;;  %v7504_v25 = vshll.u32 %v14866_v60, 16  ;;  %v7508_v11 = vshrl.u32 %v14866_v60, 16  ;;  %v7477_v58 = vor.u32 %v7476_v52, %v7473_v15  ;;  %v7497_v15 = vrot.slane %v7495_v38, 4 }
 0x45c   : > { %v4789_v35 = vadd.f32 %v10143_v48, %v13907_v55  ;;  %6169 = vmatprep.mubr.bf16.mxu1 %v9475_v57  ;;  %10777 = vmatpush3.bf16.msra.mxu0 %v14810_v56  ;;  %v14841_v59 = vadd.f32 %v14713_v44, %v4788_v18  ;;  %v9621_v55 = vcombine.high %v14843_v0, %v14380_v23  ;;  %v7492_v57 = vrot.slane %v7490_v40, 5 }
 0x45d   : > { %v10268_v32 = vpop.f32.mrb[152].mxu0  ;;  %10778 = vmatprep.subr.bf16.mxu0 %v14824_v22  ;;  %v14855_v44 = vsel %vm12428_vm13, %v7464_v19, %v7468_v26  ;;  %v7487_v49 = vor.u32 %v7486_v39, %v14832_v24  ;;  %v9474_v48 = vcombine.low %v14795_v37, %v14799_v53  ;;  %v14891_v26 = vld [vmem:[%s15742_s2 + $0x458] sm:$0xff]   ;;  %v7500_v52 = vrot.slane %v7498_v14, 5 }
 0x45e   : > { %v10144_v29 = vpop.f32.mrb[80].mxu1  ;;  %v10269_v17 = vpop.f32.mrb[153].mxu0  ;;  %v14860_v23 = vadd.f32 %v14721_v3, %v4789_v35  ;;  %v14873_v3 = vsel %vm12428_vm13, %v7454_v50, %v14766_v61  ;;  %v14895_v37 = vrot.slane %v7504_v25, 5  ;;  %v7510_v53 = vrot.slane %v7508_v11, 4 }
 0x45f   : > { %v10145_v6 = vpop.f32.mrb[81].mxu1  ;;  %v14864_v16 = vadd.f32 %v10269_v17, %v10268_v32  ;;  %v10271_v13 = vpop.f32.mrb[154].mxu0  ;;  %v9705_v61 = vcombine.high %v14873_v3, %v14855_v44  ;;  %v7478_v39 = vrot.slane %v7477_v58, 4  ;;  %v7488_v32 = vrot.slane %v7487_v49, 4 }
 0x460   : > { %v10146_v7 = vadd.f32 %v10145_v6, %v10144_v29  ;;  %v10147_v63 = vpop.f32.mrb[82].mxu1  ;;  %v10272_v2 = vpop.f32.mrb[155].mxu0  ;;  %10779 = vmatpush3.bf16.msra.mxu0 %v14837_v9  ;;  %v9704_v29 = vcombine.low %v14873_v3, %v14855_v44 }
 0x461   : > { %v10148_v42 = vpop.f32.mrb[83].mxu1  ;;  %v14882_v18 = vadd.f32 %v10272_v2, %v10271_v13  ;;  %10780 = vmatprep.subr.bf16.mxu0 %v14850_v45  ;;  %v14919_v14 = vsel %vm12428_vm13, %v7488_v32, %v7492_v57  ;;  %v7522_v2 = vshll.u32 %v14898_v21, 16  ;;  %v11184_v57 = vld [vmem:[#allocation2 + $0x38] sm:$0xff]  ;;  %v16077_v32 = vld [vmem:[#allocation39_spill] sm:$0xff] }
 0x462   : > { %v4790_v50 = vadd.f32 %v10146_v7, %v13921_v34  ;;  %v10149_v19 = vadd.f32 %v10148_v42, %v10147_v63  ;;  %8080 = vmatmul.mubr.bf16.gmra.mrb[4].mxu0 %v9702_v54  ;;  %v14903_v34 = vld [vmem:[%s15742_s2 + $0x418] sm:$0xff]   ;;  %v7501_v54 = vor.u32 %v7500_v52, %v7497_v15  ;;  %v7511_v7 = vor.u32 %v7510_v53, %v14895_v37 }
 0x463   : > { %6170 = vmatmul.mubr.bf16.gmra.mrb[188].mxu1 %v9474_v48  ;;  %8087 = vmatprep.mubr.bf16.mxu0 %v9705_v61  ;;  %v7519_v63 = vshrl.u32 %v14898_v21, 16  ;;  %v14932_v42 = vsel %vm12428_vm13, %v7478_v39, %v14832_v24  ;;  %v14947_v24 = vld [vmem:[%s15742_s2 + $0x420] sm:$0xff]   ;;  %v16076_v39 = vld [vmem:[#allocation40_spill] sm:$0xff] }
 0x464   : > { %v4791_v35 = vadd.f32 %v10149_v19, %v13933_v43  ;;  %7189 = vmatprep.mubr.bf16.mxu1 %v9621_v55  ;;  %10781 = vmatpush3.bf16.msra.mxu0 %v14879_v47  ;;  %v14907_v40 = vadd.f32 %v14752_v33, %v4790_v50  ;;  %v14914_v43 = vld [vmem:[%s15742_s2 + $0x460] sm:$0xff]   ;;  %v9620_v50 = vcombine.low %v14843_v0, %v11184_v57 }
 0x465   : > { %v10274_v17 = vpop.f32.mrb[156].mxu0  ;;  %10782 = vmatprep.subr.bf16.mxu0 %v14891_v26  ;;  %v11182_v33 = vld [vmem:[#allocation2 + $0xa0] sm:$0x11]  ;;  %v9707_v52 = vcombine.high %v14932_v42, %v14919_v14  ;;  %v9623_v0 = vcombine.high %v16077_v32, %v16076_v39 }
 0x466   : > { %v10150_v55 = vpop.f32.mrb[84].mxu1  ;;  %v10275_v38 = vpop.f32.mrb[157].mxu0  ;;  %v7514_v6 = vshll.u32 %v11182_v33, 16  ;;  %v14922_v13 = vadd.f32 %v14760_v27, %v4791_v35  ;;  %v14934_v27 = vld [vmem:[#allocation2 + $0xb0] sm:$0xff]  ;;  %v7512_v33 = vrot.slane %v7511_v7, 4 }
 0x467   : > { %v10151_v44 = vpop.f32.mrb[85].mxu1  ;;  %v14924_v25 = vadd.f32 %v10275_v38, %v10274_v17  ;;  %v10277_v11 = vpop.f32.mrb[158].mxu0  ;;  %v7528_v48 = vshll.u32 %v14934_v27, 16  ;;  %v7532_v61 = vshrl.u32 %v14934_v27, 16  ;;  %v7502_v38 = vrot.slane %v7501_v54, 4 }
 0x468   : > { %v10152_v3 = vadd.f32 %v10151_v44, %v10150_v55  ;;  %v10153_v58 = vpop.f32.mrb[86].mxu1  ;;  %v10278_v49 = vpop.f32.mrb[159].mxu0  ;;  %10783 = vmatpush3.bf16.msra.mxu0 %v14903_v34  ;;  %v7516_v17 = vrot.slane %v7514_v6, 5  ;;  %v14956_v55 = vld [vmem:[%s15742_s2 + $0x468] sm:$0xff]   ;;  %v7521_v44 = vrot.slane %v7519_v63, 4  ;;  %v9622_v54 = vcombine.low %v16077_v32, %v16076_v39 }
 0x469   : > { %v10154_v19 = vpop.f32.mrb[87].mxu1  ;;  %v14940_v15 = vadd.f32 %v10278_v49, %v10277_v11  ;;  %10784 = vmatprep.subr.bf16.mxu0 %v14914_v43  ;;  %v7524_v11 = vrot.slane %v7522_v2, 5  ;;  %v14958_v49 = vld [vmem:[#allocation2 + $0xc0] sm:$0xff]  ;;  %v7534_v6 = vrot.slane %v7532_v61, 4  ;;  %v11185_v7 = vld [vmem:[#allocation2 + $0xb8] sm:$0x11] }
 0x46a   : > { %v4792_v53 = vadd.f32 %v10152_v3, %v13939_v4  ;;  %v10155_v35 = vadd.f32 %v10154_v19, %v10153_v58  ;;  %8088 = vmatmul.mubr.bf16.gmra.mrb[8].mxu0 %v9704_v29  ;;  %v16078_v4 = vld [vmem:[#allocation48_spill] sm:$0xff]  ;;  %v14962_v29 = vrot.slane %v7528_v48, 5  ;;  %v7538_v63 = vshll.u32 %v11185_v7, 16  ;;  %v14973_v2 = vld [vmem:[%s15742_s2 + $0x428] sm:$0xff]  }
 0x46b   : > { %7190 = vmatmul.mubr.bf16.vlgmr.msra.gmra.mrb[192].mxu1 %v9620_v50  ;;  %8095 = vmatprep.mubr.bf16.mxu0 %v9707_v52  ;;  %v7543_v61 = vshrl.u32 %v14958_v49, 16  ;;  %v7546_v50 = vshll.u32 %v14958_v49, 16  ;;  %v9706_v52 = vcombine.low %v14932_v42, %v14919_v14  ;;  %v14995_v32 = vld [vmem:[#allocation2 + $0xc8] sm:$0xff]  ;;  %v7525_v14 = vor.u32 %v7524_v11, %v7521_v44 }
 0x46c   : > { %v4793_v3 = vadd.f32 %v10155_v35, %v16078_v4  ;;  %10904 = vmatpush3.bf16.msra.mxu1 %v14810_v56  ;;  %7197 = vmatprep.mubr.bf16.mxu1 %v9623_v0  ;;  %v14965_v58 = vadd.f32 %v14790_v8, %v4792_v53  ;;  %v14978_v8 = vsel %vm12428_vm13, %v7512_v33, %v7516_v17  ;;  %v7552_v0 = vshll.u32 %v14995_v32, 16 }
 0x46d   : > { %v10280_v57 = vpop.f32.mrb[160].mxu0  ;;  %10897 = vmatprep.subr.bf16.mxu1 %v14824_v22  ;;  %10785 = vmatpush3.bf16.msra.mxu0 %v14947_v24  ;;  %v14985_v22 = vld [vmem:[%s15742_s2 + $0x470] sm:$0xff]   ;;  %v7556_v17 = vshrl.u32 %v14995_v32, 16  ;;  %v7535_v42 = vor.u32 %v7534_v6, %v14962_v29  ;;  %v7545_v11 = vrot.slane %v7543_v61, 4  ;;  %v7548_v6 = vrot.slane %v7546_v50, 5  ;;  %v15030_v61 = vld [vmem:[#allocation2 + $0xd8] sm:$0xff] }
 0x46e   : > { %v10156_v56 = vpop.f32.mrb[88].mxu1  ;;  %v10281_v48 = vpop.f32.mrb[161].mxu0  ;;  %10786 = vmatprep.subr.bf16.mxu0 %v14956_v55  ;;  %v14989_v19 = vadd.f32 %v14816_v1, %v4793_v3  ;;  %v15002_v1 = vsel %vm12428_vm13, %v7502_v38, %v14895_v37  ;;  %v15016_v37 = vld [vmem:[%s15742_s2 + $0x430] sm:$0xff]  }
 0x46f   : > { %v10157_v53 = vpop.f32.mrb[89].mxu1  ;;  %v14993_v35 = vadd.f32 %v10281_v48, %v10280_v57  ;;  %v10283_v39 = vpop.f32.mrb[162].mxu0  ;;  %v9625_v48 = vcombine.high %v14683_v30, %v14741_v20 }
 0x470   : > { %16079 = vst [vmem:[#allocation40_spill] sm:$0xff] %v14989_v19  ;;  %v10158_v33 = vadd.f32 %v10157_v53, %v10156_v56  ;;  %v10159_v4 = vpop.f32.mrb[90].mxu1  ;;  %v10284_v7 = vpop.f32.mrb[163].mxu0  ;;  %10905 = vmatpush3.bf16.msra.mxu1 %v14837_v9  ;;  %v9709_v56 = vcombine.high %v15002_v1, %v14978_v8  ;;  %v7540_v53 = vrot.slane %v7538_v63, 5  ;;  %v16080_v9 = vld [vmem:[#allocation49_spill] sm:$0xff]  ;;  %v15024_v63 = vld [vmem:[%s15742_s2 + $0x478] sm:$0xff]  }
 0x471   : > { %v10160_v3 = vpop.f32.mrb[91].mxu1  ;;  %v15006_v57 = vadd.f32 %v10284_v7, %v10283_v39  ;;  %10898 = vmatprep.subr.bf16.mxu1 %v14850_v45  ;;  %10787 = vmatpush3.bf16.msra.mxu0 %v14973_v2  ;;  %v15026_v45 = vrot.slane %v7552_v0, 5  ;;  %v7558_v39 = vrot.slane %v7556_v17, 4  ;;  %v16081_v7 = vld [vmem:[#allocation50_spill] sm:$0xff]  ;;  %v15042_v0 = vld [vmem:[%s15742_s2 + $0x438] sm:$0xff]  }
 0x472   : > { %v4794_v38 = vadd.f32 %v10158_v33, %v16080_v9  ;;  %v10161_v44 = vadd.f32 %v10160_v3, %v10159_v4  ;;  %8096 = vmatmul.mubr.bf16.gmra.mrb[12].mxu0 %v9706_v52  ;;  %10788 = vmatprep.subr.bf16.mxu0 %v14985_v22  ;;  %v7526_v33 = vrot.slane %v7525_v14, 4  ;;  %v7536_v4 = vrot.slane %v7535_v42, 4  ;;  %v11187_v42 = vld [vmem:[#allocation2 + $0xd0] sm:$0x11] }
 0x473   : > { %7198 = vmatmul.mubr.bf16.gmra.mrb[196].mxu1 %v9622_v54  ;;  %8103 = vmatprep.mubr.bf16.mxu0 %v9709_v56  ;;  %v9708_v52 = vcombine.low %v15002_v1, %v14978_v8  ;;  %v7562_v3 = vshll.u32 %v11187_v42, 16  ;;  %v7559_v56 = vor.u32 %v7558_v39, %v15026_v45  ;;  %v7567_v9 = vshrl.u32 %v15030_v61, 16 }
 0x474   : > { %v4795_v19 = vadd.f32 %v10161_v44, %v16081_v7  ;;  %7205 = vmatprep.mubr.bf16.mxu1 %v9625_v48  ;;  %10906 = vmatpush3.bf16.msra.mxu1 %v14879_v47  ;;  %v15033_v50 = vadd.f32 %v14864_v16, %v4794_v38  ;;  %v15046_v14 = vsel %vm12428_vm13, %v7536_v4, %v7540_v53  ;;  %v7570_v38 = vshll.u32 %v15030_v61, 16  ;;  %v15060_v7 = vld [vmem:[#allocation2 + $0xe0] sm:$0xff] }
 0x475   : > { %v10286_v54 = vpop.f32.mrb[164].mxu0  ;;  %10899 = vmatprep.subr.bf16.mxu1 %v14891_v26  ;;  %10789 = vmatpush3.bf16.msra.mxu0 %v15016_v37  ;;  %v7549_v16 = vor.u32 %v7548_v6, %v7545_v11  ;;  %v7531_v6 = vsel %vm12428_vm13, %v7526_v33, %v14962_v29  ;;  %v16084_v29 = vld [vmem:[#allocation51_spill] sm:$0xff]  ;;  %v9627_v42 = vcombine.high %v14773_v12, %v14812_v10 }
 0x476   : > { %16082 = vst [vmem:[#allocation39_spill] sm:$0xff] %v15033_v50  ;;  %v10162_v17 = vpop.f32.mrb[92].mxu1  ;;  %v10287_v47 = vpop.f32.mrb[165].mxu0  ;;  %10790 = vmatprep.subr.bf16.mxu0 %v15024_v63  ;;  %v15050_v26 = vadd.f32 %v14882_v18, %v4795_v19  ;;  %v7576_v18 = vshll.u32 %v15060_v7, 16  ;;  %v7580_v19 = vshrl.u32 %v15060_v7, 16 }
 0x477   : > { %v10163_v8 = vpop.f32.mrb[93].mxu1  ;;  %v15052_v1 = vadd.f32 %v10287_v47, %v10286_v54  ;;  %v10289_v48 = vpop.f32.mrb[166].mxu0  ;;  %v9624_v54 = vcombine.low %v14683_v30, %v14741_v20  ;;  %v7572_v30 = vrot.slane %v7570_v38, 5  ;;  %v15075_v20 = vld [vmem:[#allocation2 + $0xf0] sm:$0xff] }
 0x478   : > { %16083 = vst [vmem:[#allocation48_spill] sm:$0xff] %v15050_v26  ;;  %v10164_v53 = vadd.f32 %v10163_v8, %v10162_v17  ;;  %v10165_v44 = vpop.f32.mrb[94].mxu1  ;;  %v10290_v11 = vpop.f32.mrb[167].mxu0  ;;  %10907 = vmatpush3.bf16.msra.mxu1 %v14903_v34  ;;  %v9711_v17 = vcombine.high %v7531_v6, %v15046_v14  ;;  %v7564_v34 = vrot.slane %v7562_v3, 5  ;;  %v7550_v8 = vrot.slane %v7549_v16, 4  ;;  %v16085_v26 = vld [vmem:[#allocation13_spill] sm:$0xff] }
 0x479   : > { %v10166_v39 = vpop.f32.mrb[95].mxu1  ;;  %v15065_v4 = vadd.f32 %v10290_v11, %v10289_v48  ;;  %10900 = vmatprep.subr.bf16.mxu1 %v14914_v43  ;;  %10791 = vmatpush3.bf16.msra.mxu0 %v15042_v0  ;;  %v7560_v48 = vrot.slane %v7559_v56, 4  ;;  %v7569_v11 = vrot.slane %v7567_v9, 4  ;;  %v15078_v50 = vrot.slane %v7576_v18, 5  ;;  %v11189_v56 = vld [vmem:[#allocation2 + $0xe8] sm:$0x11] }
 0x47a   : > { %v4796_v33 = vadd.f32 %v10164_v53, %v16084_v29  ;;  %v10167_v47 = vadd.f32 %v10166_v39, %v10165_v44  ;;  %8104 = vmatmul.mubr.bf16.gmra.mrb[16].mxu0 %v9708_v52  ;;  %v7582_v53 = vrot.slane %v7580_v19, 4  ;;  %v9626_v16 = vcombine.low %v14773_v12, %v14812_v10 }
 0x47b   : > { %7206 = vmatmul.mubr.bf16.gmra.mrb[200].mxu1 %v9624_v54  ;;  %8111 = vmatprep.mubr.bf16.mxu0 %v9711_v17  ;;  %v7586_v9 = vshll.u32 %v11189_v56, 16  ;;  %v7591_v18 = vshrl.u32 %v15075_v20, 16  ;;  %v9710_v19 = vcombine.low %v7531_v6, %v15046_v14  ;;  %v16086_v56 = vld [vmem:[#allocation14_spill] sm:$0xff] }
 0x47c   : > { %v4797_v43 = vadd.f32 %v10167_v47, %v16085_v26  ;;  %7213 = vmatprep.mubr.bf16.mxu1 %v9627_v42  ;;  %10908 = vmatpush3.bf16.msra.mxu1 %v14947_v24  ;;  %v15082_v52 = vadd.f32 %v14924_v25, %v4796_v33  ;;  %v15089_v26 = vsel %vm12428_vm13, %v7560_v48, %v7564_v34  ;;  %v7594_v24 = vshll.u32 %v15075_v20, 16 }
 0x47d   : > { %v10292_v3 = vpop.f32.mrb[168].mxu0  ;;  %10901 = vmatprep.subr.bf16.mxu1 %v14956_v55  ;;  %v15099_v55 = vld [vmem:[#allocation2 + $0xf8] sm:$0xff]  ;;  %v7573_v42 = vor.u32 %v7572_v30, %v7569_v11  ;;  %v7583_v14 = vor.u32 %v7582_v53, %v15078_v50  ;;  %v9629_v48 = vcombine.high %v14829_v51, %v14866_v60 }
 0x47e   : > { %v10168_v38 = vpop.f32.mrb[96].mxu1  ;;  %v10293_v44 = vpop.f32.mrb[169].mxu0  ;;  %v15094_v25 = vadd.f32 %v14940_v15, %v4797_v43  ;;  %v7600_v54 = vshll.u32 %v15099_v55, 16  ;;  %v7604_v17 = vshrl.u32 %v15099_v55, 16  ;;  %v7555_v15 = vsel %vm12428_vm13, %v7550_v8, %v15026_v45  ;;  %v16087_v30 = vld [vmem:[#allocation52_spill] sm:$0xff] }
 0x47f   : > { %v10169_v12 = vpop.f32.mrb[97].mxu1  ;;  %v15097_v10 = vadd.f32 %v10293_v44, %v10292_v3  ;;  %v10295_v39 = vpop.f32.mrb[170].mxu0  ;;  %v9713_v43 = vcombine.high %v7555_v15, %v15089_v26  ;;  %v7588_v3 = vrot.slane %v7586_v9, 5  ;;  %v7593_v45 = vrot.slane %v7591_v18, 4 }
 0x480   : > { %v10170_v29 = vadd.f32 %v10169_v12, %v10168_v38  ;;  %v10171_v33 = vpop.f32.mrb[98].mxu1  ;;  %v10296_v47 = vpop.f32.mrb[171].mxu0  ;;  %10909 = vmatpush3.bf16.msra.mxu1 %v14973_v2  ;;  %v7596_v8 = vrot.slane %v7594_v24, 5  ;;  %v15115_v2 = vrot.slane %v7600_v54, 5  ;;  %v7606_v11 = vrot.slane %v7604_v17, 4 }
 0x481   : > { %v10172_v6 = vpop.f32.mrb[99].mxu1  ;;  %v15108_v34 = vadd.f32 %v10296_v47, %v10295_v39  ;;  %10902 = vmatprep.subr.bf16.mxu1 %v14985_v22  ;;  %v7574_v12 = vrot.slane %v7573_v42, 4  ;;  %v7584_v39 = vrot.slane %v7583_v14, 4  ;;  %v15118_v47 = vld [vmem:[#allocation2 + $0x108] sm:$0xff]  ;;  %v9712_v9 = vcombine.low %v7555_v15, %v15089_v26  ;;  %v11191_v17 = vld [vmem:[#allocation2 + $0x100] sm:$0x11] }
 0x482   : > { %v4798_v38 = vadd.f32 %v10170_v29, %v16086_v56  ;;  %v10173_v44 = vadd.f32 %v10172_v6, %v10171_v33  ;;  %8112 = vmatmul.mubr.bf16.gmra.mrb[20].mxu0 %v9710_v19  ;;  %v7597_v54 = vor.u32 %v7596_v8, %v7593_v45  ;;  %v7610_v29 = vshll.u32 %v11191_v17, 16  ;;  %v16090_v17 = vld [vmem:[#allocation19_spill] sm:$0xff] }
 0x483   : > { %7214 = vmatmul.mubr.bf16.gmra.mrb[204].mxu1 %v9626_v16  ;;  %8119 = vmatprep.mubr.bf16.mxu0 %v9713_v43  ;;  %v15128_v19 = vsel %vm12428_vm13, %v7584_v39, %v7588_v3  ;;  %v7607_v26 = vor.u32 %v7606_v11, %v15115_v2  ;;  %v7618_v15 = vshll.u32 %v15118_v47, 16  ;;  %v7579_v43 = vsel %vm12428_vm13, %v7574_v12, %v15078_v50  ;;  %v15141_v3 = vld [vmem:[#allocation2 + $0x110] sm:$0xff]  ;;  %v16089_v11 = vld [vmem:[#allocation53_spill] sm:$0xff] }
 0x484   : > { %v4799_v53 = vadd.f32 %v10173_v44, %v16087_v30  ;;  %7221 = vmatprep.mubr.bf16.mxu1 %v9629_v48  ;;  %10910 = vmatpush3.bf16.msra.mxu1 %v15016_v37  ;;  %v15122_v22 = vadd.f32 %v14993_v35, %v4798_v38  ;;  %v7628_v56 = vshrl.u32 %v15141_v3, 16  ;;  %v9628_v45 = vcombine.low %v14829_v51, %v14866_v60 }
 0x485   : > { %v10298_v18 = vpop.f32.mrb[172].mxu0  ;;  %10903 = vmatprep.subr.bf16.mxu1 %v15024_v63  ;;  %v7615_v63 = vshrl.u32 %v15118_v47, 16  ;;  %v9715_v8 = vcombine.high %v7579_v43, %v15128_v19  ;;  %v9631_v50 = vcombine.high %v14898_v21, %v14934_v27  ;;  %v7612_v12 = vrot.slane %v7610_v29, 5 }
 0x486   : > { %v10174_v16 = vpop.f32.mrb[100].mxu1  ;;  %v10299_v24 = vpop.f32.mrb[173].mxu0  ;;  %v15131_v33 = vadd.f32 %v15006_v57, %v4799_v53  ;;  %v7624_v57 = vshll.u32 %v15141_v3, 16  ;;  %v7598_v39 = vrot.slane %v7597_v54, 4  ;;  %v9630_v29 = vcombine.low %v14898_v21, %v14934_v27  ;;  %v15176_v27 = vld [vmem:[#allocation2 + $0x128] sm:$0xff] }
 0x487   : > { %v10175_v37 = vpop.f32.mrb[101].mxu1  ;;  %v15133_v35 = vadd.f32 %v10299_v24, %v10298_v18  ;;  %v10301_v42 = vpop.f32.mrb[174].mxu0  ;;  %v7617_v18 = vrot.slane %v7615_v63, 4  ;;  %v15154_v24 = vld [vmem:[#allocation2 + $0x120] sm:$0xff] }
 0x488   : > { %16088 = vst [vmem:[#allocation49_spill] sm:$0xff] %v15131_v33  ;;  %v10176_v14 = vadd.f32 %v10175_v37, %v10174_v16  ;;  %v10177_v6 = vpop.f32.mrb[102].mxu1  ;;  %v10302_v48 = vpop.f32.mrb[175].mxu0  ;;  %10911 = vmatpush3.bf16.msra.mxu1 %v15042_v0  ;;  %v7608_v0 = vrot.slane %v7607_v26, 4  ;;  %v7620_v16 = vrot.slane %v7618_v15, 5  ;;  %v15157_v60 = vrot.slane %v7624_v57, 5 }
 0x489   : > { %v10178_v38 = vpop.f32.mrb[103].mxu1  ;;  %v15146_v44 = vadd.f32 %v10302_v48, %v10301_v42  ;;  %v7630_v37 = vrot.slane %v7628_v56, 4  ;;  %v7642_v48 = vshll.u32 %v15154_v24, 16 }
 0x48a   : > { %v4800_v30 = vadd.f32 %v10176_v14, %v16089_v11  ;;  %v10179_v53 = vadd.f32 %v10178_v38, %v10177_v6  ;;  %8120 = vmatmul.mubr.bf16.gmra.mrb[24].mxu0 %v9712_v9  ;;  %v11193_v14 = vld [vmem:[#allocation2 + $0x118] sm:$0x11]  ;;  %v15166_v15 = vsel %vm12428_vm13, %v7608_v0, %v7612_v12  ;;  %v7639_v6 = vshrl.u32 %v15154_v24, 16 }
 0x48b   : > { %7222 = vmatmul.mubr.bf16.gmra.mrb[208].mxu1 %v9628_v45  ;;  %8127 = vmatprep.mubr.bf16.mxu0 %v9715_v8  ;;  %v7634_v54 = vshll.u32 %v11193_v14, 16  ;;  %v7648_v45 = vshll.u32 %v15176_v27, 16  ;;  %v7652_v8 = vshrl.u32 %v15176_v27, 16  ;;  %v9633_v0 = vcombine.high %v14958_v49, %v14995_v32 }
 0x48c   : > { %v4801_v51 = vadd.f32 %v10179_v53, %v16090_v17  ;;  %7229 = vmatprep.mubr.bf16.mxu1 %v9631_v50  ;;  %v15160_v9 = vadd.f32 %v15052_v1, %v4800_v30  ;;  %v9714_v1 = vcombine.low %v7579_v43, %v15128_v19  ;;  %v7621_v50 = vor.u32 %v7620_v16, %v7617_v18  ;;  %v16094_v18 = vld [vmem:[#allocation23_spill] sm:$0xff] }
 0x48d   : > { %v10304_v42 = vpop.f32.mrb[176].mxu0  ;;  %v7631_v19 = vor.u32 %v7630_v37, %v15157_v60 }
 0x48e   : > { %16091 = vst [vmem:[#allocation50_spill] sm:$0xff] %v15160_v9  ;;  %v10180_v26 = vpop.f32.mrb[104].mxu1  ;;  %v10305_v63 = vpop.f32.mrb[177].mxu0  ;;  %v15171_v57 = vadd.f32 %v15065_v4, %v4801_v51  ;;  %v7603_v4 = vsel %vm12428_vm13, %v7598_v39, %v15115_v2  ;;  %v7636_v51 = vrot.slane %v7634_v54, 5  ;;  %v15190_v2 = vrot.slane %v7648_v45, 5 }
 0x48f   : > { %v10181_v56 = vpop.f32.mrb[105].mxu1  ;;  %v15174_v38 = vadd.f32 %v10305_v63, %v10304_v42  ;;  %v10307_v21 = vpop.f32.mrb[178].mxu0  ;;  %v9717_v17 = vcombine.high %v7603_v4, %v15166_v15  ;;  %v16093_v42 = vld [vmem:[#allocation55_spill] sm:$0xff]  ;;  %v7641_v63 = vrot.slane %v7639_v6, 4  ;;  %v7654_v39 = vrot.slane %v7652_v8, 4 }
 0x490   : > { %16092 = vst [vmem:[#allocation51_spill] sm:$0xff] %v15171_v57  ;;  %v10182_v11 = vadd.f32 %v10181_v56, %v10180_v26  ;;  %v10183_v30 = vpop.f32.mrb[106].mxu1  ;;  %v10308_v53 = vpop.f32.mrb[179].mxu0  ;;  %v7644_v56 = vrot.slane %v7642_v48, 5  ;;  %v7622_v37 = vrot.slane %v7621_v50, 4 }
 0x491   : > { %v10184_v43 = vpop.f32.mrb[107].mxu1  ;;  %v15184_v12 = vadd.f32 %v10308_v53, %v10307_v21  ;;  %v7632_v21 = vrot.slane %v7631_v19, 4  ;;  %v15193_v53 = vld [vmem:[#allocation2 + $0x138] sm:$0xff]  ;;  %v11195_v8 = vld [vmem:[#allocation2 + $0x130] sm:$0x11] }
 0x492   : > { %v4802_v14 = vadd.f32 %v10182_v11, %v16093_v42  ;;  %v10185_v26 = vadd.f32 %v10184_v43, %v10183_v30  ;;  %8128 = vmatmul.mubr.bf16.gmra.mrb[28].mxu0 %v9714_v1  ;;  %v9716_v11 = vcombine.low %v7603_v4, %v15166_v15  ;;  %v7645_v45 = vor.u32 %v7644_v56, %v7641_v63 }
 0x493   : > { %7230 = vmatmul.mubr.bf16.gmra.mrb[212].mxu1 %v9630_v29  ;;  %8135 = vmatprep.mubr.bf16.mxu0 %v9717_v17  ;;  %v15201_v29 = vsel %vm12428_vm13, %v7632_v21, %v7636_v51  ;;  %v7658_v30 = vshll.u32 %v11195_v8, 16  ;;  %v7663_v15 = vshrl.u32 %v15193_v53, 16  ;;  %v7666_v4 = vshll.u32 %v15193_v53, 16  ;;  %v16097_v21 = vld [vmem:[#allocation24_spill] sm:$0xff] }
 0x494   : > { %v4803_v16 = vadd.f32 %v10185_v26, %v16094_v18  ;;  %7237 = vmatprep.mubr.bf16.mxu1 %v9633_v0  ;;  %v15196_v54 = vadd.f32 %v15097_v10, %v4802_v14  ;;  %v7655_v0 = vor.u32 %v7654_v39, %v15190_v2  ;;  %v7627_v14 = vsel %vm12428_vm13, %v7622_v37, %v15157_v60  ;;  %v15214_v26 = vld [vmem:[#allocation2 + $0x140] sm:$0xff] }
 0x495   : > { %v10310_v1 = vpop.f32.mrb[180].mxu0  ;;  %v7676_v63 = vshrl.u32 %v15214_v26, 16  ;;  %v9632_v39 = vcombine.low %v14958_v49, %v14995_v32  ;;  %v9635_v60 = vcombine.high %v15030_v61, %v15060_v7  ;;  %v7660_v37 = vrot.slane %v7658_v30, 5 }
 0x496   : > { %16095 = vst [vmem:[#allocation13_spill] sm:$0xff] %v15196_v54  ;;  %v10186_v6 = vpop.f32.mrb[108].mxu1  ;;  %v10311_v48 = vpop.f32.mrb[181].mxu0  ;;  %v15204_v50 = vadd.f32 %v15108_v34, %v4803_v16  ;;  %v7672_v34 = vshll.u32 %v15214_v26, 16  ;;  %v9719_v16 = vcombine.high %v7627_v14, %v15201_v29  ;;  %v7656_v8 = vrot.slane %v7655_v0, 4 }
 0x497   : > { %v10187_v19 = vpop.f32.mrb[109].mxu1  ;;  %v15206_v43 = vadd.f32 %v10311_v48, %v10310_v1  ;;  %v10313_v10 = vpop.f32.mrb[182].mxu0  ;;  %v7646_v48 = vrot.slane %v7645_v45, 4  ;;  %v9634_v30 = vcombine.low %v15030_v61, %v15060_v7  ;;  %v15248_v7 = vld [vmem:[#allocation2 + $0x158] sm:$0xff] }
 0x498   : > { %16096 = vst [vmem:[#allocation14_spill] sm:$0xff] %v15204_v50  ;;  %v10188_v17 = vadd.f32 %v10187_v19, %v10186_v6  ;;  %v10189_v42 = vpop.f32.mrb[110].mxu1  ;;  %v10314_v51 = vpop.f32.mrb[183].mxu0  ;;  %v7665_v19 = vrot.slane %v7663_v15, 4  ;;  %v16098_v50 = vld [vmem:[#allocation27_spill] sm:$0xff]  ;;  %v15229_v32 = vrot.slane %v7672_v34, 5 }
 0x499   : > { %v10190_v56 = vpop.f32.mrb[111].mxu1  ;;  %v15218_v18 = vadd.f32 %v10314_v51, %v10313_v10  ;;  %v7668_v10 = vrot.slane %v7666_v4, 5  ;;  %v15226_v51 = vld [vmem:[#allocation2 + $0x150] sm:$0xff]  ;;  %v15238_v4 = vsel %vm12428_vm13, %v7656_v8, %v7660_v37 }
 0x49a   : > { %v4804_v1 = vadd.f32 %v10188_v17, %v16097_v21  ;;  %v10191_v6 = vadd.f32 %v10190_v56, %v10189_v42  ;;  %8136 = vmatmul.mubr.bf16.gmra.mrb[32].mxu0 %v9716_v11  ;;  %v7678_v17 = vrot.slane %v7676_v63, 4  ;;  %v11197_v56 = vld [vmem:[#allocation2 + $0x148] sm:$0x11]  ;;  %v7690_v34 = vshll.u32 %v15226_v51, 16 }
 0x49b   : > { %7238 = vmatmul.mubr.bf16.gmra.mrb[216].mxu1 %v9632_v39  ;;  %8143 = vmatprep.mubr.bf16.mxu0 %v9719_v16  ;;  %v7682_v45 = vshll.u32 %v11197_v56, 16  ;;  %v7696_v21 = vshll.u32 %v15248_v7, 16  ;;  %v7669_v8 = vor.u32 %v7668_v10, %v7665_v19  ;;  %v16102_v19 = vld [vmem:[#allocation43_spill] sm:$0xff] }
 0x49c   : > { %v4805_v49 = vadd.f32 %v10191_v6, %v16098_v50  ;;  %7245 = vmatprep.mubr.bf16.mxu1 %v9635_v60  ;;  %v15232_v11 = vadd.f32 %v15133_v35, %v4804_v1  ;;  %v7687_v50 = vshrl.u32 %v15226_v51, 16  ;;  %v9718_v35 = vcombine.low %v7627_v14, %v15201_v29 }
 0x49d   : > { %v10316_v42 = vpop.f32.mrb[184].mxu0  ;;  %v7700_v1 = vshrl.u32 %v15248_v7, 16  ;;  %v7679_v29 = vor.u32 %v7678_v17, %v15229_v32  ;;  %v7692_v54 = vrot.slane %v7690_v34, 5  ;;  %v7670_v17 = vrot.slane %v7669_v8, 4 }
 0x49e   : > { %16099 = vst [vmem:[#allocation52_spill] sm:$0xff] %v15232_v11  ;;  %v10192_v0 = vpop.f32.mrb[112].mxu1  ;;  %v10317_v15 = vpop.f32.mrb[185].mxu0  ;;  %v15243_v63 = vadd.f32 %v15146_v44, %v4805_v49  ;;  %v7651_v44 = vsel %vm12428_vm13, %v7646_v48, %v15190_v2  ;;  %v7689_v11 = vrot.slane %v7687_v50, 4  ;;  %v15262_v2 = vrot.slane %v7696_v21, 5 }
 0x49f   : > { %v10193_v39 = vpop.f32.mrb[113].mxu1  ;;  %v15246_v16 = vadd.f32 %v10317_v15, %v10316_v42  ;;  %v10319_v61 = vpop.f32.mrb[186].mxu0  ;;  %v9637_v42 = vcombine.high %v15075_v20, %v15099_v55  ;;  %v9721_v56 = vcombine.high %v7651_v44, %v15238_v4  ;;  %v7684_v15 = vrot.slane %v7682_v45, 5 }
 0x4a0   : > { %16100 = vst [vmem:[#allocation53_spill] sm:$0xff] %v15243_v63  ;;  %v10194_v6 = vadd.f32 %v10193_v39, %v10192_v0  ;;  %v10195_v60 = vpop.f32.mrb[114].mxu1  ;;  %v10320_v37 = vpop.f32.mrb[187].mxu0  ;;  %v16101_v63 = vld [vmem:[#allocation28_spill] sm:$0xff]  ;;  %v7702_v48 = vrot.slane %v7700_v1, 4  ;;  %v9720_v50 = vcombine.low %v7651_v44, %v15238_v4  ;;  %v7693_v1 = vor.u32 %v7692_v54, %v7689_v11  ;;  %v15286_v11 = vld [vmem:[#allocation2 + $0x170] sm:$0xff] }
 0x4a1   : > { %v10196_v14 = vpop.f32.mrb[115].mxu1  ;;  %v15256_v49 = vadd.f32 %v10320_v37, %v10319_v61  ;;  %v7680_v61 = vrot.slane %v7679_v29, 4  ;;  %v15265_v37 = vld [vmem:[#allocation2 + $0x168] sm:$0xff] }
 0x4a2   : > { %v4806_v0 = vadd.f32 %v10194_v6, %v16101_v63  ;;  %v10197_v39 = vadd.f32 %v10196_v14, %v10195_v60  ;;  %8144 = vmatmul.mubr.bf16.gmra.mrb[36].mxu0 %v9718_v35  ;;  %v11199_v6 = vld [vmem:[#allocation2 + $0x160] sm:$0x11]  ;;  %v7703_v14 = vor.u32 %v7702_v48, %v15262_v2  ;;  %v7714_v4 = vshll.u32 %v15265_v37, 16 }
 0x4a3   : > { %7246 = vmatmul.mubr.bf16.gmra.mrb[220].mxu1 %v9634_v30  ;;  %8151 = vmatprep.mubr.bf16.mxu0 %v9721_v56  ;;  %v7706_v35 = vshll.u32 %v11199_v6, 16  ;;  %v15273_v21 = vsel %vm12428_vm13, %v7680_v61, %v7684_v15  ;;  %v7675_v15 = vsel %vm12428_vm13, %v7670_v17, %v15229_v32  ;;  %v9636_v48 = vcombine.low %v15075_v20, %v15099_v55  ;;  %v15298_v17 = vld [vmem:[#allocation2 + $0x180] sm:$0xff]  ;;  %v16106_v55 = vld [vmem:[#allocation32_spill] sm:$0xff] }
 0x4a4   : > { %v4807_v10 = vadd.f32 %v10197_v39, %v16102_v19  ;;  %7253 = vmatprep.mubr.bf16.mxu1 %v9637_v42  ;;  %v15268_v45 = vadd.f32 %v15174_v38, %v4806_v0  ;;  %v7711_v42 = vshrl.u32 %v15265_v37, 16  ;;  %v7724_v0 = vshrl.u32 %v15286_v11, 16 }
 0x4a5   : > { %v10322_v63 = vpop.f32.mrb[188].mxu0  ;;  %v9723_v19 = vcombine.high %v7675_v15, %v15273_v21  ;;  %v7708_v61 = vrot.slane %v7706_v35, 5  ;;  %v9639_v32 = vcombine.high %v15118_v47, %v15141_v3  ;;  %v7716_v20 = vrot.slane %v7714_v4, 5 }
 0x4a6   : > { %16103 = vst [vmem:[#allocation19_spill] sm:$0xff] %v15268_v45  ;;  %v10198_v30 = vpop.f32.mrb[116].mxu1  ;;  %v10323_v34 = vpop.f32.mrb[189].mxu0  ;;  %v15276_v60 = vadd.f32 %v15184_v12, %v4807_v10  ;;  %v7720_v12 = vshll.u32 %v15286_v11, 16  ;;  %v7726_v35 = vrot.slane %v7724_v0, 4  ;;  %v15314_v0 = vld [vmem:[#allocation2 + $0x188] sm:$0xff] }
 0x4a7   : > { %v10199_v8 = vpop.f32.mrb[117].mxu1  ;;  %v15278_v29 = vadd.f32 %v10323_v34, %v10322_v63  ;;  %v10325_v38 = vpop.f32.mrb[190].mxu0  ;;  %v16105_v63 = vld [vmem:[#allocation31_spill] sm:$0xff]  ;;  %v7694_v34 = vrot.slane %v7693_v1, 4  ;;  %v7735_v1 = vshrl.u32 %v15298_v17, 16 }
 0x4a8   : > { %16104 = vst [vmem:[#allocation55_spill] sm:$0xff] %v15276_v60  ;;  %v10200_v44 = vadd.f32 %v10199_v8, %v10198_v30  ;;  %v10201_v56 = vpop.f32.mrb[118].mxu1  ;;  %v10326_v54 = vpop.f32.mrb[191].mxu0  ;;  %v7704_v8 = vrot.slane %v7703_v14, 4  ;;  %v7713_v60 = vrot.slane %v7711_v42, 4  ;;  %v7738_v14 = vshll.u32 %v15298_v17, 16 }
 0x4a9   : > { %v10202_v39 = vpop.f32.mrb[119].mxu1  ;;  %v15293_v10 = vadd.f32 %v10326_v54, %v10325_v38  ;;  %v15301_v38 = vrot.slane %v7720_v12, 5  ;;  %v11201_v54 = vld [vmem:[#allocation2 + $0x178] sm:$0x11]  ;;  %v9638_v12 = vcombine.low %v15118_v47, %v15141_v3  ;;  %v7699_v47 = vsel %vm12428_vm13, %v7694_v34, %v15262_v2 }
 0x4aa   : > { %v4808_v6 = vadd.f32 %v10200_v44, %v16105_v63  ;;  %v10203_v30 = vadd.f32 %v10202_v39, %v10201_v56  ;;  %8152 = vmatmul.mubr.bf16.gmra.mrb[40].mxu0 %v9720_v50  ;;  %v15308_v56 = vsel %vm12428_vm13, %v7704_v8, %v7708_v61  ;;  %v7730_v39 = vshll.u32 %v11201_v54, 16  ;;  %v16110_v34 = vld [vmem:[#allocation36_spill] sm:$0xff] }
 0x4ab   : > { %7254 = vmatmul.mubr.bf16.gmra.mrb[224].mxu1 %v9636_v48  ;;  %8159 = vmatprep.mubr.bf16.mxu0 %v9723_v19  ;;  %v7748_v48 = vshrl.u32 %v15314_v0, 16  ;;  %v9722_v61 = vcombine.low %v7675_v15, %v15273_v21  ;;  %v9725_v54 = vcombine.high %v7699_v47, %v15308_v56 }
 0x4ac   : > { %v4809_v45 = vadd.f32 %v10203_v30, %v16106_v55  ;;  %7261 = vmatprep.mubr.bf16.mxu1 %v9639_v32  ;;  %v15304_v44 = vadd.f32 %v15206_v43, %v4808_v6  ;;  %v7744_v43 = vshll.u32 %v15314_v0, 16  ;;  %v9641_v32 = vcombine.high %v15154_v24, %v15176_v27 }
 0x4ad   : > { %v10456_v50 = vpop.f32.mrb[192].mxu0  ;;  %v7750_v2 = vrot.slane %v7748_v48, 4 }
 0x4ae   : > { %16107 = vst [vmem:[#allocation23_spill] sm:$0xff] %v15304_v44  ;;  %v10204_v42 = vpop.f32.mrb[120].mxu1  ;;  %v10457_v4 = vpop.f32.mrb[193].mxu0  ;;  %v15319_v19 = vadd.f32 %v15218_v18, %v4809_v45  ;;  %v7717_v18 = vor.u32 %v7716_v20, %v7713_v60  ;;  %v7727_v45 = vor.u32 %v7726_v35, %v15301_v38  ;;  %v16109_v44 = vld [vmem:[#allocation35_spill] sm:$0xff]  ;;  %v7746_v33 = vrot.slane %v7744_v43, 5  ;;  %v15335_v35 = vld [vmem:[#allocation2 + $0x198] sm:$0xff] }
 0x4af   : > { %v10205_v63 = vpop.f32.mrb[121].mxu1  ;;  %v15322_v6 = vadd.f32 %v10457_v4, %v10456_v50  ;;  %v10459_v30 = vpop.f32.mrb[194].mxu0  ;;  %v7732_v50 = vrot.slane %v7730_v39, 5  ;;  %v7737_v4 = vrot.slane %v7735_v1, 4 }
 0x4b0   : > { %16108 = vst [vmem:[#allocation24_spill] sm:$0xff] %v15319_v19  ;;  %v10206_v3 = vadd.f32 %v10205_v63, %v10204_v42  ;;  %v10207_v8 = vpop.f32.mrb[122].mxu1  ;;  %v10460_v55 = vpop.f32.mrb[195].mxu0  ;;  %v7740_v19 = vrot.slane %v7738_v14, 5  ;;  %v7718_v60 = vrot.slane %v7717_v18, 4  ;;  %v7728_v20 = vrot.slane %v7727_v45, 4 }
 0x4b1   : > { %v10208_v21 = vpop.f32.mrb[123].mxu1  ;;  %v15331_v15 = vadd.f32 %v10460_v55, %v10459_v30  ;;  %v7751_v48 = vor.u32 %v7750_v2, %v7746_v33  ;;  %v15355_v18 = vld [vmem:[#allocation2 + $0x1a0] sm:$0xff]  ;;  %v16112_v2 = vld [vmem:[#allocation56_spill] sm:$0xff] }
 0x4b2   : > { %v4810_v57 = vadd.f32 %v10206_v3, %v16109_v44  ;;  %v10209_v9 = vadd.f32 %v10208_v21, %v10207_v8  ;;  %8160 = vmatmul.mubr.bf16.gmra.mrb[44].mxu0 %v9722_v61  ;;  %v9640_v44 = vcombine.low %v15154_v24, %v15176_v27  ;;  %v7741_v1 = vor.u32 %v7740_v19, %v7737_v4 }
 0x4b3   : > { %7262 = vmatmul.mubr.bf16.gmra.mrb[228].mxu1 %v9638_v12  ;;  %8167 = vmatprep.mubr.bf16.mxu0 %v9725_v54  ;;  %v7733_v12 = vsel %vm12428_vm13, %v7728_v20, %v7732_v50  ;;  %v7759_v24 = vshrl.u32 %v15335_v35, 16  ;;  %v7762_v27 = vshll.u32 %v15335_v35, 16  ;;  %v7723_v54 = vsel %vm12428_vm13, %v7718_v60, %v15301_v38 }
 0x4b4   : > { %v4811_v42 = vadd.f32 %v10209_v9, %v16110_v34  ;;  %7269 = vmatprep.mubr.bf16.mxu1 %v9641_v32  ;;  %v15338_v63 = vadd.f32 %v15246_v16, %v4810_v57  ;;  %v11203_v9 = vld [vmem:[#allocation2 + $0x190] sm:$0x11]  ;;  %v9724_v32 = vcombine.low %v7699_v47, %v15308_v56  ;;  %v7772_v56 = vshrl.u32 %v15355_v18, 16 }
 0x4b5   : > { %v10462_v39 = vpop.f32.mrb[196].mxu0  ;;  %v7754_v61 = vshll.u32 %v11203_v9, 16  ;;  %v9643_v21 = vcombine.high %v15193_v53, %v15214_v26  ;;  %v9727_v50 = vcombine.high %v7723_v54, %v7733_v12  ;;  %v7742_v4 = vrot.slane %v7741_v1, 4 }
 0x4b6   : > { %v10210_v14 = vpop.f32.mrb[124].mxu1  ;;  %v10463_v43 = vpop.f32.mrb[197].mxu0  ;;  %v15345_v30 = vadd.f32 %v15256_v49, %v4811_v42  ;;  %v7768_v49 = vshll.u32 %v15355_v18, 16  ;;  %v7752_v20 = vrot.slane %v7751_v48, 4  ;;  %v7761_v60 = vrot.slane %v7759_v24, 4 }
 0x4b7   : > { %v10211_v57 = vpop.f32.mrb[125].mxu1  ;;  %v15348_v16 = vadd.f32 %v10463_v43, %v10462_v39  ;;  %v10465_v3 = vpop.f32.mrb[198].mxu0  ;;  %v7756_v38 = vrot.slane %v7754_v61, 5  ;;  %v7764_v39 = vrot.slane %v7762_v27, 5  ;;  %v11205_v48 = vld [vmem:[#allocation2 + $0x1a8] sm:$0x11] }
 0x4b8   : > { %16111 = vst [vmem:[#allocation27_spill] sm:$0xff] %v15345_v30  ;;  %v10212_v19 = vadd.f32 %v10211_v57, %v10210_v14  ;;  %v10213_v8 = vpop.f32.mrb[126].mxu1  ;;  %v10466_v55 = vpop.f32.mrb[199].mxu0  ;;  %v16113_v14 = vld [vmem:[#allocation57_spill] sm:$0xff]  ;;  %v7770_v9 = vrot.slane %v7768_v49, 5  ;;  %v7774_v57 = vrot.slane %v7772_v56, 4 }
 0x4b9   : > { %v10214_v47 = vpop.f32.mrb[127].mxu1  ;;  %v15359_v45 = vadd.f32 %v10466_v55, %v10465_v3  ;;  %v7778_v61 = vshll.u32 %v11205_v48, 16 }
 0x4ba   : > { %v4812_v34 = vadd.f32 %v10212_v19, %v16112_v2  ;;  %v10215_v42 = vadd.f32 %v10214_v47, %v10213_v8  ;;  %8168 = vmatmul.mubr.bf16.gmra.mrb[48].mxu0 %v9724_v32  ;;  %v7747_v32 = vsel %vm12428_vm13, %v7742_v4, %v7746_v33  ;;  %v9642_v4 = vcombine.low %v15193_v53, %v15214_v26 }
 0x4bb   : > { %7270 = vmatmul.mubr.bf16.gmra.mrb[232].mxu1 %v9640_v44  ;;  %8175 = vmatprep.mubr.bf16.mxu0 %v9727_v50  ;;  %v7757_v44 = vsel %vm12428_vm13, %v7752_v20, %v7756_v38  ;;  %v7775_v50 = vor.u32 %v7774_v57, %v7770_v9 }
 0x4bc   : > { %v4813_v43 = vadd.f32 %v10215_v42, %v16113_v14  ;;  %7277 = vmatprep.mubr.bf16.mxu1 %v9643_v21  ;;  %v15366_v3 = vadd.f32 %v15278_v29, %v4812_v34  ;;  %v9726_v29 = vcombine.low %v7723_v54, %v7733_v12  ;;  %v7765_v21 = vor.u32 %v7764_v39, %v7761_v60 }
 0x4bd   : > { %v10468_v55 = vpop.f32.mrb[200].mxu0  ;;  %v9729_v34 = vcombine.high %v7747_v32, %v7757_v44  ;;  %v7780_v12 = vrot.slane %v7778_v61, 5  ;;  %v7776_v38 = vrot.slane %v7775_v50, 4 }
 0x4be   : > { %v10344_v1 = vpop.f32.mrb[128].mxu1  ;;  %v10469_v30 = vpop.f32.mrb[201].mxu0  ;;  %v15373_v24 = vadd.f32 %v15293_v10, %v4813_v43  ;;  %v7766_v20 = vrot.slane %v7765_v21, 4 }
 0x4bf   : > { %v10345_v27 = vpop.f32.mrb[129].mxu1  ;;  %v15375_v19 = vadd.f32 %v10469_v30, %v10468_v55  ;;  %v10471_v8 = vpop.f32.mrb[202].mxu0  ;;  %v9645_v30 = vcombine.high %v15226_v51, %v15248_v7 }
 0x4c0   : > { %v10346_v49 = vadd.f32 %v10345_v27, %v10344_v1  ;;  %v10347_v56 = vpop.f32.mrb[130].mxu1  ;;  %v10472_v47 = vpop.f32.mrb[203].mxu0 }
 0x4c1   : > { %v10348_v2 = vpop.f32.mrb[131].mxu1  ;;  %v15377_v33 = vadd.f32 %v10472_v47, %v10471_v8  ;;  %v9647_v47 = vcombine.high %v15265_v37, %v15286_v11 }
 0x4c2   : > { %v6178_v10 = vadd.f32 %v10346_v49, %v14695_v31  ;;  %v10349_v42 = vadd.f32 %v10348_v2, %v10347_v56  ;;  %8176 = vmatmul.mubr.bf16.gmra.mrb[52].mxu0 %v9726_v29  ;;  %v7781_v31 = vsel %vm12428_vm13, %v7776_v38, %v7780_v12  ;;  %v9644_v29 = vcombine.low %v15226_v51, %v15248_v7 }
 0x4c3   : > { %7278 = vmatmul.mubr.bf16.gmra.mrb[236].mxu1 %v9642_v4  ;;  %8183 = vmatprep.mubr.bf16.mxu0 %v9729_v34 }
 0x4c4   : > { %v6179_v54 = vadd.f32 %v10349_v42, %v14711_v28  ;;  %7285 = vmatprep.mubr.bf16.mxu1 %v9645_v30  ;;  %v15386_v60 = vadd.f32 %v15322_v6, %v6178_v10  ;;  %v9728_v28 = vcombine.low %v7747_v32, %v7757_v44  ;;  %v7771_v6 = vsel %vm12428_vm13, %v7766_v20, %v7770_v9  ;;  %v16115_v20 = vld [vmem:[#allocation3_spill] sm:$0xff] }
 0x4c5   : > { %v10474_v53 = vpop.f32.mrb[204].mxu0  ;;  %v9731_v49 = vcombine.high %v7771_v6, %v7781_v31  ;;  %v9730_v2 = vcombine.low %v7771_v6, %v7781_v31 }
 0x4c6   : > { %v10350_v26 = vpop.f32.mrb[132].mxu1  ;;  %v10475_v39 = vpop.f32.mrb[205].mxu0  ;;  %v15391_v14 = vadd.f32 %v15331_v15, %v6179_v54  ;;  %v16114_v54 = vld [vmem:[#allocation4_spill] sm:$0xff] }
 0x4c7   : > { %v10351_v43 = vpop.f32.mrb[133].mxu1  ;;  %v15393_v57 = vadd.f32 %v10475_v39, %v10474_v53  ;;  %v10477_v55 = vpop.f32.mrb[206].mxu0  ;;  %v16116_v38 = vcombine.high %v16114_v54, %v16115_v20 }
 0x4c8   : > { %v10352_v1 = vadd.f32 %v10351_v43, %v10350_v26  ;;  %v10353_v48 = vpop.f32.mrb[134].mxu1  ;;  %v10478_v61 = vpop.f32.mrb[207].mxu0 }
 0x4c9   : > { %v10354_v27 = vpop.f32.mrb[135].mxu1  ;;  %v10479_v8 = vadd.f32 %v10478_v61, %v10477_v55 }
 0x4ca   : > { %v6180_v15 = vadd.f32 %v10352_v1, %v14735_v41  ;;  %v10355_v56 = vadd.f32 %v10354_v27, %v10353_v48  ;;  %8184 = vmatmul.mubr.bf16.gmra.mrb[56].mxu0 %v9728_v28 }
 0x4cb   : > { %7286 = vmatmul.mubr.bf16.gmra.mrb[240].mxu1 %v9644_v29  ;;  %8191 = vmatprep.mubr.bf16.mxu0 %v9731_v49  ;;  %v16117_v29 = vcombine.low %v16114_v54, %v16115_v20 }
 0x4cc   : > { %v6181_v32 = vadd.f32 %v10355_v56, %v14750_v46  ;;  %7293 = vmatprep.mubr.bf16.mxu1 %v9647_v47  ;;  %v15404_v5 = vadd.f32 %v15348_v16, %v6180_v15  ;;  %v9646_v46 = vcombine.low %v15265_v37, %v15286_v11 }
 0x4cd   : > { %v10480_v9 = vpop.f32.mrb[208].mxu0 }
 0x4ce   : > { %v10356_v44 = vpop.f32.mrb[136].mxu1  ;;  %v10481_v21 = vpop.f32.mrb[209].mxu0  ;;  %v15407_v51 = vadd.f32 %v15359_v45, %v6181_v32  ;;  %v9649_v45 = vcombine.high %v15298_v17, %v15314_v0 }
 0x4cf   : > { %v10357_v41 = vpop.f32.mrb[137].mxu1  ;;  %v10482_v7 = vadd.f32 %v10481_v21, %v10480_v9  ;;  %v10483_v50 = vpop.f32.mrb[210].mxu0 }
 0x4d0   : > { %v10358_v4 = vadd.f32 %v10357_v41, %v10356_v44  ;;  %v10359_v34 = vpop.f32.mrb[138].mxu1  ;;  %v10484_v10 = vpop.f32.mrb[211].mxu0 }
 0x4d1   : > { %v10360_v42 = vpop.f32.mrb[139].mxu1  ;;  %v10485_v30 = vadd.f32 %v10484_v10, %v10483_v50  ;;  %v16118_v10 = vld [vmem:[#allocation5_spill] sm:$0xff] }
 0x4d2   : > { %v6182_v16 = vadd.f32 %v10358_v4, %v14777_v62  ;;  %v10361_v12 = vadd.f32 %v10360_v42, %v10359_v34  ;;  %8192 = vmatmul.mubr.bf16.gmra.mrb[60].mxu0 %v9730_v2 }
 0x4d3   : > { %7294 = vmatmul.mubr.bf16.gmra.mrb[244].mxu1 %v9646_v46  ;;  %8697 = vmatprep.mubr.bf16.mxu0 %v16116_v38 }
 0x4d4   : > { %v6183_v53 = vadd.f32 %v10361_v12, %v14788_v36  ;;  %7301 = vmatprep.mubr.bf16.mxu1 %v9649_v45  ;;  %v15419_v26 = vadd.f32 %v15375_v19, %v6182_v16  ;;  %v9648_v36 = vcombine.low %v15298_v17, %v15314_v0 }
 0x4d5   : > { %v10486_v39 = vpop.f32.mrb[212].mxu0 }
 0x4d6   : > { %v10362_v37 = vpop.f32.mrb[140].mxu1  ;;  %v10487_v11 = vpop.f32.mrb[213].mxu0  ;;  %v15422_v62 = vadd.f32 %v15377_v33, %v6183_v53  ;;  %v9651_v33 = vcombine.high %v15335_v35, %v15355_v18 }
 0x4d7   : > { %v10363_v31 = vpop.f32.mrb[141].mxu1  ;;  %v10488_v43 = vadd.f32 %v10487_v11, %v10486_v39  ;;  %v10489_v55 = vpop.f32.mrb[214].mxu0 }
 0x4d8   : > { %v10364_v28 = vadd.f32 %v10363_v31, %v10362_v37  ;;  %v10365_v1 = vpop.f32.mrb[142].mxu1  ;;  %v10490_v48 = vpop.f32.mrb[215].mxu0  ;;  %v16122_v31 = vld [vmem:[#allocation40_spill] sm:$0xff] }
 0x4d9   : > { %v10366_v61 = vpop.f32.mrb[143].mxu1  ;;  %v10491_v6 = vadd.f32 %v10490_v48, %v10489_v55 }
 0x4da   : > { %v6184_v19 = vadd.f32 %v10364_v28, %v14841_v59  ;;  %v10367_v27 = vadd.f32 %v10366_v61, %v10365_v1  ;;  %8698 = vmatmul.mubr.bf16.vlgmr.msra.gmra.mrb[64].mxu0 %v16117_v29  ;;  %v16123_v28 = vld [vmem:[#allocation7_spill] sm:$0xff] }
 0x4db   : > { %7302 = vmatmul.mubr.bf16.gmra.mrb[248].mxu1 %v9648_v36 }
 0x4dc   : > { %v6185_v49 = vadd.f32 %v10367_v27, %v14860_v23  ;;  %7309 = vmatprep.mubr.bf16.mxu1 %v9651_v33  ;;  %v15434_v15 = vadd.f32 %v15393_v57, %v6184_v19  ;;  %v9650_v23 = vcombine.low %v15335_v35, %v15355_v18 }
 0x4dd   : > { %v10492_v56 = vpop.f32.mrb[216].mxu0 }
 0x4de   : > { %v10368_v47 = vpop.f32.mrb[144].mxu1  ;;  %v10493_v17 = vpop.f32.mrb[217].mxu0  ;;  %v15436_v0 = vadd.f32 %v10479_v8, %v6185_v49  ;;  %v16119_v8 = vld [vmem:[#allocation6_spill] sm:$0xff] }
 0x4df   : > { %v10369_v59 = vpop.f32.mrb[145].mxu1  ;;  %v10494_v32 = vadd.f32 %v10493_v17, %v10492_v56  ;;  %v10495_v9 = vpop.f32.mrb[218].mxu0  ;;  %v16120_v42 = vcombine.high %v16118_v10, %v16119_v8 }
 0x4e0   : > { %v10370_v44 = vadd.f32 %v10369_v59, %v10368_v47  ;;  %v10371_v21 = vpop.f32.mrb[146].mxu1  ;;  %v10496_v41 = vpop.f32.mrb[219].mxu0 }
 0x4e1   : > { %v10372_v50 = vpop.f32.mrb[147].mxu1  ;;  %v10497_v2 = vadd.f32 %v10496_v41, %v10495_v9  ;;  %v16126_v9 = vld [vmem:[#allocation39_spill] sm:$0xff]  ;;  %v16128_v41 = vld [vmem:[#allocation48_spill] sm:$0xff] }
 0x4e2   : > { %v6186_v4 = vadd.f32 %v10370_v44, %v14907_v40  ;;  %v10373_v57 = vadd.f32 %v10372_v50, %v10371_v21 }
 0x4e3   : > { %7310 = vmatmul.mubr.bf16.gmra.mrb[252].mxu1 %v9650_v23  ;;  %v16129_v23 = vld [vmem:[#allocation10_spill] sm:$0xff] }
 0x4e4   : > { %v6187_v34 = vadd.f32 %v10373_v57, %v14922_v13  ;;  %8705 = vmatprep.mubr.bf16.mxu1 %v16120_v42  ;;  %v15445_v46 = vadd.f32 %v10482_v7, %v6186_v4  ;;  %v16121_v7 = vcombine.low %v16118_v10, %v16119_v8 }
 0x4e5   : > { %v10498_v16 = vpop.f32.mrb[220].mxu0 }
 0x4e6   : > { %v10374_v12 = vpop.f32.mrb[148].mxu1  ;;  %v10499_v45 = vpop.f32.mrb[221].mxu0  ;;  %v15447_v54 = vadd.f32 %v10485_v30, %v6187_v34  ;;  %v16124_v30 = vld [vmem:[#allocation8_spill] sm:$0xff] }
 0x4e7   : > { %v10375_v20 = vpop.f32.mrb[149].mxu1  ;;  %v10500_v38 = vadd.f32 %v10499_v45, %v10498_v16  ;;  %v10501_v35 = vpop.f32.mrb[222].mxu0  ;;  %v16125_v1 = vcombine.high %v16123_v28, %v16124_v30 }
 0x4e8   : > { %v10376_v18 = vadd.f32 %v10375_v20, %v10374_v12  ;;  %v10377_v40 = vpop.f32.mrb[150].mxu1  ;;  %v10502_v53 = vpop.f32.mrb[223].mxu0 }
 0x4e9   : > { %v10378_v39 = vpop.f32.mrb[151].mxu1  ;;  %v10503_v37 = vadd.f32 %v10502_v53, %v10501_v35 }
 0x4ea   : > { %v6188_v13 = vadd.f32 %v10376_v18, %v14965_v58  ;;  %v10379_v11 = vadd.f32 %v10378_v39, %v10377_v40 }
 0x4eb   : > { %8706 = vmatmul.mubr.bf16.vlgmr.msra.gmra.mrb[0].mxu1 %v16121_v7  ;;  %v16133_v7 = vld [vmem:[#allocation12_spill] sm:$0xff] }
 0x4ec   : > { %v6189_v55 = vadd.f32 %v10379_v11, %v16122_v31  ;;  %8713 = vmatprep.mubr.bf16.mxu1 %v16125_v1  ;;  %v15457_v48 = vadd.f32 %v10488_v43, %v6188_v13  ;;  %v16127_v43 = vcombine.low %v16123_v28, %v16124_v30 }
 0x4ed   : > { %v10504_v61 = vpop.f32.mrb[224].mxu0 }
 0x4ee   : > { %v10380_v36 = vpop.f32.mrb[152].mxu1  ;;  %v10505_v19 = vpop.f32.mrb[225].mxu0  ;;  %v15459_v27 = vadd.f32 %v10491_v6, %v6189_v55  ;;  %v16130_v6 = vld [vmem:[#allocation9_spill] sm:$0xff] }
 0x4ef   : > { %v10381_v29 = vpop.f32.mrb[153].mxu1  ;;  %v10506_v58 = vadd.f32 %v10505_v19, %v10504_v61  ;;  %v10507_v33 = vpop.f32.mrb[226].mxu0  ;;  %v16131_v4 = vcombine.high %v16129_v23, %v16130_v6 }
 0x4f0   : > { %v10382_v49 = vadd.f32 %v10381_v29, %v10380_v36  ;;  %v10383_v56 = vpop.f32.mrb[154].mxu1  ;;  %v10508_v47 = vpop.f32.mrb[227].mxu0 }
 0x4f1   : > { %v10384_v17 = vpop.f32.mrb[155].mxu1  ;;  %v10509_v59 = vadd.f32 %v10508_v47, %v10507_v33 }
 0x4f2   : > { %v6190_v44 = vadd.f32 %v10382_v49, %v16126_v9  ;;  %v10385_v21 = vadd.f32 %v10384_v17, %v10383_v56  ;;  %v16137_v9 = vld [vmem:[#allocation49_spill] sm:$0xff] }
 0x4f3   : > { %8714 = vmatmul.mubr.bf16.gmra.mrb[4].mxu1 %v16127_v43 }
 0x4f4   : > { %v6191_v50 = vadd.f32 %v10385_v21, %v16128_v41  ;;  %8721 = vmatprep.mubr.bf16.mxu1 %v16131_v4  ;;  %v15469_v57 = vadd.f32 %v10494_v32, %v6190_v44  ;;  %v16132_v32 = vcombine.low %v16129_v23, %v16130_v6  ;;  %v16138_v21 = vld [vmem:[#allocation16_spill] sm:$0xff] }
 0x4f5   : > { %v10510_v34 = vpop.f32.mrb[228].mxu0 }
 0x4f6   : > { %v10386_v10 = vpop.f32.mrb[156].mxu1  ;;  %v10511_v8 = vpop.f32.mrb[229].mxu0  ;;  %v15471_v42 = vadd.f32 %v10497_v2, %v6191_v50  ;;  %v16134_v2 = vld [vmem:[#allocation11_spill] sm:$0xff] }
 0x4f7   : > { %v10387_v16 = vpop.f32.mrb[157].mxu1  ;;  %v10512_v12 = vadd.f32 %v10511_v8, %v10510_v34  ;;  %v10513_v45 = vpop.f32.mrb[230].mxu0  ;;  %v16135_v31 = vcombine.high %v16133_v7, %v16134_v2 }
 0x4f8   : > { %v10388_v20 = vadd.f32 %v10387_v16, %v10386_v10  ;;  %v10389_v35 = vpop.f32.mrb[158].mxu1  ;;  %v10514_v18 = vpop.f32.mrb[231].mxu0 }
 0x4f9   : > { %v10390_v40 = vpop.f32.mrb[159].mxu1  ;;  %v10515_v53 = vadd.f32 %v10514_v18, %v10513_v45  ;;  %v16141_v18 = vld [vmem:[#allocation50_spill] sm:$0xff] }
 0x4fa   : > { %v6192_v39 = vadd.f32 %v10388_v20, %v15082_v52  ;;  %v10391_v13 = vadd.f32 %v10390_v40, %v10389_v35 }
 0x4fb   : > { %8722 = vmatmul.mubr.bf16.gmra.mrb[8].mxu1 %v16132_v32 }
 0x4fc   : > { %v6193_v11 = vadd.f32 %v10391_v13, %v15094_v25  ;;  %8729 = vmatprep.mubr.bf16.mxu1 %v16135_v31  ;;  %v15481_v55 = vadd.f32 %v10500_v38, %v6192_v39  ;;  %v16136_v38 = vcombine.low %v16133_v7, %v16134_v2  ;;  %v16143_v13 = vld [vmem:[#allocation51_spill] sm:$0xff] }
 0x4fd   : > { %v10516_v28 = vpop.f32.mrb[232].mxu0 }
 0x4fe   : > { %v10392_v30 = vpop.f32.mrb[160].mxu1  ;;  %v10517_v1 = vpop.f32.mrb[233].mxu0  ;;  %v15483_v61 = vadd.f32 %v10503_v37, %v6193_v11  ;;  %v16139_v37 = vld [vmem:[#allocation15_spill] sm:$0xff]  ;;  %v16144_v11 = vld [vmem:[#allocation17_spill] sm:$0xff] }
 0x4ff   : > { %v10393_v36 = vpop.f32.mrb[161].mxu1  ;;  %v10518_v52 = vadd.f32 %v10517_v1, %v10516_v28  ;;  %v10519_v19 = vpop.f32.mrb[234].mxu0  ;;  %v16140_v43 = vcombine.high %v16138_v21, %v16139_v37 }
 0x500   : > { %v10394_v29 = vadd.f32 %v10393_v36, %v10392_v30  ;;  %v10395_v33 = vpop.f32.mrb[162].mxu1  ;;  %v10520_v49 = vpop.f32.mrb[235].mxu0 }
 0x501   : > { %v10396_v56 = vpop.f32.mrb[163].mxu1  ;;  %v10521_v47 = vadd.f32 %v10520_v49, %v10519_v19 }
 0x502   : > { %v6194_v25 = vadd.f32 %v10394_v29, %v15122_v22  ;;  %v10397_v17 = vadd.f32 %v10396_v56, %v10395_v33 }
 0x503   : > { %8730 = vmatmul.mubr.bf16.gmra.mrb[12].mxu1 %v16136_v38  ;;  %v16147_v38 = vld [vmem:[#allocation13_spill] sm:$0xff] }
 0x504   : > { %v6195_v44 = vadd.f32 %v10397_v17, %v16137_v9  ;;  %8737 = vmatprep.mubr.bf16.mxu1 %v16140_v43  ;;  %v15493_v41 = vadd.f32 %v10506_v58, %v6194_v25  ;;  %v16142_v58 = vcombine.low %v16138_v21, %v16139_v37  ;;  %v16149_v21 = vld [vmem:[#allocation14_spill] sm:$0xff]  ;;  %v16150_v43 = vld [vmem:[#allocation21_spill] sm:$0xff] }
 0x505   : > { %v10522_v50 = vpop.f32.mrb[236].mxu0 }
 0x506   : > { %v10398_v23 = vpop.f32.mrb[164].mxu1  ;;  %v10523_v6 = vpop.f32.mrb[237].mxu0  ;;  %v15495_v4 = vadd.f32 %v10509_v59, %v6195_v44  ;;  %v16145_v59 = vld [vmem:[#allocation18_spill] sm:$0xff] }
 0x507   : > { %v10399_v34 = vpop.f32.mrb[165].mxu1  ;;  %v10524_v22 = vadd.f32 %v10523_v6, %v10522_v50  ;;  %v10525_v10 = vpop.f32.mrb[238].mxu0  ;;  %v16146_v7 = vcombine.high %v16144_v11, %v16145_v59 }
 0x508   : > { %v10400_v8 = vadd.f32 %v10399_v34, %v10398_v23  ;;  %v10401_v16 = vpop.f32.mrb[166].mxu1  ;;  %v10526_v45 = vpop.f32.mrb[239].mxu0 }
 0x509   : > { %v10402_v20 = vpop.f32.mrb[167].mxu1  ;;  %v10527_v35 = vadd.f32 %v10526_v45, %v10525_v10 }
 0x50a   : > { %v6196_v40 = vadd.f32 %v10400_v8, %v16141_v18  ;;  %v10403_v39 = vadd.f32 %v10402_v20, %v10401_v16 }
 0x50b   : > { %8738 = vmatmul.mubr.bf16.gmra.mrb[16].mxu1 %v16142_v58 }
 0x50c   : > { %v6197_v32 = vadd.f32 %v10403_v39, %v16143_v13  ;;  %8745 = vmatprep.mubr.bf16.mxu1 %v16146_v7  ;;  %v15505_v2 = vadd.f32 %v10512_v12, %v6196_v40  ;;  %v16148_v12 = vcombine.low %v16144_v11, %v16145_v59  ;;  %v16155_v7 = vld [vmem:[#allocation53_spill] sm:$0xff] }
 0x50d   : > { %v10528_v31 = vpop.f32.mrb[240].mxu0 }
 0x50e   : > { %v10404_v28 = vpop.f32.mrb[168].mxu1  ;;  %v10529_v30 = vpop.f32.mrb[241].mxu0  ;;  %v15507_v1 = vadd.f32 %v10515_v53, %v6197_v32  ;;  %v16151_v53 = vld [vmem:[#allocation22_spill] sm:$0xff]  ;;  %v16153_v32 = vld [vmem:[#allocation52_spill] sm:$0xff] }
 0x50f   : > { %v10405_v36 = vpop.f32.mrb[169].mxu1  ;;  %v10530_v19 = vadd.f32 %v10529_v30, %v10528_v31  ;;  %v10531_v29 = vpop.f32.mrb[242].mxu0  ;;  %v16152_v50 = vcombine.high %v16150_v43, %v16151_v53 }
 0x510   : > { %v10406_v33 = vadd.f32 %v10405_v36, %v10404_v28  ;;  %v10407_v49 = vpop.f32.mrb[170].mxu1  ;;  %v10532_v56 = vpop.f32.mrb[243].mxu0  ;;  %v16156_v28 = vld [vmem:[#allocation25_spill] sm:$0xff] }
 0x511   : > { %v10408_v25 = vpop.f32.mrb[171].mxu1  ;;  %v10533_v17 = vadd.f32 %v10532_v56, %v10531_v29 }
 0x512   : > { %v6198_v9 = vadd.f32 %v10406_v33, %v16147_v38  ;;  %v10409_v44 = vadd.f32 %v10408_v25, %v10407_v49 }
 0x513   : > { %8746 = vmatmul.mubr.bf16.gmra.mrb[20].mxu1 %v16148_v12 }
 0x514   : > { %v6199_v37 = vadd.f32 %v10409_v44, %v16149_v21  ;;  %8753 = vmatprep.mubr.bf16.mxu1 %v16152_v50  ;;  %v15517_v23 = vadd.f32 %v10518_v52, %v6198_v9  ;;  %v16154_v52 = vcombine.low %v16150_v43, %v16151_v53  ;;  %v16159_v53 = vld [vmem:[#allocation19_spill] sm:$0xff] }
 0x515   : > { %v10534_v6 = vpop.f32.mrb[244].mxu0 }
 0x516   : > { %v10410_v34 = vpop.f32.mrb[172].mxu1  ;;  %v10535_v10 = vpop.f32.mrb[245].mxu0  ;;  %v15519_v8 = vadd.f32 %v10521_v47, %v6199_v37  ;;  %v16157_v47 = vld [vmem:[#allocation26_spill] sm:$0xff] }
 0x517   : > { %v10411_v16 = vpop.f32.mrb[173].mxu1  ;;  %v10536_v45 = vadd.f32 %v10535_v10, %v10534_v6  ;;  %v10537_v20 = vpop.f32.mrb[246].mxu0  ;;  %v16158_v30 = vcombine.high %v16156_v28, %v16157_v47 }
 0x518   : > { %v10412_v18 = vadd.f32 %v10411_v16, %v10410_v34  ;;  %v10413_v40 = vpop.f32.mrb[174].mxu1  ;;  %v10538_v39 = vpop.f32.mrb[247].mxu0  ;;  %v16161_v34 = vld [vmem:[#allocation55_spill] sm:$0xff]  ;;  %v16162_v16 = vld [vmem:[#allocation30_spill] sm:$0xff] }
 0x519   : > { %v10414_v58 = vpop.f32.mrb[175].mxu1  ;;  %v10539_v13 = vadd.f32 %v10538_v39, %v10537_v20 }
 0x51a   : > { %v6200_v11 = vadd.f32 %v10412_v18, %v16153_v32  ;;  %v10415_v59 = vadd.f32 %v10414_v58, %v10413_v40 }
 0x51b   : > { %8754 = vmatmul.mubr.bf16.gmra.mrb[24].mxu1 %v16154_v52 }
 0x51c   : > { %v6201_v31 = vadd.f32 %v10415_v59, %v16155_v7  ;;  %8761 = vmatprep.mubr.bf16.mxu1 %v16158_v30  ;;  %v15529_v36 = vadd.f32 %v10524_v22, %v6200_v11  ;;  %v16160_v22 = vcombine.low %v16156_v28, %v16157_v47 }
 0x51d   : > { %v10540_v29 = vpop.f32.mrb[248].mxu0 }
 0x51e   : > { %v10416_v33 = vpop.f32.mrb[176].mxu1  ;;  %v10541_v49 = vpop.f32.mrb[249].mxu0  ;;  %v15531_v56 = vadd.f32 %v10527_v35, %v6201_v31  ;;  %v16163_v35 = vld [vmem:[#allocation29_spill] sm:$0xff] }
 0x51f   : > { %v10417_v25 = vpop.f32.mrb[177].mxu1  ;;  %v10542_v38 = vadd.f32 %v10541_v49, %v10540_v29  ;;  %v10543_v9 = vpop.f32.mrb[250].mxu0  ;;  %v16164_v20 = vcombine.high %v16162_v16, %v16163_v35  ;;  %v16165_v29 = vld [vmem:[#allocation23_spill] sm:$0xff] }
 0x520   : > { %v10418_v44 = vadd.f32 %v10417_v25, %v10416_v33  ;;  %v10419_v12 = vpop.f32.mrb[178].mxu1  ;;  %v10544_v21 = vpop.f32.mrb[251].mxu0  ;;  %v16167_v25 = vld [vmem:[#allocation24_spill] sm:$0xff] }
 0x521   : > { %v10420_v37 = vpop.f32.mrb[179].mxu1  ;;  %v10545_v43 = vadd.f32 %v10544_v21, %v10543_v9 }
 0x522   : > { %v6202_v50 = vadd.f32 %v10418_v44, %v16159_v53  ;;  %v10421_v6 = vadd.f32 %v10420_v37, %v10419_v12  ;;  %v16168_v44 = vld [vmem:[#allocation34_spill] sm:$0xff] }
 0x523   : > { %8762 = vmatmul.mubr.bf16.gmra.mrb[28].mxu1 %v16160_v22 }
 0x524   : > { %v6203_v10 = vadd.f32 %v10421_v6, %v16161_v34  ;;  %8769 = vmatprep.mubr.bf16.mxu1 %v16164_v20  ;;  %v15541_v18 = vadd.f32 %v10530_v19, %v6202_v50  ;;  %v16166_v19 = vcombine.low %v16162_v16, %v16163_v35 }
 0x525   : > { %v10546_v40 = vpop.f32.mrb[252].mxu0 }
 0x526   : > { %v10422_v39 = vpop.f32.mrb[180].mxu1  ;;  %v10547_v58 = vpop.f32.mrb[253].mxu0  ;;  %v15543_v32 = vadd.f32 %v10533_v17, %v6203_v10  ;;  %v16169_v17 = vld [vmem:[#allocation33_spill] sm:$0xff] }
 0x527   : > { %v10423_v11 = vpop.f32.mrb[181].mxu1  ;;  %v10548_v59 = vadd.f32 %v10547_v58, %v10546_v40  ;;  %v10549_v52 = vpop.f32.mrb[254].mxu0  ;;  %v16170_v12 = vcombine.high %v16168_v44, %v16169_v17 }
 0x528   : > { %v10424_v7 = vadd.f32 %v10423_v11, %v10422_v39  ;;  %v10425_v31 = vpop.f32.mrb[182].mxu1  ;;  %v10550_v28 = vpop.f32.mrb[255].mxu0 }
 0x529   : > { %v10426_v47 = vpop.f32.mrb[183].mxu1  ;;  %v10551_v30 = vadd.f32 %v10550_v28, %v10549_v52  ;;  %v16172_v52 = vld [vmem:[#allocation27_spill] sm:$0xff] }
 0x52a   : > { %v6204_v33 = vadd.f32 %v10424_v7, %v16165_v29  ;;  %v10427_v49 = vadd.f32 %v10426_v47, %v10425_v31  ;;  %v16173_v31 = vld [vmem:[#allocation38_spill] sm:$0xff] }
 0x52b   : > { %8770 = vmatmul.mubr.bf16.gmra.mrb[32].mxu1 %v16166_v19 }
 0x52c   : > { %v6205_v9 = vadd.f32 %v10427_v49, %v16167_v25  ;;  %8777 = vmatprep.mubr.bf16.mxu1 %v16170_v12  ;;  %v15553_v21 = vadd.f32 %v10536_v45, %v6204_v33  ;;  %v16171_v45 = vcombine.low %v16168_v44, %v16169_v17 }
 0x52d   : > { %v10680_v37 = vpop.f32.mrb[0].mxu0 }
 0x52e   : > { %v10428_v53 = vpop.f32.mrb[184].mxu1  ;;  %v10681_v50 = vpop.f32.mrb[1].mxu0  ;;  %v15555_v6 = vadd.f32 %v10539_v13, %v6205_v9  ;;  %v16174_v13 = vld [vmem:[#allocation37_spill] sm:$0xff] }
 0x52f   : > { %v10429_v22 = vpop.f32.mrb[185].mxu1  ;;  %v10682_v34 = vadd.f32 %v10681_v50, %v10680_v37  ;;  %v10683_v10 = vpop.f32.mrb[2].mxu0  ;;  %v16175_v28 = vcombine.high %v16173_v31, %v16174_v13 }
 0x530   : > { %v10430_v20 = vadd.f32 %v10429_v22, %v10428_v53  ;;  %v10431_v40 = vpop.f32.mrb[186].mxu1  ;;  %v10684_v16 = vpop.f32.mrb[3].mxu0 }
 0x531   : > { %v10432_v35 = vpop.f32.mrb[187].mxu1  ;;  %v10685_v39 = vadd.f32 %v10684_v16, %v10683_v10 }
 0x532   : > { %v6206_v58 = vadd.f32 %v10430_v20, %v15338_v63  ;;  %v10433_v11 = vadd.f32 %v10432_v35, %v10431_v40  ;;  %v16177_v20 = vld [vmem:[#allocation42_spill] sm:$0xff] }
 0x533   : > { %8778 = vmatmul.mubr.bf16.gmra.mrb[36].mxu1 %v16171_v45 }
 0x534   : > { %v6207_v7 = vadd.f32 %v10433_v11, %v16172_v52  ;;  %8785 = vmatprep.mubr.bf16.mxu1 %v16175_v28  ;;  %v15565_v47 = vadd.f32 %v10542_v38, %v6206_v58  ;;  %v16176_v38 = vcombine.low %v16173_v31, %v16174_v13 }
 0x535   : > { %v10686_v29 = vpop.f32.mrb[4].mxu0 }
 0x536   : > { %v10434_v33 = vpop.f32.mrb[188].mxu1  ;;  %v10687_v49 = vpop.f32.mrb[5].mxu0  ;;  %v15567_v19 = vadd.f32 %v10545_v43, %v6207_v7  ;;  %v16178_v43 = vld [vmem:[#allocation41_spill] sm:$0xff] }
 0x537   : > { %v10435_v25 = vpop.f32.mrb[189].mxu1  ;;  %v10688_v63 = vadd.f32 %v10687_v49, %v10686_v29  ;;  %v10689_v9 = vpop.f32.mrb[6].mxu0  ;;  %v16179_v40 = vcombine.high %v16177_v20, %v16178_v43 }
 0x538   : > { %v10436_v12 = vadd.f32 %v10435_v25, %v10434_v33  ;;  %v10437_v37 = vpop.f32.mrb[190].mxu1  ;;  %v10690_v44 = vpop.f32.mrb[7].mxu0 }
 0x539   : > { %v10438_v17 = vpop.f32.mrb[191].mxu1  ;;  %v10691_v53 = vadd.f32 %v10690_v44, %v10689_v9  ;;  %v16181_v9 = vld [vmem:[#allocation45_spill] sm:$0xff] }
 0x53a   : > { %v6208_v50 = vadd.f32 %v10436_v12, %v15366_v3  ;;  %v10439_v22 = vadd.f32 %v10438_v17, %v10437_v37 }
 0x53b   : > { %8786 = vmatmul.mubr.bf16.gmra.mrb[40].mxu1 %v16176_v38 }
 0x53c   : > { %v6209_v10 = vadd.f32 %v10439_v22, %v15373_v24  ;;  %8793 = vmatprep.mubr.bf16.mxu1 %v16179_v40  ;;  %v15577_v16 = vadd.f32 %v10548_v59, %v6208_v50  ;;  %v16180_v59 = vcombine.low %v16177_v20, %v16178_v43 }
 0x53d   : > { %v10692_v35 = vpop.f32.mrb[8].mxu0 }
 0x53e   : > { %v10568_v58 = vpop.f32.mrb[192].mxu1  ;;  %v10693_v11 = vpop.f32.mrb[9].mxu0  ;;  %v15579_v45 = vadd.f32 %v10551_v30, %v6209_v10  ;;  %v16182_v30 = vld [vmem:[#allocation44_spill] sm:$0xff] }
 0x53f   : > { %v10569_v52 = vpop.f32.mrb[193].mxu1  ;;  %v10694_v3 = vadd.f32 %v10693_v11, %v10692_v35  ;;  %v10695_v7 = vpop.f32.mrb[10].mxu0  ;;  %v16183_v12 = vcombine.high %v16181_v9, %v16182_v30 }
 0x540   : > { %v10570_v28 = vadd.f32 %v10569_v52, %v10568_v58  ;;  %v10571_v29 = vpop.f32.mrb[194].mxu1  ;;  %v10696_v31 = vpop.f32.mrb[11].mxu0 }
 0x541   : > { %v10572_v13 = vpop.f32.mrb[195].mxu1  ;;  %v10697_v33 = vadd.f32 %v10696_v31, %v10695_v7  ;;  %v16185_v7 = vld [vmem:[#allocation20_spill] sm:$0xff] }
 0x542   : > { %v7318_v24 = vadd.f32 %v10570_v28, %v15386_v60  ;;  %v10573_v49 = vadd.f32 %v10572_v13, %v10571_v29 }
 0x543   : > { %8794 = vmatmul.mubr.bf16.gmra.mrb[44].mxu1 %v16180_v59 }
 0x544   : > { %v7319_v25 = vadd.f32 %v10573_v49, %v15391_v14  ;;  %8801 = vmatprep.mubr.bf16.mxu1 %v16183_v12  ;;  %v15589_v37 = vadd.f32 %v10682_v34, %v7318_v24  ;;  %v16184_v34 = vcombine.low %v16181_v9, %v16182_v30 }
 0x545   : > { %v10698_v44 = vpop.f32.mrb[12].mxu0 }
 0x546   : > { %v10574_v17 = vpop.f32.mrb[196].mxu1  ;;  %v10699_v50 = vpop.f32.mrb[13].mxu0  ;;  %v15591_v22 = vadd.f32 %v10685_v39, %v7319_v25  ;;  %v16186_v39 = vld [vmem:[#allocation54_spill] sm:$0xff] }
 0x547   : > { %v10575_v38 = vpop.f32.mrb[197].mxu1  ;;  %v10700_v60 = vadd.f32 %v10699_v50, %v10698_v44  ;;  %v10701_v10 = vpop.f32.mrb[14].mxu0  ;;  %v16187_v28 = vcombine.high %v16185_v7, %v16186_v39 }
 0x548   : > { %v10576_v40 = vadd.f32 %v10575_v38, %v10574_v17  ;;  %v10577_v35 = vpop.f32.mrb[198].mxu1  ;;  %v10702_v20 = vpop.f32.mrb[15].mxu0 }
 0x549   : > { %v10578_v43 = vpop.f32.mrb[199].mxu1  ;;  %v10703_v58 = vadd.f32 %v10702_v20, %v10701_v10  ;;  %v16189_v10 = vld [vmem:[#allocation46_spill] sm:$0xff] }
 0x54a   : > { %v7320_v14 = vadd.f32 %v10576_v40, %v15404_v5  ;;  %v10579_v11 = vadd.f32 %v10578_v43, %v10577_v35 }
 0x54b   : > { %8802 = vmatmul.mubr.bf16.gmra.mrb[48].mxu1 %v16184_v34 }
 0x54c   : > { %v7321_v52 = vadd.f32 %v10579_v11, %v15407_v51  ;;  %8809 = vmatprep.mubr.bf16.mxu1 %v16187_v28  ;;  %v15601_v29 = vadd.f32 %v10688_v63, %v7320_v14  ;;  %v16188_v63 = vcombine.low %v16185_v7, %v16186_v39 }
 0x54d   : > { %v10704_v31 = vpop.f32.mrb[16].mxu0 }
 0x54e   : > { %v10580_v13 = vpop.f32.mrb[200].mxu1  ;;  %v10705_v24 = vpop.f32.mrb[17].mxu0  ;;  %v15603_v49 = vadd.f32 %v10691_v53, %v7321_v52  ;;  %v16190_v53 = vld [vmem:[#allocation47_spill] sm:$0xff] }
 0x54f   : > { %v10581_v59 = vpop.f32.mrb[201].mxu1  ;;  %v10706_v5 = vadd.f32 %v10705_v24, %v10704_v31  ;;  %v10707_v25 = vpop.f32.mrb[18].mxu0  ;;  %v16191_v40 = vcombine.high %v16189_v10, %v16190_v53 }
 0x550   : > { %v10582_v12 = vadd.f32 %v10581_v59, %v10580_v13  ;;  %v10583_v44 = vpop.f32.mrb[202].mxu1  ;;  %v10708_v9 = vpop.f32.mrb[19].mxu0 }
 0x551   : > { %v10584_v30 = vpop.f32.mrb[203].mxu1  ;;  %v10709_v17 = vadd.f32 %v10708_v9, %v10707_v25 }
 0x552   : > { %v7322_v51 = vadd.f32 %v10582_v12, %v15419_v26  ;;  %v10585_v50 = vadd.f32 %v10584_v30, %v10583_v44 }
 0x553   : > { %8810 = vmatmul.mubr.bf16.gmra.mrb[52].mxu1 %v16188_v63 }
 0x554   : > { %v7323_v38 = vadd.f32 %v10585_v50, %v15422_v62  ;;  %8817 = vmatprep.mubr.bf16.mxu1 %v16191_v40  ;;  %v15613_v35 = vadd.f32 %v10694_v3, %v7322_v51  ;;  %v16192_v3 = vcombine.low %v16189_v10, %v16190_v53 }
 0x555   : > { %v10710_v20 = vpop.f32.mrb[20].mxu0 }
 0x556   : > { %v10586_v43 = vpop.f32.mrb[204].mxu1  ;;  %v10711_v14 = vpop.f32.mrb[21].mxu0  ;;  %v15615_v11 = vadd.f32 %v10697_v33, %v7323_v38 }
 0x557   : > { %v10587_v34 = vpop.f32.mrb[205].mxu1  ;;  %v10712_v26 = vadd.f32 %v10711_v14, %v10710_v20  ;;  %v10713_v52 = vpop.f32.mrb[22].mxu0 }
 0x558   : > { %v10588_v28 = vadd.f32 %v10587_v34, %v10586_v43  ;;  %v10589_v31 = vpop.f32.mrb[206].mxu1  ;;  %v10714_v7 = vpop.f32.mrb[23].mxu0 }
 0x559   : > { %v10590_v39 = vpop.f32.mrb[207].mxu1  ;;  %v10715_v13 = vadd.f32 %v10714_v7, %v10713_v52 }
 0x55a   : > { %v7324_v62 = vadd.f32 %v10588_v28, %v15434_v15  ;;  %v10591_v24 = vadd.f32 %v10590_v39, %v10589_v31 }
 0x55b   : > { %8818 = vmatmul.mubr.bf16.gmra.mrb[56].mxu1 %v16192_v3 }
 0x55c   : > { %v7325_v59 = vadd.f32 %v10591_v24, %v15436_v0  ;;  %v15622_v25 = vadd.f32 %v10700_v60, %v7324_v62 }
 0x55d   : > { %v10716_v33 = vpop.f32.mrb[24].mxu0 }
 0x55e   : > { %v10592_v12 = vpop.f32.mrb[208].mxu1  ;;  %v10717_v44 = vpop.f32.mrb[25].mxu0  ;;  %v15624_v9 = vadd.f32 %v10703_v58, %v7325_v59 }
 0x55f   : > { %v10593_v30 = vpop.f32.mrb[209].mxu1  ;;  %v10718_v51 = vadd.f32 %v10717_v44, %v10716_v33  ;;  %v10719_v50 = vpop.f32.mrb[26].mxu0 }
 0x560   : > { %v10594_v63 = vadd.f32 %v10593_v30, %v10592_v12  ;;  %v10595_v38 = vpop.f32.mrb[210].mxu1  ;;  %v10720_v15 = vpop.f32.mrb[27].mxu0 }
 0x561   : > { %v10596_v40 = vpop.f32.mrb[211].mxu1  ;;  %v10721_v20 = vadd.f32 %v10720_v15, %v10719_v50 }
 0x562   : > { %v7326_v10 = vadd.f32 %v10594_v63, %v15445_v46  ;;  %v10597_v53 = vadd.f32 %v10596_v40, %v10595_v38 }
 0x564   : > { %v7327_v0 = vadd.f32 %v10597_v53, %v15447_v54  ;;  %v15628_v60 = vadd.f32 %v10706_v5, %v7326_v10 }
 0x565   : > { %v10722_v43 = vpop.f32.mrb[28].mxu0 }
 0x566   : > { %v10598_v14 = vpop.f32.mrb[212].mxu1  ;;  %v10723_v34 = vpop.f32.mrb[29].mxu0  ;;  %v15630_v58 = vadd.f32 %v10709_v17, %v7327_v0 }
 0x567   : > { %v10599_v52 = vpop.f32.mrb[213].mxu1  ;;  %v10724_v28 = vadd.f32 %v10723_v34, %v10722_v43  ;;  %v10725_v31 = vpop.f32.mrb[30].mxu0 }
 0x568   : > { %v10600_v7 = vadd.f32 %v10599_v52, %v10598_v14  ;;  %v10601_v39 = vpop.f32.mrb[214].mxu1  ;;  %v10726_v62 = vpop.f32.mrb[31].mxu0 }
 0x569   : > { %v10602_v24 = vpop.f32.mrb[215].mxu1  ;;  %v10727_v3 = vadd.f32 %v10726_v62, %v10725_v31 }
 0x56a   : > { %v7328_v46 = vadd.f32 %v10600_v7, %v15457_v48  ;;  %v10603_v59 = vadd.f32 %v10602_v24, %v10601_v39 }
 0x56c   : > { %v7329_v54 = vadd.f32 %v10603_v59, %v15459_v27  ;;  %v15634_v5 = vadd.f32 %v10712_v26, %v7328_v46 }
 0x56d   : > { %v10728_v33 = vpop.f32.mrb[32].mxu0 }
 0x56e   : > { %v10604_v12 = vpop.f32.mrb[216].mxu1  ;;  %v10729_v44 = vpop.f32.mrb[33].mxu0  ;;  %v15636_v17 = vadd.f32 %v10715_v13, %v7329_v54 }
 0x56f   : > { %v10605_v30 = vpop.f32.mrb[217].mxu1  ;;  %v10730_v50 = vadd.f32 %v10729_v44, %v10728_v33  ;;  %v10731_v63 = vpop.f32.mrb[34].mxu0 }
 0x570   : > { %v10606_v38 = vadd.f32 %v10605_v30, %v10604_v12  ;;  %v10607_v15 = vpop.f32.mrb[218].mxu1  ;;  %v10732_v40 = vpop.f32.mrb[35].mxu0 }
 0x571   : > { %v10608_v10 = vpop.f32.mrb[219].mxu1  ;;  %v10733_v53 = vadd.f32 %v10732_v40, %v10731_v63 }
 0x572   : > { %v7330_v48 = vadd.f32 %v10606_v38, %v15469_v57  ;;  %v10609_v0 = vadd.f32 %v10608_v10, %v10607_v15 }
 0x574   : > { %v7331_v27 = vadd.f32 %v10609_v0, %v15471_v42  ;;  %v15640_v26 = vadd.f32 %v10718_v51, %v7330_v48 }
 0x575   : > { %v10734_v43 = vpop.f32.mrb[36].mxu0 }
 0x576   : > { %v10610_v14 = vpop.f32.mrb[220].mxu1  ;;  %v10735_v34 = vpop.f32.mrb[37].mxu0  ;;  %v15642_v13 = vadd.f32 %v10721_v20, %v7331_v27 }
 0x577   : > { %v10611_v52 = vpop.f32.mrb[221].mxu1  ;;  %v10736_v31 = vadd.f32 %v10735_v34, %v10734_v43  ;;  %v10737_v7 = vpop.f32.mrb[38].mxu0 }
 0x578   : > { %v10612_v39 = vadd.f32 %v10611_v52, %v10610_v14  ;;  %v10613_v62 = vpop.f32.mrb[222].mxu1  ;;  %v10738_v24 = vpop.f32.mrb[39].mxu0 }
 0x579   : > { %v10614_v46 = vpop.f32.mrb[223].mxu1  ;;  %v10739_v59 = vadd.f32 %v10738_v24, %v10737_v7 }
 0x57a   : > { %v7332_v57 = vadd.f32 %v10612_v39, %v15481_v55  ;;  %v10615_v54 = vadd.f32 %v10614_v46, %v10613_v62 }
 0x57c   : > { %v7333_v42 = vadd.f32 %v10615_v54, %v15483_v61  ;;  %v15646_v51 = vadd.f32 %v10724_v28, %v7332_v57 }
 0x57d   : > { %v10740_v33 = vpop.f32.mrb[40].mxu0 }
 0x57e   : > { %v10616_v12 = vpop.f32.mrb[224].mxu1  ;;  %v10741_v44 = vpop.f32.mrb[41].mxu0  ;;  %v15648_v20 = vadd.f32 %v10727_v3, %v7333_v42 }
 0x57f   : > { %v10617_v30 = vpop.f32.mrb[225].mxu1  ;;  %v10742_v63 = vadd.f32 %v10741_v44, %v10740_v33  ;;  %v10743_v38 = vpop.f32.mrb[42].mxu0 }
 0x580   : > { %v10618_v15 = vadd.f32 %v10617_v30, %v10616_v12  ;;  %v10619_v40 = vpop.f32.mrb[226].mxu1  ;;  %v10744_v10 = vpop.f32.mrb[43].mxu0 }
 0x581   : > { %v10620_v48 = vpop.f32.mrb[227].mxu1  ;;  %v10745_v0 = vadd.f32 %v10744_v10, %v10743_v38 }
 0x582   : > { %v7334_v55 = vadd.f32 %v10618_v15, %v15493_v41  ;;  %v10621_v27 = vadd.f32 %v10620_v48, %v10619_v40 }
 0x584   : > { %v7335_v61 = vadd.f32 %v10621_v27, %v15495_v4  ;;  %v15652_v28 = vadd.f32 %v10730_v50, %v7334_v55 }
 0x585   : > { %v10746_v43 = vpop.f32.mrb[44].mxu0 }
 0x586   : > { %v10622_v14 = vpop.f32.mrb[228].mxu1  ;;  %v10747_v34 = vpop.f32.mrb[45].mxu0  ;;  %v15654_v3 = vadd.f32 %v10733_v53, %v7335_v61 }
 0x587   : > { %v10623_v52 = vpop.f32.mrb[229].mxu1  ;;  %v10748_v7 = vadd.f32 %v10747_v34, %v10746_v43  ;;  %v10749_v39 = vpop.f32.mrb[46].mxu0 }
 0x588   : > { %v10624_v62 = vadd.f32 %v10623_v52, %v10622_v14  ;;  %v10625_v24 = vpop.f32.mrb[230].mxu1  ;;  %v10750_v46 = vpop.f32.mrb[47].mxu0 }
 0x589   : > { %v10626_v57 = vpop.f32.mrb[231].mxu1  ;;  %v10751_v54 = vadd.f32 %v10750_v46, %v10749_v39 }
 0x58a   : > { %v7336_v41 = vadd.f32 %v10624_v62, %v15505_v2  ;;  %v10627_v42 = vadd.f32 %v10626_v57, %v10625_v24 }
 0x58c   : > { %v7337_v4 = vadd.f32 %v10627_v42, %v15507_v1  ;;  %v15658_v50 = vadd.f32 %v10736_v31, %v7336_v41 }
 0x58d   : > { %v10752_v33 = vpop.f32.mrb[48].mxu0 }
 0x58e   : > { %v10628_v12 = vpop.f32.mrb[232].mxu1  ;;  %v10753_v44 = vpop.f32.mrb[49].mxu0  ;;  %v15660_v53 = vadd.f32 %v10739_v59, %v7337_v4 }
 0x58f   : > { %v10629_v30 = vpop.f32.mrb[233].mxu1  ;;  %v10754_v38 = vadd.f32 %v10753_v44, %v10752_v33  ;;  %v10755_v15 = vpop.f32.mrb[50].mxu0 }
 0x590   : > { %v10630_v40 = vadd.f32 %v10629_v30, %v10628_v12  ;;  %v10631_v10 = vpop.f32.mrb[234].mxu1  ;;  %v10756_v48 = vpop.f32.mrb[51].mxu0 }
 0x591   : > { %v10632_v55 = vpop.f32.mrb[235].mxu1  ;;  %v10757_v27 = vadd.f32 %v10756_v48, %v10755_v15 }
 0x592   : > { %v7338_v2 = vadd.f32 %v10630_v40, %v15517_v23  ;;  %v10633_v61 = vadd.f32 %v10632_v55, %v10631_v10 }
 0x594   : > { %v7339_v1 = vadd.f32 %v10633_v61, %v15519_v8  ;;  %v15664_v31 = vadd.f32 %v10742_v63, %v7338_v2 }
 0x595   : > { %v10758_v43 = vpop.f32.mrb[52].mxu0 }
 0x596   : > { %v10634_v14 = vpop.f32.mrb[236].mxu1  ;;  %v10759_v34 = vpop.f32.mrb[53].mxu0  ;;  %v15666_v59 = vadd.f32 %v10745_v0, %v7339_v1 }
 0x597   : > { %v10635_v52 = vpop.f32.mrb[237].mxu1  ;;  %v10760_v39 = vadd.f32 %v10759_v34, %v10758_v43  ;;  %v10761_v62 = vpop.f32.mrb[54].mxu0 }
 0x598   : > { %v10636_v24 = vadd.f32 %v10635_v52, %v10634_v14  ;;  %v10637_v46 = vpop.f32.mrb[238].mxu1  ;;  %v10762_v57 = vpop.f32.mrb[55].mxu0 }
 0x599   : > { %v10638_v41 = vpop.f32.mrb[239].mxu1  ;;  %v10763_v42 = vadd.f32 %v10762_v57, %v10761_v62 }
 0x59a   : > { %v7340_v23 = vadd.f32 %v10636_v24, %v15529_v36  ;;  %v10639_v4 = vadd.f32 %v10638_v41, %v10637_v46 }
 0x59c   : > { %v7341_v8 = vadd.f32 %v10639_v4, %v15531_v56  ;;  %v15670_v63 = vadd.f32 %v10748_v7, %v7340_v23 }
 0x59d   : > { %v10764_v33 = vpop.f32.mrb[56].mxu0 }
 0x59e   : > { %v10640_v12 = vpop.f32.mrb[240].mxu1  ;;  %v10765_v44 = vpop.f32.mrb[57].mxu0  ;;  %v15672_v0 = vadd.f32 %v10751_v54, %v7341_v8 }
 0x59f   : > { %v10641_v30 = vpop.f32.mrb[241].mxu1  ;;  %v10766_v15 = vadd.f32 %v10765_v44, %v10764_v33  ;;  %v10767_v40 = vpop.f32.mrb[58].mxu0 }
 0x5a0   : > { %v10642_v10 = vadd.f32 %v10641_v30, %v10640_v12  ;;  %v10643_v48 = vpop.f32.mrb[242].mxu1  ;;  %v10768_v55 = vpop.f32.mrb[59].mxu0 }
 0x5a1   : > { %v10644_v2 = vpop.f32.mrb[243].mxu1  ;;  %v10769_v61 = vadd.f32 %v10768_v55, %v10767_v40 }
 0x5a2   : > { %v7342_v36 = vadd.f32 %v10642_v10, %v15541_v18  ;;  %v10645_v1 = vadd.f32 %v10644_v2, %v10643_v48 }
 0x5a4   : > { %v7343_v56 = vadd.f32 %v10645_v1, %v15543_v32  ;;  %v15676_v7 = vadd.f32 %v10754_v38, %v7342_v36 }
 0x5a5   : > { %v10770_v43 = vpop.f32.mrb[60].mxu0 }
 0x5a6   : > { %v10646_v14 = vpop.f32.mrb[244].mxu1  ;;  %v10771_v34 = vpop.f32.mrb[61].mxu0  ;;  %v15678_v54 = vadd.f32 %v10757_v27, %v7343_v56 }
 0x5a7   : > { %v10647_v52 = vpop.f32.mrb[245].mxu1  ;;  %v10772_v62 = vadd.f32 %v10771_v34, %v10770_v43  ;;  %v10773_v24 = vpop.f32.mrb[62].mxu0 }
 0x5a8   : > { %v10648_v46 = vadd.f32 %v10647_v52, %v10646_v14  ;;  %v10649_v57 = vpop.f32.mrb[246].mxu1  ;;  %v10774_v41 = vpop.f32.mrb[63].mxu0 }
 0x5a9   : > { %v10650_v23 = vpop.f32.mrb[247].mxu1  ;;  %v10775_v4 = vadd.f32 %v10774_v41, %v10773_v24 }
 0x5aa   : > { %v7344_v18 = vadd.f32 %v10648_v46, %v15553_v21  ;;  %v10651_v8 = vadd.f32 %v10650_v23, %v10649_v57 }
 0x5ac   : > { %v7345_v32 = vadd.f32 %v10651_v8, %v15555_v6  ;;  %v15682_v38 = vadd.f32 %v10760_v39, %v7344_v18 }
 0x5ad   : > { %v10792_v33 = vpop.f32.mrb[64].mxu0 }
 0x5ae   : > { %v10652_v12 = vpop.f32.mrb[248].mxu1  ;;  %v10793_v44 = vpop.f32.mrb[65].mxu0  ;;  %v15684_v27 = vadd.f32 %v10763_v42, %v7345_v32 }
 0x5af   : > { %v10653_v30 = vpop.f32.mrb[249].mxu1  ;;  %v10794_v40 = vadd.f32 %v10793_v44, %v10792_v33  ;;  %v10795_v10 = vpop.f32.mrb[66].mxu0 }
 0x5b0   : > { %v10654_v48 = vadd.f32 %v10653_v30, %v10652_v12  ;;  %v10655_v55 = vpop.f32.mrb[250].mxu1  ;;  %v10796_v2 = vpop.f32.mrb[67].mxu0 }
 0x5b1   : > { %v8826_v36 = vadd.f32 %v10794_v40, %v15589_v37  ;;  %v10656_v1 = vpop.f32.mrb[251].mxu1  ;;  %v10797_v21 = vadd.f32 %v10796_v2, %v10795_v10 }
 0x5b2   : > { %v7346_v56 = vadd.f32 %v10654_v48, %v15565_v47  ;;  %v10657_v6 = vadd.f32 %v10656_v1, %v10655_v55 }
 0x5b3   : > { %v8827_v39 = vadd.f32 %v10797_v21, %v15591_v22  ;;  %8859 = vxpose.xlu0.b32.start [1/16] (narrow) %v8826_v36, 8 }
 0x5b4   : > { %v7347_v43 = vadd.f32 %v10657_v6, %v15567_v19  ;;  %v15690_v42 = vadd.f32 %v10766_v15, %v7346_v56 }
 0x5b6   : > { %v10658_v14 = vpop.f32.mrb[252].mxu1  ;;  %v15692_v34 = vadd.f32 %v10769_v61, %v7347_v43 }
 0x5b7   : > { %v10659_v52 = vpop.f32.mrb[253].mxu1  ;;  %8860 = vxpose.xlu0.b32.cont [2/16] (narrow) %v8827_v39, 8 }
 0x5b8   : > { %v10660_v24 = vadd.f32 %v10659_v52, %v10658_v14  ;;  %v10661_v46 = vpop.f32.mrb[254].mxu1 }
 0x5b9   : > { %v10662_v37 = vpop.f32.mrb[255].mxu1 }
 0x5ba   : > { %v7348_v57 = vadd.f32 %v10660_v24, %v15577_v16  ;;  %v10663_v41 = vadd.f32 %v10662_v37, %v10661_v46 }
 0x5bc   : > { %v7349_v47 = vadd.f32 %v10663_v41, %v15579_v45  ;;  %v15696_v23 = vadd.f32 %v10772_v62, %v7348_v57 }
 0x5be   : > { %v10798_v22 = vpop.f32.mrb[0].mxu1  ;;  %v15698_v18 = vadd.f32 %v10775_v4, %v7349_v47 }
 0x5bf   : > { %v10799_v19 = vpop.f32.mrb[1].mxu1 }
 0x5c0   : > { %v10800_v15 = vadd.f32 %v10799_v19, %v10798_v22  ;;  %v10801_v8 = vpop.f32.mrb[2].mxu1 }
 0x5c1   : > { %v10802_v61 = vpop.f32.mrb[3].mxu1 }
 0x5c2   : > { %v8828_v32 = vadd.f32 %v10800_v15, %v15601_v29  ;;  %v10803_v33 = vadd.f32 %v10802_v61, %v10801_v8 }
 0x5c4   : > { %v8829_v12 = vadd.f32 %v10803_v33, %v15603_v49  ;;  %8861 = vxpose.xlu0.b32.cont [3/16] (narrow) %v8828_v32, 8 }
 0x5c6   : > { %v10804_v44 = vpop.f32.mrb[4].mxu1 }
 0x5c7   : > { %v10805_v16 = vpop.f32.mrb[5].mxu1 }
 0x5c8   : > { %v10806_v30 = vadd.f32 %v10805_v16, %v10804_v44  ;;  %v10807_v40 = vpop.f32.mrb[6].mxu1  ;;  %8862 = vxpose.xlu0.b32.cont [4/16] (narrow) %v8829_v12, 8 }
 0x5c9   : > { %v10808_v45 = vpop.f32.mrb[7].mxu1 }
 0x5ca   : > { %v8830_v62 = vadd.f32 %v10806_v30, %v15613_v35  ;;  %v10809_v4 = vadd.f32 %v10808_v45, %v10807_v40 }
 0x5cc   : > { %v8831_v10 = vadd.f32 %v10809_v4, %v15615_v11  ;;  %8863 = vxpose.xlu0.b32.cont [5/16] (narrow) %v8830_v62, 8 }
 0x5ce   : > { %v10810_v48 = vpop.f32.mrb[8].mxu1 }
 0x5cf   : > { %v10811_v55 = vpop.f32.mrb[9].mxu1 }
 0x5d0   : > { %v10812_v2 = vadd.f32 %v10811_v55, %v10810_v48  ;;  %v10813_v29 = vpop.f32.mrb[10].mxu1  ;;  %8864 = vxpose.xlu0.b32.cont [6/16] (narrow) %v8831_v10, 8 }
 0x5d1   : > { %v10814_v36 = vpop.f32.mrb[11].mxu1 }
 0x5d2   : > { %v8832_v49 = vadd.f32 %v10812_v2, %v15622_v25  ;;  %v10815_v1 = vadd.f32 %v10814_v36, %v10813_v29 }
 0x5d4   : > { %v8833_v21 = vadd.f32 %v10815_v1, %v15624_v9  ;;  %8865 = vxpose.xlu0.b32.cont [7/16] (narrow) %v8832_v49, 8 }
 0x5d6   : > { %v10816_v56 = vpop.f32.mrb[12].mxu1 }
 0x5d7   : > { %v10817_v6 = vpop.f32.mrb[13].mxu1 }
 0x5d8   : > { %v10818_v39 = vadd.f32 %v10817_v6, %v10816_v56  ;;  %v10819_v35 = vpop.f32.mrb[14].mxu1  ;;  %8866 = vxpose.xlu0.b32.cont [8/16] (narrow) %v8833_v21, 8 }
 0x5d9   : > { %v10820_v43 = vpop.f32.mrb[15].mxu1 }
 0x5da   : > { %v8834_v11 = vadd.f32 %v10818_v39, %v15628_v60  ;;  %v10821_v14 = vadd.f32 %v10820_v43, %v10819_v35 }
 0x5dc   : > { %v8835_v52 = vadd.f32 %v10821_v14, %v15630_v58  ;;  %8867 = vxpose.xlu0.b32.cont [9/16] (narrow) %v8834_v11, 8 }
 0x5de   : > { %v10822_v24 = vpop.f32.mrb[16].mxu1 }
 0x5df   : > { %v10823_v46 = vpop.f32.mrb[17].mxu1 }
 0x5e0   : > { %v10824_v37 = vadd.f32 %v10823_v46, %v10822_v24  ;;  %v10825_v25 = vpop.f32.mrb[18].mxu1  ;;  %8868 = vxpose.xlu0.b32.cont [10/16] (narrow) %v8835_v52, 8 }
 0x5e1   : > { %v10826_v57 = vpop.f32.mrb[19].mxu1 }
 0x5e2   : > { %v8836_v9 = vadd.f32 %v10824_v37, %v15634_v5  ;;  %v10827_v41 = vadd.f32 %v10826_v57, %v10825_v25 }
 0x5e4   : > { %v8837_v47 = vadd.f32 %v10827_v41, %v15636_v17  ;;  %8869 = vxpose.xlu0.b32.cont [11/16] (narrow) %v8836_v9, 8 }
 0x5e6   : > { %v10828_v22 = vpop.f32.mrb[20].mxu1 }
 0x5e7   : > { %v10829_v19 = vpop.f32.mrb[21].mxu1 }
 0x5e8   : > { %v10830_v15 = vadd.f32 %v10829_v19, %v10828_v22  ;;  %v10831_v60 = vpop.f32.mrb[22].mxu1  ;;  %8870 = vxpose.xlu0.b32.cont [12/16] (narrow) %v8837_v47, 8 }
 0x5e9   : > { %v10832_v8 = vpop.f32.mrb[23].mxu1 }
 0x5ea   : > { %v8838_v58 = vadd.f32 %v10830_v15, %v15640_v26  ;;  %v10833_v61 = vadd.f32 %v10832_v8, %v10831_v60 }
 0x5ec   : > { %v8839_v32 = vadd.f32 %v10833_v61, %v15642_v13  ;;  %8871 = vxpose.xlu0.b32.cont [13/16] (narrow) %v8838_v58, 8 }
 0x5ee   : > { %v10834_v33 = vpop.f32.mrb[24].mxu1 }
 0x5ef   : > { %v10835_v12 = vpop.f32.mrb[25].mxu1 }
 0x5f0   : > { %v10836_v44 = vadd.f32 %v10835_v12, %v10834_v33  ;;  %v10837_v5 = vpop.f32.mrb[26].mxu1  ;;  %8872 = vxpose.xlu0.b32.cont [14/16] (narrow) %v8839_v32, 8 }
 0x5f1   : > { %v10838_v16 = vpop.f32.mrb[27].mxu1 }
 0x5f2   : > { %v8840_v17 = vadd.f32 %v10836_v44, %v15646_v51  ;;  %v10839_v30 = vadd.f32 %v10838_v16, %v10837_v5 }
 0x5f4   : > { %v8841_v40 = vadd.f32 %v10839_v30, %v15648_v20  ;;  %8873 = vxpose.xlu0.b32.cont [15/16] (narrow) %v8840_v17, 8 }
 0x5f6   : > { %v10840_v45 = vpop.f32.mrb[28].mxu1 }
 0x5f7   : > { %v10841_v62 = vpop.f32.mrb[29].mxu1 }
 0x5f8   : > { %v10842_v4 = vadd.f32 %v10841_v62, %v10840_v45  ;;  %v10843_v26 = vpop.f32.mrb[30].mxu1  ;;  %8874 = vxpose.xlu0.b32.end [16/16] (narrow) %v8841_v40, 8 }
 0x5f9   : > { %v10844_v10 = vpop.f32.mrb[31].mxu1 }
 0x5fa   : > { %v8842_v13 = vadd.f32 %v10842_v4, %v15652_v28  ;;  %v10845_v48 = vadd.f32 %v10844_v10, %v10843_v26 }
 0x5fc   : > { %v8843_v55 = vadd.f32 %v10845_v48, %v15654_v3  ;;  %8891 = vxpose.xlu1.b32.start [1/16] (narrow) %v8842_v13, 8 }
 0x5fe   : > { %v10846_v2 = vpop.f32.mrb[32].mxu1 }
 0x5ff   : > { %v10847_v29 = vpop.f32.mrb[33].mxu1 }
 0x600   : > { %v10848_v36 = vadd.f32 %v10847_v29, %v10846_v2  ;;  %v10849_v51 = vpop.f32.mrb[34].mxu1  ;;  %8892 = vxpose.xlu1.b32.cont [2/16] (narrow) %v8843_v55, 8 }
 0x601   : > { %v10850_v49 = vpop.f32.mrb[35].mxu1 }
 0x602   : > { %v8844_v20 = vadd.f32 %v10848_v36, %v15658_v50  ;;  %v10851_v1 = vadd.f32 %v10850_v49, %v10849_v51 }
 0x604   : > { %v8845_v21 = vadd.f32 %v10851_v1, %v15660_v53  ;;  %8893 = vxpose.xlu1.b32.cont [3/16] (narrow) %v8844_v20, 8 }
 0x606   : > { %v10852_v56 = vpop.f32.mrb[36].mxu1 }
 0x607   : > { %v10853_v6 = vpop.f32.mrb[37].mxu1 }
 0x608   : > { %v10854_v39 = vadd.f32 %v10853_v6, %v10852_v56  ;;  %v10855_v28 = vpop.f32.mrb[38].mxu1  ;;  %8894 = vxpose.xlu1.b32.cont [4/16] (narrow) %v8845_v21, 8 }
 0x609   : > { %v10856_v35 = vpop.f32.mrb[39].mxu1 }
 0x60a   : > { %v8846_v3 = vadd.f32 %v10854_v39, %v15664_v31  ;;  %v10857_v43 = vadd.f32 %v10856_v35, %v10855_v28 }
 0x60c   : > { %v8847_v11 = vadd.f32 %v10857_v43, %v15666_v59  ;;  %8895 = vxpose.xlu1.b32.cont [5/16] (narrow) %v8846_v3, 8 }
 0x60e   : > { %v10858_v14 = vpop.f32.mrb[40].mxu1 }
 0x60f   : > { %v10859_v52 = vpop.f32.mrb[41].mxu1 }
 0x610   : > { %v10860_v24 = vadd.f32 %v10859_v52, %v10858_v14  ;;  %v10861_v50 = vpop.f32.mrb[42].mxu1  ;;  %8896 = vxpose.xlu1.b32.cont [6/16] (narrow) %v8847_v11, 8 }
 0x611   : > { %v10862_v46 = vpop.f32.mrb[43].mxu1 }
 0x612   : > { %v8848_v53 = vadd.f32 %v10860_v24, %v15670_v63  ;;  %v10863_v37 = vadd.f32 %v10862_v46, %v10861_v50 }
 0x614   : > { %v8849_v25 = vadd.f32 %v10863_v37, %v15672_v0  ;;  %8897 = vxpose.xlu1.b32.cont [7/16] (narrow) %v8848_v53, 8 }
 0x616   : > { %v10864_v57 = vpop.f32.mrb[44].mxu1 }
 0x617   : > { %v10865_v9 = vpop.f32.mrb[45].mxu1 }
 0x618   : > { %v10866_v41 = vadd.f32 %v10865_v9, %v10864_v57  ;;  %v10867_v31 = vpop.f32.mrb[46].mxu1  ;;  %8898 = vxpose.xlu1.b32.cont [8/16] (narrow) %v8849_v25, 8 }
 0x619   : > { %v10868_v47 = vpop.f32.mrb[47].mxu1 }
 0x61a   : > { %v8850_v59 = vadd.f32 %v10866_v41, %v15676_v7  ;;  %v10869_v22 = vadd.f32 %v10868_v47, %v10867_v31 }
 0x61c   : > { %v8851_v19 = vadd.f32 %v10869_v22, %v15678_v54  ;;  %8899 = vxpose.xlu1.b32.cont [9/16] (narrow) %v8850_v59, 8 }
 0x61e   : > { %v10870_v15 = vpop.f32.mrb[48].mxu1 }
 0x61f   : > { %v10871_v60 = vpop.f32.mrb[49].mxu1 }
 0x620   : > { %v10872_v8 = vadd.f32 %v10871_v60, %v10870_v15  ;;  %v10873_v63 = vpop.f32.mrb[50].mxu1  ;;  %8900 = vxpose.xlu1.b32.cont [10/16] (narrow) %v8851_v19, 8 }
 0x621   : > { %v10874_v58 = vpop.f32.mrb[51].mxu1 }
 0x622   : > { %v8852_v0 = vadd.f32 %v10872_v8, %v15682_v38  ;;  %v10875_v61 = vadd.f32 %v10874_v58, %v10873_v63 }
 0x624   : > { %v8853_v32 = vadd.f32 %v10875_v61, %v15684_v27  ;;  %8901 = vxpose.xlu1.b32.cont [11/16] (narrow) %v8852_v0, 8 }
 0x626   : > { %v10876_v33 = vpop.f32.mrb[52].mxu1 }
 0x627   : > { %v10877_v12 = vpop.f32.mrb[53].mxu1 }
 0x628   : > { %v10878_v44 = vadd.f32 %v10877_v12, %v10876_v33  ;;  %v10879_v7 = vpop.f32.mrb[54].mxu1  ;;  %8902 = vxpose.xlu1.b32.cont [12/16] (narrow) %v8853_v32, 8 }
 0x629   : > { %v10880_v5 = vpop.f32.mrb[55].mxu1 }
 0x62a   : > { %v8854_v54 = vadd.f32 %v10878_v44, %v15690_v42  ;;  %v10881_v16 = vadd.f32 %v10880_v5, %v10879_v7 }
 0x62c   : > { %v8855_v17 = vadd.f32 %v10881_v16, %v15692_v34  ;;  %8903 = vxpose.xlu1.b32.cont [13/16] (narrow) %v8854_v54, 8  ;;  %v8858_v34 = vld [vmem:[%s212_s11] sm:$0xff] }
 0x62e   : > { %v10882_v30 = vpop.f32.mrb[56].mxu1 }
 0x62f   : > { %v10883_v40 = vpop.f32.mrb[57].mxu1 }
 0x630   : > { %v10884_v38 = vadd.f32 %v10883_v40, %v10882_v30  ;;  %v10885_v45 = vpop.f32.mrb[58].mxu1  ;;  %8904 = vxpose.xlu1.b32.cont [14/16] (narrow) %v8855_v17, 8 }
 0x631   : > { %v10886_v27 = vpop.f32.mrb[59].mxu1 }
 0x632   : > { %v8856_v62 = vadd.f32 %v10884_v38, %v15696_v23  ;;  %v10887_v4 = vadd.f32 %v10886_v27, %v10885_v45 }
 0x634   : > { %v8857_v26 = vadd.f32 %v10887_v4, %v15698_v18  ;;  %8905 = vxpose.xlu1.b32.cont [15/16] (narrow) %v8856_v62, 8 }
 0x638   : > { %8906 = vxpose.xlu1.b32.end [16/16] (narrow) %v8857_v26, 8 }
 0x63c   : > { %v8875_v42 = vpop.trf.xlu0 }
 0x67c   : > { %v8907_v10 = vpop.trf.xlu1 }
 0x67d   : > { %v8925_v13 = vcombine.low %v8875_v42, %v8907_v10 }
 0x67f   : > { %v8927_v48 = vadd.f32 %v8925_v13, %v8858_v34 }
 0x681   : > { %8928 = vst [vmem:[%s217_s30] sm:$0xff] %v8927_v48 }
 0x682 PF: > { %s14_s15 = sadd.s32 1, %s11212_s15  }
 0x683   : > { %p11_p4 = scmp.ge.s32.totalorder %s14_s15, 4  }
 0x685   :  { %13 = sbr.rel (!%p11_p4) target bundleno = 1 (0x1), region = 81 }

</bundles_post_ra>
